<compile_context>
chip_gen: v7x
topology: tpu7x:2x2x1
jax: 0.10.0
libtpu: 0.0.40
codegen_flags: <defaults>
</compile_context>

<pallas_src>
import functools

import jax
import jax.numpy as jnp
from jax.experimental import pallas as pl
from jax.experimental.pallas import tpu as pltpu


# ----------------------------- configuration -------------------------------
class Args:
    n_agents = 4
    n_enemies = 3
    n_groups = 2
    mixing_embed_dim = 8          # embed_dim
    rnn_hidden_dim = 16
    hypernet_embed = 32
    state_ally_feats_size = 6     # last n_groups entries = group one-hot
    state_enemy_feats_size = 4
    obs_shape = 10                # obs_dim
    n_heads = 2
    nonlinear = False
    weighted_head = True
    state_bias = True
    attend_reg_coef = 0.001
    last_actions_size = 12
    state_shape = (n_agents * state_ally_feats_size
                   + n_enemies * state_enemy_feats_size
                   + last_actions_size,)   # -> 48


# ------------------------------ small helpers -------------------------------
_MAX_LANE_TILE = 512   # lanes per grid step; fits VMEM comfortably on v5e/v6e/v7x


def _rup(x, m):
    return ((x + m - 1) // m) * m


def _bt_plan(bt):
    """bt padded to a multiple of 128; lane tile that divides it, >=2 steps when possible."""
    bt_pad = max(128, _rup(bt, 128))
    for cand in (_MAX_LANE_TILE, 384, 256, 128):
        if cand <= bt_pad and bt_pad % cand == 0 and (bt_pad // cand >= 2 or bt_pad == 128):
            return cand, bt_pad
    return 128, bt_pad


def _pad_last(x, n):
    if x.shape[-1] == n:
        return x
    pad = [(0, 0)] * (x.ndim - 1) + [(0, n - x.shape[-1])]
    return jnp.pad(x, pad)


def _elu(x):
    # TODO(synk): switch to jnp.expm1 once confirmed in the Mosaic lowering set.
    return jnp.where(x > 0, x, jnp.exp(x) - 1.0)


def _sigmoid(x):
    return 1.0 / (1.0 + jnp.exp(-x))


def _parallel():
    return pltpu.CompilerParams(dimension_semantics=("parallel",))


# ------------------------------ Pallas kernels ------------------------------
def _stage1_kernel(dims, pairs,
                   st_ref, obs_ref, h_ref, mo_ref,
                   w1_ref, b1_ref, w2_ref, b2_ref,
                   wih_ref, whh_ref, bih_ref, bhh_ref,
                   hnew_ref, emb_ref, mix_ref, cos_ref):
    """Fused hypernets + per-sample embedding matmuls + GRU + cosine stats.

    Layout: features on sublanes, bt on lanes (T = lane tile).
    """
    A, G, E, D, H = dims['A'], dims['G'], dims['E'], dims['D'], dims['H']
    MIXW = dims['MIXW']
    o_ew1, o_eb1 = dims['off_ew1'], dims['off_eb1']
    o_ew2, o_eb2 = dims['off_ew2'], dims['off_eb2']
    f32 = jnp.float32

    # ---- all hypernet heads in ONE fused 2-layer MLP (wide MXU matmuls)
    hmid = jnp.maximum(
        jnp.dot(w1_ref[...], st_ref[...], preferred_element_type=f32) + b1_ref[...],
        0.0)                                                    # (HTOT, T)
    slab = jnp.dot(w2_ref[...], hmid, preferred_element_type=f32) + b2_ref[...]  # (OTOT, T)

    # attention / final-mixing weights consumed by the second kernel
    mix_ref[...] = slab[0:MIXW, :]

    obs = obs_ref[...]            # (A, D, T)
    hid = h_ref[...]              # (A, H, T)
    mo = mo_ref[...]              # (G, A, T)
    wih = wih_ref[...]            # (3H, E)
    whh = whh_ref[...]            # (3H, H)
    bih = bih_ref[...]            # (3H, 1)
    bhh = bhh_ref[...]            # (3H, 1)

    embs = []
    for a in range(A):
        # --- per-sample hypernet matmul #1: ELU(obs @ w1 + b1)
        obs_a = obs[a]                                           # (D, T)
        acc = slab[o_eb1 + a * E:o_eb1 + (a + 1) * E, :]
        for d in range(D):
            acc = acc + obs_a[d:d + 1, :] * slab[o_ew1 + d * E:o_ew1 + (d + 1) * E, :]
        x_a = _elu(acc)                                          # (E, T)

        # --- GRU cell (shared weights, split input/hidden matmuls, exact sigmoid)
        h_a = hid[a]                                             # (H, T)
        gi = jnp.dot(wih, x_a, preferred_element_type=f32) + bih
        gh = jnp.dot(whh, h_a, preferred_element_type=f32) + bhh
        r = _sigmoid(gi[0:H, :] + gh[0:H, :])
        z = _sigmoid(gi[H:2 * H, :] + gh[H:2 * H, :])
        cand = jnp.tanh(gi[2 * H:3 * H, :] + r * gh[2 * H:3 * H, :])
        hn = (1.0 - z) * cand + z * h_a                          # (H, T)
        hnew_ref[a, :, :] = hn

        # --- per-sample hypernet matmul #2: ELU(h_new @ w2 + b2)
        acc2 = slab[o_eb2 + a * E:o_eb2 + (a + 1) * E, :]
        for d in range(H):
            acc2 = acc2 + hn[d:d + 1, :] * slab[o_ew2 + d * E:o_ew2 + (d + 1) * E, :]
        e_a = _elu(acc2)                                         # (E, T)
        emb_ref[a, :, :] = e_a
        embs.append(e_a)

    # ---- group-contrastive cosine partial sums / nonzero counts for this tile
    #      (padded lanes have zero masks -> zero embeddings -> contribute nothing)
    ge = [[embs[a] * mo[i][a:a + 1, :] for a in range(A)] for i in range(G)]
    sq = [[jnp.sum(v * v, axis=0, keepdims=True) for v in row] for row in ge]
    sums, counts = [], []
    for (pi, pj) in pairs:
        s_vec = jnp.zeros_like(ge[0][0][0:1, :])
        c_vec = jnp.zeros_like(s_vec)
        for p in range(A):
            for q in range(A):
                dot = jnp.sum(ge[pi][p] * ge[pj][q], axis=0, keepdims=True)
                cosv = dot * jax.lax.rsqrt(jnp.maximum(sq[pi][p] * sq[pj][q], 1e-16))
                s_vec = s_vec + cosv
                c_vec = c_vec + (cosv != 0.0).astype(f32)
        sums.append(jnp.sum(s_vec, axis=1, keepdims=True))       # (1, 1)
        counts.append(jnp.sum(c_vec, axis=1, keepdims=True))     # (1, 1)
    row = jnp.concatenate(sums + counts, axis=1)                 # (1, 2P)
    cos_ref[...] = jnp.concatenate(
        [row, jnp.zeros((7, 2 * len(pairs)), f32)], axis=0)      # (8, 2P)


def _stage1_call(dims, pairs, tile, states_t, obs_t, hid_t, mo_t, prep):
    A, G, E, D, H, S = dims['A'], dims['G'], dims['E'], dims['D'], dims['H'], dims['S']
    MIXW, HTOT, OTOT = dims['MIXW'], dims['HTOT'], dims['OTOT']
    bt_pad = states_t.shape[-1]
    n_tiles = bt_pad // tile
    P = len(pairs)

    kernel = functools.partial(_stage1_kernel, dims, tuple(pairs))
    out_shape = (
        jax.ShapeDtypeStruct((A, H, bt_pad), jnp.float32),       # new hidden state
        jax.ShapeDtypeStruct((A, E, bt_pad), jnp.float32),       # agent embeddings
        jax.ShapeDtypeStruct((MIXW, bt_pad), jnp.float32),       # mix sub-slab
        jax.ShapeDtypeStruct((n_tiles * 8, 2 * P), jnp.float32),  # cos partials
    )
    in_specs = [
        pl.BlockSpec((S, tile), lambda i: (0, i)),
        pl.BlockSpec((A, D, tile), lambda i: (0, 0, i)),
        pl.BlockSpec((A, H, tile), lambda i: (0, 0, i)),
        pl.BlockSpec((G, A, tile), lambda i: (0, 0, i)),
        pl.BlockSpec((HTOT, S), lambda i: (0, 0)),
        pl.BlockSpec((HTOT, 1), lambda i: (0, 0)),
        pl.BlockSpec((OTOT, HTOT), lambda i: (0, 0)),
        pl.BlockSpec((OTOT, 1), lambda i: (0, 0)),
        pl.BlockSpec((3 * H, E), lambda i: (0, 0)),
        pl.BlockSpec((3 * H, H), lambda i: (0, 0)),
        pl.BlockSpec((3 * H, 1), lambda i: (0, 0)),
        pl.BlockSpec((3 * H, 1), lambda i: (0, 0)),
    ]
    out_specs = [
        pl.BlockSpec((A, H, tile), lambda i: (0, 0, i)),
        pl.BlockSpec((A, E, tile), lambda i: (0, 0, i)),
        pl.BlockSpec((MIXW, tile), lambda i: (0, i)),
        pl.BlockSpec((8, 2 * P), lambda i: (i, 0)),
    ]
    return pl.pallas_call(
        kernel,
        grid=(n_tiles,),
        in_specs=in_specs,
        out_specs=out_specs,
        out_shape=out_shape,
        input_output_aliases={2: 0},          # reuse hidden-state buffer
        compiler_params=_parallel(),
    )(states_t, obs_t, hid_t, mo_t,
      prep['w1T'], prep['b1T'], prep['w2T'], prep['b2T'],
      prep['wihT'], prep['whhT'], prep['bihT'], prep['bhhT'])


def _stage2_kernel(dims, obs_ref, mre_ref, q_ref, mo_ref, mix_ref, wk_ref, o_ref):
    """Key projection + per-group multi-head attention + final monotonic mixing."""
    A, G, NH, E = dims['A'], dims['G'], dims['NH'], dims['E']
    m_sel, m_hb1, m_hw1 = dims['off_sel'], dims['off_hb1'], dims['off_hw1']
    m_hw2, m_wh, m_v, m_hb2 = (dims['off_hw2'], dims['off_wh'],
                               dims['off_v'], dims['off_hb2'])
    inv_sqrt_e = 1.0 / float(E) ** 0.5
    f32 = jnp.float32

    obs = obs_ref[...]            # (A, DE, T)  -- reference's raw-reshape layout
    mre = mre_ref[...]            # (G, A, T)   -- mask, raw-reshape layout
    qv = q_ref[...][0]            # (A, T)      -- original agent order
    mo = mo_ref[...]              # (G, A, T)   -- mask, original order
    mix = mix_ref[...]            # (MIXW, T)
    wk = wk_ref[...]              # (G*NH, DE, E)

    group_q = []
    for i in range(G):
        y = mix[m_v + i * 8:m_v + i * 8 + 1, :]                    # V_i, (1, T)
        w_head = jnp.abs(mix[m_wh + i * 8:m_wh + i * 8 + NH, :])   # (NH, T)
        mq = qv * mo[i]                                            # masked q-values
        for h in range(NH):
            k = i * NH + h
            sel_k = mix[m_sel + k * E:m_sel + (k + 1) * E, :]      # (E, T)
            proj = jnp.dot(wk[k], sel_k, preferred_element_type=f32)   # (DE, T)
            rows = [jnp.sum(obs[a] * proj, axis=0, keepdims=True)
                    for a in range(A)]
            logits = jnp.concatenate(rows, axis=0) * mre[i]        # (A, T)
            scaled = logits * inv_sqrt_e
            m = jnp.max(scaled, axis=0, keepdims=True)
            p = jnp.exp(scaled - m)
            w = p / jnp.sum(p, axis=0, keepdims=True)              # exact divide
            head_q = jnp.sum(mq * w, axis=0, keepdims=True)        # (1, T)
            y = y + w_head[h:h + 1, :] * head_q
        group_q.append(y)

    # final monotonic mixing (abs == pos_func)
    hidden = mix[m_hb1:m_hb1 + E, :]                               # (E, T)
    for g in range(G):
        hidden = hidden + group_q[g] * jnp.abs(mix[m_hw1 + g * E:m_hw1 + (g + 1) * E, :])
    hidden = _elu(hidden)
    qtot = jnp.sum(hidden * jnp.abs(mix[m_hw2:m_hw2 + E, :]), axis=0, keepdims=True)
    o_ref[...] = qtot + mix[m_hb2:m_hb2 + 1, :]                    # lane-dense (1, T)


def _stage2_call(dims, tile, obs_t, mre_t, qv_t, mo_t, mix_t, wk3):
    A, G, NH, E, DE = dims['A'], dims['G'], dims['NH'], dims['E'], dims['DE']
    MIXW = dims['MIXW']
    bt_pad = qv_t.shape[-1]
    n_tiles = bt_pad // tile
    kernel = functools.partial(_stage2_kernel, dims)
    return pl.pallas_call(
        kernel,
        grid=(n_tiles,),
        in_specs=[
            pl.BlockSpec((A, DE, tile), lambda i: (0, 0, i)),
            pl.BlockSpec((G, A, tile), lambda i: (0, 0, i)),
            pl.BlockSpec((1, A, tile), lambda i: (0, 0, i)),
            pl.BlockSpec((G, A, tile), lambda i: (0, 0, i)),
            pl.BlockSpec((MIXW, tile), lambda i: (0, i)),
            pl.BlockSpec((G * NH, DE, E), lambda i: (0, 0, 0)),
        ],
        out_specs=pl.BlockSpec((1, tile), lambda i: (0, i)),
        out_shape=jax.ShapeDtypeStruct((1, bt_pad), jnp.float32),
        compiler_params=_parallel(),
    )(obs_t, mre_t, qv_t, mo_t, mix_t, wk3)


# ------------------------------ parameters ---------------------------------
def _linear(key, din, dout, bias=True):
    kw, kb = jax.random.split(key)
    lim = 1.0 / (din ** 0.5)
    W = jax.random.uniform(kw, (din, dout), jnp.float32, -lim, lim)
    if bias:
        b = jax.random.uniform(kb, (dout,), jnp.float32, -lim, lim)
    else:
        b = jnp.zeros((dout,), jnp.float32)
    return W, b


def _seq(key, d_in, d_hidden, d_out, bias2=True):
    k1, k2 = jax.random.split(key)
    W1, b1 = _linear(k1, d_in, d_hidden)
    W2, b2 = _linear(k2, d_hidden, d_out, bias=bias2)
    return (W1, b1, W2, b2)


def init_params(key, args):
    A, G, E = args.n_agents, args.n_groups, args.mixing_embed_dim
    H, HY, NH = args.rnn_hidden_dim, args.hypernet_embed, args.n_heads
    S = int(args.state_shape[0])
    D = args.obs_shape
    DE = D + E if G > 1 else D

    keys = jax.random.split(key, 16 + G * (2 * NH + 2) + 1)
    it = iter(keys)
    p = {
        'embedding_w1': _seq(next(it), S, HY, D * E),
        'embedding_b1': _seq(next(it), S, HY, A * E),
        'embedding_w2': _seq(next(it), S, HY, H * E),
        'embedding_b2': _seq(next(it), S, HY, A * E),
        'hyper_w1': _seq(next(it), S, HY, G * E),
        'hyper_b1': _seq(next(it), S, HY, E),
        'hyper_w2': _seq(next(it), S, HY, E),
        'hyper_b2': _seq(next(it), S, E, 1),
    }
    # GRUCell(E, H): weights (in, 3H), gate order (r, z, n)
    kih, khh, kb1, kb2 = jax.random.split(next(it), 4)
    lim = 1.0 / (H ** 0.5)
    p['gru'] = (
        jax.random.uniform(kih, (E, 3 * H), jnp.float32, -lim, lim),
        jax.random.uniform(khh, (H, 3 * H), jnp.float32, -lim, lim),
        jax.random.uniform(kb1, (3 * H,), jnp.float32, -lim, lim),
        jax.random.uniform(kb2, (3 * H,), jnp.float32, -lim, lim),
    )
    groups = []
    for _ in range(G):
        g = {
            'selectors': [_seq(next(it), S, HY, E, bias2=False) for _ in range(NH)],
            'keys': [_linear(next(it), DE, E, bias=False)[0] for _ in range(NH)],
            'hyper_w_head': _seq(next(it), S, HY, NH),
            'V': _seq(next(it), S, E, 1),
        }
        groups.append(g)
    p['groups'] = groups
    return p


def prepare_mixer_params(params, args):
    """One-time (hoisted) packing of every hypernet into one wide fused MLP,
    laid out so the first MIXW output columns are exactly the attention/mixing
    sub-slab consumed by the second kernel (8-aligned slots)."""
    A, G, E = args.n_agents, args.n_groups, args.mixing_embed_dim
    H, NH, D = args.rnn_hidden_dim, args.n_heads, args.obs_shape
    S = int(args.state_shape[0])
    DE = D + E if G > 1 else D

    # mix-region layout (becomes the first MIXW rows of the transposed slab)
    off_sel = 0
    off_hb1 = off_sel + G * NH * E
    off_hw1 = off_hb1 + E
    off_hw2 = off_hw1 + G * E
    off_wh = off_hw2 + E            # group i slot at off_wh + i*8 (NH rows used)
    off_v = off_wh + G * 8          # group i slot at off_v + i*8 (1 row used)
    off_hb2 = off_v + G * 8         # 1 row used
    MIXW = _rup(off_hb2 + 8, 128)

    # per-sample embedding weights region
    off_ew1 = MIXW
    off_eb1 = off_ew1 + D * E
    off_ew2 = off_eb1 + A * E
    off_eb2 = off_ew2 + H * E
    OTOT = _rup(off_eb2 + A * E, 128)

    entries = [
        (params['embedding_w1'], off_ew1),
        (params['embedding_b1'], off_eb1),
        (params['embedding_w2'], off_ew2),
        (params['embedding_b2'], off_eb2),
        (params['hyper_w1'], off_hw1),
        (params['hyper_b1'], off_hb1),
        (params['hyper_w2'], off_hw2),
        (params['hyper_b2'], off_hb2),
    ]
    for i in range(G):
        for h in range(NH):
            entries.append((params['groups'][i]['selectors'][h],
                            off_sel + (i * NH + h) * E))
        entries.append((params['groups'][i]['hyper_w_head'], off_wh + i * 8))
        entries.append((params['groups'][i]['V'], off_v + i * 8))

    HTOT = _rup(sum(e[0][0].shape[1] for e in entries), 128)
    w1c = jnp.zeros((S, HTOT), jnp.float32)
    b1c = jnp.zeros((HTOT,), jnp.float32)
    w2c = jnp.zeros((HTOT, OTOT), jnp.float32)
    b2c = jnp.zeros((OTOT,), jnp.float32)
    ho = 0
    for (W1, B1, W2, B2), oo in entries:
        hw, ow = W1.shape[1], W2.shape[1]
        w1c = w1c.at[:, ho:ho + hw].set(W1)
        b1c = b1c.at[ho:ho + hw].set(B1)
        w2c = w2c.at[ho:ho + hw, oo:oo + ow].set(W2)
        b2c = b2c.at[oo:oo + ow].set(B2)
        ho += hw

    Wih, Whh, bih, bhh = params['gru']
    wk3 = jnp.stack([params['groups'][i]['keys'][h]
                     for i in range(G) for h in range(NH)], axis=0)  # (G*NH, DE, E)

    prep = {
        'w1T': w1c.T, 'b1T': b1c.reshape(-1, 1),
        'w2T': w2c.T, 'b2T': b2c.reshape(-1, 1),
        'wihT': Wih.T, 'whhT': Whh.T,
        'bihT': bih.reshape(-1, 1), 'bhhT': bhh.reshape(-1, 1),
        'wk3': wk3,
    }
    pairs = tuple((i, i) for i in range(G)) + tuple(
        (i, j) for i in range(G) for j in range(i + 1, G))
    dims = dict(A=A, G=G, NH=NH, E=E, D=D, H=H, S=S, DE=DE,
                MIXW=MIXW, HTOT=HTOT, OTOT=OTOT,
                off_sel=off_sel, off_hb1=off_hb1, off_hw1=off_hw1, off_hw2=off_hw2,
                off_wh=off_wh, off_v=off_v, off_hb2=off_hb2,
                off_ew1=off_ew1, off_eb1=off_eb1, off_ew2=off_ew2, off_eb2=off_eb2,
                pairs=pairs)
    return prep, dims


# ------------------------------ forward pass --------------------------------
def gattenmixer_forward(prep, qvals, states, obs, hidden_states, *, dims, args):
    b, t, a = qvals.shape
    A, G, E, H, D = dims['A'], dims['G'], dims['E'], dims['H'], dims['D']
    S, DE = dims['S'], dims['DE']
    afs = args.state_ally_feats_size
    bt = b * t
    tile, bt_pad = _bt_plan(bt)
    pairs = dims['pairs']

    # ----- group masks from the trailing one-hot of the ally state features -----
    ally_states = states[:, :, :A * afs].reshape(b, t, A, afs)
    if G == 1:
        masks = [jnp.ones((b, t, A), jnp.float32)]
    else:
        masks = []
        for i in range(G):
            m = (ally_states[:, 0, :, afs - G + i] == 1.0).astype(jnp.float32)
            masks.append(jnp.broadcast_to(m[:, None, :], (b, t, A)))

    # ----- transposed (feature-on-sublane, bt-on-lane) operands, padded once -----
    states_t = _pad_last(states.reshape(bt, S).T, bt_pad)                    # (S, btp)
    obs_bt = obs.reshape(bt, A, D)
    obs_t = _pad_last(jnp.transpose(obs_bt, (1, 2, 0)), bt_pad)              # (A, D, btp)
    hid_t = _pad_last(jnp.transpose(hidden_states.reshape(bt, A, H), (1, 2, 0)),
                      bt_pad)                                                # (A, H, btp)
    mo_t = _pad_last(jnp.stack([m.reshape(bt, A).T for m in masks], 0), bt_pad)  # (G, A, btp)

    # ----- kernel 1: fused hypernets + embedding matmuls + GRU + cosine stats -----
    h_new, ally_emb, mix_t, cos_part = _stage1_call(
        dims, pairs, tile, states_t, obs_t, hid_t, mo_t, prep)

    # group-contrastive loss from per-tile partial sums / nonzero counts
    tot = jnp.sum(cos_part, axis=0)                                          # (2P,)
    P = len(pairs)
    group_loss = jnp.float32(0.0)
    for idx, (pi, pj) in enumerate(pairs):
        term = tot[idx] / tot[P + idx]
        group_loss = group_loss + (-term if pi == pj else term)

    # ----- kernel 2: attention + monotonic mixing (raw-reshape layout as in torch) -----
    emb_bt = jnp.transpose(ally_emb[:, :, :bt], (2, 0, 1))                   # (bt, A, E)
    if G == 1:
        obs_enh = obs_bt
    else:
        obs_enh = jnp.concatenate([obs_bt, emb_bt], axis=-1)                 # (bt, A, DE)
    # NOTE: raw reshape (bt*A, DE) -> (A, bt, DE), exactly as the PyTorch .reshape()
    obs_re = obs_enh.reshape(bt * A, DE).reshape(A, bt, DE)
    obs_re_t = _pad_last(jnp.transpose(obs_re, (0, 2, 1)), bt_pad)           # (A, DE, btp)
    mre_t = _pad_last(jnp.stack([m.reshape(A, bt) for m in masks], 0), bt_pad)
    qv_t = _pad_last(qvals.reshape(bt, A).T[None], bt_pad)                   # (1, A, btp)

    qtot = _stage2_call(dims, tile, obs_re_t, mre_t, qv_t, mo_t, mix_t, prep['wk3'])

    # attend_mag_regs / head_entropies are dead locals in the PyTorch forward
    # (never returned) -> omitted.
    # TODO(synk): expose them if the training loop ever consumes them.
    hidden_new = jnp.transpose(h_new[:, :, :bt], (2, 0, 1)).reshape(b, t, A, H)
    return qtot[0, :bt].reshape(b, t, 1), group_loss, hidden_new


# --------------------------------- main -------------------------------------
if __name__ == "__main__":
    args = Args()
    b, t = 2, 3
    A, G = args.n_agents, args.n_groups
    S = int(args.state_shape[0])
    D = args.obs_shape
    H = args.rnn_hidden_dim
    afs = args.state_ally_feats_size

    key = jax.random.PRNGKey(0)
    kp, k1, k2, k3, k4 = jax.random.split(key, 5)

    params = init_params(kp, args)
    prep, dims = prepare_mixer_params(params, args)   # hoisted one-time packing

    # build states so that the trailing n_groups ally features are a valid one-hot
    ally_feat = jax.random.normal(k1, (b, t, A, afs - G), jnp.float32)
    group_ids = jnp.arange(A) % G
    onehot = jnp.broadcast_to(jax.nn.one_hot(group_ids, G, dtype=jnp.float32),
                              (b, t, A, G))
    ally_full = jnp.concatenate([ally_feat, onehot], axis=-1).reshape(b, t, A * afs)
    rest = 0.5 * jax.random.normal(k2, (b, t, S - A * afs), jnp.float32)
    states = jnp.concatenate([ally_full, rest], axis=-1)                     # (b,t,S)

    qvals = jax.random.normal(k3, (b, t, A), jnp.float32)
    obs = jax.random.normal(k4, (b, t, A, D), jnp.float32)
    hidden0 = jnp.zeros((b * t * A, H), jnp.float32)   # == init_hidden(b*t)

    fwd = jax.jit(functools.partial(gattenmixer_forward, dims=dims, args=args))
    qtot, group_loss, new_hidden = fwd(prep, qvals, states, obs, hidden0)
    jax.block_until_ready((qtot, group_loss, new_hidden))

    assert qtot.shape == (b, t, 1)
    assert new_hidden.shape == (b, t, A, H)
    assert jnp.isfinite(qtot).all() and jnp.isfinite(group_loss)
    print("KERNEL_OK")
</pallas_src>

<mosaic_0001>
module attributes {stable_mosaic.version = 11 : i64} {
  func.func @_stage1_kernel(%arg0: i32, %arg1: memref<48x128xf32, #tpu.memory_space<vmem>>, %arg2: memref<4x10x128xf32, #tpu.memory_space<vmem>>, %arg3: memref<4x16x128xf32, #tpu.memory_space<vmem>>, %arg4: memref<2x4x128xf32, #tpu.memory_space<vmem>>, %arg5: memref<512x48xf32, #tpu.memory_space<vmem>>, %arg6: memref<512x1xf32, #tpu.memory_space<vmem>>, %arg7: memref<512x512xf32, #tpu.memory_space<vmem>>, %arg8: memref<512x1xf32, #tpu.memory_space<vmem>>, %arg9: memref<48x8xf32, #tpu.memory_space<vmem>>, %arg10: memref<48x16xf32, #tpu.memory_space<vmem>>, %arg11: memref<48x1xf32, #tpu.memory_space<vmem>>, %arg12: memref<48x1xf32, #tpu.memory_space<vmem>>, %arg13: memref<4x16x128xf32, #tpu.memory_space<vmem>>, %arg14: memref<4x8x128xf32, #tpu.memory_space<vmem>>, %arg15: memref<128x128xf32, #tpu.memory_space<vmem>>, %arg16: memref<8x6xf32, #tpu.memory_space<vmem>>) attributes {dimension_semantics = [#tpu.dimension_semantics<parallel>], iteration_bounds = array<i64: 1>, scalar_prefetch = 0 : i64, scratch_operands = 0 : i64, tpu.core_type = #tpu.core_type<tc>, window_params = [{transform_indices = @transform_0, window_bounds = array<i64: 48, 128>}, {transform_indices = @transform_1, window_bounds = array<i64: 4, 10, 128>}, {transform_indices = @transform_2, window_bounds = array<i64: 4, 16, 128>}, {transform_indices = @transform_3, window_bounds = array<i64: 2, 4, 128>}, {pipeline_mode = #tpu.pipeline_mode<synchronous>, transform_indices = @transform_4, window_bounds = array<i64: 512, 48>}, {pipeline_mode = #tpu.pipeline_mode<synchronous>, transform_indices = @transform_5, window_bounds = array<i64: 512, 1>}, {pipeline_mode = #tpu.pipeline_mode<synchronous>, transform_indices = @transform_6, window_bounds = array<i64: 512, 512>}, {pipeline_mode = #tpu.pipeline_mode<synchronous>, transform_indices = @transform_7, window_bounds = array<i64: 512, 1>}, {pipeline_mode = #tpu.pipeline_mode<synchronous>, transform_indices = @transform_8, window_bounds = array<i64: 48, 8>}, {pipeline_mode = #tpu.pipeline_mode<synchronous>, transform_indices = @transform_9, window_bounds = array<i64: 48, 16>}, {pipeline_mode = #tpu.pipeline_mode<synchronous>, transform_indices = @transform_10, window_bounds = array<i64: 48, 1>}, {pipeline_mode = #tpu.pipeline_mode<synchronous>, transform_indices = @transform_11, window_bounds = array<i64: 48, 1>}, {transform_indices = @transform_12, window_bounds = array<i64: 4, 16, 128>}, {transform_indices = @transform_13, window_bounds = array<i64: 4, 8, 128>}, {transform_indices = @transform_14, window_bounds = array<i64: 128, 128>}, {transform_indices = @transform_15, window_bounds = array<i64: 8, 6>}]} {
    %c0 = arith.constant 0 : index
    %c0_0 = arith.constant 0 : index
    %0 = vector.load %arg5[%c0, %c0_0] : memref<512x48xf32, #tpu.memory_space<vmem>>, vector<512x48xf32>
    %c0_1 = arith.constant 0 : index
    %c0_2 = arith.constant 0 : index
    %1 = vector.load %arg1[%c0_1, %c0_2] : memref<48x128xf32, #tpu.memory_space<vmem>>, vector<48x128xf32>
    %cst = arith.constant dense<0.000000e+00> : vector<512x128xf32>
    %2 = tpu.matmul %0, %1, %cst {dimension_numbers = #tpu.dot_dimension_numbers<[1], [0], [0], [1], [0, 0, 1, 1], [], []>} : vector<512x48xf32>, vector<48x128xf32>, vector<512x128xf32> -> vector<512x128xf32>
    %c0_3 = arith.constant 0 : index
    %c0_4 = arith.constant 0 : index
    %3 = vector.load %arg6[%c0_3, %c0_4] : memref<512x1xf32, #tpu.memory_space<vmem>>, vector<512x1xf32>
    %4 = vector.broadcast %3 : vector<512x1xf32> to vector<512x128xf32>
    %5 = arith.addf %2, %4 : vector<512x128xf32>
    %cst_5 = arith.constant 0.000000e+00 : f32
    %6 = vector.broadcast %cst_5 : f32 to vector<512x128xf32>
    %7 = arith.maximumf %5, %6 : vector<512x128xf32>
    %c0_6 = arith.constant 0 : index
    %c0_7 = arith.constant 0 : index
    %8 = vector.load %arg7[%c0_6, %c0_7] : memref<512x512xf32, #tpu.memory_space<vmem>>, vector<512x512xf32>
    %cst_8 = arith.constant dense<0.000000e+00> : vector<512x128xf32>
    %9 = tpu.matmul %8, %7, %cst_8 {dimension_numbers = #tpu.dot_dimension_numbers<[1], [0], [0], [1], [0, 0, 1, 1], [], []>} : vector<512x512xf32>, vector<512x128xf32>, vector<512x128xf32> -> vector<512x128xf32>
    %c0_9 = arith.constant 0 : index
    %c0_10 = arith.constant 0 : index
    %10 = vector.load %arg8[%c0_9, %c0_10] : memref<512x1xf32, #tpu.memory_space<vmem>>, vector<512x1xf32>
    %11 = vector.broadcast %10 : vector<512x1xf32> to vector<512x128xf32>
    %12 = arith.addf %9, %11 : vector<512x128xf32>
    %13 = vector.extract_strided_slice %12 {offsets = [0, 0], sizes = [128, 128], strides = [1, 1]} : vector<512x128xf32> to vector<128x128xf32>
    %c0_11 = arith.constant 0 : index
    %c0_12 = arith.constant 0 : index
    %14 = vector.load %arg15[%c0_11, %c0_12] : memref<128x128xf32, #tpu.memory_space<vmem>>, vector<128x128xf32>
    tpu.vector_store %arg15[%c0_11, %c0_12], %13 {strides = array<i32>} : memref<128x128xf32, #tpu.memory_space<vmem>>, vector<128x128xf32>,
    %c0_13 = arith.constant 0 : index
    %c0_14 = arith.constant 0 : index
    %c0_15 = arith.constant 0 : index
    %15 = vector.load %arg2[%c0_13, %c0_14, %c0_15] : memref<4x10x128xf32, #tpu.memory_space<vmem>>, vector<4x10x128xf32>
    %c0_16 = arith.constant 0 : index
    %c0_17 = arith.constant 0 : index
    %c0_18 = arith.constant 0 : index
    %16 = vector.load %arg3[%c0_16, %c0_17, %c0_18] : memref<4x16x128xf32, #tpu.memory_space<vmem>>, vector<4x16x128xf32>
    %c0_19 = arith.constant 0 : index
    %c0_20 = arith.constant 0 : index
    %c0_21 = arith.constant 0 : index
    %17 = vector.load %arg4[%c0_19, %c0_20, %c0_21] : memref<2x4x128xf32, #tpu.memory_space<vmem>>, vector<2x4x128xf32>
    %c0_22 = arith.constant 0 : index
    %c0_23 = arith.constant 0 : index
    %18 = vector.load %arg9[%c0_22, %c0_23] : memref<48x8xf32, #tpu.memory_space<vmem>>, vector<48x8xf32>
    %c0_24 = arith.constant 0 : index
    %c0_25 = arith.constant 0 : index
    %19 = vector.load %arg10[%c0_24, %c0_25] : memref<48x16xf32, #tpu.memory_space<vmem>>, vector<48x16xf32>
    %c0_26 = arith.constant 0 : index
    %c0_27 = arith.constant 0 : index
    %20 = vector.load %arg11[%c0_26, %c0_27] : memref<48x1xf32, #tpu.memory_space<vmem>>, vector<48x1xf32>
    %c0_28 = arith.constant 0 : index
    %c0_29 = arith.constant 0 : index
    %21 = vector.load %arg12[%c0_28, %c0_29] : memref<48x1xf32, #tpu.memory_space<vmem>>, vector<48x1xf32>
    %22 = vector.extract_strided_slice %15 {offsets = [0, 0, 0], sizes = [1, 10, 128], strides = [1, 1, 1]} : vector<4x10x128xf32> to vector<1x10x128xf32>
    %23 = vector.shape_cast %22 : vector<1x10x128xf32> to vector<10x128xf32>
    %24 = vector.extract_strided_slice %12 {offsets = [208, 0], sizes = [8, 128], strides = [1, 1]} : vector<512x128xf32> to vector<8x128xf32>
    %25 = vector.extract_strided_slice %23 {offsets = [0, 0], sizes = [1, 128], strides = [1, 1]} : vector<10x128xf32> to vector<1x128xf32>
    %26 = vector.extract_strided_slice %12 {offsets = [128, 0], sizes = [8, 128], strides = [1, 1]} : vector<512x128xf32> to vector<8x128xf32>
    %27 = vector.broadcast %25 : vector<1x128xf32> to vector<8x128xf32>
    %28 = arith.mulf %27, %26 : vector<8x128xf32>
    %29 = arith.addf %24, %28 : vector<8x128xf32>
    %30 = vector.extract_strided_slice %23 {offsets = [1, 0], sizes = [1, 128], strides = [1, 1]} : vector<10x128xf32> to vector<1x128xf32>
    %31 = vector.extract_strided_slice %12 {offsets = [136, 0], sizes = [8, 128], strides = [1, 1]} : vector<512x128xf32> to vector<8x128xf32>
    %32 = vector.broadcast %30 : vector<1x128xf32> to vector<8x128xf32>
    %33 = arith.mulf %32, %31 : vector<8x128xf32>
    %34 = arith.addf %29, %33 : vector<8x128xf32>
    %35 = vector.extract_strided_slice %23 {offsets = [2, 0], sizes = [1, 128], strides = [1, 1]} : vector<10x128xf32> to vector<1x128xf32>
    %36 = vector.extract_strided_slice %12 {offsets = [144, 0], sizes = [8, 128], strides = [1, 1]} : vector<512x128xf32> to vector<8x128xf32>
    %37 = vector.broadcast %35 : vector<1x128xf32> to vector<8x128xf32>
    %38 = arith.mulf %37, %36 : vector<8x128xf32>
    %39 = arith.addf %34, %38 : vector<8x128xf32>
    %40 = vector.extract_strided_slice %23 {offsets = [3, 0], sizes = [1, 128], strides = [1, 1]} : vector<10x128xf32> to vector<1x128xf32>
    %41 = vector.extract_strided_slice %12 {offsets = [152, 0], sizes = [8, 128], strides = [1, 1]} : vector<512x128xf32> to vector<8x128xf32>
    %42 = vector.broadcast %40 : vector<1x128xf32> to vector<8x128xf32>
    %43 = arith.mulf %42, %41 : vector<8x128xf32>
    %44 = arith.addf %39, %43 : vector<8x128xf32>
    %45 = vector.extract_strided_slice %23 {offsets = [4, 0], sizes = [1, 128], strides = [1, 1]} : vector<10x128xf32> to vector<1x128xf32>
    %46 = vector.extract_strided_slice %12 {offsets = [160, 0], sizes = [8, 128], strides = [1, 1]} : vector<512x128xf32> to vector<8x128xf32>
    %47 = vector.broadcast %45 : vector<1x128xf32> to vector<8x128xf32>
    %48 = arith.mulf %47, %46 : vector<8x128xf32>
    %49 = arith.addf %44, %48 : vector<8x128xf32>
    %50 = vector.extract_strided_slice %23 {offsets = [5, 0], sizes = [1, 128], strides = [1, 1]} : vector<10x128xf32> to vector<1x128xf32>
    %51 = vector.extract_strided_slice %12 {offsets = [168, 0], sizes = [8, 128], strides = [1, 1]} : vector<512x128xf32> to vector<8x128xf32>
    %52 = vector.broadcast %50 : vector<1x128xf32> to vector<8x128xf32>
    %53 = arith.mulf %52, %51 : vector<8x128xf32>
    %54 = arith.addf %49, %53 : vector<8x128xf32>
    %55 = vector.extract_strided_slice %23 {offsets = [6, 0], sizes = [1, 128], strides = [1, 1]} : vector<10x128xf32> to vector<1x128xf32>
    %56 = vector.extract_strided_slice %12 {offsets = [176, 0], sizes = [8, 128], strides = [1, 1]} : vector<512x128xf32> to vector<8x128xf32>
    %57 = vector.broadcast %55 : vector<1x128xf32> to vector<8x128xf32>
    %58 = arith.mulf %57, %56 : vector<8x128xf32>
    %59 = arith.addf %54, %58 : vector<8x128xf32>
    %60 = vector.extract_strided_slice %23 {offsets = [7, 0], sizes = [1, 128], strides = [1, 1]} : vector<10x128xf32> to vector<1x128xf32>
    %61 = vector.extract_strided_slice %12 {offsets = [184, 0], sizes = [8, 128], strides = [1, 1]} : vector<512x128xf32> to vector<8x128xf32>
    %62 = vector.broadcast %60 : vector<1x128xf32> to vector<8x128xf32>
    %63 = arith.mulf %62, %61 : vector<8x128xf32>
    %64 = arith.addf %59, %63 : vector<8x128xf32>
    %65 = vector.extract_strided_slice %23 {offsets = [8, 0], sizes = [1, 128], strides = [1, 1]} : vector<10x128xf32> to vector<1x128xf32>
    %66 = vector.extract_strided_slice %12 {offsets = [192, 0], sizes = [8, 128], strides = [1, 1]} : vector<512x128xf32> to vector<8x128xf32>
    %67 = vector.broadcast %65 : vector<1x128xf32> to vector<8x128xf32>
    %68 = arith.mulf %67, %66 : vector<8x128xf32>
    %69 = arith.addf %64, %68 : vector<8x128xf32>
    %70 = vector.extract_strided_slice %23 {offsets = [9, 0], sizes = [1, 128], strides = [1, 1]} : vector<10x128xf32> to vector<1x128xf32>
    %71 = vector.extract_strided_slice %12 {offsets = [200, 0], sizes = [8, 128], strides = [1, 1]} : vector<512x128xf32> to vector<8x128xf32>
    %72 = vector.broadcast %70 : vector<1x128xf32> to vector<8x128xf32>
    %73 = arith.mulf %72, %71 : vector<8x128xf32>
    %74 = arith.addf %69, %73 : vector<8x128xf32>
    %cst_30 = arith.constant 0.000000e+00 : f32
    %75 = vector.broadcast %cst_30 : f32 to vector<8x128xf32>
    %76 = arith.cmpf ogt, %74, %75 : vector<8x128xf32>
    %77 = math.exp %74 : vector<8x128xf32>
    %cst_31 = arith.constant 1.000000e+00 : f32
    %78 = vector.broadcast %cst_31 : f32 to vector<8x128xf32>
    %79 = arith.subf %77, %78 : vector<8x128xf32>
    %80 = arith.select %76, %74, %79 : vector<8x128xi1>, vector<8x128xf32>
    %81 = vector.extract_strided_slice %16 {offsets = [0, 0, 0], sizes = [1, 16, 128], strides = [1, 1, 1]} : vector<4x16x128xf32> to vector<1x16x128xf32>
    %82 = vector.shape_cast %81 : vector<1x16x128xf32> to vector<16x128xf32>
    %cst_32 = arith.constant dense<0.000000e+00> : vector<48x128xf32>
    %83 = tpu.matmul %18, %80, %cst_32 {dimension_numbers = #tpu.dot_dimension_numbers<[1], [0], [0], [1], [0, 0, 1, 1], [], []>} : vector<48x8xf32>, vector<8x128xf32>, vector<48x128xf32> -> vector<48x128xf32>
    %84 = vector.broadcast %20 : vector<48x1xf32> to vector<48x128xf32>
    %85 = arith.addf %83, %84 : vector<48x128xf32>
    %cst_33 = arith.constant dense<0.000000e+00> : vector<48x128xf32>
    %86 = tpu.matmul %19, %82, %cst_33 {dimension_numbers = #tpu.dot_dimension_numbers<[1], [0], [0], [1], [0, 0, 1, 1], [], []>} : vector<48x16xf32>, vector<16x128xf32>, vector<48x128xf32> -> vector<48x128xf32>
    %87 = vector.broadcast %21 : vector<48x1xf32> to vector<48x128xf32>
    %88 = arith.addf %86, %87 : vector<48x128xf32>
    %89 = vector.extract_strided_slice %85 {offsets = [0, 0], sizes = [16, 128], strides = [1, 1]} : vector<48x128xf32> to vector<16x128xf32>
    %90 = vector.extract_strided_slice %88 {offsets = [0, 0], sizes = [16, 128], strides = [1, 1]} : vector<48x128xf32> to vector<16x128xf32>
    %91 = arith.addf %89, %90 : vector<16x128xf32>
    %cst_34 = arith.constant 0.000000e+00 : f32
    %92 = vector.broadcast %cst_34 : f32 to vector<16x128xf32>
    %93 = arith.subf %92, %91 : vector<16x128xf32>
    %94 = math.exp %93 : vector<16x128xf32>
    %cst_35 = arith.constant 1.000000e+00 : f32
    %95 = vector.broadcast %cst_35 : f32 to vector<16x128xf32>
    %96 = arith.addf %95, %94 : vector<16x128xf32>
    %cst_36 = arith.constant 1.000000e+00 : f32
    %97 = vector.broadcast %cst_36 : f32 to vector<16x128xf32>
    %98 = arith.divf %97, %96 : vector<16x128xf32>
    %99 = vector.extract_strided_slice %85 {offsets = [16, 0], sizes = [16, 128], strides = [1, 1]} : vector<48x128xf32> to vector<16x128xf32>
    %100 = vector.extract_strided_slice %88 {offsets = [16, 0], sizes = [16, 128], strides = [1, 1]} : vector<48x128xf32> to vector<16x128xf32>
    %101 = arith.addf %99, %100 : vector<16x128xf32>
    %cst_37 = arith.constant 0.000000e+00 : f32
    %102 = vector.broadcast %cst_37 : f32 to vector<16x128xf32>
    %103 = arith.subf %102, %101 : vector<16x128xf32>
    %104 = math.exp %103 : vector<16x128xf32>
    %cst_38 = arith.constant 1.000000e+00 : f32
    %105 = vector.broadcast %cst_38 : f32 to vector<16x128xf32>
    %106 = arith.addf %105, %104 : vector<16x128xf32>
    %cst_39 = arith.constant 1.000000e+00 : f32
    %107 = vector.broadcast %cst_39 : f32 to vector<16x128xf32>
    %108 = arith.divf %107, %106 : vector<16x128xf32>
    %109 = vector.extract_strided_slice %85 {offsets = [32, 0], sizes = [16, 128], strides = [1, 1]} : vector<48x128xf32> to vector<16x128xf32>
    %110 = vector.extract_strided_slice %88 {offsets = [32, 0], sizes = [16, 128], strides = [1, 1]} : vector<48x128xf32> to vector<16x128xf32>
    %111 = arith.mulf %98, %110 : vector<16x128xf32>
    %112 = arith.addf %109, %111 : vector<16x128xf32>
    %113 = math.tanh %112 : vector<16x128xf32>
    %cst_40 = arith.constant 1.000000e+00 : f32
    %114 = vector.broadcast %cst_40 : f32 to vector<16x128xf32>
    %115 = arith.subf %114, %108 : vector<16x128xf32>
    %116 = arith.mulf %115, %113 : vector<16x128xf32>
    %117 = arith.mulf %108, %82 : vector<16x128xf32>
    %118 = arith.addf %116, %117 : vector<16x128xf32>
    %c0_41 = arith.constant 0 : index
    %c0_42 = arith.constant 0 : index
    %c0_43 = arith.constant 0 : index
    %119 = vector.load %arg13[%c0_41, %c0_42, %c0_43] : memref<4x16x128xf32, #tpu.memory_space<vmem>>, vector<1x16x128xf32>
    %120 = vector.shape_cast %119 : vector<1x16x128xf32> to vector<16x128xf32>
    %121 = vector.shape_cast %118 : vector<16x128xf32> to vector<1x16x128xf32>
    tpu.vector_store %arg13[%c0_41, %c0_42, %c0_43], %121 {strides = array<i32>} : memref<4x16x128xf32, #tpu.memory_space<vmem>>, vector<1x16x128xf32>,
    %122 = vector.extract_strided_slice %12 {offsets = [368, 0], sizes = [8, 128], strides = [1, 1]} : vector<512x128xf32> to vector<8x128xf32>
    %123 = vector.extract_strided_slice %118 {offsets = [0, 0], sizes = [1, 128], strides = [1, 1]} : vector<16x128xf32> to vector<1x128xf32>
    %124 = vector.extract_strided_slice %12 {offsets = [240, 0], sizes = [8, 128], strides = [1, 1]} : vector<512x128xf32> to vector<8x128xf32>
    %125 = vector.broadcast %123 : vector<1x128xf32> to vector<8x128xf32>
    %126 = arith.mulf %125, %124 : vector<8x128xf32>
    %127 = arith.addf %122, %126 : vector<8x128xf32>
    %128 = vector.extract_strided_slice %118 {offsets = [1, 0], sizes = [1, 128], strides = [1, 1]} : vector<16x128xf32> to vector<1x128xf32>
    %129 = vector.extract_strided_slice %12 {offsets = [248, 0], sizes = [8, 128], strides = [1, 1]} : vector<512x128xf32> to vector<8x128xf32>
    %130 = vector.broadcast %128 : vector<1x128xf32> to vector<8x128xf32>
    %131 = arith.mulf %130, %129 : vector<8x128xf32>
    %132 = arith.addf %127, %131 : vector<8x128xf32>
    %133 = vector.extract_strided_slice %118 {offsets = [2, 0], sizes = [1, 128], strides = [1, 1]} : vector<16x128xf32> to vector<1x128xf32>
    %134 = vector.extract_strided_slice %12 {offsets = [256, 0], sizes = [8, 128], strides = [1, 1]} : vector<512x128xf32> to vector<8x128xf32>
    %135 = vector.broadcast %133 : vector<1x128xf32> to vector<8x128xf32>
    %136 = arith.mulf %135, %134 : vector<8x128xf32>
    %137 = arith.addf %132, %136 : vector<8x128xf32>
    %138 = vector.extract_strided_slice %118 {offsets = [3, 0], sizes = [1, 128], strides = [1, 1]} : vector<16x128xf32> to vector<1x128xf32>
    %139 = vector.extract_strided_slice %12 {offsets = [264, 0], sizes = [8, 128], strides = [1, 1]} : vector<512x128xf32> to vector<8x128xf32>
    %140 = vector.broadcast %138 : vector<1x128xf32> to vector<8x128xf32>
    %141 = arith.mulf %140, %139 : vector<8x128xf32>
    %142 = arith.addf %137, %141 : vector<8x128xf32>
    %143 = vector.extract_strided_slice %118 {offsets = [4, 0], sizes = [1, 128], strides = [1, 1]} : vector<16x128xf32> to vector<1x128xf32>
    %144 = vector.extract_strided_slice %12 {offsets = [272, 0], sizes = [8, 128], strides = [1, 1]} : vector<512x128xf32> to vector<8x128xf32>
    %145 = vector.broadcast %143 : vector<1x128xf32> to vector<8x128xf32>
    %146 = arith.mulf %145, %144 : vector<8x128xf32>
    %147 = arith.addf %142, %146 : vector<8x128xf32>
    %148 = vector.extract_strided_slice %118 {offsets = [5, 0], sizes = [1, 128], strides = [1, 1]} : vector<16x128xf32> to vector<1x128xf32>
    %149 = vector.extract_strided_slice %12 {offsets = [280, 0], sizes = [8, 128], strides = [1, 1]} : vector<512x128xf32> to vector<8x128xf32>
    %150 = vector.broadcast %148 : vector<1x128xf32> to vector<8x128xf32>
    %151 = arith.mulf %150, %149 : vector<8x128xf32>
    %152 = arith.addf %147, %151 : vector<8x128xf32>
    %153 = vector.extract_strided_slice %118 {offsets = [6, 0], sizes = [1, 128], strides = [1, 1]} : vector<16x128xf32> to vector<1x128xf32>
    %154 = vector.extract_strided_slice %12 {offsets = [288, 0], sizes = [8, 128], strides = [1, 1]} : vector<512x128xf32> to vector<8x128xf32>
    %155 = vector.broadcast %153 : vector<1x128xf32> to vector<8x128xf32>
    %156 = arith.mulf %155, %154 : vector<8x128xf32>
    %157 = arith.addf %152, %156 : vector<8x128xf32>
    %158 = vector.extract_strided_slice %118 {offsets = [7, 0], sizes = [1, 128], strides = [1, 1]} : vector<16x128xf32> to vector<1x128xf32>
    %159 = vector.extract_strided_slice %12 {offsets = [296, 0], sizes = [8, 128], strides = [1, 1]} : vector<512x128xf32> to vector<8x128xf32>
    %160 = vector.broadcast %158 : vector<1x128xf32> to vector<8x128xf32>
    %161 = arith.mulf %160, %159 : vector<8x128xf32>
    %162 = arith.addf %157, %161 : vector<8x128xf32>
    %163 = vector.extract_strided_slice %118 {offsets = [8, 0], sizes = [1, 128], strides = [1, 1]} : vector<16x128xf32> to vector<1x128xf32>
    %164 = vector.extract_strided_slice %12 {offsets = [304, 0], sizes = [8, 128], strides = [1, 1]} : vector<512x128xf32> to vector<8x128xf32>
    %165 = vector.broadcast %163 : vector<1x128xf32> to vector<8x128xf32>
    %166 = arith.mulf %165, %164 : vector<8x128xf32>
    %167 = arith.addf %162, %166 : vector<8x128xf32>
    %168 = vector.extract_strided_slice %118 {offsets = [9, 0], sizes = [1, 128], strides = [1, 1]} : vector<16x128xf32> to vector<1x128xf32>
    %169 = vector.extract_strided_slice %12 {offsets = [312, 0], sizes = [8, 128], strides = [1, 1]} : vector<512x128xf32> to vector<8x128xf32>
    %170 = vector.broadcast %168 : vector<1x128xf32> to vector<8x128xf32>
    %171 = arith.mulf %170, %169 : vector<8x128xf32>
    %172 = arith.addf %167, %171 : vector<8x128xf32>
    %173 = vector.extract_strided_slice %118 {offsets = [10, 0], sizes = [1, 128], strides = [1, 1]} : vector<16x128xf32> to vector<1x128xf32>
    %174 = vector.extract_strided_slice %12 {offsets = [320, 0], sizes = [8, 128], strides = [1, 1]} : vector<512x128xf32> to vector<8x128xf32>
    %175 = vector.broadcast %173 : vector<1x128xf32> to vector<8x128xf32>
    %176 = arith.mulf %175, %174 : vector<8x128xf32>
    %177 = arith.addf %172, %176 : vector<8x128xf32>
    %178 = vector.extract_strided_slice %118 {offsets = [11, 0], sizes = [1, 128], strides = [1, 1]} : vector<16x128xf32> to vector<1x128xf32>
    %179 = vector.extract_strided_slice %12 {offsets = [328, 0], sizes = [8, 128], strides = [1, 1]} : vector<512x128xf32> to vector<8x128xf32>
    %180 = vector.broadcast %178 : vector<1x128xf32> to vector<8x128xf32>
    %181 = arith.mulf %180, %179 : vector<8x128xf32>
    %182 = arith.addf %177, %181 : vector<8x128xf32>
    %183 = vector.extract_strided_slice %118 {offsets = [12, 0], sizes = [1, 128], strides = [1, 1]} : vector<16x128xf32> to vector<1x128xf32>
    %184 = vector.extract_strided_slice %12 {offsets = [336, 0], sizes = [8, 128], strides = [1, 1]} : vector<512x128xf32> to vector<8x128xf32>
    %185 = vector.broadcast %183 : vector<1x128xf32> to vector<8x128xf32>
    %186 = arith.mulf %185, %184 : vector<8x128xf32>
    %187 = arith.addf %182, %186 : vector<8x128xf32>
    %188 = vector.extract_strided_slice %118 {offsets = [13, 0], sizes = [1, 128], strides = [1, 1]} : vector<16x128xf32> to vector<1x128xf32>
    %189 = vector.extract_strided_slice %12 {offsets = [344, 0], sizes = [8, 128], strides = [1, 1]} : vector<512x128xf32> to vector<8x128xf32>
    %190 = vector.broadcast %188 : vector<1x128xf32> to vector<8x128xf32>
    %191 = arith.mulf %190, %189 : vector<8x128xf32>
    %192 = arith.addf %187, %191 : vector<8x128xf32>
    %193 = vector.extract_strided_slice %118 {offsets = [14, 0], sizes = [1, 128], strides = [1, 1]} : vector<16x128xf32> to vector<1x128xf32>
    %194 = vector.extract_strided_slice %12 {offsets = [352, 0], sizes = [8, 128], strides = [1, 1]} : vector<512x128xf32> to vector<8x128xf32>
    %195 = vector.broadcast %193 : vector<1x128xf32> to vector<8x128xf32>
    %196 = arith.mulf %195, %194 : vector<8x128xf32>
    %197 = arith.addf %192, %196 : vector<8x128xf32>
    %198 = vector.extract_strided_slice %118 {offsets = [15, 0], sizes = [1, 128], strides = [1, 1]} : vector<16x128xf32> to vector<1x128xf32>
    %199 = vector.extract_strided_slice %12 {offsets = [360, 0], sizes = [8, 128], strides = [1, 1]} : vector<512x128xf32> to vector<8x128xf32>
    %200 = vector.broadcast %198 : vector<1x128xf32> to vector<8x128xf32>
    %201 = arith.mulf %200, %199 : vector<8x128xf32>
    %202 = arith.addf %197, %201 : vector<8x128xf32>
    %cst_44 = arith.constant 0.000000e+00 : f32
    %203 = vector.broadcast %cst_44 : f32 to vector<8x128xf32>
    %204 = arith.cmpf ogt, %202, %203 : vector<8x128xf32>
    %205 = math.exp %202 : vector<8x128xf32>
    %cst_45 = arith.constant 1.000000e+00 : f32
    %206 = vector.broadcast %cst_45 : f32 to vector<8x128xf32>
    %207 = arith.subf %205, %206 : vector<8x128xf32>
    %208 = arith.select %204, %202, %207 : vector<8x128xi1>, vector<8x128xf32>
    %c0_46 = arith.constant 0 : index
    %c0_47 = arith.constant 0 : index
    %c0_48 = arith.constant 0 : index
    %209 = vector.load %arg14[%c0_46, %c0_47, %c0_48] : memref<4x8x128xf32, #tpu.memory_space<vmem>>, vector<1x8x128xf32>
    %210 = vector.shape_cast %209 : vector<1x8x128xf32> to vector<8x128xf32>
    %211 = vector.shape_cast %208 : vector<8x128xf32> to vector<1x8x128xf32>
    tpu.vector_store %arg14[%c0_46, %c0_47, %c0_48], %211 {strides = array<i32>} : memref<4x8x128xf32, #tpu.memory_space<vmem>>, vector<1x8x128xf32>,
    %212 = vector.extract_strided_slice %15 {offsets = [1, 0, 0], sizes = [1, 10, 128], strides = [1, 1, 1]} : vector<4x10x128xf32> to vector<1x10x128xf32>
    %213 = vector.shape_cast %212 : vector<1x10x128xf32> to vector<10x128xf32>
    %214 = vector.extract_strided_slice %12 {offsets = [216, 0], sizes = [8, 128], strides = [1, 1]} : vector<512x128xf32> to vector<8x128xf32>
    %215 = vector.extract_strided_slice %213 {offsets = [0, 0], sizes = [1, 128], strides = [1, 1]} : vector<10x128xf32> to vector<1x128xf32>
    %216 = vector.extract_strided_slice %12 {offsets = [128, 0], sizes = [8, 128], strides = [1, 1]} : vector<512x128xf32> to vector<8x128xf32>
    %217 = vector.broadcast %215 : vector<1x128xf32> to vector<8x128xf32>
    %218 = arith.mulf %217, %216 : vector<8x128xf32>
    %219 = arith.addf %214, %218 : vector<8x128xf32>
    %220 = vector.extract_strided_slice %213 {offsets = [1, 0], sizes = [1, 128], strides = [1, 1]} : vector<10x128xf32> to vector<1x128xf32>
    %221 = vector.extract_strided_slice %12 {offsets = [136, 0], sizes = [8, 128], strides = [1, 1]} : vector<512x128xf32> to vector<8x128xf32>
    %222 = vector.broadcast %220 : vector<1x128xf32> to vector<8x128xf32>
    %223 = arith.mulf %222, %221 : vector<8x128xf32>
    %224 = arith.addf %219, %223 : vector<8x128xf32>
    %225 = vector.extract_strided_slice %213 {offsets = [2, 0], sizes = [1, 128], strides = [1, 1]} : vector<10x128xf32> to vector<1x128xf32>
    %226 = vector.extract_strided_slice %12 {offsets = [144, 0], sizes = [8, 128], strides = [1, 1]} : vector<512x128xf32> to vector<8x128xf32>
    %227 = vector.broadcast %225 : vector<1x128xf32> to vector<8x128xf32>
    %228 = arith.mulf %227, %226 : vector<8x128xf32>
    %229 = arith.addf %224, %228 : vector<8x128xf32>
    %230 = vector.extract_strided_slice %213 {offsets = [3, 0], sizes = [1, 128], strides = [1, 1]} : vector<10x128xf32> to vector<1x128xf32>
    %231 = vector.extract_strided_slice %12 {offsets = [152, 0], sizes = [8, 128], strides = [1, 1]} : vector<512x128xf32> to vector<8x128xf32>
    %232 = vector.broadcast %230 : vector<1x128xf32> to vector<8x128xf32>
    %233 = arith.mulf %232, %231 : vector<8x128xf32>
    %234 = arith.addf %229, %233 : vector<8x128xf32>
    %235 = vector.extract_strided_slice %213 {offsets = [4, 0], sizes = [1, 128], strides = [1, 1]} : vector<10x128xf32> to vector<1x128xf32>
    %236 = vector.extract_strided_slice %12 {offsets = [160, 0], sizes = [8, 128], strides = [1, 1]} : vector<512x128xf32> to vector<8x128xf32>
    %237 = vector.broadcast %235 : vector<1x128xf32> to vector<8x128xf32>
    %238 = arith.mulf %237, %236 : vector<8x128xf32>
    %239 = arith.addf %234, %238 : vector<8x128xf32>
    %240 = vector.extract_strided_slice %213 {offsets = [5, 0], sizes = [1, 128], strides = [1, 1]} : vector<10x128xf32> to vector<1x128xf32>
    %241 = vector.extract_strided_slice %12 {offsets = [168, 0], sizes = [8, 128], strides = [1, 1]} : vector<512x128xf32> to vector<8x128xf32>
    %242 = vector.broadcast %240 : vector<1x128xf32> to vector<8x128xf32>
    %243 = arith.mulf %242, %241 : vector<8x128xf32>
    %244 = arith.addf %239, %243 : vector<8x128xf32>
    %245 = vector.extract_strided_slice %213 {offsets = [6, 0], sizes = [1, 128], strides = [1, 1]} : vector<10x128xf32> to vector<1x128xf32>
    %246 = vector.extract_strided_slice %12 {offsets = [176, 0], sizes = [8, 128], strides = [1, 1]} : vector<512x128xf32> to vector<8x128xf32>
    %247 = vector.broadcast %245 : vector<1x128xf32> to vector<8x128xf32>
    %248 = arith.mulf %247, %246 : vector<8x128xf32>
    %249 = arith.addf %244, %248 : vector<8x128xf32>
    %250 = vector.extract_strided_slice %213 {offsets = [7, 0], sizes = [1, 128], strides = [1, 1]} : vector<10x128xf32> to vector<1x128xf32>
    %251 = vector.extract_strided_slice %12 {offsets = [184, 0], sizes = [8, 128], strides = [1, 1]} : vector<512x128xf32> to vector<8x128xf32>
    %252 = vector.broadcast %250 : vector<1x128xf32> to vector<8x128xf32>
    %253 = arith.mulf %252, %251 : vector<8x128xf32>
    %254 = arith.addf %249, %253 : vector<8x128xf32>
    %255 = vector.extract_strided_slice %213 {offsets = [8, 0], sizes = [1, 128], strides = [1, 1]} : vector<10x128xf32> to vector<1x128xf32>
    %256 = vector.extract_strided_slice %12 {offsets = [192, 0], sizes = [8, 128], strides = [1, 1]} : vector<512x128xf32> to vector<8x128xf32>
    %257 = vector.broadcast %255 : vector<1x128xf32> to vector<8x128xf32>
    %258 = arith.mulf %257, %256 : vector<8x128xf32>
    %259 = arith.addf %254, %258 : vector<8x128xf32>
    %260 = vector.extract_strided_slice %213 {offsets = [9, 0], sizes = [1, 128], strides = [1, 1]} : vector<10x128xf32> to vector<1x128xf32>
    %261 = vector.extract_strided_slice %12 {offsets = [200, 0], sizes = [8, 128], strides = [1, 1]} : vector<512x128xf32> to vector<8x128xf32>
    %262 = vector.broadcast %260 : vector<1x128xf32> to vector<8x128xf32>
    %263 = arith.mulf %262, %261 : vector<8x128xf32>
    %264 = arith.addf %259, %263 : vector<8x128xf32>
    %cst_49 = arith.constant 0.000000e+00 : f32
    %265 = vector.broadcast %cst_49 : f32 to vector<8x128xf32>
    %266 = arith.cmpf ogt, %264, %265 : vector<8x128xf32>
    %267 = math.exp %264 : vector<8x128xf32>
    %cst_50 = arith.constant 1.000000e+00 : f32
    %268 = vector.broadcast %cst_50 : f32 to vector<8x128xf32>
    %269 = arith.subf %267, %268 : vector<8x128xf32>
    %270 = arith.select %266, %264, %269 : vector<8x128xi1>, vector<8x128xf32>
    %271 = vector.extract_strided_slice %16 {offsets = [1, 0, 0], sizes = [1, 16, 128], strides = [1, 1, 1]} : vector<4x16x128xf32> to vector<1x16x128xf32>
    %272 = vector.shape_cast %271 : vector<1x16x128xf32> to vector<16x128xf32>
    %cst_51 = arith.constant dense<0.000000e+00> : vector<48x128xf32>
    %273 = tpu.matmul %18, %270, %cst_51 {dimension_numbers = #tpu.dot_dimension_numbers<[1], [0], [0], [1], [0, 0, 1, 1], [], []>} : vector<48x8xf32>, vector<8x128xf32>, vector<48x128xf32> -> vector<48x128xf32>
    %274 = vector.broadcast %20 : vector<48x1xf32> to vector<48x128xf32>
    %275 = arith.addf %273, %274 : vector<48x128xf32>
    %cst_52 = arith.constant dense<0.000000e+00> : vector<48x128xf32>
    %276 = tpu.matmul %19, %272, %cst_52 {dimension_numbers = #tpu.dot_dimension_numbers<[1], [0], [0], [1], [0, 0, 1, 1], [], []>} : vector<48x16xf32>, vector<16x128xf32>, vector<48x128xf32> -> vector<48x128xf32>
    %277 = vector.broadcast %21 : vector<48x1xf32> to vector<48x128xf32>
    %278 = arith.addf %276, %277 : vector<48x128xf32>
    %279 = vector.extract_strided_slice %275 {offsets = [0, 0], sizes = [16, 128], strides = [1, 1]} : vector<48x128xf32> to vector<16x128xf32>
    %280 = vector.extract_strided_slice %278 {offsets = [0, 0], sizes = [16, 128], strides = [1, 1]} : vector<48x128xf32> to vector<16x128xf32>
    %281 = arith.addf %279, %280 : vector<16x128xf32>
    %cst_53 = arith.constant 0.000000e+00 : f32
    %282 = vector.broadcast %cst_53 : f32 to vector<16x128xf32>
    %283 = arith.subf %282, %281 : vector<16x128xf32>
    %284 = math.exp %283 : vector<16x128xf32>
    %cst_54 = arith.constant 1.000000e+00 : f32
    %285 = vector.broadcast %cst_54 : f32 to vector<16x128xf32>
    %286 = arith.addf %285, %284 : vector<16x128xf32>
    %cst_55 = arith.constant 1.000000e+00 : f32
    %287 = vector.broadcast %cst_55 : f32 to vector<16x128xf32>
    %288 = arith.divf %287, %286 : vector<16x128xf32>
    %289 = vector.extract_strided_slice %275 {offsets = [16, 0], sizes = [16, 128], strides = [1, 1]} : vector<48x128xf32> to vector<16x128xf32>
    %290 = vector.extract_strided_slice %278 {offsets = [16, 0], sizes = [16, 128], strides = [1, 1]} : vector<48x128xf32> to vector<16x128xf32>
    %291 = arith.addf %289, %290 : vector<16x128xf32>
    %cst_56 = arith.constant 0.000000e+00 : f32
    %292 = vector.broadcast %cst_56 : f32 to vector<16x128xf32>
    %293 = arith.subf %292, %291 : vector<16x128xf32>
    %294 = math.exp %293 : vector<16x128xf32>
    %cst_57 = arith.constant 1.000000e+00 : f32
    %295 = vector.broadcast %cst_57 : f32 to vector<16x128xf32>
    %296 = arith.addf %295, %294 : vector<16x128xf32>
    %cst_58 = arith.constant 1.000000e+00 : f32
    %297 = vector.broadcast %cst_58 : f32 to vector<16x128xf32>
    %298 = arith.divf %297, %296 : vector<16x128xf32>
    %299 = vector.extract_strided_slice %275 {offsets = [32, 0], sizes = [16, 128], strides = [1, 1]} : vector<48x128xf32> to vector<16x128xf32>
    %300 = vector.extract_strided_slice %278 {offsets = [32, 0], sizes = [16, 128], strides = [1, 1]} : vector<48x128xf32> to vector<16x128xf32>
    %301 = arith.mulf %288, %300 : vector<16x128xf32>
    %302 = arith.addf %299, %301 : vector<16x128xf32>
    %303 = math.tanh %302 : vector<16x128xf32>
    %cst_59 = arith.constant 1.000000e+00 : f32
    %304 = vector.broadcast %cst_59 : f32 to vector<16x128xf32>
    %305 = arith.subf %304, %298 : vector<16x128xf32>
    %306 = arith.mulf %305, %303 : vector<16x128xf32>
    %307 = arith.mulf %298, %272 : vector<16x128xf32>
    %308 = arith.addf %306, %307 : vector<16x128xf32>
    %c1 = arith.constant 1 : index
    %c0_60 = arith.constant 0 : index
    %c0_61 = arith.constant 0 : index
    %309 = vector.load %arg13[%c1, %c0_60, %c0_61] : memref<4x16x128xf32, #tpu.memory_space<vmem>>, vector<1x16x128xf32>
    %310 = vector.shape_cast %309 : vector<1x16x128xf32> to vector<16x128xf32>
    %311 = vector.shape_cast %308 : vector<16x128xf32> to vector<1x16x128xf32>
    tpu.vector_store %arg13[%c1, %c0_60, %c0_61], %311 {strides = array<i32>} : memref<4x16x128xf32, #tpu.memory_space<vmem>>, vector<1x16x128xf32>,
    %312 = vector.extract_strided_slice %12 {offsets = [376, 0], sizes = [8, 128], strides = [1, 1]} : vector<512x128xf32> to vector<8x128xf32>
    %313 = vector.extract_strided_slice %308 {offsets = [0, 0], sizes = [1, 128], strides = [1, 1]} : vector<16x128xf32> to vector<1x128xf32>
    %314 = vector.extract_strided_slice %12 {offsets = [240, 0], sizes = [8, 128], strides = [1, 1]} : vector<512x128xf32> to vector<8x128xf32>
    %315 = vector.broadcast %313 : vector<1x128xf32> to vector<8x128xf32>
    %316 = arith.mulf %315, %314 : vector<8x128xf32>
    %317 = arith.addf %312, %316 : vector<8x128xf32>
    %318 = vector.extract_strided_slice %308 {offsets = [1, 0], sizes = [1, 128], strides = [1, 1]} : vector<16x128xf32> to vector<1x128xf32>
    %319 = vector.extract_strided_slice %12 {offsets = [248, 0], sizes = [8, 128], strides = [1, 1]} : vector<512x128xf32> to vector<8x128xf32>
    %320 = vector.broadcast %318 : vector<1x128xf32> to vector<8x128xf32>
    %321 = arith.mulf %320, %319 : vector<8x128xf32>
    %322 = arith.addf %317, %321 : vector<8x128xf32>
    %323 = vector.extract_strided_slice %308 {offsets = [2, 0], sizes = [1, 128], strides = [1, 1]} : vector<16x128xf32> to vector<1x128xf32>
    %324 = vector.extract_strided_slice %12 {offsets = [256, 0], sizes = [8, 128], strides = [1, 1]} : vector<512x128xf32> to vector<8x128xf32>
    %325 = vector.broadcast %323 : vector<1x128xf32> to vector<8x128xf32>
    %326 = arith.mulf %325, %324 : vector<8x128xf32>
    %327 = arith.addf %322, %326 : vector<8x128xf32>
    %328 = vector.extract_strided_slice %308 {offsets = [3, 0], sizes = [1, 128], strides = [1, 1]} : vector<16x128xf32> to vector<1x128xf32>
    %329 = vector.extract_strided_slice %12 {offsets = [264, 0], sizes = [8, 128], strides = [1, 1]} : vector<512x128xf32> to vector<8x128xf32>
    %330 = vector.broadcast %328 : vector<1x128xf32> to vector<8x128xf32>
    %331 = arith.mulf %330, %329 : vector<8x128xf32>
    %332 = arith.addf %327, %331 : vector<8x128xf32>
    %333 = vector.extract_strided_slice %308 {offsets = [4, 0], sizes = [1, 128], strides = [1, 1]} : vector<16x128xf32> to vector<1x128xf32>
    %334 = vector.extract_strided_slice %12 {offsets = [272, 0], sizes = [8, 128], strides = [1, 1]} : vector<512x128xf32> to vector<8x128xf32>
    %335 = vector.broadcast %333 : vector<1x128xf32> to vector<8x128xf32>
    %336 = arith.mulf %335, %334 : vector<8x128xf32>
    %337 = arith.addf %332, %336 : vector<8x128xf32>
    %338 = vector.extract_strided_slice %308 {offsets = [5, 0], sizes = [1, 128], strides = [1, 1]} : vector<16x128xf32> to vector<1x128xf32>
    %339 = vector.extract_strided_slice %12 {offsets = [280, 0], sizes = [8, 128], strides = [1, 1]} : vector<512x128xf32> to vector<8x128xf32>
    %340 = vector.broadcast %338 : vector<1x128xf32> to vector<8x128xf32>
    %341 = arith.mulf %340, %339 : vector<8x128xf32>
    %342 = arith.addf %337, %341 : vector<8x128xf32>
    %343 = vector.extract_strided_slice %308 {offsets = [6, 0], sizes = [1, 128], strides = [1, 1]} : vector<16x128xf32> to vector<1x128xf32>
    %344 = vector.extract_strided_slice %12 {offsets = [288, 0], sizes = [8, 128], strides = [1, 1]} : vector<512x128xf32> to vector<8x128xf32>
    %345 = vector.broadcast %343 : vector<1x128xf32> to vector<8x128xf32>
    %346 = arith.mulf %345, %344 : vector<8x128xf32>
    %347 = arith.addf %342, %346 : vector<8x128xf32>
    %348 = vector.extract_strided_slice %308 {offsets = [7, 0], sizes = [1, 128], strides = [1, 1]} : vector<16x128xf32> to vector<1x128xf32>
    %349 = vector.extract_strided_slice %12 {offsets = [296, 0], sizes = [8, 128], strides = [1, 1]} : vector<512x128xf32> to vector<8x128xf32>
    %350 = vector.broadcast %348 : vector<1x128xf32> to vector<8x128xf32>
    %351 = arith.mulf %350, %349 : vector<8x128xf32>
    %352 = arith.addf %347, %351 : vector<8x128xf32>
    %353 = vector.extract_strided_slice %308 {offsets = [8, 0], sizes = [1, 128], strides = [1, 1]} : vector<16x128xf32> to vector<1x128xf32>
    %354 = vector.extract_strided_slice %12 {offsets = [304, 0], sizes = [8, 128], strides = [1, 1]} : vector<512x128xf32> to vector<8x128xf32>
    %355 = vector.broadcast %353 : vector<1x128xf32> to vector<8x128xf32>
    %356 = arith.mulf %355, %354 : vector<8x128xf32>
    %357 = arith.addf %352, %356 : vector<8x128xf32>
    %358 = vector.extract_strided_slice %308 {offsets = [9, 0], sizes = [1, 128], strides = [1, 1]} : vector<16x128xf32> to vector<1x128xf32>
    %359 = vector.extract_strided_slice %12 {offsets = [312, 0], sizes = [8, 128], strides = [1, 1]} : vector<512x128xf32> to vector<8x128xf32>
    %360 = vector.broadcast %358 : vector<1x128xf32> to vector<8x128xf32>
    %361 = arith.mulf %360, %359 : vector<8x128xf32>
    %362 = arith.addf %357, %361 : vector<8x128xf32>
    %363 = vector.extract_strided_slice %308 {offsets = [10, 0], sizes = [1, 128], strides = [1, 1]} : vector<16x128xf32> to vector<1x128xf32>
    %364 = vector.extract_strided_slice %12 {offsets = [320, 0], sizes = [8, 128], strides = [1, 1]} : vector<512x128xf32> to vector<8x128xf32>
    %365 = vector.broadcast %363 : vector<1x128xf32> to vector<8x128xf32>
    %366 = arith.mulf %365, %364 : vector<8x128xf32>
    %367 = arith.addf %362, %366 : vector<8x128xf32>
    %368 = vector.extract_strided_slice %308 {offsets = [11, 0], sizes = [1, 128], strides = [1, 1]} : vector<16x128xf32> to vector<1x128xf32>
    %369 = vector.extract_strided_slice %12 {offsets = [328, 0], sizes = [8, 128], strides = [1, 1]} : vector<512x128xf32> to vector<8x128xf32>
    %370 = vector.broadcast %368 : vector<1x128xf32> to vector<8x128xf32>
    %371 = arith.mulf %370, %369 : vector<8x128xf32>
    %372 = arith.addf %367, %371 : vector<8x128xf32>
    %373 = vector.extract_strided_slice %308 {offsets = [12, 0], sizes = [1, 128], strides = [1, 1]} : vector<16x128xf32> to vector<1x128xf32>
    %374 = vector.extract_strided_slice %12 {offsets = [336, 0], sizes = [8, 128], strides = [1, 1]} : vector<512x128xf32> to vector<8x128xf32>
    %375 = vector.broadcast %373 : vector<1x128xf32> to vector<8x128xf32>
    %376 = arith.mulf %375, %374 : vector<8x128xf32>
    %377 = arith.addf %372, %376 : vector<8x128xf32>
    %378 = vector.extract_strided_slice %308 {offsets = [13, 0], sizes = [1, 128], strides = [1, 1]} : vector<16x128xf32> to vector<1x128xf32>
    %379 = vector.extract_strided_slice %12 {offsets = [344, 0], sizes = [8, 128], strides = [1, 1]} : vector<512x128xf32> to vector<8x128xf32>
    %380 = vector.broadcast %378 : vector<1x128xf32> to vector<8x128xf32>
    %381 = arith.mulf %380, %379 : vector<8x128xf32>
    %382 = arith.addf %377, %381 : vector<8x128xf32>
    %383 = vector.extract_strided_slice %308 {offsets = [14, 0], sizes = [1, 128], strides = [1, 1]} : vector<16x128xf32> to vector<1x128xf32>
    %384 = vector.extract_strided_slice %12 {offsets = [352, 0], sizes = [8, 128], strides = [1, 1]} : vector<512x128xf32> to vector<8x128xf32>
    %385 = vector.broadcast %383 : vector<1x128xf32> to vector<8x128xf32>
    %386 = arith.mulf %385, %384 : vector<8x128xf32>
    %387 = arith.addf %382, %386 : vector<8x128xf32>
    %388 = vector.extract_strided_slice %308 {offsets = [15, 0], sizes = [1, 128], strides = [1, 1]} : vector<16x128xf32> to vector<1x128xf32>
    %389 = vector.extract_strided_slice %12 {offsets = [360, 0], sizes = [8, 128], strides = [1, 1]} : vector<512x128xf32> to vector<8x128xf32>
    %390 = vector.broadcast %388 : vector<1x128xf32> to vector<8x128xf32>
    %391 = arith.mulf %390, %389 : vector<8x128xf32>
    %392 = arith.addf %387, %391 : vector<8x128xf32>
    %cst_62 = arith.constant 0.000000e+00 : f32
    %393 = vector.broadcast %cst_62 : f32 to vector<8x128xf32>
    %394 = arith.cmpf ogt, %392, %393 : vector<8x128xf32>
    %395 = math.exp %392 : vector<8x128xf32>
    %cst_63 = arith.constant 1.000000e+00 : f32
    %396 = vector.broadcast %cst_63 : f32 to vector<8x128xf32>
    %397 = arith.subf %395, %396 : vector<8x128xf32>
    %398 = arith.select %394, %392, %397 : vector<8x128xi1>, vector<8x128xf32>
    %c1_64 = arith.constant 1 : index
    %c0_65 = arith.constant 0 : index
    %c0_66 = arith.constant 0 : index
    %399 = vector.load %arg14[%c1_64, %c0_65, %c0_66] : memref<4x8x128xf32, #tpu.memory_space<vmem>>, vector<1x8x128xf32>
    %400 = vector.shape_cast %399 : vector<1x8x128xf32> to vector<8x128xf32>
    %401 = vector.shape_cast %398 : vector<8x128xf32> to vector<1x8x128xf32>
    tpu.vector_store %arg14[%c1_64, %c0_65, %c0_66], %401 {strides = array<i32>} : memref<4x8x128xf32, #tpu.memory_space<vmem>>, vector<1x8x128xf32>,
    %402 = vector.extract_strided_slice %15 {offsets = [2, 0, 0], sizes = [1, 10, 128], strides = [1, 1, 1]} : vector<4x10x128xf32> to vector<1x10x128xf32>
    %403 = vector.shape_cast %402 : vector<1x10x128xf32> to vector<10x128xf32>
    %404 = vector.extract_strided_slice %12 {offsets = [224, 0], sizes = [8, 128], strides = [1, 1]} : vector<512x128xf32> to vector<8x128xf32>
    %405 = vector.extract_strided_slice %403 {offsets = [0, 0], sizes = [1, 128], strides = [1, 1]} : vector<10x128xf32> to vector<1x128xf32>
    %406 = vector.extract_strided_slice %12 {offsets = [128, 0], sizes = [8, 128], strides = [1, 1]} : vector<512x128xf32> to vector<8x128xf32>
    %407 = vector.broadcast %405 : vector<1x128xf32> to vector<8x128xf32>
    %408 = arith.mulf %407, %406 : vector<8x128xf32>
    %409 = arith.addf %404, %408 : vector<8x128xf32>
    %410 = vector.extract_strided_slice %403 {offsets = [1, 0], sizes = [1, 128], strides = [1, 1]} : vector<10x128xf32> to vector<1x128xf32>
    %411 = vector.extract_strided_slice %12 {offsets = [136, 0], sizes = [8, 128], strides = [1, 1]} : vector<512x128xf32> to vector<8x128xf32>
    %412 = vector.broadcast %410 : vector<1x128xf32> to vector<8x128xf32>
    %413 = arith.mulf %412, %411 : vector<8x128xf32>
    %414 = arith.addf %409, %413 : vector<8x128xf32>
    %415 = vector.extract_strided_slice %403 {offsets = [2, 0], sizes = [1, 128], strides = [1, 1]} : vector<10x128xf32> to vector<1x128xf32>
    %416 = vector.extract_strided_slice %12 {offsets = [144, 0], sizes = [8, 128], strides = [1, 1]} : vector<512x128xf32> to vector<8x128xf32>
    %417 = vector.broadcast %415 : vector<1x128xf32> to vector<8x128xf32>
    %418 = arith.mulf %417, %416 : vector<8x128xf32>
    %419 = arith.addf %414, %418 : vector<8x128xf32>
    %420 = vector.extract_strided_slice %403 {offsets = [3, 0], sizes = [1, 128], strides = [1, 1]} : vector<10x128xf32> to vector<1x128xf32>
    %421 = vector.extract_strided_slice %12 {offsets = [152, 0], sizes = [8, 128], strides = [1, 1]} : vector<512x128xf32> to vector<8x128xf32>
    %422 = vector.broadcast %420 : vector<1x128xf32> to vector<8x128xf32>
    %423 = arith.mulf %422, %421 : vector<8x128xf32>
    %424 = arith.addf %419, %423 : vector<8x128xf32>
    %425 = vector.extract_strided_slice %403 {offsets = [4, 0], sizes = [1, 128], strides = [1, 1]} : vector<10x128xf32> to vector<1x128xf32>
    %426 = vector.extract_strided_slice %12 {offsets = [160, 0], sizes = [8, 128], strides = [1, 1]} : vector<512x128xf32> to vector<8x128xf32>
    %427 = vector.broadcast %425 : vector<1x128xf32> to vector<8x128xf32>
    %428 = arith.mulf %427, %426 : vector<8x128xf32>
    %429 = arith.addf %424, %428 : vector<8x128xf32>
    %430 = vector.extract_strided_slice %403 {offsets = [5, 0], sizes = [1, 128], strides = [1, 1]} : vector<10x128xf32> to vector<1x128xf32>
    %431 = vector.extract_strided_slice %12 {offsets = [168, 0], sizes = [8, 128], strides = [1, 1]} : vector<512x128xf32> to vector<8x128xf32>
    %432 = vector.broadcast %430 : vector<1x128xf32> to vector<8x128xf32>
    %433 = arith.mulf %432, %431 : vector<8x128xf32>
    %434 = arith.addf %429, %433 : vector<8x128xf32>
    %435 = vector.extract_strided_slice %403 {offsets = [6, 0], sizes = [1, 128], strides = [1, 1]} : vector<10x128xf32> to vector<1x128xf32>
    %436 = vector.extract_strided_slice %12 {offsets = [176, 0], sizes = [8, 128], strides = [1, 1]} : vector<512x128xf32> to vector<8x128xf32>
    %437 = vector.broadcast %435 : vector<1x128xf32> to vector<8x128xf32>
    %438 = arith.mulf %437, %436 : vector<8x128xf32>
    %439 = arith.addf %434, %438 : vector<8x128xf32>
    %440 = vector.extract_strided_slice %403 {offsets = [7, 0], sizes = [1, 128], strides = [1, 1]} : vector<10x128xf32> to vector<1x128xf32>
    %441 = vector.extract_strided_slice %12 {offsets = [184, 0], sizes = [8, 128], strides = [1, 1]} : vector<512x128xf32> to vector<8x128xf32>
    %442 = vector.broadcast %440 : vector<1x128xf32> to vector<8x128xf32>
    %443 = arith.mulf %442, %441 : vector<8x128xf32>
    %444 = arith.addf %439, %443 : vector<8x128xf32>
    %445 = vector.extract_strided_slice %403 {offsets = [8, 0], sizes = [1, 128], strides = [1, 1]} : vector<10x128xf32> to vector<1x128xf32>
    %446 = vector.extract_strided_slice %12 {offsets = [192, 0], sizes = [8, 128], strides = [1, 1]} : vector<512x128xf32> to vector<8x128xf32>
    %447 = vector.broadcast %445 : vector<1x128xf32> to vector<8x128xf32>
    %448 = arith.mulf %447, %446 : vector<8x128xf32>
    %449 = arith.addf %444, %448 : vector<8x128xf32>
    %450 = vector.extract_strided_slice %403 {offsets = [9, 0], sizes = [1, 128], strides = [1, 1]} : vector<10x128xf32> to vector<1x128xf32>
    %451 = vector.extract_strided_slice %12 {offsets = [200, 0], sizes = [8, 128], strides = [1, 1]} : vector<512x128xf32> to vector<8x128xf32>
    %452 = vector.broadcast %450 : vector<1x128xf32> to vector<8x128xf32>
    %453 = arith.mulf %452, %451 : vector<8x128xf32>
    %454 = arith.addf %449, %453 : vector<8x128xf32>
    %cst_67 = arith.constant 0.000000e+00 : f32
    %455 = vector.broadcast %cst_67 : f32 to vector<8x128xf32>
    %456 = arith.cmpf ogt, %454, %455 : vector<8x128xf32>
    %457 = math.exp %454 : vector<8x128xf32>
    %cst_68 = arith.constant 1.000000e+00 : f32
    %458 = vector.broadcast %cst_68 : f32 to vector<8x128xf32>
    %459 = arith.subf %457, %458 : vector<8x128xf32>
    %460 = arith.select %456, %454, %459 : vector<8x128xi1>, vector<8x128xf32>
    %461 = vector.extract_strided_slice %16 {offsets = [2, 0, 0], sizes = [1, 16, 128], strides = [1, 1, 1]} : vector<4x16x128xf32> to vector<1x16x128xf32>
    %462 = vector.shape_cast %461 : vector<1x16x128xf32> to vector<16x128xf32>
    %cst_69 = arith.constant dense<0.000000e+00> : vector<48x128xf32>
    %463 = tpu.matmul %18, %460, %cst_69 {dimension_numbers = #tpu.dot_dimension_numbers<[1], [0], [0], [1], [0, 0, 1, 1], [], []>} : vector<48x8xf32>, vector<8x128xf32>, vector<48x128xf32> -> vector<48x128xf32>
    %464 = vector.broadcast %20 : vector<48x1xf32> to vector<48x128xf32>
    %465 = arith.addf %463, %464 : vector<48x128xf32>
    %cst_70 = arith.constant dense<0.000000e+00> : vector<48x128xf32>
    %466 = tpu.matmul %19, %462, %cst_70 {dimension_numbers = #tpu.dot_dimension_numbers<[1], [0], [0], [1], [0, 0, 1, 1], [], []>} : vector<48x16xf32>, vector<16x128xf32>, vector<48x128xf32> -> vector<48x128xf32>
    %467 = vector.broadcast %21 : vector<48x1xf32> to vector<48x128xf32>
    %468 = arith.addf %466, %467 : vector<48x128xf32>
    %469 = vector.extract_strided_slice %465 {offsets = [0, 0], sizes = [16, 128], strides = [1, 1]} : vector<48x128xf32> to vector<16x128xf32>
    %470 = vector.extract_strided_slice %468 {offsets = [0, 0], sizes = [16, 128], strides = [1, 1]} : vector<48x128xf32> to vector<16x128xf32>
    %471 = arith.addf %469, %470 : vector<16x128xf32>
    %cst_71 = arith.constant 0.000000e+00 : f32
    %472 = vector.broadcast %cst_71 : f32 to vector<16x128xf32>
    %473 = arith.subf %472, %471 : vector<16x128xf32>
    %474 = math.exp %473 : vector<16x128xf32>
    %cst_72 = arith.constant 1.000000e+00 : f32
    %475 = vector.broadcast %cst_72 : f32 to vector<16x128xf32>
    %476 = arith.addf %475, %474 : vector<16x128xf32>
    %cst_73 = arith.constant 1.000000e+00 : f32
    %477 = vector.broadcast %cst_73 : f32 to vector<16x128xf32>
    %478 = arith.divf %477, %476 : vector<16x128xf32>
    %479 = vector.extract_strided_slice %465 {offsets = [16, 0], sizes = [16, 128], strides = [1, 1]} : vector<48x128xf32> to vector<16x128xf32>
    %480 = vector.extract_strided_slice %468 {offsets = [16, 0], sizes = [16, 128], strides = [1, 1]} : vector<48x128xf32> to vector<16x128xf32>
    %481 = arith.addf %479, %480 : vector<16x128xf32>
    %cst_74 = arith.constant 0.000000e+00 : f32
    %482 = vector.broadcast %cst_74 : f32 to vector<16x128xf32>
    %483 = arith.subf %482, %481 : vector<16x128xf32>
    %484 = math.exp %483 : vector<16x128xf32>
    %cst_75 = arith.constant 1.000000e+00 : f32
    %485 = vector.broadcast %cst_75 : f32 to vector<16x128xf32>
    %486 = arith.addf %485, %484 : vector<16x128xf32>
    %cst_76 = arith.constant 1.000000e+00 : f32
    %487 = vector.broadcast %cst_76 : f32 to vector<16x128xf32>
    %488 = arith.divf %487, %486 : vector<16x128xf32>
    %489 = vector.extract_strided_slice %465 {offsets = [32, 0], sizes = [16, 128], strides = [1, 1]} : vector<48x128xf32> to vector<16x128xf32>
    %490 = vector.extract_strided_slice %468 {offsets = [32, 0], sizes = [16, 128], strides = [1, 1]} : vector<48x128xf32> to vector<16x128xf32>
    %491 = arith.mulf %478, %490 : vector<16x128xf32>
    %492 = arith.addf %489, %491 : vector<16x128xf32>
    %493 = math.tanh %492 : vector<16x128xf32>
    %cst_77 = arith.constant 1.000000e+00 : f32
    %494 = vector.broadcast %cst_77 : f32 to vector<16x128xf32>
    %495 = arith.subf %494, %488 : vector<16x128xf32>
    %496 = arith.mulf %495, %493 : vector<16x128xf32>
    %497 = arith.mulf %488, %462 : vector<16x128xf32>
    %498 = arith.addf %496, %497 : vector<16x128xf32>
    %c2 = arith.constant 2 : index
    %c0_78 = arith.constant 0 : index
    %c0_79 = arith.constant 0 : index
    %499 = vector.load %arg13[%c2, %c0_78, %c0_79] : memref<4x16x128xf32, #tpu.memory_space<vmem>>, vector<1x16x128xf32>
    %500 = vector.shape_cast %499 : vector<1x16x128xf32> to vector<16x128xf32>
    %501 = vector.shape_cast %498 : vector<16x128xf32> to vector<1x16x128xf32>
    tpu.vector_store %arg13[%c2, %c0_78, %c0_79], %501 {strides = array<i32>} : memref<4x16x128xf32, #tpu.memory_space<vmem>>, vector<1x16x128xf32>,
    %502 = vector.extract_strided_slice %12 {offsets = [384, 0], sizes = [8, 128], strides = [1, 1]} : vector<512x128xf32> to vector<8x128xf32>
    %503 = vector.extract_strided_slice %498 {offsets = [0, 0], sizes = [1, 128], strides = [1, 1]} : vector<16x128xf32> to vector<1x128xf32>
    %504 = vector.extract_strided_slice %12 {offsets = [240, 0], sizes = [8, 128], strides = [1, 1]} : vector<512x128xf32> to vector<8x128xf32>
    %505 = vector.broadcast %503 : vector<1x128xf32> to vector<8x128xf32>
    %506 = arith.mulf %505, %504 : vector<8x128xf32>
    %507 = arith.addf %502, %506 : vector<8x128xf32>
    %508 = vector.extract_strided_slice %498 {offsets = [1, 0], sizes = [1, 128], strides = [1, 1]} : vector<16x128xf32> to vector<1x128xf32>
    %509 = vector.extract_strided_slice %12 {offsets = [248, 0], sizes = [8, 128], strides = [1, 1]} : vector<512x128xf32> to vector<8x128xf32>
    %510 = vector.broadcast %508 : vector<1x128xf32> to vector<8x128xf32>
    %511 = arith.mulf %510, %509 : vector<8x128xf32>
    %512 = arith.addf %507, %511 : vector<8x128xf32>
    %513 = vector.extract_strided_slice %498 {offsets = [2, 0], sizes = [1, 128], strides = [1, 1]} : vector<16x128xf32> to vector<1x128xf32>
    %514 = vector.extract_strided_slice %12 {offsets = [256, 0], sizes = [8, 128], strides = [1, 1]} : vector<512x128xf32> to vector<8x128xf32>
    %515 = vector.broadcast %513 : vector<1x128xf32> to vector<8x128xf32>
    %516 = arith.mulf %515, %514 : vector<8x128xf32>
    %517 = arith.addf %512, %516 : vector<8x128xf32>
    %518 = vector.extract_strided_slice %498 {offsets = [3, 0], sizes = [1, 128], strides = [1, 1]} : vector<16x128xf32> to vector<1x128xf32>
    %519 = vector.extract_strided_slice %12 {offsets = [264, 0], sizes = [8, 128], strides = [1, 1]} : vector<512x128xf32> to vector<8x128xf32>
    %520 = vector.broadcast %518 : vector<1x128xf32> to vector<8x128xf32>
    %521 = arith.mulf %520, %519 : vector<8x128xf32>
    %522 = arith.addf %517, %521 : vector<8x128xf32>
    %523 = vector.extract_strided_slice %498 {offsets = [4, 0], sizes = [1, 128], strides = [1, 1]} : vector<16x128xf32> to vector<1x128xf32>
    %524 = vector.extract_strided_slice %12 {offsets = [272, 0], sizes = [8, 128], strides = [1, 1]} : vector<512x128xf32> to vector<8x128xf32>
    %525 = vector.broadcast %523 : vector<1x128xf32> to vector<8x128xf32>
    %526 = arith.mulf %525, %524 : vector<8x128xf32>
    %527 = arith.addf %522, %526 : vector<8x128xf32>
    %528 = vector.extract_strided_slice %498 {offsets = [5, 0], sizes = [1, 128], strides = [1, 1]} : vector<16x128xf32> to vector<1x128xf32>
    %529 = vector.extract_strided_slice %12 {offsets = [280, 0], sizes = [8, 128], strides = [1, 1]} : vector<512x128xf32> to vector<8x128xf32>
    %530 = vector.broadcast %528 : vector<1x128xf32> to vector<8x128xf32>
    %531 = arith.mulf %530, %529 : vector<8x128xf32>
    %532 = arith.addf %527, %531 : vector<8x128xf32>
    %533 = vector.extract_strided_slice %498 {offsets = [6, 0], sizes = [1, 128], strides = [1, 1]} : vector<16x128xf32> to vector<1x128xf32>
    %534 = vector.extract_strided_slice %12 {offsets = [288, 0], sizes = [8, 128], strides = [1, 1]} : vector<512x128xf32> to vector<8x128xf32>
    %535 = vector.broadcast %533 : vector<1x128xf32> to vector<8x128xf32>
    %536 = arith.mulf %535, %534 : vector<8x128xf32>
    %537 = arith.addf %532, %536 : vector<8x128xf32>
    %538 = vector.extract_strided_slice %498 {offsets = [7, 0], sizes = [1, 128], strides = [1, 1]} : vector<16x128xf32> to vector<1x128xf32>
    %539 = vector.extract_strided_slice %12 {offsets = [296, 0], sizes = [8, 128], strides = [1, 1]} : vector<512x128xf32> to vector<8x128xf32>
    %540 = vector.broadcast %538 : vector<1x128xf32> to vector<8x128xf32>
    %541 = arith.mulf %540, %539 : vector<8x128xf32>
    %542 = arith.addf %537, %541 : vector<8x128xf32>
    %543 = vector.extract_strided_slice %498 {offsets = [8, 0], sizes = [1, 128], strides = [1, 1]} : vector<16x128xf32> to vector<1x128xf32>
    %544 = vector.extract_strided_slice %12 {offsets = [304, 0], sizes = [8, 128], strides = [1, 1]} : vector<512x128xf32> to vector<8x128xf32>
    %545 = vector.broadcast %543 : vector<1x128xf32> to vector<8x128xf32>
    %546 = arith.mulf %545, %544 : vector<8x128xf32>
    %547 = arith.addf %542, %546 : vector<8x128xf32>
    %548 = vector.extract_strided_slice %498 {offsets = [9, 0], sizes = [1, 128], strides = [1, 1]} : vector<16x128xf32> to vector<1x128xf32>
    %549 = vector.extract_strided_slice %12 {offsets = [312, 0], sizes = [8, 128], strides = [1, 1]} : vector<512x128xf32> to vector<8x128xf32>
    %550 = vector.broadcast %548 : vector<1x128xf32> to vector<8x128xf32>
    %551 = arith.mulf %550, %549 : vector<8x128xf32>
    %552 = arith.addf %547, %551 : vector<8x128xf32>
    %553 = vector.extract_strided_slice %498 {offsets = [10, 0], sizes = [1, 128], strides = [1, 1]} : vector<16x128xf32> to vector<1x128xf32>
    %554 = vector.extract_strided_slice %12 {offsets = [320, 0], sizes = [8, 128], strides = [1, 1]} : vector<512x128xf32> to vector<8x128xf32>
    %555 = vector.broadcast %553 : vector<1x128xf32> to vector<8x128xf32>
    %556 = arith.mulf %555, %554 : vector<8x128xf32>
    %557 = arith.addf %552, %556 : vector<8x128xf32>
    %558 = vector.extract_strided_slice %498 {offsets = [11, 0], sizes = [1, 128], strides = [1, 1]} : vector<16x128xf32> to vector<1x128xf32>
    %559 = vector.extract_strided_slice %12 {offsets = [328, 0], sizes = [8, 128], strides = [1, 1]} : vector<512x128xf32> to vector<8x128xf32>
    %560 = vector.broadcast %558 : vector<1x128xf32> to vector<8x128xf32>
    %561 = arith.mulf %560, %559 : vector<8x128xf32>
    %562 = arith.addf %557, %561 : vector<8x128xf32>
    %563 = vector.extract_strided_slice %498 {offsets = [12, 0], sizes = [1, 128], strides = [1, 1]} : vector<16x128xf32> to vector<1x128xf32>
    %564 = vector.extract_strided_slice %12 {offsets = [336, 0], sizes = [8, 128], strides = [1, 1]} : vector<512x128xf32> to vector<8x128xf32>
    %565 = vector.broadcast %563 : vector<1x128xf32> to vector<8x128xf32>
    %566 = arith.mulf %565, %564 : vector<8x128xf32>
    %567 = arith.addf %562, %566 : vector<8x128xf32>
    %568 = vector.extract_strided_slice %498 {offsets = [13, 0], sizes = [1, 128], strides = [1, 1]} : vector<16x128xf32> to vector<1x128xf32>
    %569 = vector.extract_strided_slice %12 {offsets = [344, 0], sizes = [8, 128], strides = [1, 1]} : vector<512x128xf32> to vector<8x128xf32>
    %570 = vector.broadcast %568 : vector<1x128xf32> to vector<8x128xf32>
    %571 = arith.mulf %570, %569 : vector<8x128xf32>
    %572 = arith.addf %567, %571 : vector<8x128xf32>
    %573 = vector.extract_strided_slice %498 {offsets = [14, 0], sizes = [1, 128], strides = [1, 1]} : vector<16x128xf32> to vector<1x128xf32>
    %574 = vector.extract_strided_slice %12 {offsets = [352, 0], sizes = [8, 128], strides = [1, 1]} : vector<512x128xf32> to vector<8x128xf32>
    %575 = vector.broadcast %573 : vector<1x128xf32> to vector<8x128xf32>
    %576 = arith.mulf %575, %574 : vector<8x128xf32>
    %577 = arith.addf %572, %576 : vector<8x128xf32>
    %578 = vector.extract_strided_slice %498 {offsets = [15, 0], sizes = [1, 128], strides = [1, 1]} : vector<16x128xf32> to vector<1x128xf32>
    %579 = vector.extract_strided_slice %12 {offsets = [360, 0], sizes = [8, 128], strides = [1, 1]} : vector<512x128xf32> to vector<8x128xf32>
    %580 = vector.broadcast %578 : vector<1x128xf32> to vector<8x128xf32>
    %581 = arith.mulf %580, %579 : vector<8x128xf32>
    %582 = arith.addf %577, %581 : vector<8x128xf32>
    %cst_80 = arith.constant 0.000000e+00 : f32
    %583 = vector.broadcast %cst_80 : f32 to vector<8x128xf32>
    %584 = arith.cmpf ogt, %582, %583 : vector<8x128xf32>
    %585 = math.exp %582 : vector<8x128xf32>
    %cst_81 = arith.constant 1.000000e+00 : f32
    %586 = vector.broadcast %cst_81 : f32 to vector<8x128xf32>
    %587 = arith.subf %585, %586 : vector<8x128xf32>
    %588 = arith.select %584, %582, %587 : vector<8x128xi1>, vector<8x128xf32>
    %c2_82 = arith.constant 2 : index
    %c0_83 = arith.constant 0 : index
    %c0_84 = arith.constant 0 : index
    %589 = vector.load %arg14[%c2_82, %c0_83, %c0_84] : memref<4x8x128xf32, #tpu.memory_space<vmem>>, vector<1x8x128xf32>
    %590 = vector.shape_cast %589 : vector<1x8x128xf32> to vector<8x128xf32>
    %591 = vector.shape_cast %588 : vector<8x128xf32> to vector<1x8x128xf32>
    tpu.vector_store %arg14[%c2_82, %c0_83, %c0_84], %591 {strides = array<i32>} : memref<4x8x128xf32, #tpu.memory_space<vmem>>, vector<1x8x128xf32>,
    %592 = vector.extract_strided_slice %15 {offsets = [3, 0, 0], sizes = [1, 10, 128], strides = [1, 1, 1]} : vector<4x10x128xf32> to vector<1x10x128xf32>
    %593 = vector.shape_cast %592 : vector<1x10x128xf32> to vector<10x128xf32>
    %594 = vector.extract_strided_slice %12 {offsets = [232, 0], sizes = [8, 128], strides = [1, 1]} : vector<512x128xf32> to vector<8x128xf32>
    %595 = vector.extract_strided_slice %593 {offsets = [0, 0], sizes = [1, 128], strides = [1, 1]} : vector<10x128xf32> to vector<1x128xf32>
    %596 = vector.extract_strided_slice %12 {offsets = [128, 0], sizes = [8, 128], strides = [1, 1]} : vector<512x128xf32> to vector<8x128xf32>
    %597 = vector.broadcast %595 : vector<1x128xf32> to vector<8x128xf32>
    %598 = arith.mulf %597, %596 : vector<8x128xf32>
    %599 = arith.addf %594, %598 : vector<8x128xf32>
    %600 = vector.extract_strided_slice %593 {offsets = [1, 0], sizes = [1, 128], strides = [1, 1]} : vector<10x128xf32> to vector<1x128xf32>
    %601 = vector.extract_strided_slice %12 {offsets = [136, 0], sizes = [8, 128], strides = [1, 1]} : vector<512x128xf32> to vector<8x128xf32>
    %602 = vector.broadcast %600 : vector<1x128xf32> to vector<8x128xf32>
    %603 = arith.mulf %602, %601 : vector<8x128xf32>
    %604 = arith.addf %599, %603 : vector<8x128xf32>
    %605 = vector.extract_strided_slice %593 {offsets = [2, 0], sizes = [1, 128], strides = [1, 1]} : vector<10x128xf32> to vector<1x128xf32>
    %606 = vector.extract_strided_slice %12 {offsets = [144, 0], sizes = [8, 128], strides = [1, 1]} : vector<512x128xf32> to vector<8x128xf32>
    %607 = vector.broadcast %605 : vector<1x128xf32> to vector<8x128xf32>
    %608 = arith.mulf %607, %606 : vector<8x128xf32>
    %609 = arith.addf %604, %608 : vector<8x128xf32>
    %610 = vector.extract_strided_slice %593 {offsets = [3, 0], sizes = [1, 128], strides = [1, 1]} : vector<10x128xf32> to vector<1x128xf32>
    %611 = vector.extract_strided_slice %12 {offsets = [152, 0], sizes = [8, 128], strides = [1, 1]} : vector<512x128xf32> to vector<8x128xf32>
    %612 = vector.broadcast %610 : vector<1x128xf32> to vector<8x128xf32>
    %613 = arith.mulf %612, %611 : vector<8x128xf32>
    %614 = arith.addf %609, %613 : vector<8x128xf32>
    %615 = vector.extract_strided_slice %593 {offsets = [4, 0], sizes = [1, 128], strides = [1, 1]} : vector<10x128xf32> to vector<1x128xf32>
    %616 = vector.extract_strided_slice %12 {offsets = [160, 0], sizes = [8, 128], strides = [1, 1]} : vector<512x128xf32> to vector<8x128xf32>
    %617 = vector.broadcast %615 : vector<1x128xf32> to vector<8x128xf32>
    %618 = arith.mulf %617, %616 : vector<8x128xf32>
    %619 = arith.addf %614, %618 : vector<8x128xf32>
    %620 = vector.extract_strided_slice %593 {offsets = [5, 0], sizes = [1, 128], strides = [1, 1]} : vector<10x128xf32> to vector<1x128xf32>
    %621 = vector.extract_strided_slice %12 {offsets = [168, 0], sizes = [8, 128], strides = [1, 1]} : vector<512x128xf32> to vector<8x128xf32>
    %622 = vector.broadcast %620 : vector<1x128xf32> to vector<8x128xf32>
    %623 = arith.mulf %622, %621 : vector<8x128xf32>
    %624 = arith.addf %619, %623 : vector<8x128xf32>
    %625 = vector.extract_strided_slice %593 {offsets = [6, 0], sizes = [1, 128], strides = [1, 1]} : vector<10x128xf32> to vector<1x128xf32>
    %626 = vector.extract_strided_slice %12 {offsets = [176, 0], sizes = [8, 128], strides = [1, 1]} : vector<512x128xf32> to vector<8x128xf32>
    %627 = vector.broadcast %625 : vector<1x128xf32> to vector<8x128xf32>
    %628 = arith.mulf %627, %626 : vector<8x128xf32>
    %629 = arith.addf %624, %628 : vector<8x128xf32>
    %630 = vector.extract_strided_slice %593 {offsets = [7, 0], sizes = [1, 128], strides = [1, 1]} : vector<10x128xf32> to vector<1x128xf32>
    %631 = vector.extract_strided_slice %12 {offsets = [184, 0], sizes = [8, 128], strides = [1, 1]} : vector<512x128xf32> to vector<8x128xf32>
    %632 = vector.broadcast %630 : vector<1x128xf32> to vector<8x128xf32>
    %633 = arith.mulf %632, %631 : vector<8x128xf32>
    %634 = arith.addf %629, %633 : vector<8x128xf32>
    %635 = vector.extract_strided_slice %593 {offsets = [8, 0], sizes = [1, 128], strides = [1, 1]} : vector<10x128xf32> to vector<1x128xf32>
    %636 = vector.extract_strided_slice %12 {offsets = [192, 0], sizes = [8, 128], strides = [1, 1]} : vector<512x128xf32> to vector<8x128xf32>
    %637 = vector.broadcast %635 : vector<1x128xf32> to vector<8x128xf32>
    %638 = arith.mulf %637, %636 : vector<8x128xf32>
    %639 = arith.addf %634, %638 : vector<8x128xf32>
    %640 = vector.extract_strided_slice %593 {offsets = [9, 0], sizes = [1, 128], strides = [1, 1]} : vector<10x128xf32> to vector<1x128xf32>
    %641 = vector.extract_strided_slice %12 {offsets = [200, 0], sizes = [8, 128], strides = [1, 1]} : vector<512x128xf32> to vector<8x128xf32>
    %642 = vector.broadcast %640 : vector<1x128xf32> to vector<8x128xf32>
    %643 = arith.mulf %642, %641 : vector<8x128xf32>
    %644 = arith.addf %639, %643 : vector<8x128xf32>
    %cst_85 = arith.constant 0.000000e+00 : f32
    %645 = vector.broadcast %cst_85 : f32 to vector<8x128xf32>
    %646 = arith.cmpf ogt, %644, %645 : vector<8x128xf32>
    %647 = math.exp %644 : vector<8x128xf32>
    %cst_86 = arith.constant 1.000000e+00 : f32
    %648 = vector.broadcast %cst_86 : f32 to vector<8x128xf32>
    %649 = arith.subf %647, %648 : vector<8x128xf32>
    %650 = arith.select %646, %644, %649 : vector<8x128xi1>, vector<8x128xf32>
    %651 = vector.extract_strided_slice %16 {offsets = [3, 0, 0], sizes = [1, 16, 128], strides = [1, 1, 1]} : vector<4x16x128xf32> to vector<1x16x128xf32>
    %652 = vector.shape_cast %651 : vector<1x16x128xf32> to vector<16x128xf32>
    %cst_87 = arith.constant dense<0.000000e+00> : vector<48x128xf32>
    %653 = tpu.matmul %18, %650, %cst_87 {dimension_numbers = #tpu.dot_dimension_numbers<[1], [0], [0], [1], [0, 0, 1, 1], [], []>} : vector<48x8xf32>, vector<8x128xf32>, vector<48x128xf32> -> vector<48x128xf32>
    %654 = vector.broadcast %20 : vector<48x1xf32> to vector<48x128xf32>
    %655 = arith.addf %653, %654 : vector<48x128xf32>
    %cst_88 = arith.constant dense<0.000000e+00> : vector<48x128xf32>
    %656 = tpu.matmul %19, %652, %cst_88 {dimension_numbers = #tpu.dot_dimension_numbers<[1], [0], [0], [1], [0, 0, 1, 1], [], []>} : vector<48x16xf32>, vector<16x128xf32>, vector<48x128xf32> -> vector<48x128xf32>
    %657 = vector.broadcast %21 : vector<48x1xf32> to vector<48x128xf32>
    %658 = arith.addf %656, %657 : vector<48x128xf32>
    %659 = vector.extract_strided_slice %655 {offsets = [0, 0], sizes = [16, 128], strides = [1, 1]} : vector<48x128xf32> to vector<16x128xf32>
    %660 = vector.extract_strided_slice %658 {offsets = [0, 0], sizes = [16, 128], strides = [1, 1]} : vector<48x128xf32> to vector<16x128xf32>
    %661 = arith.addf %659, %660 : vector<16x128xf32>
    %cst_89 = arith.constant 0.000000e+00 : f32
    %662 = vector.broadcast %cst_89 : f32 to vector<16x128xf32>
    %663 = arith.subf %662, %661 : vector<16x128xf32>
    %664 = math.exp %663 : vector<16x128xf32>
    %cst_90 = arith.constant 1.000000e+00 : f32
    %665 = vector.broadcast %cst_90 : f32 to vector<16x128xf32>
    %666 = arith.addf %665, %664 : vector<16x128xf32>
    %cst_91 = arith.constant 1.000000e+00 : f32
    %667 = vector.broadcast %cst_91 : f32 to vector<16x128xf32>
    %668 = arith.divf %667, %666 : vector<16x128xf32>
    %669 = vector.extract_strided_slice %655 {offsets = [16, 0], sizes = [16, 128], strides = [1, 1]} : vector<48x128xf32> to vector<16x128xf32>
    %670 = vector.extract_strided_slice %658 {offsets = [16, 0], sizes = [16, 128], strides = [1, 1]} : vector<48x128xf32> to vector<16x128xf32>
    %671 = arith.addf %669, %670 : vector<16x128xf32>
    %cst_92 = arith.constant 0.000000e+00 : f32
    %672 = vector.broadcast %cst_92 : f32 to vector<16x128xf32>
    %673 = arith.subf %672, %671 : vector<16x128xf32>
    %674 = math.exp %673 : vector<16x128xf32>
    %cst_93 = arith.constant 1.000000e+00 : f32
    %675 = vector.broadcast %cst_93 : f32 to vector<16x128xf32>
    %676 = arith.addf %675, %674 : vector<16x128xf32>
    %cst_94 = arith.constant 1.000000e+00 : f32
    %677 = vector.broadcast %cst_94 : f32 to vector<16x128xf32>
    %678 = arith.divf %677, %676 : vector<16x128xf32>
    %679 = vector.extract_strided_slice %655 {offsets = [32, 0], sizes = [16, 128], strides = [1, 1]} : vector<48x128xf32> to vector<16x128xf32>
    %680 = vector.extract_strided_slice %658 {offsets = [32, 0], sizes = [16, 128], strides = [1, 1]} : vector<48x128xf32> to vector<16x128xf32>
    %681 = arith.mulf %668, %680 : vector<16x128xf32>
    %682 = arith.addf %679, %681 : vector<16x128xf32>
    %683 = math.tanh %682 : vector<16x128xf32>
    %cst_95 = arith.constant 1.000000e+00 : f32
    %684 = vector.broadcast %cst_95 : f32 to vector<16x128xf32>
    %685 = arith.subf %684, %678 : vector<16x128xf32>
    %686 = arith.mulf %685, %683 : vector<16x128xf32>
    %687 = arith.mulf %678, %652 : vector<16x128xf32>
    %688 = arith.addf %686, %687 : vector<16x128xf32>
    %c3 = arith.constant 3 : index
    %c0_96 = arith.constant 0 : index
    %c0_97 = arith.constant 0 : index
    %689 = vector.load %arg13[%c3, %c0_96, %c0_97] : memref<4x16x128xf32, #tpu.memory_space<vmem>>, vector<1x16x128xf32>
    %690 = vector.shape_cast %689 : vector<1x16x128xf32> to vector<16x128xf32>
    %691 = vector.shape_cast %688 : vector<16x128xf32> to vector<1x16x128xf32>
    tpu.vector_store %arg13[%c3, %c0_96, %c0_97], %691 {strides = array<i32>} : memref<4x16x128xf32, #tpu.memory_space<vmem>>, vector<1x16x128xf32>,
    %692 = vector.extract_strided_slice %12 {offsets = [392, 0], sizes = [8, 128], strides = [1, 1]} : vector<512x128xf32> to vector<8x128xf32>
    %693 = vector.extract_strided_slice %688 {offsets = [0, 0], sizes = [1, 128], strides = [1, 1]} : vector<16x128xf32> to vector<1x128xf32>
    %694 = vector.extract_strided_slice %12 {offsets = [240, 0], sizes = [8, 128], strides = [1, 1]} : vector<512x128xf32> to vector<8x128xf32>
    %695 = vector.broadcast %693 : vector<1x128xf32> to vector<8x128xf32>
    %696 = arith.mulf %695, %694 : vector<8x128xf32>
    %697 = arith.addf %692, %696 : vector<8x128xf32>
    %698 = vector.extract_strided_slice %688 {offsets = [1, 0], sizes = [1, 128], strides = [1, 1]} : vector<16x128xf32> to vector<1x128xf32>
    %699 = vector.extract_strided_slice %12 {offsets = [248, 0], sizes = [8, 128], strides = [1, 1]} : vector<512x128xf32> to vector<8x128xf32>
    %700 = vector.broadcast %698 : vector<1x128xf32> to vector<8x128xf32>
    %701 = arith.mulf %700, %699 : vector<8x128xf32>
    %702 = arith.addf %697, %701 : vector<8x128xf32>
    %703 = vector.extract_strided_slice %688 {offsets = [2, 0], sizes = [1, 128], strides = [1, 1]} : vector<16x128xf32> to vector<1x128xf32>
    %704 = vector.extract_strided_slice %12 {offsets = [256, 0], sizes = [8, 128], strides = [1, 1]} : vector<512x128xf32> to vector<8x128xf32>
    %705 = vector.broadcast %703 : vector<1x128xf32> to vector<8x128xf32>
    %706 = arith.mulf %705, %704 : vector<8x128xf32>
    %707 = arith.addf %702, %706 : vector<8x128xf32>
    %708 = vector.extract_strided_slice %688 {offsets = [3, 0], sizes = [1, 128], strides = [1, 1]} : vector<16x128xf32> to vector<1x128xf32>
    %709 = vector.extract_strided_slice %12 {offsets = [264, 0], sizes = [8, 128], strides = [1, 1]} : vector<512x128xf32> to vector<8x128xf32>
    %710 = vector.broadcast %708 : vector<1x128xf32> to vector<8x128xf32>
    %711 = arith.mulf %710, %709 : vector<8x128xf32>
    %712 = arith.addf %707, %711 : vector<8x128xf32>
    %713 = vector.extract_strided_slice %688 {offsets = [4, 0], sizes = [1, 128], strides = [1, 1]} : vector<16x128xf32> to vector<1x128xf32>
    %714 = vector.extract_strided_slice %12 {offsets = [272, 0], sizes = [8, 128], strides = [1, 1]} : vector<512x128xf32> to vector<8x128xf32>
    %715 = vector.broadcast %713 : vector<1x128xf32> to vector<8x128xf32>
    %716 = arith.mulf %715, %714 : vector<8x128xf32>
    %717 = arith.addf %712, %716 : vector<8x128xf32>
    %718 = vector.extract_strided_slice %688 {offsets = [5, 0], sizes = [1, 128], strides = [1, 1]} : vector<16x128xf32> to vector<1x128xf32>
    %719 = vector.extract_strided_slice %12 {offsets = [280, 0], sizes = [8, 128], strides = [1, 1]} : vector<512x128xf32> to vector<8x128xf32>
    %720 = vector.broadcast %718 : vector<1x128xf32> to vector<8x128xf32>
    %721 = arith.mulf %720, %719 : vector<8x128xf32>
    %722 = arith.addf %717, %721 : vector<8x128xf32>
    %723 = vector.extract_strided_slice %688 {offsets = [6, 0], sizes = [1, 128], strides = [1, 1]} : vector<16x128xf32> to vector<1x128xf32>
    %724 = vector.extract_strided_slice %12 {offsets = [288, 0], sizes = [8, 128], strides = [1, 1]} : vector<512x128xf32> to vector<8x128xf32>
    %725 = vector.broadcast %723 : vector<1x128xf32> to vector<8x128xf32>
    %726 = arith.mulf %725, %724 : vector<8x128xf32>
    %727 = arith.addf %722, %726 : vector<8x128xf32>
    %728 = vector.extract_strided_slice %688 {offsets = [7, 0], sizes = [1, 128], strides = [1, 1]} : vector<16x128xf32> to vector<1x128xf32>
    %729 = vector.extract_strided_slice %12 {offsets = [296, 0], sizes = [8, 128], strides = [1, 1]} : vector<512x128xf32> to vector<8x128xf32>
    %730 = vector.broadcast %728 : vector<1x128xf32> to vector<8x128xf32>
    %731 = arith.mulf %730, %729 : vector<8x128xf32>
    %732 = arith.addf %727, %731 : vector<8x128xf32>
    %733 = vector.extract_strided_slice %688 {offsets = [8, 0], sizes = [1, 128], strides = [1, 1]} : vector<16x128xf32> to vector<1x128xf32>
    %734 = vector.extract_strided_slice %12 {offsets = [304, 0], sizes = [8, 128], strides = [1, 1]} : vector<512x128xf32> to vector<8x128xf32>
    %735 = vector.broadcast %733 : vector<1x128xf32> to vector<8x128xf32>
    %736 = arith.mulf %735, %734 : vector<8x128xf32>
    %737 = arith.addf %732, %736 : vector<8x128xf32>
    %738 = vector.extract_strided_slice %688 {offsets = [9, 0], sizes = [1, 128], strides = [1, 1]} : vector<16x128xf32> to vector<1x128xf32>
    %739 = vector.extract_strided_slice %12 {offsets = [312, 0], sizes = [8, 128], strides = [1, 1]} : vector<512x128xf32> to vector<8x128xf32>
    %740 = vector.broadcast %738 : vector<1x128xf32> to vector<8x128xf32>
    %741 = arith.mulf %740, %739 : vector<8x128xf32>
    %742 = arith.addf %737, %741 : vector<8x128xf32>
    %743 = vector.extract_strided_slice %688 {offsets = [10, 0], sizes = [1, 128], strides = [1, 1]} : vector<16x128xf32> to vector<1x128xf32>
    %744 = vector.extract_strided_slice %12 {offsets = [320, 0], sizes = [8, 128], strides = [1, 1]} : vector<512x128xf32> to vector<8x128xf32>
    %745 = vector.broadcast %743 : vector<1x128xf32> to vector<8x128xf32>
    %746 = arith.mulf %745, %744 : vector<8x128xf32>
    %747 = arith.addf %742, %746 : vector<8x128xf32>
    %748 = vector.extract_strided_slice %688 {offsets = [11, 0], sizes = [1, 128], strides = [1, 1]} : vector<16x128xf32> to vector<1x128xf32>
    %749 = vector.extract_strided_slice %12 {offsets = [328, 0], sizes = [8, 128], strides = [1, 1]} : vector<512x128xf32> to vector<8x128xf32>
    %750 = vector.broadcast %748 : vector<1x128xf32> to vector<8x128xf32>
    %751 = arith.mulf %750, %749 : vector<8x128xf32>
    %752 = arith.addf %747, %751 : vector<8x128xf32>
    %753 = vector.extract_strided_slice %688 {offsets = [12, 0], sizes = [1, 128], strides = [1, 1]} : vector<16x128xf32> to vector<1x128xf32>
    %754 = vector.extract_strided_slice %12 {offsets = [336, 0], sizes = [8, 128], strides = [1, 1]} : vector<512x128xf32> to vector<8x128xf32>
    %755 = vector.broadcast %753 : vector<1x128xf32> to vector<8x128xf32>
    %756 = arith.mulf %755, %754 : vector<8x128xf32>
    %757 = arith.addf %752, %756 : vector<8x128xf32>
    %758 = vector.extract_strided_slice %688 {offsets = [13, 0], sizes = [1, 128], strides = [1, 1]} : vector<16x128xf32> to vector<1x128xf32>
    %759 = vector.extract_strided_slice %12 {offsets = [344, 0], sizes = [8, 128], strides = [1, 1]} : vector<512x128xf32> to vector<8x128xf32>
    %760 = vector.broadcast %758 : vector<1x128xf32> to vector<8x128xf32>
    %761 = arith.mulf %760, %759 : vector<8x128xf32>
    %762 = arith.addf %757, %761 : vector<8x128xf32>
    %763 = vector.extract_strided_slice %688 {offsets = [14, 0], sizes = [1, 128], strides = [1, 1]} : vector<16x128xf32> to vector<1x128xf32>
    %764 = vector.extract_strided_slice %12 {offsets = [352, 0], sizes = [8, 128], strides = [1, 1]} : vector<512x128xf32> to vector<8x128xf32>
    %765 = vector.broadcast %763 : vector<1x128xf32> to vector<8x128xf32>
    %766 = arith.mulf %765, %764 : vector<8x128xf32>
    %767 = arith.addf %762, %766 : vector<8x128xf32>
    %768 = vector.extract_strided_slice %688 {offsets = [15, 0], sizes = [1, 128], strides = [1, 1]} : vector<16x128xf32> to vector<1x128xf32>
    %769 = vector.extract_strided_slice %12 {offsets = [360, 0], sizes = [8, 128], strides = [1, 1]} : vector<512x128xf32> to vector<8x128xf32>
    %770 = vector.broadcast %768 : vector<1x128xf32> to vector<8x128xf32>
    %771 = arith.mulf %770, %769 : vector<8x128xf32>
    %772 = arith.addf %767, %771 : vector<8x128xf32>
    %cst_98 = arith.constant 0.000000e+00 : f32
    %773 = vector.broadcast %cst_98 : f32 to vector<8x128xf32>
    %774 = arith.cmpf ogt, %772, %773 : vector<8x128xf32>
    %775 = math.exp %772 : vector<8x128xf32>
    %cst_99 = arith.constant 1.000000e+00 : f32
    %776 = vector.broadcast %cst_99 : f32 to vector<8x128xf32>
    %777 = arith.subf %775, %776 : vector<8x128xf32>
    %778 = arith.select %774, %772, %777 : vector<8x128xi1>, vector<8x128xf32>
    %c3_100 = arith.constant 3 : index
    %c0_101 = arith.constant 0 : index
    %c0_102 = arith.constant 0 : index
    %779 = vector.load %arg14[%c3_100, %c0_101, %c0_102] : memref<4x8x128xf32, #tpu.memory_space<vmem>>, vector<1x8x128xf32>
    %780 = vector.shape_cast %779 : vector<1x8x128xf32> to vector<8x128xf32>
    %781 = vector.shape_cast %778 : vector<8x128xf32> to vector<1x8x128xf32>
    tpu.vector_store %arg14[%c3_100, %c0_101, %c0_102], %781 {strides = array<i32>} : memref<4x8x128xf32, #tpu.memory_space<vmem>>, vector<1x8x128xf32>,
    %782 = vector.extract_strided_slice %17 {offsets = [0, 0, 0], sizes = [1, 4, 128], strides = [1, 1, 1]} : vector<2x4x128xf32> to vector<1x4x128xf32>
    %783 = vector.shape_cast %782 : vector<1x4x128xf32> to vector<4x128xf32>
    %784 = vector.extract_strided_slice %783 {offsets = [0, 0], sizes = [1, 128], strides = [1, 1]} : vector<4x128xf32> to vector<1x128xf32>
    %785 = vector.broadcast %784 : vector<1x128xf32> to vector<8x128xf32>
    %786 = arith.mulf %208, %785 : vector<8x128xf32>
    %787 = vector.extract_strided_slice %17 {offsets = [0, 0, 0], sizes = [1, 4, 128], strides = [1, 1, 1]} : vector<2x4x128xf32> to vector<1x4x128xf32>
    %788 = vector.shape_cast %787 : vector<1x4x128xf32> to vector<4x128xf32>
    %789 = vector.extract_strided_slice %788 {offsets = [1, 0], sizes = [1, 128], strides = [1, 1]} : vector<4x128xf32> to vector<1x128xf32>
    %790 = vector.broadcast %789 : vector<1x128xf32> to vector<8x128xf32>
    %791 = arith.mulf %398, %790 : vector<8x128xf32>
    %792 = vector.extract_strided_slice %17 {offsets = [0, 0, 0], sizes = [1, 4, 128], strides = [1, 1, 1]} : vector<2x4x128xf32> to vector<1x4x128xf32>
    %793 = vector.shape_cast %792 : vector<1x4x128xf32> to vector<4x128xf32>
    %794 = vector.extract_strided_slice %793 {offsets = [2, 0], sizes = [1, 128], strides = [1, 1]} : vector<4x128xf32> to vector<1x128xf32>
    %795 = vector.broadcast %794 : vector<1x128xf32> to vector<8x128xf32>
    %796 = arith.mulf %588, %795 : vector<8x128xf32>
    %797 = vector.extract_strided_slice %17 {offsets = [0, 0, 0], sizes = [1, 4, 128], strides = [1, 1, 1]} : vector<2x4x128xf32> to vector<1x4x128xf32>
    %798 = vector.shape_cast %797 : vector<1x4x128xf32> to vector<4x128xf32>
    %799 = vector.extract_strided_slice %798 {offsets = [3, 0], sizes = [1, 128], strides = [1, 1]} : vector<4x128xf32> to vector<1x128xf32>
    %800 = vector.broadcast %799 : vector<1x128xf32> to vector<8x128xf32>
    %801 = arith.mulf %778, %800 : vector<8x128xf32>
    %802 = vector.extract_strided_slice %17 {offsets = [1, 0, 0], sizes = [1, 4, 128], strides = [1, 1, 1]} : vector<2x4x128xf32> to vector<1x4x128xf32>
    %803 = vector.shape_cast %802 : vector<1x4x128xf32> to vector<4x128xf32>
    %804 = vector.extract_strided_slice %803 {offsets = [0, 0], sizes = [1, 128], strides = [1, 1]} : vector<4x128xf32> to vector<1x128xf32>
    %805 = vector.broadcast %804 : vector<1x128xf32> to vector<8x128xf32>
    %806 = arith.mulf %208, %805 : vector<8x128xf32>
    %807 = vector.extract_strided_slice %17 {offsets = [1, 0, 0], sizes = [1, 4, 128], strides = [1, 1, 1]} : vector<2x4x128xf32> to vector<1x4x128xf32>
    %808 = vector.shape_cast %807 : vector<1x4x128xf32> to vector<4x128xf32>
    %809 = vector.extract_strided_slice %808 {offsets = [1, 0], sizes = [1, 128], strides = [1, 1]} : vector<4x128xf32> to vector<1x128xf32>
    %810 = vector.broadcast %809 : vector<1x128xf32> to vector<8x128xf32>
    %811 = arith.mulf %398, %810 : vector<8x128xf32>
    %812 = vector.extract_strided_slice %17 {offsets = [1, 0, 0], sizes = [1, 4, 128], strides = [1, 1, 1]} : vector<2x4x128xf32> to vector<1x4x128xf32>
    %813 = vector.shape_cast %812 : vector<1x4x128xf32> to vector<4x128xf32>
    %814 = vector.extract_strided_slice %813 {offsets = [2, 0], sizes = [1, 128], strides = [1, 1]} : vector<4x128xf32> to vector<1x128xf32>
    %815 = vector.broadcast %814 : vector<1x128xf32> to vector<8x128xf32>
    %816 = arith.mulf %588, %815 : vector<8x128xf32>
    %817 = vector.extract_strided_slice %17 {offsets = [1, 0, 0], sizes = [1, 4, 128], strides = [1, 1, 1]} : vector<2x4x128xf32> to vector<1x4x128xf32>
    %818 = vector.shape_cast %817 : vector<1x4x128xf32> to vector<4x128xf32>
    %819 = vector.extract_strided_slice %818 {offsets = [3, 0], sizes = [1, 128], strides = [1, 1]} : vector<4x128xf32> to vector<1x128xf32>
    %820 = vector.broadcast %819 : vector<1x128xf32> to vector<8x128xf32>
    %821 = arith.mulf %778, %820 : vector<8x128xf32>
    %822 = arith.mulf %786, %786 : vector<8x128xf32>
    %cst_103 = arith.constant dense<0.000000e+00> : vector<128xf32>
    %823 = vector.multi_reduction <add>, %822, %cst_103 [0] : vector<8x128xf32> to vector<128xf32>
    %824 = vector.shape_cast %823 : vector<128xf32> to vector<1x128xf32>
    %825 = arith.mulf %791, %791 : vector<8x128xf32>
    %cst_104 = arith.constant dense<0.000000e+00> : vector<128xf32>
    %826 = vector.multi_reduction <add>, %825, %cst_104 [0] : vector<8x128xf32> to vector<128xf32>
    %827 = vector.shape_cast %826 : vector<128xf32> to vector<1x128xf32>
    %828 = arith.mulf %796, %796 : vector<8x128xf32>
    %cst_105 = arith.constant dense<0.000000e+00> : vector<128xf32>
    %829 = vector.multi_reduction <add>, %828, %cst_105 [0] : vector<8x128xf32> to vector<128xf32>
    %830 = vector.shape_cast %829 : vector<128xf32> to vector<1x128xf32>
    %831 = arith.mulf %801, %801 : vector<8x128xf32>
    %cst_106 = arith.constant dense<0.000000e+00> : vector<128xf32>
    %832 = vector.multi_reduction <add>, %831, %cst_106 [0] : vector<8x128xf32> to vector<128xf32>
    %833 = vector.shape_cast %832 : vector<128xf32> to vector<1x128xf32>
    %834 = arith.mulf %806, %806 : vector<8x128xf32>
    %cst_107 = arith.constant dense<0.000000e+00> : vector<128xf32>
    %835 = vector.multi_reduction <add>, %834, %cst_107 [0] : vector<8x128xf32> to vector<128xf32>
    %836 = vector.shape_cast %835 : vector<128xf32> to vector<1x128xf32>
    %837 = arith.mulf %811, %811 : vector<8x128xf32>
    %cst_108 = arith.constant dense<0.000000e+00> : vector<128xf32>
    %838 = vector.multi_reduction <add>, %837, %cst_108 [0] : vector<8x128xf32> to vector<128xf32>
    %839 = vector.shape_cast %838 : vector<128xf32> to vector<1x128xf32>
    %840 = arith.mulf %816, %816 : vector<8x128xf32>
    %cst_109 = arith.constant dense<0.000000e+00> : vector<128xf32>
    %841 = vector.multi_reduction <add>, %840, %cst_109 [0] : vector<8x128xf32> to vector<128xf32>
    %842 = vector.shape_cast %841 : vector<128xf32> to vector<1x128xf32>
    %843 = arith.mulf %821, %821 : vector<8x128xf32>
    %cst_110 = arith.constant dense<0.000000e+00> : vector<128xf32>
    %844 = vector.multi_reduction <add>, %843, %cst_110 [0] : vector<8x128xf32> to vector<128xf32>
    %845 = vector.shape_cast %844 : vector<128xf32> to vector<1x128xf32>
    %cst_111 = arith.constant 0.000000e+00 : f32
    %846 = vector.broadcast %cst_111 : f32 to vector<1x128xf32>
    %cst_112 = arith.constant 0.000000e+00 : f32
    %847 = vector.broadcast %cst_112 : f32 to vector<1x128xf32>
    %848 = arith.mulf %786, %786 : vector<8x128xf32>
    %cst_113 = arith.constant dense<0.000000e+00> : vector<128xf32>
    %849 = vector.multi_reduction <add>, %848, %cst_113 [0] : vector<8x128xf32> to vector<128xf32>
    %850 = vector.shape_cast %849 : vector<128xf32> to vector<1x128xf32>
    %851 = arith.mulf %824, %824 : vector<1x128xf32>
    %cst_114 = arith.constant 1.000000e-16 : f32
    %852 = vector.broadcast %cst_114 : f32 to vector<1x128xf32>
    %853 = arith.maximumf %851, %852 : vector<1x128xf32>
    %854 = math.rsqrt %853 : vector<1x128xf32>
    %855 = arith.mulf %850, %854 : vector<1x128xf32>
    %856 = arith.addf %846, %855 : vector<1x128xf32>
    %cst_115 = arith.constant 0.000000e+00 : f32
    %857 = vector.broadcast %cst_115 : f32 to vector<1x128xf32>
    %858 = arith.cmpf one, %855, %857 : vector<1x128xf32>
    %859 = arith.extui %858 : vector<1x128xi1> to vector<1x128xi32>
    %860 = arith.sitofp %859 : vector<1x128xi32> to vector<1x128xf32>
    %861 = arith.addf %847, %860 : vector<1x128xf32>
    %862 = arith.mulf %786, %791 : vector<8x128xf32>
    %cst_116 = arith.constant dense<0.000000e+00> : vector<128xf32>
    %863 = vector.multi_reduction <add>, %862, %cst_116 [0] : vector<8x128xf32> to vector<128xf32>
    %864 = vector.shape_cast %863 : vector<128xf32> to vector<1x128xf32>
    %865 = arith.mulf %824, %827 : vector<1x128xf32>
    %cst_117 = arith.constant 1.000000e-16 : f32
    %866 = vector.broadcast %cst_117 : f32 to vector<1x128xf32>
    %867 = arith.maximumf %865, %866 : vector<1x128xf32>
    %868 = math.rsqrt %867 : vector<1x128xf32>
    %869 = arith.mulf %864, %868 : vector<1x128xf32>
    %870 = arith.addf %856, %869 : vector<1x128xf32>
    %cst_118 = arith.constant 0.000000e+00 : f32
    %871 = vector.broadcast %cst_118 : f32 to vector<1x128xf32>
    %872 = arith.cmpf one, %869, %871 : vector<1x128xf32>
    %873 = arith.extui %872 : vector<1x128xi1> to vector<1x128xi32>
    %874 = arith.sitofp %873 : vector<1x128xi32> to vector<1x128xf32>
    %875 = arith.addf %861, %874 : vector<1x128xf32>
    %876 = arith.mulf %786, %796 : vector<8x128xf32>
    %cst_119 = arith.constant dense<0.000000e+00> : vector<128xf32>
    %877 = vector.multi_reduction <add>, %876, %cst_119 [0] : vector<8x128xf32> to vector<128xf32>
    %878 = vector.shape_cast %877 : vector<128xf32> to vector<1x128xf32>
    %879 = arith.mulf %824, %830 : vector<1x128xf32>
    %cst_120 = arith.constant 1.000000e-16 : f32
    %880 = vector.broadcast %cst_120 : f32 to vector<1x128xf32>
    %881 = arith.maximumf %879, %880 : vector<1x128xf32>
    %882 = math.rsqrt %881 : vector<1x128xf32>
    %883 = arith.mulf %878, %882 : vector<1x128xf32>
    %884 = arith.addf %870, %883 : vector<1x128xf32>
    %cst_121 = arith.constant 0.000000e+00 : f32
    %885 = vector.broadcast %cst_121 : f32 to vector<1x128xf32>
    %886 = arith.cmpf one, %883, %885 : vector<1x128xf32>
    %887 = arith.extui %886 : vector<1x128xi1> to vector<1x128xi32>
    %888 = arith.sitofp %887 : vector<1x128xi32> to vector<1x128xf32>
    %889 = arith.addf %875, %888 : vector<1x128xf32>
    %890 = arith.mulf %786, %801 : vector<8x128xf32>
    %cst_122 = arith.constant dense<0.000000e+00> : vector<128xf32>
    %891 = vector.multi_reduction <add>, %890, %cst_122 [0] : vector<8x128xf32> to vector<128xf32>
    %892 = vector.shape_cast %891 : vector<128xf32> to vector<1x128xf32>
    %893 = arith.mulf %824, %833 : vector<1x128xf32>
    %cst_123 = arith.constant 1.000000e-16 : f32
    %894 = vector.broadcast %cst_123 : f32 to vector<1x128xf32>
    %895 = arith.maximumf %893, %894 : vector<1x128xf32>
    %896 = math.rsqrt %895 : vector<1x128xf32>
    %897 = arith.mulf %892, %896 : vector<1x128xf32>
    %898 = arith.addf %884, %897 : vector<1x128xf32>
    %cst_124 = arith.constant 0.000000e+00 : f32
    %899 = vector.broadcast %cst_124 : f32 to vector<1x128xf32>
    %900 = arith.cmpf one, %897, %899 : vector<1x128xf32>
    %901 = arith.extui %900 : vector<1x128xi1> to vector<1x128xi32>
    %902 = arith.sitofp %901 : vector<1x128xi32> to vector<1x128xf32>
    %903 = arith.addf %889, %902 : vector<1x128xf32>
    %904 = arith.mulf %791, %786 : vector<8x128xf32>
    %cst_125 = arith.constant dense<0.000000e+00> : vector<128xf32>
    %905 = vector.multi_reduction <add>, %904, %cst_125 [0] : vector<8x128xf32> to vector<128xf32>
    %906 = vector.shape_cast %905 : vector<128xf32> to vector<1x128xf32>
    %907 = arith.mulf %827, %824 : vector<1x128xf32>
    %cst_126 = arith.constant 1.000000e-16 : f32
    %908 = vector.broadcast %cst_126 : f32 to vector<1x128xf32>
    %909 = arith.maximumf %907, %908 : vector<1x128xf32>
    %910 = math.rsqrt %909 : vector<1x128xf32>
    %911 = arith.mulf %906, %910 : vector<1x128xf32>
    %912 = arith.addf %898, %911 : vector<1x128xf32>
    %cst_127 = arith.constant 0.000000e+00 : f32
    %913 = vector.broadcast %cst_127 : f32 to vector<1x128xf32>
    %914 = arith.cmpf one, %911, %913 : vector<1x128xf32>
    %915 = arith.extui %914 : vector<1x128xi1> to vector<1x128xi32>
    %916 = arith.sitofp %915 : vector<1x128xi32> to vector<1x128xf32>
    %917 = arith.addf %903, %916 : vector<1x128xf32>
    %918 = arith.mulf %791, %791 : vector<8x128xf32>
    %cst_128 = arith.constant dense<0.000000e+00> : vector<128xf32>
    %919 = vector.multi_reduction <add>, %918, %cst_128 [0] : vector<8x128xf32> to vector<128xf32>
    %920 = vector.shape_cast %919 : vector<128xf32> to vector<1x128xf32>
    %921 = arith.mulf %827, %827 : vector<1x128xf32>
    %cst_129 = arith.constant 1.000000e-16 : f32
    %922 = vector.broadcast %cst_129 : f32 to vector<1x128xf32>
    %923 = arith.maximumf %921, %922 : vector<1x128xf32>
    %924 = math.rsqrt %923 : vector<1x128xf32>
    %925 = arith.mulf %920, %924 : vector<1x128xf32>
    %926 = arith.addf %912, %925 : vector<1x128xf32>
    %cst_130 = arith.constant 0.000000e+00 : f32
    %927 = vector.broadcast %cst_130 : f32 to vector<1x128xf32>
    %928 = arith.cmpf one, %925, %927 : vector<1x128xf32>
    %929 = arith.extui %928 : vector<1x128xi1> to vector<1x128xi32>
    %930 = arith.sitofp %929 : vector<1x128xi32> to vector<1x128xf32>
    %931 = arith.addf %917, %930 : vector<1x128xf32>
    %932 = arith.mulf %791, %796 : vector<8x128xf32>
    %cst_131 = arith.constant dense<0.000000e+00> : vector<128xf32>
    %933 = vector.multi_reduction <add>, %932, %cst_131 [0] : vector<8x128xf32> to vector<128xf32>
    %934 = vector.shape_cast %933 : vector<128xf32> to vector<1x128xf32>
    %935 = arith.mulf %827, %830 : vector<1x128xf32>
    %cst_132 = arith.constant 1.000000e-16 : f32
    %936 = vector.broadcast %cst_132 : f32 to vector<1x128xf32>
    %937 = arith.maximumf %935, %936 : vector<1x128xf32>
    %938 = math.rsqrt %937 : vector<1x128xf32>
    %939 = arith.mulf %934, %938 : vector<1x128xf32>
    %940 = arith.addf %926, %939 : vector<1x128xf32>
    %cst_133 = arith.constant 0.000000e+00 : f32
    %941 = vector.broadcast %cst_133 : f32 to vector<1x128xf32>
    %942 = arith.cmpf one, %939, %941 : vector<1x128xf32>
    %943 = arith.extui %942 : vector<1x128xi1> to vector<1x128xi32>
    %944 = arith.sitofp %943 : vector<1x128xi32> to vector<1x128xf32>
    %945 = arith.addf %931, %944 : vector<1x128xf32>
    %946 = arith.mulf %791, %801 : vector<8x128xf32>
    %cst_134 = arith.constant dense<0.000000e+00> : vector<128xf32>
    %947 = vector.multi_reduction <add>, %946, %cst_134 [0] : vector<8x128xf32> to vector<128xf32>
    %948 = vector.shape_cast %947 : vector<128xf32> to vector<1x128xf32>
    %949 = arith.mulf %827, %833 : vector<1x128xf32>
    %cst_135 = arith.constant 1.000000e-16 : f32
    %950 = vector.broadcast %cst_135 : f32 to vector<1x128xf32>
    %951 = arith.maximumf %949, %950 : vector<1x128xf32>
    %952 = math.rsqrt %951 : vector<1x128xf32>
    %953 = arith.mulf %948, %952 : vector<1x128xf32>
    %954 = arith.addf %940, %953 : vector<1x128xf32>
    %cst_136 = arith.constant 0.000000e+00 : f32
    %955 = vector.broadcast %cst_136 : f32 to vector<1x128xf32>
    %956 = arith.cmpf one, %953, %955 : vector<1x128xf32>
    %957 = arith.extui %956 : vector<1x128xi1> to vector<1x128xi32>
    %958 = arith.sitofp %957 : vector<1x128xi32> to vector<1x128xf32>
    %959 = arith.addf %945, %958 : vector<1x128xf32>
    %960 = arith.mulf %796, %786 : vector<8x128xf32>
    %cst_137 = arith.constant dense<0.000000e+00> : vector<128xf32>
    %961 = vector.multi_reduction <add>, %960, %cst_137 [0] : vector<8x128xf32> to vector<128xf32>
    %962 = vector.shape_cast %961 : vector<128xf32> to vector<1x128xf32>
    %963 = arith.mulf %830, %824 : vector<1x128xf32>
    %cst_138 = arith.constant 1.000000e-16 : f32
    %964 = vector.broadcast %cst_138 : f32 to vector<1x128xf32>
    %965 = arith.maximumf %963, %964 : vector<1x128xf32>
    %966 = math.rsqrt %965 : vector<1x128xf32>
    %967 = arith.mulf %962, %966 : vector<1x128xf32>
    %968 = arith.addf %954, %967 : vector<1x128xf32>
    %cst_139 = arith.constant 0.000000e+00 : f32
    %969 = vector.broadcast %cst_139 : f32 to vector<1x128xf32>
    %970 = arith.cmpf one, %967, %969 : vector<1x128xf32>
    %971 = arith.extui %970 : vector<1x128xi1> to vector<1x128xi32>
    %972 = arith.sitofp %971 : vector<1x128xi32> to vector<1x128xf32>
    %973 = arith.addf %959, %972 : vector<1x128xf32>
    %974 = arith.mulf %796, %791 : vector<8x128xf32>
    %cst_140 = arith.constant dense<0.000000e+00> : vector<128xf32>
    %975 = vector.multi_reduction <add>, %974, %cst_140 [0] : vector<8x128xf32> to vector<128xf32>
    %976 = vector.shape_cast %975 : vector<128xf32> to vector<1x128xf32>
    %977 = arith.mulf %830, %827 : vector<1x128xf32>
    %cst_141 = arith.constant 1.000000e-16 : f32
    %978 = vector.broadcast %cst_141 : f32 to vector<1x128xf32>
    %979 = arith.maximumf %977, %978 : vector<1x128xf32>
    %980 = math.rsqrt %979 : vector<1x128xf32>
    %981 = arith.mulf %976, %980 : vector<1x128xf32>
    %982 = arith.addf %968, %981 : vector<1x128xf32>
    %cst_142 = arith.constant 0.000000e+00 : f32
    %983 = vector.broadcast %cst_142 : f32 to vector<1x128xf32>
    %984 = arith.cmpf one, %981, %983 : vector<1x128xf32>
    %985 = arith.extui %984 : vector<1x128xi1> to vector<1x128xi32>
    %986 = arith.sitofp %985 : vector<1x128xi32> to vector<1x128xf32>
    %987 = arith.addf %973, %986 : vector<1x128xf32>
    %988 = arith.mulf %796, %796 : vector<8x128xf32>
    %cst_143 = arith.constant dense<0.000000e+00> : vector<128xf32>
    %989 = vector.multi_reduction <add>, %988, %cst_143 [0] : vector<8x128xf32> to vector<128xf32>
    %990 = vector.shape_cast %989 : vector<128xf32> to vector<1x128xf32>
    %991 = arith.mulf %830, %830 : vector<1x128xf32>
    %cst_144 = arith.constant 1.000000e-16 : f32
    %992 = vector.broadcast %cst_144 : f32 to vector<1x128xf32>
    %993 = arith.maximumf %991, %992 : vector<1x128xf32>
    %994 = math.rsqrt %993 : vector<1x128xf32>
    %995 = arith.mulf %990, %994 : vector<1x128xf32>
    %996 = arith.addf %982, %995 : vector<1x128xf32>
    %cst_145 = arith.constant 0.000000e+00 : f32
    %997 = vector.broadcast %cst_145 : f32 to vector<1x128xf32>
    %998 = arith.cmpf one, %995, %997 : vector<1x128xf32>
    %999 = arith.extui %998 : vector<1x128xi1> to vector<1x128xi32>
    %1000 = arith.sitofp %999 : vector<1x128xi32> to vector<1x128xf32>
    %1001 = arith.addf %987, %1000 : vector<1x128xf32>
    %1002 = arith.mulf %796, %801 : vector<8x128xf32>
    %cst_146 = arith.constant dense<0.000000e+00> : vector<128xf32>
    %1003 = vector.multi_reduction <add>, %1002, %cst_146 [0] : vector<8x128xf32> to vector<128xf32>
    %1004 = vector.shape_cast %1003 : vector<128xf32> to vector<1x128xf32>
    %1005 = arith.mulf %830, %833 : vector<1x128xf32>
    %cst_147 = arith.constant 1.000000e-16 : f32
    %1006 = vector.broadcast %cst_147 : f32 to vector<1x128xf32>
    %1007 = arith.maximumf %1005, %1006 : vector<1x128xf32>
    %1008 = math.rsqrt %1007 : vector<1x128xf32>
    %1009 = arith.mulf %1004, %1008 : vector<1x128xf32>
    %1010 = arith.addf %996, %1009 : vector<1x128xf32>
    %cst_148 = arith.constant 0.000000e+00 : f32
    %1011 = vector.broadcast %cst_148 : f32 to vector<1x128xf32>
    %1012 = arith.cmpf one, %1009, %1011 : vector<1x128xf32>
    %1013 = arith.extui %1012 : vector<1x128xi1> to vector<1x128xi32>
    %1014 = arith.sitofp %1013 : vector<1x128xi32> to vector<1x128xf32>
    %1015 = arith.addf %1001, %1014 : vector<1x128xf32>
    %1016 = arith.mulf %801, %786 : vector<8x128xf32>
    %cst_149 = arith.constant dense<0.000000e+00> : vector<128xf32>
    %1017 = vector.multi_reduction <add>, %1016, %cst_149 [0] : vector<8x128xf32> to vector<128xf32>
    %1018 = vector.shape_cast %1017 : vector<128xf32> to vector<1x128xf32>
    %1019 = arith.mulf %833, %824 : vector<1x128xf32>
    %cst_150 = arith.constant 1.000000e-16 : f32
    %1020 = vector.broadcast %cst_150 : f32 to vector<1x128xf32>
    %1021 = arith.maximumf %1019, %1020 : vector<1x128xf32>
    %1022 = math.rsqrt %1021 : vector<1x128xf32>
    %1023 = arith.mulf %1018, %1022 : vector<1x128xf32>
    %1024 = arith.addf %1010, %1023 : vector<1x128xf32>
    %cst_151 = arith.constant 0.000000e+00 : f32
    %1025 = vector.broadcast %cst_151 : f32 to vector<1x128xf32>
    %1026 = arith.cmpf one, %1023, %1025 : vector<1x128xf32>
    %1027 = arith.extui %1026 : vector<1x128xi1> to vector<1x128xi32>
    %1028 = arith.sitofp %1027 : vector<1x128xi32> to vector<1x128xf32>
    %1029 = arith.addf %1015, %1028 : vector<1x128xf32>
    %1030 = arith.mulf %801, %791 : vector<8x128xf32>
    %cst_152 = arith.constant dense<0.000000e+00> : vector<128xf32>
    %1031 = vector.multi_reduction <add>, %1030, %cst_152 [0] : vector<8x128xf32> to vector<128xf32>
    %1032 = vector.shape_cast %1031 : vector<128xf32> to vector<1x128xf32>
    %1033 = arith.mulf %833, %827 : vector<1x128xf32>
    %cst_153 = arith.constant 1.000000e-16 : f32
    %1034 = vector.broadcast %cst_153 : f32 to vector<1x128xf32>
    %1035 = arith.maximumf %1033, %1034 : vector<1x128xf32>
    %1036 = math.rsqrt %1035 : vector<1x128xf32>
    %1037 = arith.mulf %1032, %1036 : vector<1x128xf32>
    %1038 = arith.addf %1024, %1037 : vector<1x128xf32>
    %cst_154 = arith.constant 0.000000e+00 : f32
    %1039 = vector.broadcast %cst_154 : f32 to vector<1x128xf32>
    %1040 = arith.cmpf one, %1037, %1039 : vector<1x128xf32>
    %1041 = arith.extui %1040 : vector<1x128xi1> to vector<1x128xi32>
    %1042 = arith.sitofp %1041 : vector<1x128xi32> to vector<1x128xf32>
    %1043 = arith.addf %1029, %1042 : vector<1x128xf32>
    %1044 = arith.mulf %801, %796 : vector<8x128xf32>
    %cst_155 = arith.constant dense<0.000000e+00> : vector<128xf32>
    %1045 = vector.multi_reduction <add>, %1044, %cst_155 [0] : vector<8x128xf32> to vector<128xf32>
    %1046 = vector.shape_cast %1045 : vector<128xf32> to vector<1x128xf32>
    %1047 = arith.mulf %833, %830 : vector<1x128xf32>
    %cst_156 = arith.constant 1.000000e-16 : f32
    %1048 = vector.broadcast %cst_156 : f32 to vector<1x128xf32>
    %1049 = arith.maximumf %1047, %1048 : vector<1x128xf32>
    %1050 = math.rsqrt %1049 : vector<1x128xf32>
    %1051 = arith.mulf %1046, %1050 : vector<1x128xf32>
    %1052 = arith.addf %1038, %1051 : vector<1x128xf32>
    %cst_157 = arith.constant 0.000000e+00 : f32
    %1053 = vector.broadcast %cst_157 : f32 to vector<1x128xf32>
    %1054 = arith.cmpf one, %1051, %1053 : vector<1x128xf32>
    %1055 = arith.extui %1054 : vector<1x128xi1> to vector<1x128xi32>
    %1056 = arith.sitofp %1055 : vector<1x128xi32> to vector<1x128xf32>
    %1057 = arith.addf %1043, %1056 : vector<1x128xf32>
    %1058 = arith.mulf %801, %801 : vector<8x128xf32>
    %cst_158 = arith.constant dense<0.000000e+00> : vector<128xf32>
    %1059 = vector.multi_reduction <add>, %1058, %cst_158 [0] : vector<8x128xf32> to vector<128xf32>
    %1060 = vector.shape_cast %1059 : vector<128xf32> to vector<1x128xf32>
    %1061 = arith.mulf %833, %833 : vector<1x128xf32>
    %cst_159 = arith.constant 1.000000e-16 : f32
    %1062 = vector.broadcast %cst_159 : f32 to vector<1x128xf32>
    %1063 = arith.maximumf %1061, %1062 : vector<1x128xf32>
    %1064 = math.rsqrt %1063 : vector<1x128xf32>
    %1065 = arith.mulf %1060, %1064 : vector<1x128xf32>
    %1066 = arith.addf %1052, %1065 : vector<1x128xf32>
    %cst_160 = arith.constant 0.000000e+00 : f32
    %1067 = vector.broadcast %cst_160 : f32 to vector<1x128xf32>
    %1068 = arith.cmpf one, %1065, %1067 : vector<1x128xf32>
    %1069 = arith.extui %1068 : vector<1x128xi1> to vector<1x128xi32>
    %1070 = arith.sitofp %1069 : vector<1x128xi32> to vector<1x128xf32>
    %1071 = arith.addf %1057, %1070 : vector<1x128xf32>
    %cst_161 = arith.constant dense<0.000000e+00> : vector<1xf32>
    %1072 = vector.multi_reduction <add>, %1066, %cst_161 [1] : vector<1x128xf32> to vector<1xf32>
    %1073 = vector.shape_cast %1072 : vector<1xf32> to vector<1x1xf32>
    %cst_162 = arith.constant dense<0.000000e+00> : vector<1xf32>
    %1074 = vector.multi_reduction <add>, %1071, %cst_162 [1] : vector<1x128xf32> to vector<1xf32>
    %1075 = vector.shape_cast %1074 : vector<1xf32> to vector<1x1xf32>
    %cst_163 = arith.constant 0.000000e+00 : f32
    %1076 = vector.broadcast %cst_163 : f32 to vector<1x128xf32>
    %cst_164 = arith.constant 0.000000e+00 : f32
    %1077 = vector.broadcast %cst_164 : f32 to vector<1x128xf32>
    %1078 = arith.mulf %806, %806 : vector<8x128xf32>
    %cst_165 = arith.constant dense<0.000000e+00> : vector<128xf32>
    %1079 = vector.multi_reduction <add>, %1078, %cst_165 [0] : vector<8x128xf32> to vector<128xf32>
    %1080 = vector.shape_cast %1079 : vector<128xf32> to vector<1x128xf32>
    %1081 = arith.mulf %836, %836 : vector<1x128xf32>
    %cst_166 = arith.constant 1.000000e-16 : f32
    %1082 = vector.broadcast %cst_166 : f32 to vector<1x128xf32>
    %1083 = arith.maximumf %1081, %1082 : vector<1x128xf32>
    %1084 = math.rsqrt %1083 : vector<1x128xf32>
    %1085 = arith.mulf %1080, %1084 : vector<1x128xf32>
    %1086 = arith.addf %1076, %1085 : vector<1x128xf32>
    %cst_167 = arith.constant 0.000000e+00 : f32
    %1087 = vector.broadcast %cst_167 : f32 to vector<1x128xf32>
    %1088 = arith.cmpf one, %1085, %1087 : vector<1x128xf32>
    %1089 = arith.extui %1088 : vector<1x128xi1> to vector<1x128xi32>
    %1090 = arith.sitofp %1089 : vector<1x128xi32> to vector<1x128xf32>
    %1091 = arith.addf %1077, %1090 : vector<1x128xf32>
    %1092 = arith.mulf %806, %811 : vector<8x128xf32>
    %cst_168 = arith.constant dense<0.000000e+00> : vector<128xf32>
    %1093 = vector.multi_reduction <add>, %1092, %cst_168 [0] : vector<8x128xf32> to vector<128xf32>
    %1094 = vector.shape_cast %1093 : vector<128xf32> to vector<1x128xf32>
    %1095 = arith.mulf %836, %839 : vector<1x128xf32>
    %cst_169 = arith.constant 1.000000e-16 : f32
    %1096 = vector.broadcast %cst_169 : f32 to vector<1x128xf32>
    %1097 = arith.maximumf %1095, %1096 : vector<1x128xf32>
    %1098 = math.rsqrt %1097 : vector<1x128xf32>
    %1099 = arith.mulf %1094, %1098 : vector<1x128xf32>
    %1100 = arith.addf %1086, %1099 : vector<1x128xf32>
    %cst_170 = arith.constant 0.000000e+00 : f32
    %1101 = vector.broadcast %cst_170 : f32 to vector<1x128xf32>
    %1102 = arith.cmpf one, %1099, %1101 : vector<1x128xf32>
    %1103 = arith.extui %1102 : vector<1x128xi1> to vector<1x128xi32>
    %1104 = arith.sitofp %1103 : vector<1x128xi32> to vector<1x128xf32>
    %1105 = arith.addf %1091, %1104 : vector<1x128xf32>
    %1106 = arith.mulf %806, %816 : vector<8x128xf32>
    %cst_171 = arith.constant dense<0.000000e+00> : vector<128xf32>
    %1107 = vector.multi_reduction <add>, %1106, %cst_171 [0] : vector<8x128xf32> to vector<128xf32>
    %1108 = vector.shape_cast %1107 : vector<128xf32> to vector<1x128xf32>
    %1109 = arith.mulf %836, %842 : vector<1x128xf32>
    %cst_172 = arith.constant 1.000000e-16 : f32
    %1110 = vector.broadcast %cst_172 : f32 to vector<1x128xf32>
    %1111 = arith.maximumf %1109, %1110 : vector<1x128xf32>
    %1112 = math.rsqrt %1111 : vector<1x128xf32>
    %1113 = arith.mulf %1108, %1112 : vector<1x128xf32>
    %1114 = arith.addf %1100, %1113 : vector<1x128xf32>
    %cst_173 = arith.constant 0.000000e+00 : f32
    %1115 = vector.broadcast %cst_173 : f32 to vector<1x128xf32>
    %1116 = arith.cmpf one, %1113, %1115 : vector<1x128xf32>
    %1117 = arith.extui %1116 : vector<1x128xi1> to vector<1x128xi32>
    %1118 = arith.sitofp %1117 : vector<1x128xi32> to vector<1x128xf32>
    %1119 = arith.addf %1105, %1118 : vector<1x128xf32>
    %1120 = arith.mulf %806, %821 : vector<8x128xf32>
    %cst_174 = arith.constant dense<0.000000e+00> : vector<128xf32>
    %1121 = vector.multi_reduction <add>, %1120, %cst_174 [0] : vector<8x128xf32> to vector<128xf32>
    %1122 = vector.shape_cast %1121 : vector<128xf32> to vector<1x128xf32>
    %1123 = arith.mulf %836, %845 : vector<1x128xf32>
    %cst_175 = arith.constant 1.000000e-16 : f32
    %1124 = vector.broadcast %cst_175 : f32 to vector<1x128xf32>
    %1125 = arith.maximumf %1123, %1124 : vector<1x128xf32>
    %1126 = math.rsqrt %1125 : vector<1x128xf32>
    %1127 = arith.mulf %1122, %1126 : vector<1x128xf32>
    %1128 = arith.addf %1114, %1127 : vector<1x128xf32>
    %cst_176 = arith.constant 0.000000e+00 : f32
    %1129 = vector.broadcast %cst_176 : f32 to vector<1x128xf32>
    %1130 = arith.cmpf one, %1127, %1129 : vector<1x128xf32>
    %1131 = arith.extui %1130 : vector<1x128xi1> to vector<1x128xi32>
    %1132 = arith.sitofp %1131 : vector<1x128xi32> to vector<1x128xf32>
    %1133 = arith.addf %1119, %1132 : vector<1x128xf32>
    %1134 = arith.mulf %811, %806 : vector<8x128xf32>
    %cst_177 = arith.constant dense<0.000000e+00> : vector<128xf32>
    %1135 = vector.multi_reduction <add>, %1134, %cst_177 [0] : vector<8x128xf32> to vector<128xf32>
    %1136 = vector.shape_cast %1135 : vector<128xf32> to vector<1x128xf32>
    %1137 = arith.mulf %839, %836 : vector<1x128xf32>
    %cst_178 = arith.constant 1.000000e-16 : f32
    %1138 = vector.broadcast %cst_178 : f32 to vector<1x128xf32>
    %1139 = arith.maximumf %1137, %1138 : vector<1x128xf32>
    %1140 = math.rsqrt %1139 : vector<1x128xf32>
    %1141 = arith.mulf %1136, %1140 : vector<1x128xf32>
    %1142 = arith.addf %1128, %1141 : vector<1x128xf32>
    %cst_179 = arith.constant 0.000000e+00 : f32
    %1143 = vector.broadcast %cst_179 : f32 to vector<1x128xf32>
    %1144 = arith.cmpf one, %1141, %1143 : vector<1x128xf32>
    %1145 = arith.extui %1144 : vector<1x128xi1> to vector<1x128xi32>
    %1146 = arith.sitofp %1145 : vector<1x128xi32> to vector<1x128xf32>
    %1147 = arith.addf %1133, %1146 : vector<1x128xf32>
    %1148 = arith.mulf %811, %811 : vector<8x128xf32>
    %cst_180 = arith.constant dense<0.000000e+00> : vector<128xf32>
    %1149 = vector.multi_reduction <add>, %1148, %cst_180 [0] : vector<8x128xf32> to vector<128xf32>
    %1150 = vector.shape_cast %1149 : vector<128xf32> to vector<1x128xf32>
    %1151 = arith.mulf %839, %839 : vector<1x128xf32>
    %cst_181 = arith.constant 1.000000e-16 : f32
    %1152 = vector.broadcast %cst_181 : f32 to vector<1x128xf32>
    %1153 = arith.maximumf %1151, %1152 : vector<1x128xf32>
    %1154 = math.rsqrt %1153 : vector<1x128xf32>
    %1155 = arith.mulf %1150, %1154 : vector<1x128xf32>
    %1156 = arith.addf %1142, %1155 : vector<1x128xf32>
    %cst_182 = arith.constant 0.000000e+00 : f32
    %1157 = vector.broadcast %cst_182 : f32 to vector<1x128xf32>
    %1158 = arith.cmpf one, %1155, %1157 : vector<1x128xf32>
    %1159 = arith.extui %1158 : vector<1x128xi1> to vector<1x128xi32>
    %1160 = arith.sitofp %1159 : vector<1x128xi32> to vector<1x128xf32>
    %1161 = arith.addf %1147, %1160 : vector<1x128xf32>
    %1162 = arith.mulf %811, %816 : vector<8x128xf32>
    %cst_183 = arith.constant dense<0.000000e+00> : vector<128xf32>
    %1163 = vector.multi_reduction <add>, %1162, %cst_183 [0] : vector<8x128xf32> to vector<128xf32>
    %1164 = vector.shape_cast %1163 : vector<128xf32> to vector<1x128xf32>
    %1165 = arith.mulf %839, %842 : vector<1x128xf32>
    %cst_184 = arith.constant 1.000000e-16 : f32
    %1166 = vector.broadcast %cst_184 : f32 to vector<1x128xf32>
    %1167 = arith.maximumf %1165, %1166 : vector<1x128xf32>
    %1168 = math.rsqrt %1167 : vector<1x128xf32>
    %1169 = arith.mulf %1164, %1168 : vector<1x128xf32>
    %1170 = arith.addf %1156, %1169 : vector<1x128xf32>
    %cst_185 = arith.constant 0.000000e+00 : f32
    %1171 = vector.broadcast %cst_185 : f32 to vector<1x128xf32>
    %1172 = arith.cmpf one, %1169, %1171 : vector<1x128xf32>
    %1173 = arith.extui %1172 : vector<1x128xi1> to vector<1x128xi32>
    %1174 = arith.sitofp %1173 : vector<1x128xi32> to vector<1x128xf32>
    %1175 = arith.addf %1161, %1174 : vector<1x128xf32>
    %1176 = arith.mulf %811, %821 : vector<8x128xf32>
    %cst_186 = arith.constant dense<0.000000e+00> : vector<128xf32>
    %1177 = vector.multi_reduction <add>, %1176, %cst_186 [0] : vector<8x128xf32> to vector<128xf32>
    %1178 = vector.shape_cast %1177 : vector<128xf32> to vector<1x128xf32>
    %1179 = arith.mulf %839, %845 : vector<1x128xf32>
    %cst_187 = arith.constant 1.000000e-16 : f32
    %1180 = vector.broadcast %cst_187 : f32 to vector<1x128xf32>
    %1181 = arith.maximumf %1179, %1180 : vector<1x128xf32>
    %1182 = math.rsqrt %1181 : vector<1x128xf32>
    %1183 = arith.mulf %1178, %1182 : vector<1x128xf32>
    %1184 = arith.addf %1170, %1183 : vector<1x128xf32>
    %cst_188 = arith.constant 0.000000e+00 : f32
    %1185 = vector.broadcast %cst_188 : f32 to vector<1x128xf32>
    %1186 = arith.cmpf one, %1183, %1185 : vector<1x128xf32>
    %1187 = arith.extui %1186 : vector<1x128xi1> to vector<1x128xi32>
    %1188 = arith.sitofp %1187 : vector<1x128xi32> to vector<1x128xf32>
    %1189 = arith.addf %1175, %1188 : vector<1x128xf32>
    %1190 = arith.mulf %816, %806 : vector<8x128xf32>
    %cst_189 = arith.constant dense<0.000000e+00> : vector<128xf32>
    %1191 = vector.multi_reduction <add>, %1190, %cst_189 [0] : vector<8x128xf32> to vector<128xf32>
    %1192 = vector.shape_cast %1191 : vector<128xf32> to vector<1x128xf32>
    %1193 = arith.mulf %842, %836 : vector<1x128xf32>
    %cst_190 = arith.constant 1.000000e-16 : f32
    %1194 = vector.broadcast %cst_190 : f32 to vector<1x128xf32>
    %1195 = arith.maximumf %1193, %1194 : vector<1x128xf32>
    %1196 = math.rsqrt %1195 : vector<1x128xf32>
    %1197 = arith.mulf %1192, %1196 : vector<1x128xf32>
    %1198 = arith.addf %1184, %1197 : vector<1x128xf32>
    %cst_191 = arith.constant 0.000000e+00 : f32
    %1199 = vector.broadcast %cst_191 : f32 to vector<1x128xf32>
    %1200 = arith.cmpf one, %1197, %1199 : vector<1x128xf32>
    %1201 = arith.extui %1200 : vector<1x128xi1> to vector<1x128xi32>
    %1202 = arith.sitofp %1201 : vector<1x128xi32> to vector<1x128xf32>
    %1203 = arith.addf %1189, %1202 : vector<1x128xf32>
    %1204 = arith.mulf %816, %811 : vector<8x128xf32>
    %cst_192 = arith.constant dense<0.000000e+00> : vector<128xf32>
    %1205 = vector.multi_reduction <add>, %1204, %cst_192 [0] : vector<8x128xf32> to vector<128xf32>
    %1206 = vector.shape_cast %1205 : vector<128xf32> to vector<1x128xf32>
    %1207 = arith.mulf %842, %839 : vector<1x128xf32>
    %cst_193 = arith.constant 1.000000e-16 : f32
    %1208 = vector.broadcast %cst_193 : f32 to vector<1x128xf32>
    %1209 = arith.maximumf %1207, %1208 : vector<1x128xf32>
    %1210 = math.rsqrt %1209 : vector<1x128xf32>
    %1211 = arith.mulf %1206, %1210 : vector<1x128xf32>
    %1212 = arith.addf %1198, %1211 : vector<1x128xf32>
    %cst_194 = arith.constant 0.000000e+00 : f32
    %1213 = vector.broadcast %cst_194 : f32 to vector<1x128xf32>
    %1214 = arith.cmpf one, %1211, %1213 : vector<1x128xf32>
    %1215 = arith.extui %1214 : vector<1x128xi1> to vector<1x128xi32>
    %1216 = arith.sitofp %1215 : vector<1x128xi32> to vector<1x128xf32>
    %1217 = arith.addf %1203, %1216 : vector<1x128xf32>
    %1218 = arith.mulf %816, %816 : vector<8x128xf32>
    %cst_195 = arith.constant dense<0.000000e+00> : vector<128xf32>
    %1219 = vector.multi_reduction <add>, %1218, %cst_195 [0] : vector<8x128xf32> to vector<128xf32>
    %1220 = vector.shape_cast %1219 : vector<128xf32> to vector<1x128xf32>
    %1221 = arith.mulf %842, %842 : vector<1x128xf32>
    %cst_196 = arith.constant 1.000000e-16 : f32
    %1222 = vector.broadcast %cst_196 : f32 to vector<1x128xf32>
    %1223 = arith.maximumf %1221, %1222 : vector<1x128xf32>
    %1224 = math.rsqrt %1223 : vector<1x128xf32>
    %1225 = arith.mulf %1220, %1224 : vector<1x128xf32>
    %1226 = arith.addf %1212, %1225 : vector<1x128xf32>
    %cst_197 = arith.constant 0.000000e+00 : f32
    %1227 = vector.broadcast %cst_197 : f32 to vector<1x128xf32>
    %1228 = arith.cmpf one, %1225, %1227 : vector<1x128xf32>
    %1229 = arith.extui %1228 : vector<1x128xi1> to vector<1x128xi32>
    %1230 = arith.sitofp %1229 : vector<1x128xi32> to vector<1x128xf32>
    %1231 = arith.addf %1217, %1230 : vector<1x128xf32>
    %1232 = arith.mulf %816, %821 : vector<8x128xf32>
    %cst_198 = arith.constant dense<0.000000e+00> : vector<128xf32>
    %1233 = vector.multi_reduction <add>, %1232, %cst_198 [0] : vector<8x128xf32> to vector<128xf32>
    %1234 = vector.shape_cast %1233 : vector<128xf32> to vector<1x128xf32>
    %1235 = arith.mulf %842, %845 : vector<1x128xf32>
    %cst_199 = arith.constant 1.000000e-16 : f32
    %1236 = vector.broadcast %cst_199 : f32 to vector<1x128xf32>
    %1237 = arith.maximumf %1235, %1236 : vector<1x128xf32>
    %1238 = math.rsqrt %1237 : vector<1x128xf32>
    %1239 = arith.mulf %1234, %1238 : vector<1x128xf32>
    %1240 = arith.addf %1226, %1239 : vector<1x128xf32>
    %cst_200 = arith.constant 0.000000e+00 : f32
    %1241 = vector.broadcast %cst_200 : f32 to vector<1x128xf32>
    %1242 = arith.cmpf one, %1239, %1241 : vector<1x128xf32>
    %1243 = arith.extui %1242 : vector<1x128xi1> to vector<1x128xi32>
    %1244 = arith.sitofp %1243 : vector<1x128xi32> to vector<1x128xf32>
    %1245 = arith.addf %1231, %1244 : vector<1x128xf32>
    %1246 = arith.mulf %821, %806 : vector<8x128xf32>
    %cst_201 = arith.constant dense<0.000000e+00> : vector<128xf32>
    %1247 = vector.multi_reduction <add>, %1246, %cst_201 [0] : vector<8x128xf32> to vector<128xf32>
    %1248 = vector.shape_cast %1247 : vector<128xf32> to vector<1x128xf32>
    %1249 = arith.mulf %845, %836 : vector<1x128xf32>
    %cst_202 = arith.constant 1.000000e-16 : f32
    %1250 = vector.broadcast %cst_202 : f32 to vector<1x128xf32>
    %1251 = arith.maximumf %1249, %1250 : vector<1x128xf32>
    %1252 = math.rsqrt %1251 : vector<1x128xf32>
    %1253 = arith.mulf %1248, %1252 : vector<1x128xf32>
    %1254 = arith.addf %1240, %1253 : vector<1x128xf32>
    %cst_203 = arith.constant 0.000000e+00 : f32
    %1255 = vector.broadcast %cst_203 : f32 to vector<1x128xf32>
    %1256 = arith.cmpf one, %1253, %1255 : vector<1x128xf32>
    %1257 = arith.extui %1256 : vector<1x128xi1> to vector<1x128xi32>
    %1258 = arith.sitofp %1257 : vector<1x128xi32> to vector<1x128xf32>
    %1259 = arith.addf %1245, %1258 : vector<1x128xf32>
    %1260 = arith.mulf %821, %811 : vector<8x128xf32>
    %cst_204 = arith.constant dense<0.000000e+00> : vector<128xf32>
    %1261 = vector.multi_reduction <add>, %1260, %cst_204 [0] : vector<8x128xf32> to vector<128xf32>
    %1262 = vector.shape_cast %1261 : vector<128xf32> to vector<1x128xf32>
    %1263 = arith.mulf %845, %839 : vector<1x128xf32>
    %cst_205 = arith.constant 1.000000e-16 : f32
    %1264 = vector.broadcast %cst_205 : f32 to vector<1x128xf32>
    %1265 = arith.maximumf %1263, %1264 : vector<1x128xf32>
    %1266 = math.rsqrt %1265 : vector<1x128xf32>
    %1267 = arith.mulf %1262, %1266 : vector<1x128xf32>
    %1268 = arith.addf %1254, %1267 : vector<1x128xf32>
    %cst_206 = arith.constant 0.000000e+00 : f32
    %1269 = vector.broadcast %cst_206 : f32 to vector<1x128xf32>
    %1270 = arith.cmpf one, %1267, %1269 : vector<1x128xf32>
    %1271 = arith.extui %1270 : vector<1x128xi1> to vector<1x128xi32>
    %1272 = arith.sitofp %1271 : vector<1x128xi32> to vector<1x128xf32>
    %1273 = arith.addf %1259, %1272 : vector<1x128xf32>
    %1274 = arith.mulf %821, %816 : vector<8x128xf32>
    %cst_207 = arith.constant dense<0.000000e+00> : vector<128xf32>
    %1275 = vector.multi_reduction <add>, %1274, %cst_207 [0] : vector<8x128xf32> to vector<128xf32>
    %1276 = vector.shape_cast %1275 : vector<128xf32> to vector<1x128xf32>
    %1277 = arith.mulf %845, %842 : vector<1x128xf32>
    %cst_208 = arith.constant 1.000000e-16 : f32
    %1278 = vector.broadcast %cst_208 : f32 to vector<1x128xf32>
    %1279 = arith.maximumf %1277, %1278 : vector<1x128xf32>
    %1280 = math.rsqrt %1279 : vector<1x128xf32>
    %1281 = arith.mulf %1276, %1280 : vector<1x128xf32>
    %1282 = arith.addf %1268, %1281 : vector<1x128xf32>
    %cst_209 = arith.constant 0.000000e+00 : f32
    %1283 = vector.broadcast %cst_209 : f32 to vector<1x128xf32>
    %1284 = arith.cmpf one, %1281, %1283 : vector<1x128xf32>
    %1285 = arith.extui %1284 : vector<1x128xi1> to vector<1x128xi32>
    %1286 = arith.sitofp %1285 : vector<1x128xi32> to vector<1x128xf32>
    %1287 = arith.addf %1273, %1286 : vector<1x128xf32>
    %1288 = arith.mulf %821, %821 : vector<8x128xf32>
    %cst_210 = arith.constant dense<0.000000e+00> : vector<128xf32>
    %1289 = vector.multi_reduction <add>, %1288, %cst_210 [0] : vector<8x128xf32> to vector<128xf32>
    %1290 = vector.shape_cast %1289 : vector<128xf32> to vector<1x128xf32>
    %1291 = arith.mulf %845, %845 : vector<1x128xf32>
    %cst_211 = arith.constant 1.000000e-16 : f32
    %1292 = vector.broadcast %cst_211 : f32 to vector<1x128xf32>
    %1293 = arith.maximumf %1291, %1292 : vector<1x128xf32>
    %1294 = math.rsqrt %1293 : vector<1x128xf32>
    %1295 = arith.mulf %1290, %1294 : vector<1x128xf32>
    %1296 = arith.addf %1282, %1295 : vector<1x128xf32>
    %cst_212 = arith.constant 0.000000e+00 : f32
    %1297 = vector.broadcast %cst_212 : f32 to vector<1x128xf32>
    %1298 = arith.cmpf one, %1295, %1297 : vector<1x128xf32>
    %1299 = arith.extui %1298 : vector<1x128xi1> to vector<1x128xi32>
    %1300 = arith.sitofp %1299 : vector<1x128xi32> to vector<1x128xf32>
    %1301 = arith.addf %1287, %1300 : vector<1x128xf32>
    %cst_213 = arith.constant dense<0.000000e+00> : vector<1xf32>
    %1302 = vector.multi_reduction <add>, %1296, %cst_213 [1] : vector<1x128xf32> to vector<1xf32>
    %1303 = vector.shape_cast %1302 : vector<1xf32> to vector<1x1xf32>
    %cst_214 = arith.constant dense<0.000000e+00> : vector<1xf32>
    %1304 = vector.multi_reduction <add>, %1301, %cst_214 [1] : vector<1x128xf32> to vector<1xf32>
    %1305 = vector.shape_cast %1304 : vector<1xf32> to vector<1x1xf32>
    %cst_215 = arith.constant 0.000000e+00 : f32
    %1306 = vector.broadcast %cst_215 : f32 to vector<1x128xf32>
    %cst_216 = arith.constant 0.000000e+00 : f32
    %1307 = vector.broadcast %cst_216 : f32 to vector<1x128xf32>
    %1308 = arith.mulf %786, %806 : vector<8x128xf32>
    %cst_217 = arith.constant dense<0.000000e+00> : vector<128xf32>
    %1309 = vector.multi_reduction <add>, %1308, %cst_217 [0] : vector<8x128xf32> to vector<128xf32>
    %1310 = vector.shape_cast %1309 : vector<128xf32> to vector<1x128xf32>
    %1311 = arith.mulf %824, %836 : vector<1x128xf32>
    %cst_218 = arith.constant 1.000000e-16 : f32
    %1312 = vector.broadcast %cst_218 : f32 to vector<1x128xf32>
    %1313 = arith.maximumf %1311, %1312 : vector<1x128xf32>
    %1314 = math.rsqrt %1313 : vector<1x128xf32>
    %1315 = arith.mulf %1310, %1314 : vector<1x128xf32>
    %1316 = arith.addf %1306, %1315 : vector<1x128xf32>
    %cst_219 = arith.constant 0.000000e+00 : f32
    %1317 = vector.broadcast %cst_219 : f32 to vector<1x128xf32>
    %1318 = arith.cmpf one, %1315, %1317 : vector<1x128xf32>
    %1319 = arith.extui %1318 : vector<1x128xi1> to vector<1x128xi32>
    %1320 = arith.sitofp %1319 : vector<1x128xi32> to vector<1x128xf32>
    %1321 = arith.addf %1307, %1320 : vector<1x128xf32>
    %1322 = arith.mulf %786, %811 : vector<8x128xf32>
    %cst_220 = arith.constant dense<0.000000e+00> : vector<128xf32>
    %1323 = vector.multi_reduction <add>, %1322, %cst_220 [0] : vector<8x128xf32> to vector<128xf32>
    %1324 = vector.shape_cast %1323 : vector<128xf32> to vector<1x128xf32>
    %1325 = arith.mulf %824, %839 : vector<1x128xf32>
    %cst_221 = arith.constant 1.000000e-16 : f32
    %1326 = vector.broadcast %cst_221 : f32 to vector<1x128xf32>
    %1327 = arith.maximumf %1325, %1326 : vector<1x128xf32>
    %1328 = math.rsqrt %1327 : vector<1x128xf32>
    %1329 = arith.mulf %1324, %1328 : vector<1x128xf32>
    %1330 = arith.addf %1316, %1329 : vector<1x128xf32>
    %cst_222 = arith.constant 0.000000e+00 : f32
    %1331 = vector.broadcast %cst_222 : f32 to vector<1x128xf32>
    %1332 = arith.cmpf one, %1329, %1331 : vector<1x128xf32>
    %1333 = arith.extui %1332 : vector<1x128xi1> to vector<1x128xi32>
    %1334 = arith.sitofp %1333 : vector<1x128xi32> to vector<1x128xf32>
    %1335 = arith.addf %1321, %1334 : vector<1x128xf32>
    %1336 = arith.mulf %786, %816 : vector<8x128xf32>
    %cst_223 = arith.constant dense<0.000000e+00> : vector<128xf32>
    %1337 = vector.multi_reduction <add>, %1336, %cst_223 [0] : vector<8x128xf32> to vector<128xf32>
    %1338 = vector.shape_cast %1337 : vector<128xf32> to vector<1x128xf32>
    %1339 = arith.mulf %824, %842 : vector<1x128xf32>
    %cst_224 = arith.constant 1.000000e-16 : f32
    %1340 = vector.broadcast %cst_224 : f32 to vector<1x128xf32>
    %1341 = arith.maximumf %1339, %1340 : vector<1x128xf32>
    %1342 = math.rsqrt %1341 : vector<1x128xf32>
    %1343 = arith.mulf %1338, %1342 : vector<1x128xf32>
    %1344 = arith.addf %1330, %1343 : vector<1x128xf32>
    %cst_225 = arith.constant 0.000000e+00 : f32
    %1345 = vector.broadcast %cst_225 : f32 to vector<1x128xf32>
    %1346 = arith.cmpf one, %1343, %1345 : vector<1x128xf32>
    %1347 = arith.extui %1346 : vector<1x128xi1> to vector<1x128xi32>
    %1348 = arith.sitofp %1347 : vector<1x128xi32> to vector<1x128xf32>
    %1349 = arith.addf %1335, %1348 : vector<1x128xf32>
    %1350 = arith.mulf %786, %821 : vector<8x128xf32>
    %cst_226 = arith.constant dense<0.000000e+00> : vector<128xf32>
    %1351 = vector.multi_reduction <add>, %1350, %cst_226 [0] : vector<8x128xf32> to vector<128xf32>
    %1352 = vector.shape_cast %1351 : vector<128xf32> to vector<1x128xf32>
    %1353 = arith.mulf %824, %845 : vector<1x128xf32>
    %cst_227 = arith.constant 1.000000e-16 : f32
    %1354 = vector.broadcast %cst_227 : f32 to vector<1x128xf32>
    %1355 = arith.maximumf %1353, %1354 : vector<1x128xf32>
    %1356 = math.rsqrt %1355 : vector<1x128xf32>
    %1357 = arith.mulf %1352, %1356 : vector<1x128xf32>
    %1358 = arith.addf %1344, %1357 : vector<1x128xf32>
    %cst_228 = arith.constant 0.000000e+00 : f32
    %1359 = vector.broadcast %cst_228 : f32 to vector<1x128xf32>
    %1360 = arith.cmpf one, %1357, %1359 : vector<1x128xf32>
    %1361 = arith.extui %1360 : vector<1x128xi1> to vector<1x128xi32>
    %1362 = arith.sitofp %1361 : vector<1x128xi32> to vector<1x128xf32>
    %1363 = arith.addf %1349, %1362 : vector<1x128xf32>
    %1364 = arith.mulf %791, %806 : vector<8x128xf32>
    %cst_229 = arith.constant dense<0.000000e+00> : vector<128xf32>
    %1365 = vector.multi_reduction <add>, %1364, %cst_229 [0] : vector<8x128xf32> to vector<128xf32>
    %1366 = vector.shape_cast %1365 : vector<128xf32> to vector<1x128xf32>
    %1367 = arith.mulf %827, %836 : vector<1x128xf32>
    %cst_230 = arith.constant 1.000000e-16 : f32
    %1368 = vector.broadcast %cst_230 : f32 to vector<1x128xf32>
    %1369 = arith.maximumf %1367, %1368 : vector<1x128xf32>
    %1370 = math.rsqrt %1369 : vector<1x128xf32>
    %1371 = arith.mulf %1366, %1370 : vector<1x128xf32>
    %1372 = arith.addf %1358, %1371 : vector<1x128xf32>
    %cst_231 = arith.constant 0.000000e+00 : f32
    %1373 = vector.broadcast %cst_231 : f32 to vector<1x128xf32>
    %1374 = arith.cmpf one, %1371, %1373 : vector<1x128xf32>
    %1375 = arith.extui %1374 : vector<1x128xi1> to vector<1x128xi32>
    %1376 = arith.sitofp %1375 : vector<1x128xi32> to vector<1x128xf32>
    %1377 = arith.addf %1363, %1376 : vector<1x128xf32>
    %1378 = arith.mulf %791, %811 : vector<8x128xf32>
    %cst_232 = arith.constant dense<0.000000e+00> : vector<128xf32>
    %1379 = vector.multi_reduction <add>, %1378, %cst_232 [0] : vector<8x128xf32> to vector<128xf32>
    %1380 = vector.shape_cast %1379 : vector<128xf32> to vector<1x128xf32>
    %1381 = arith.mulf %827, %839 : vector<1x128xf32>
    %cst_233 = arith.constant 1.000000e-16 : f32
    %1382 = vector.broadcast %cst_233 : f32 to vector<1x128xf32>
    %1383 = arith.maximumf %1381, %1382 : vector<1x128xf32>
    %1384 = math.rsqrt %1383 : vector<1x128xf32>
    %1385 = arith.mulf %1380, %1384 : vector<1x128xf32>
    %1386 = arith.addf %1372, %1385 : vector<1x128xf32>
    %cst_234 = arith.constant 0.000000e+00 : f32
    %1387 = vector.broadcast %cst_234 : f32 to vector<1x128xf32>
    %1388 = arith.cmpf one, %1385, %1387 : vector<1x128xf32>
    %1389 = arith.extui %1388 : vector<1x128xi1> to vector<1x128xi32>
    %1390 = arith.sitofp %1389 : vector<1x128xi32> to vector<1x128xf32>
    %1391 = arith.addf %1377, %1390 : vector<1x128xf32>
    %1392 = arith.mulf %791, %816 : vector<8x128xf32>
    %cst_235 = arith.constant dense<0.000000e+00> : vector<128xf32>
    %1393 = vector.multi_reduction <add>, %1392, %cst_235 [0] : vector<8x128xf32> to vector<128xf32>
    %1394 = vector.shape_cast %1393 : vector<128xf32> to vector<1x128xf32>
    %1395 = arith.mulf %827, %842 : vector<1x128xf32>
    %cst_236 = arith.constant 1.000000e-16 : f32
    %1396 = vector.broadcast %cst_236 : f32 to vector<1x128xf32>
    %1397 = arith.maximumf %1395, %1396 : vector<1x128xf32>
    %1398 = math.rsqrt %1397 : vector<1x128xf32>
    %1399 = arith.mulf %1394, %1398 : vector<1x128xf32>
    %1400 = arith.addf %1386, %1399 : vector<1x128xf32>
    %cst_237 = arith.constant 0.000000e+00 : f32
    %1401 = vector.broadcast %cst_237 : f32 to vector<1x128xf32>
    %1402 = arith.cmpf one, %1399, %1401 : vector<1x128xf32>
    %1403 = arith.extui %1402 : vector<1x128xi1> to vector<1x128xi32>
    %1404 = arith.sitofp %1403 : vector<1x128xi32> to vector<1x128xf32>
    %1405 = arith.addf %1391, %1404 : vector<1x128xf32>
    %1406 = arith.mulf %791, %821 : vector<8x128xf32>
    %cst_238 = arith.constant dense<0.000000e+00> : vector<128xf32>
    %1407 = vector.multi_reduction <add>, %1406, %cst_238 [0] : vector<8x128xf32> to vector<128xf32>
    %1408 = vector.shape_cast %1407 : vector<128xf32> to vector<1x128xf32>
    %1409 = arith.mulf %827, %845 : vector<1x128xf32>
    %cst_239 = arith.constant 1.000000e-16 : f32
    %1410 = vector.broadcast %cst_239 : f32 to vector<1x128xf32>
    %1411 = arith.maximumf %1409, %1410 : vector<1x128xf32>
    %1412 = math.rsqrt %1411 : vector<1x128xf32>
    %1413 = arith.mulf %1408, %1412 : vector<1x128xf32>
    %1414 = arith.addf %1400, %1413 : vector<1x128xf32>
    %cst_240 = arith.constant 0.000000e+00 : f32
    %1415 = vector.broadcast %cst_240 : f32 to vector<1x128xf32>
    %1416 = arith.cmpf one, %1413, %1415 : vector<1x128xf32>
    %1417 = arith.extui %1416 : vector<1x128xi1> to vector<1x128xi32>
    %1418 = arith.sitofp %1417 : vector<1x128xi32> to vector<1x128xf32>
    %1419 = arith.addf %1405, %1418 : vector<1x128xf32>
    %1420 = arith.mulf %796, %806 : vector<8x128xf32>
    %cst_241 = arith.constant dense<0.000000e+00> : vector<128xf32>
    %1421 = vector.multi_reduction <add>, %1420, %cst_241 [0] : vector<8x128xf32> to vector<128xf32>
    %1422 = vector.shape_cast %1421 : vector<128xf32> to vector<1x128xf32>
    %1423 = arith.mulf %830, %836 : vector<1x128xf32>
    %cst_242 = arith.constant 1.000000e-16 : f32
    %1424 = vector.broadcast %cst_242 : f32 to vector<1x128xf32>
    %1425 = arith.maximumf %1423, %1424 : vector<1x128xf32>
    %1426 = math.rsqrt %1425 : vector<1x128xf32>
    %1427 = arith.mulf %1422, %1426 : vector<1x128xf32>
    %1428 = arith.addf %1414, %1427 : vector<1x128xf32>
    %cst_243 = arith.constant 0.000000e+00 : f32
    %1429 = vector.broadcast %cst_243 : f32 to vector<1x128xf32>
    %1430 = arith.cmpf one, %1427, %1429 : vector<1x128xf32>
    %1431 = arith.extui %1430 : vector<1x128xi1> to vector<1x128xi32>
    %1432 = arith.sitofp %1431 : vector<1x128xi32> to vector<1x128xf32>
    %1433 = arith.addf %1419, %1432 : vector<1x128xf32>
    %1434 = arith.mulf %796, %811 : vector<8x128xf32>
    %cst_244 = arith.constant dense<0.000000e+00> : vector<128xf32>
    %1435 = vector.multi_reduction <add>, %1434, %cst_244 [0] : vector<8x128xf32> to vector<128xf32>
    %1436 = vector.shape_cast %1435 : vector<128xf32> to vector<1x128xf32>
    %1437 = arith.mulf %830, %839 : vector<1x128xf32>
    %cst_245 = arith.constant 1.000000e-16 : f32
    %1438 = vector.broadcast %cst_245 : f32 to vector<1x128xf32>
    %1439 = arith.maximumf %1437, %1438 : vector<1x128xf32>
    %1440 = math.rsqrt %1439 : vector<1x128xf32>
    %1441 = arith.mulf %1436, %1440 : vector<1x128xf32>
    %1442 = arith.addf %1428, %1441 : vector<1x128xf32>
    %cst_246 = arith.constant 0.000000e+00 : f32
    %1443 = vector.broadcast %cst_246 : f32 to vector<1x128xf32>
    %1444 = arith.cmpf one, %1441, %1443 : vector<1x128xf32>
    %1445 = arith.extui %1444 : vector<1x128xi1> to vector<1x128xi32>
    %1446 = arith.sitofp %1445 : vector<1x128xi32> to vector<1x128xf32>
    %1447 = arith.addf %1433, %1446 : vector<1x128xf32>
    %1448 = arith.mulf %796, %816 : vector<8x128xf32>
    %cst_247 = arith.constant dense<0.000000e+00> : vector<128xf32>
    %1449 = vector.multi_reduction <add>, %1448, %cst_247 [0] : vector<8x128xf32> to vector<128xf32>
    %1450 = vector.shape_cast %1449 : vector<128xf32> to vector<1x128xf32>
    %1451 = arith.mulf %830, %842 : vector<1x128xf32>
    %cst_248 = arith.constant 1.000000e-16 : f32
    %1452 = vector.broadcast %cst_248 : f32 to vector<1x128xf32>
    %1453 = arith.maximumf %1451, %1452 : vector<1x128xf32>
    %1454 = math.rsqrt %1453 : vector<1x128xf32>
    %1455 = arith.mulf %1450, %1454 : vector<1x128xf32>
    %1456 = arith.addf %1442, %1455 : vector<1x128xf32>
    %cst_249 = arith.constant 0.000000e+00 : f32
    %1457 = vector.broadcast %cst_249 : f32 to vector<1x128xf32>
    %1458 = arith.cmpf one, %1455, %1457 : vector<1x128xf32>
    %1459 = arith.extui %1458 : vector<1x128xi1> to vector<1x128xi32>
    %1460 = arith.sitofp %1459 : vector<1x128xi32> to vector<1x128xf32>
    %1461 = arith.addf %1447, %1460 : vector<1x128xf32>
    %1462 = arith.mulf %796, %821 : vector<8x128xf32>
    %cst_250 = arith.constant dense<0.000000e+00> : vector<128xf32>
    %1463 = vector.multi_reduction <add>, %1462, %cst_250 [0] : vector<8x128xf32> to vector<128xf32>
    %1464 = vector.shape_cast %1463 : vector<128xf32> to vector<1x128xf32>
    %1465 = arith.mulf %830, %845 : vector<1x128xf32>
    %cst_251 = arith.constant 1.000000e-16 : f32
    %1466 = vector.broadcast %cst_251 : f32 to vector<1x128xf32>
    %1467 = arith.maximumf %1465, %1466 : vector<1x128xf32>
    %1468 = math.rsqrt %1467 : vector<1x128xf32>
    %1469 = arith.mulf %1464, %1468 : vector<1x128xf32>
    %1470 = arith.addf %1456, %1469 : vector<1x128xf32>
    %cst_252 = arith.constant 0.000000e+00 : f32
    %1471 = vector.broadcast %cst_252 : f32 to vector<1x128xf32>
    %1472 = arith.cmpf one, %1469, %1471 : vector<1x128xf32>
    %1473 = arith.extui %1472 : vector<1x128xi1> to vector<1x128xi32>
    %1474 = arith.sitofp %1473 : vector<1x128xi32> to vector<1x128xf32>
    %1475 = arith.addf %1461, %1474 : vector<1x128xf32>
    %1476 = arith.mulf %801, %806 : vector<8x128xf32>
    %cst_253 = arith.constant dense<0.000000e+00> : vector<128xf32>
    %1477 = vector.multi_reduction <add>, %1476, %cst_253 [0] : vector<8x128xf32> to vector<128xf32>
    %1478 = vector.shape_cast %1477 : vector<128xf32> to vector<1x128xf32>
    %1479 = arith.mulf %833, %836 : vector<1x128xf32>
    %cst_254 = arith.constant 1.000000e-16 : f32
    %1480 = vector.broadcast %cst_254 : f32 to vector<1x128xf32>
    %1481 = arith.maximumf %1479, %1480 : vector<1x128xf32>
    %1482 = math.rsqrt %1481 : vector<1x128xf32>
    %1483 = arith.mulf %1478, %1482 : vector<1x128xf32>
    %1484 = arith.addf %1470, %1483 : vector<1x128xf32>
    %cst_255 = arith.constant 0.000000e+00 : f32
    %1485 = vector.broadcast %cst_255 : f32 to vector<1x128xf32>
    %1486 = arith.cmpf one, %1483, %1485 : vector<1x128xf32>
    %1487 = arith.extui %1486 : vector<1x128xi1> to vector<1x128xi32>
    %1488 = arith.sitofp %1487 : vector<1x128xi32> to vector<1x128xf32>
    %1489 = arith.addf %1475, %1488 : vector<1x128xf32>
    %1490 = arith.mulf %801, %811 : vector<8x128xf32>
    %cst_256 = arith.constant dense<0.000000e+00> : vector<128xf32>
    %1491 = vector.multi_reduction <add>, %1490, %cst_256 [0] : vector<8x128xf32> to vector<128xf32>
    %1492 = vector.shape_cast %1491 : vector<128xf32> to vector<1x128xf32>
    %1493 = arith.mulf %833, %839 : vector<1x128xf32>
    %cst_257 = arith.constant 1.000000e-16 : f32
    %1494 = vector.broadcast %cst_257 : f32 to vector<1x128xf32>
    %1495 = arith.maximumf %1493, %1494 : vector<1x128xf32>
    %1496 = math.rsqrt %1495 : vector<1x128xf32>
    %1497 = arith.mulf %1492, %1496 : vector<1x128xf32>
    %1498 = arith.addf %1484, %1497 : vector<1x128xf32>
    %cst_258 = arith.constant 0.000000e+00 : f32
    %1499 = vector.broadcast %cst_258 : f32 to vector<1x128xf32>
    %1500 = arith.cmpf one, %1497, %1499 : vector<1x128xf32>
    %1501 = arith.extui %1500 : vector<1x128xi1> to vector<1x128xi32>
    %1502 = arith.sitofp %1501 : vector<1x128xi32> to vector<1x128xf32>
    %1503 = arith.addf %1489, %1502 : vector<1x128xf32>
    %1504 = arith.mulf %801, %816 : vector<8x128xf32>
    %cst_259 = arith.constant dense<0.000000e+00> : vector<128xf32>
    %1505 = vector.multi_reduction <add>, %1504, %cst_259 [0] : vector<8x128xf32> to vector<128xf32>
    %1506 = vector.shape_cast %1505 : vector<128xf32> to vector<1x128xf32>
    %1507 = arith.mulf %833, %842 : vector<1x128xf32>
    %cst_260 = arith.constant 1.000000e-16 : f32
    %1508 = vector.broadcast %cst_260 : f32 to vector<1x128xf32>
    %1509 = arith.maximumf %1507, %1508 : vector<1x128xf32>
    %1510 = math.rsqrt %1509 : vector<1x128xf32>
    %1511 = arith.mulf %1506, %1510 : vector<1x128xf32>
    %1512 = arith.addf %1498, %1511 : vector<1x128xf32>
    %cst_261 = arith.constant 0.000000e+00 : f32
    %1513 = vector.broadcast %cst_261 : f32 to vector<1x128xf32>
    %1514 = arith.cmpf one, %1511, %1513 : vector<1x128xf32>
    %1515 = arith.extui %1514 : vector<1x128xi1> to vector<1x128xi32>
    %1516 = arith.sitofp %1515 : vector<1x128xi32> to vector<1x128xf32>
    %1517 = arith.addf %1503, %1516 : vector<1x128xf32>
    %1518 = arith.mulf %801, %821 : vector<8x128xf32>
    %cst_262 = arith.constant dense<0.000000e+00> : vector<128xf32>
    %1519 = vector.multi_reduction <add>, %1518, %cst_262 [0] : vector<8x128xf32> to vector<128xf32>
    %1520 = vector.shape_cast %1519 : vector<128xf32> to vector<1x128xf32>
    %1521 = arith.mulf %833, %845 : vector<1x128xf32>
    %cst_263 = arith.constant 1.000000e-16 : f32
    %1522 = vector.broadcast %cst_263 : f32 to vector<1x128xf32>
    %1523 = arith.maximumf %1521, %1522 : vector<1x128xf32>
    %1524 = math.rsqrt %1523 : vector<1x128xf32>
    %1525 = arith.mulf %1520, %1524 : vector<1x128xf32>
    %1526 = arith.addf %1512, %1525 : vector<1x128xf32>
    %cst_264 = arith.constant 0.000000e+00 : f32
    %1527 = vector.broadcast %cst_264 : f32 to vector<1x128xf32>
    %1528 = arith.cmpf one, %1525, %1527 : vector<1x128xf32>
    %1529 = arith.extui %1528 : vector<1x128xi1> to vector<1x128xi32>
    %1530 = arith.sitofp %1529 : vector<1x128xi32> to vector<1x128xf32>
    %1531 = arith.addf %1517, %1530 : vector<1x128xf32>
    %cst_265 = arith.constant dense<0.000000e+00> : vector<1xf32>
    %1532 = vector.multi_reduction <add>, %1526, %cst_265 [1] : vector<1x128xf32> to vector<1xf32>
    %1533 = vector.shape_cast %1532 : vector<1xf32> to vector<1x1xf32>
    %cst_266 = arith.constant dense<0.000000e+00> : vector<1xf32>
    %1534 = vector.multi_reduction <add>, %1531, %cst_266 [1] : vector<1x128xf32> to vector<1xf32>
    %1535 = vector.shape_cast %1534 : vector<1xf32> to vector<1x1xf32>
    %1536 = tpu.concatenate %1073, %1303, %1533, %1075, %1305, %1535 in 1 : vector<1x1xf32>, vector<1x1xf32>, vector<1x1xf32>, vector<1x1xf32>, vector<1x1xf32>, vector<1x1xf32> -> vector<1x6xf32>
    %cst_267 = arith.constant 0.000000e+00 : f32
    %1537 = vector.broadcast %cst_267 : f32 to vector<7x6xf32>
    %1538 = tpu.concatenate %1536, %1537 in 0 : vector<1x6xf32>, vector<7x6xf32> -> vector<8x6xf32>
    %c0_268 = arith.constant 0 : index
    %c0_269 = arith.constant 0 : index
    %1539 = vector.load %arg16[%c0_268, %c0_269] : memref<8x6xf32, #tpu.memory_space<vmem>>, vector<8x6xf32>
    tpu.vector_store %arg16[%c0_268, %c0_269], %1538 {strides = array<i32>} : memref<8x6xf32, #tpu.memory_space<vmem>>, vector<8x6xf32>,
    return
  }
  func.func @transform_0(%arg0: i32) -> (i32, i32) {
    %c0_i32 = arith.constant 0 : i32
    %c0_i32_0 = arith.constant 0 : i32
    return %c0_i32, %arg0 : i32, i32
  }
  func.func @transform_1(%arg0: i32) -> (i32, i32, i32) {
    %c0_i32 = arith.constant 0 : i32
    %c0_i32_0 = arith.constant 0 : i32
    %c0_i32_1 = arith.constant 0 : i32
    return %c0_i32, %c0_i32_0, %arg0 : i32, i32, i32
  }
  func.func @transform_2(%arg0: i32) -> (i32, i32, i32) {
    %c0_i32 = arith.constant 0 : i32
    %c0_i32_0 = arith.constant 0 : i32
    %c0_i32_1 = arith.constant 0 : i32
    return %c0_i32, %c0_i32_0, %arg0 : i32, i32, i32
  }
  func.func @transform_3(%arg0: i32) -> (i32, i32, i32) {
    %c0_i32 = arith.constant 0 : i32
    %c0_i32_0 = arith.constant 0 : i32
    %c0_i32_1 = arith.constant 0 : i32
    return %c0_i32, %c0_i32_0, %arg0 : i32, i32, i32
  }
  func.func @transform_4(%arg0: i32) -> (i32, i32) {
    %c0_i32 = arith.constant 0 : i32
    %c0_i32_0 = arith.constant 0 : i32
    %c0_i32_1 = arith.constant 0 : i32
    return %c0_i32, %c0_i32_0 : i32, i32
  }
  func.func @transform_5(%arg0: i32) -> (i32, i32) {
    %c0_i32 = arith.constant 0 : i32
    %c0_i32_0 = arith.constant 0 : i32
    %c0_i32_1 = arith.constant 0 : i32
    return %c0_i32, %c0_i32_0 : i32, i32
  }
  func.func @transform_6(%arg0: i32) -> (i32, i32) {
    %c0_i32 = arith.constant 0 : i32
    %c0_i32_0 = arith.constant 0 : i32
    %c0_i32_1 = arith.constant 0 : i32
    return %c0_i32, %c0_i32_0 : i32, i32
  }
  func.func @transform_7(%arg0: i32) -> (i32, i32) {
    %c0_i32 = arith.constant 0 : i32
    %c0_i32_0 = arith.constant 0 : i32
    %c0_i32_1 = arith.constant 0 : i32
    return %c0_i32, %c0_i32_0 : i32, i32
  }
  func.func @transform_8(%arg0: i32) -> (i32, i32) {
    %c0_i32 = arith.constant 0 : i32
    %c0_i32_0 = arith.constant 0 : i32
    %c0_i32_1 = arith.constant 0 : i32
    return %c0_i32, %c0_i32_0 : i32, i32
  }
  func.func @transform_9(%arg0: i32) -> (i32, i32) {
    %c0_i32 = arith.constant 0 : i32
    %c0_i32_0 = arith.constant 0 : i32
    %c0_i32_1 = arith.constant 0 : i32
    return %c0_i32, %c0_i32_0 : i32, i32
  }
  func.func @transform_10(%arg0: i32) -> (i32, i32) {
    %c0_i32 = arith.constant 0 : i32
    %c0_i32_0 = arith.constant 0 : i32
    %c0_i32_1 = arith.constant 0 : i32
    return %c0_i32, %c0_i32_0 : i32, i32
  }
  func.func @transform_11(%arg0: i32) -> (i32, i32) {
    %c0_i32 = arith.constant 0 : i32
    %c0_i32_0 = arith.constant 0 : i32
    %c0_i32_1 = arith.constant 0 : i32
    return %c0_i32, %c0_i32_0 : i32, i32
  }
  func.func @transform_12(%arg0: i32) -> (i32, i32, i32) {
    %c0_i32 = arith.constant 0 : i32
    %c0_i32_0 = arith.constant 0 : i32
    %c0_i32_1 = arith.constant 0 : i32
    return %c0_i32, %c0_i32_0, %arg0 : i32, i32, i32
  }
  func.func @transform_13(%arg0: i32) -> (i32, i32, i32) {
    %c0_i32 = arith.constant 0 : i32
    %c0_i32_0 = arith.constant 0 : i32
    %c0_i32_1 = arith.constant 0 : i32
    return %c0_i32, %c0_i32_0, %arg0 : i32, i32, i32
  }
  func.func @transform_14(%arg0: i32) -> (i32, i32) {
    %c0_i32 = arith.constant 0 : i32
    %c0_i32_0 = arith.constant 0 : i32
    return %c0_i32, %arg0 : i32, i32
  }
  func.func @transform_15(%arg0: i32) -> (i32, i32) {
    %c0_i32 = arith.constant 0 : i32
    %c0_i32_0 = arith.constant 0 : i32
    return %arg0, %c0_i32 : i32, i32
  }
}

module attributes {stable_mosaic.version = 11 : i64} {
  func.func @_stage2_kernel(%arg0: i32, %arg1: memref<4x18x128xf32, #tpu.memory_space<vmem>>, %arg2: memref<2x4x128xf32, #tpu.memory_space<vmem>>, %arg3: memref<1x4x128xf32, #tpu.memory_space<vmem>>, %arg4: memref<2x4x128xf32, #tpu.memory_space<vmem>>, %arg5: memref<128x128xf32, #tpu.memory_space<vmem>>, %arg6: memref<4x18x8xf32, #tpu.memory_space<vmem>>, %arg7: memref<1x128xf32, #tpu.memory_space<vmem>>) attributes {dimension_semantics = [#tpu.dimension_semantics<parallel>], iteration_bounds = array<i64: 1>, scalar_prefetch = 0 : i64, scratch_operands = 0 : i64, tpu.core_type = #tpu.core_type<tc>, window_params = [{transform_indices = @transform_0, window_bounds = array<i64: 4, 18, 128>}, {transform_indices = @transform_1, window_bounds = array<i64: 2, 4, 128>}, {transform_indices = @transform_2, window_bounds = array<i64: 1, 4, 128>}, {transform_indices = @transform_3, window_bounds = array<i64: 2, 4, 128>}, {transform_indices = @transform_4, window_bounds = array<i64: 128, 128>}, {pipeline_mode = #tpu.pipeline_mode<synchronous>, transform_indices = @transform_5, window_bounds = array<i64: 4, 18, 8>}, {transform_indices = @transform_6, window_bounds = array<i64: 1, 128>}]} {
    %c0 = arith.constant 0 : index
    %c0_0 = arith.constant 0 : index
    %c0_1 = arith.constant 0 : index
    %0 = vector.load %arg1[%c0, %c0_0, %c0_1] : memref<4x18x128xf32, #tpu.memory_space<vmem>>, vector<4x18x128xf32>
    %c0_2 = arith.constant 0 : index
    %c0_3 = arith.constant 0 : index
    %c0_4 = arith.constant 0 : index
    %1 = vector.load %arg2[%c0_2, %c0_3, %c0_4] : memref<2x4x128xf32, #tpu.memory_space<vmem>>, vector<2x4x128xf32>
    %c0_5 = arith.constant 0 : index
    %c0_6 = arith.constant 0 : index
    %c0_7 = arith.constant 0 : index
    %2 = vector.load %arg3[%c0_5, %c0_6, %c0_7] : memref<1x4x128xf32, #tpu.memory_space<vmem>>, vector<1x4x128xf32>
    %3 = vector.shape_cast %2 : vector<1x4x128xf32> to vector<4x128xf32>
    %c0_8 = arith.constant 0 : index
    %c0_9 = arith.constant 0 : index
    %c0_10 = arith.constant 0 : index
    %4 = vector.load %arg4[%c0_8, %c0_9, %c0_10] : memref<2x4x128xf32, #tpu.memory_space<vmem>>, vector<2x4x128xf32>
    %c0_11 = arith.constant 0 : index
    %c0_12 = arith.constant 0 : index
    %5 = vector.load %arg5[%c0_11, %c0_12] : memref<128x128xf32, #tpu.memory_space<vmem>>, vector<128x128xf32>
    %c0_13 = arith.constant 0 : index
    %c0_14 = arith.constant 0 : index
    %c0_15 = arith.constant 0 : index
    %6 = vector.load %arg6[%c0_13, %c0_14, %c0_15] : memref<4x18x8xf32, #tpu.memory_space<vmem>>, vector<4x18x8xf32>
    %7 = vector.extract_strided_slice %5 {offsets = [80, 0], sizes = [1, 128], strides = [1, 1]} : vector<128x128xf32> to vector<1x128xf32>
    %8 = vector.extract_strided_slice %5 {offsets = [64, 0], sizes = [2, 128], strides = [1, 1]} : vector<128x128xf32> to vector<2x128xf32>
    %9 = math.absf %8 : vector<2x128xf32>
    %10 = vector.extract_strided_slice %4 {offsets = [0, 0, 0], sizes = [1, 4, 128], strides = [1, 1, 1]} : vector<2x4x128xf32> to vector<1x4x128xf32>
    %11 = vector.shape_cast %10 : vector<1x4x128xf32> to vector<4x128xf32>
    %12 = arith.mulf %3, %11 : vector<4x128xf32>
    %13 = vector.extract_strided_slice %5 {offsets = [0, 0], sizes = [8, 128], strides = [1, 1]} : vector<128x128xf32> to vector<8x128xf32>
    %14 = vector.extract_strided_slice %6 {offsets = [0, 0, 0], sizes = [1, 18, 8], strides = [1, 1, 1]} : vector<4x18x8xf32> to vector<1x18x8xf32>
    %15 = vector.shape_cast %14 : vector<1x18x8xf32> to vector<18x8xf32>
    %cst = arith.constant dense<0.000000e+00> : vector<18x128xf32>
    %16 = tpu.matmul %15, %13, %cst {dimension_numbers = #tpu.dot_dimension_numbers<[1], [0], [0], [1], [0, 0, 1, 1], [], []>} : vector<18x8xf32>, vector<8x128xf32>, vector<18x128xf32> -> vector<18x128xf32>
    %17 = vector.extract_strided_slice %0 {offsets = [0, 0, 0], sizes = [1, 18, 128], strides = [1, 1, 1]} : vector<4x18x128xf32> to vector<1x18x128xf32>
    %18 = vector.shape_cast %17 : vector<1x18x128xf32> to vector<18x128xf32>
    %19 = arith.mulf %18, %16 : vector<18x128xf32>
    %cst_16 = arith.constant dense<0.000000e+00> : vector<128xf32>
    %20 = vector.multi_reduction <add>, %19, %cst_16 [0] : vector<18x128xf32> to vector<128xf32>
    %21 = vector.shape_cast %20 : vector<128xf32> to vector<1x128xf32>
    %22 = vector.extract_strided_slice %0 {offsets = [1, 0, 0], sizes = [1, 18, 128], strides = [1, 1, 1]} : vector<4x18x128xf32> to vector<1x18x128xf32>
    %23 = vector.shape_cast %22 : vector<1x18x128xf32> to vector<18x128xf32>
    %24 = arith.mulf %23, %16 : vector<18x128xf32>
    %cst_17 = arith.constant dense<0.000000e+00> : vector<128xf32>
    %25 = vector.multi_reduction <add>, %24, %cst_17 [0] : vector<18x128xf32> to vector<128xf32>
    %26 = vector.shape_cast %25 : vector<128xf32> to vector<1x128xf32>
    %27 = vector.extract_strided_slice %0 {offsets = [2, 0, 0], sizes = [1, 18, 128], strides = [1, 1, 1]} : vector<4x18x128xf32> to vector<1x18x128xf32>
    %28 = vector.shape_cast %27 : vector<1x18x128xf32> to vector<18x128xf32>
    %29 = arith.mulf %28, %16 : vector<18x128xf32>
    %cst_18 = arith.constant dense<0.000000e+00> : vector<128xf32>
    %30 = vector.multi_reduction <add>, %29, %cst_18 [0] : vector<18x128xf32> to vector<128xf32>
    %31 = vector.shape_cast %30 : vector<128xf32> to vector<1x128xf32>
    %32 = vector.extract_strided_slice %0 {offsets = [3, 0, 0], sizes = [1, 18, 128], strides = [1, 1, 1]} : vector<4x18x128xf32> to vector<1x18x128xf32>
    %33 = vector.shape_cast %32 : vector<1x18x128xf32> to vector<18x128xf32>
    %34 = arith.mulf %33, %16 : vector<18x128xf32>
    %cst_19 = arith.constant dense<0.000000e+00> : vector<128xf32>
    %35 = vector.multi_reduction <add>, %34, %cst_19 [0] : vector<18x128xf32> to vector<128xf32>
    %36 = vector.shape_cast %35 : vector<128xf32> to vector<1x128xf32>
    %37 = tpu.concatenate %21, %26, %31, %36 in 0 : vector<1x128xf32>, vector<1x128xf32>, vector<1x128xf32>, vector<1x128xf32> -> vector<4x128xf32>
    %38 = vector.extract_strided_slice %1 {offsets = [0, 0, 0], sizes = [1, 4, 128], strides = [1, 1, 1]} : vector<2x4x128xf32> to vector<1x4x128xf32>
    %39 = vector.shape_cast %38 : vector<1x4x128xf32> to vector<4x128xf32>
    %40 = arith.mulf %37, %39 : vector<4x128xf32>
    %cst_20 = arith.constant 0.353553385 : f32
    %41 = vector.broadcast %cst_20 : f32 to vector<4x128xf32>
    %42 = arith.mulf %40, %41 : vector<4x128xf32>
    %cst_21 = arith.constant dense<0xFF800000> : vector<128xf32>
    %43 = vector.multi_reduction <maximumf>, %42, %cst_21 [0] : vector<4x128xf32> to vector<128xf32>
    %44 = vector.shape_cast %43 : vector<128xf32> to vector<1x128xf32>
    %45 = vector.broadcast %44 : vector<1x128xf32> to vector<4x128xf32>
    %46 = arith.subf %42, %45 : vector<4x128xf32>
    %47 = math.exp %46 : vector<4x128xf32>
    %cst_22 = arith.constant dense<0.000000e+00> : vector<128xf32>
    %48 = vector.multi_reduction <add>, %47, %cst_22 [0] : vector<4x128xf32> to vector<128xf32>
    %49 = vector.shape_cast %48 : vector<128xf32> to vector<1x128xf32>
    %50 = vector.broadcast %49 : vector<1x128xf32> to vector<4x128xf32>
    %51 = arith.divf %47, %50 : vector<4x128xf32>
    %52 = arith.mulf %12, %51 : vector<4x128xf32>
    %cst_23 = arith.constant dense<0.000000e+00> : vector<128xf32>
    %53 = vector.multi_reduction <add>, %52, %cst_23 [0] : vector<4x128xf32> to vector<128xf32>
    %54 = vector.shape_cast %53 : vector<128xf32> to vector<1x128xf32>
    %55 = vector.extract_strided_slice %9 {offsets = [0, 0], sizes = [1, 128], strides = [1, 1]} : vector<2x128xf32> to vector<1x128xf32>
    %56 = arith.mulf %55, %54 : vector<1x128xf32>
    %57 = arith.addf %7, %56 : vector<1x128xf32>
    %58 = vector.extract_strided_slice %5 {offsets = [8, 0], sizes = [8, 128], strides = [1, 1]} : vector<128x128xf32> to vector<8x128xf32>
    %59 = vector.extract_strided_slice %6 {offsets = [1, 0, 0], sizes = [1, 18, 8], strides = [1, 1, 1]} : vector<4x18x8xf32> to vector<1x18x8xf32>
    %60 = vector.shape_cast %59 : vector<1x18x8xf32> to vector<18x8xf32>
    %cst_24 = arith.constant dense<0.000000e+00> : vector<18x128xf32>
    %61 = tpu.matmul %60, %58, %cst_24 {dimension_numbers = #tpu.dot_dimension_numbers<[1], [0], [0], [1], [0, 0, 1, 1], [], []>} : vector<18x8xf32>, vector<8x128xf32>, vector<18x128xf32> -> vector<18x128xf32>
    %62 = vector.extract_strided_slice %0 {offsets = [0, 0, 0], sizes = [1, 18, 128], strides = [1, 1, 1]} : vector<4x18x128xf32> to vector<1x18x128xf32>
    %63 = vector.shape_cast %62 : vector<1x18x128xf32> to vector<18x128xf32>
    %64 = arith.mulf %63, %61 : vector<18x128xf32>
    %cst_25 = arith.constant dense<0.000000e+00> : vector<128xf32>
    %65 = vector.multi_reduction <add>, %64, %cst_25 [0] : vector<18x128xf32> to vector<128xf32>
    %66 = vector.shape_cast %65 : vector<128xf32> to vector<1x128xf32>
    %67 = vector.extract_strided_slice %0 {offsets = [1, 0, 0], sizes = [1, 18, 128], strides = [1, 1, 1]} : vector<4x18x128xf32> to vector<1x18x128xf32>
    %68 = vector.shape_cast %67 : vector<1x18x128xf32> to vector<18x128xf32>
    %69 = arith.mulf %68, %61 : vector<18x128xf32>
    %cst_26 = arith.constant dense<0.000000e+00> : vector<128xf32>
    %70 = vector.multi_reduction <add>, %69, %cst_26 [0] : vector<18x128xf32> to vector<128xf32>
    %71 = vector.shape_cast %70 : vector<128xf32> to vector<1x128xf32>
    %72 = vector.extract_strided_slice %0 {offsets = [2, 0, 0], sizes = [1, 18, 128], strides = [1, 1, 1]} : vector<4x18x128xf32> to vector<1x18x128xf32>
    %73 = vector.shape_cast %72 : vector<1x18x128xf32> to vector<18x128xf32>
    %74 = arith.mulf %73, %61 : vector<18x128xf32>
    %cst_27 = arith.constant dense<0.000000e+00> : vector<128xf32>
    %75 = vector.multi_reduction <add>, %74, %cst_27 [0] : vector<18x128xf32> to vector<128xf32>
    %76 = vector.shape_cast %75 : vector<128xf32> to vector<1x128xf32>
    %77 = vector.extract_strided_slice %0 {offsets = [3, 0, 0], sizes = [1, 18, 128], strides = [1, 1, 1]} : vector<4x18x128xf32> to vector<1x18x128xf32>
    %78 = vector.shape_cast %77 : vector<1x18x128xf32> to vector<18x128xf32>
    %79 = arith.mulf %78, %61 : vector<18x128xf32>
    %cst_28 = arith.constant dense<0.000000e+00> : vector<128xf32>
    %80 = vector.multi_reduction <add>, %79, %cst_28 [0] : vector<18x128xf32> to vector<128xf32>
    %81 = vector.shape_cast %80 : vector<128xf32> to vector<1x128xf32>
    %82 = tpu.concatenate %66, %71, %76, %81 in 0 : vector<1x128xf32>, vector<1x128xf32>, vector<1x128xf32>, vector<1x128xf32> -> vector<4x128xf32>
    %83 = vector.extract_strided_slice %1 {offsets = [0, 0, 0], sizes = [1, 4, 128], strides = [1, 1, 1]} : vector<2x4x128xf32> to vector<1x4x128xf32>
    %84 = vector.shape_cast %83 : vector<1x4x128xf32> to vector<4x128xf32>
    %85 = arith.mulf %82, %84 : vector<4x128xf32>
    %cst_29 = arith.constant 0.353553385 : f32
    %86 = vector.broadcast %cst_29 : f32 to vector<4x128xf32>
    %87 = arith.mulf %85, %86 : vector<4x128xf32>
    %cst_30 = arith.constant dense<0xFF800000> : vector<128xf32>
    %88 = vector.multi_reduction <maximumf>, %87, %cst_30 [0] : vector<4x128xf32> to vector<128xf32>
    %89 = vector.shape_cast %88 : vector<128xf32> to vector<1x128xf32>
    %90 = vector.broadcast %89 : vector<1x128xf32> to vector<4x128xf32>
    %91 = arith.subf %87, %90 : vector<4x128xf32>
    %92 = math.exp %91 : vector<4x128xf32>
    %cst_31 = arith.constant dense<0.000000e+00> : vector<128xf32>
    %93 = vector.multi_reduction <add>, %92, %cst_31 [0] : vector<4x128xf32> to vector<128xf32>
    %94 = vector.shape_cast %93 : vector<128xf32> to vector<1x128xf32>
    %95 = vector.broadcast %94 : vector<1x128xf32> to vector<4x128xf32>
    %96 = arith.divf %92, %95 : vector<4x128xf32>
    %97 = arith.mulf %12, %96 : vector<4x128xf32>
    %cst_32 = arith.constant dense<0.000000e+00> : vector<128xf32>
    %98 = vector.multi_reduction <add>, %97, %cst_32 [0] : vector<4x128xf32> to vector<128xf32>
    %99 = vector.shape_cast %98 : vector<128xf32> to vector<1x128xf32>
    %100 = vector.extract_strided_slice %9 {offsets = [1, 0], sizes = [1, 128], strides = [1, 1]} : vector<2x128xf32> to vector<1x128xf32>
    %101 = arith.mulf %100, %99 : vector<1x128xf32>
    %102 = arith.addf %57, %101 : vector<1x128xf32>
    %103 = vector.extract_strided_slice %5 {offsets = [88, 0], sizes = [1, 128], strides = [1, 1]} : vector<128x128xf32> to vector<1x128xf32>
    %104 = vector.extract_strided_slice %5 {offsets = [72, 0], sizes = [2, 128], strides = [1, 1]} : vector<128x128xf32> to vector<2x128xf32>
    %105 = math.absf %104 : vector<2x128xf32>
    %106 = vector.extract_strided_slice %4 {offsets = [1, 0, 0], sizes = [1, 4, 128], strides = [1, 1, 1]} : vector<2x4x128xf32> to vector<1x4x128xf32>
    %107 = vector.shape_cast %106 : vector<1x4x128xf32> to vector<4x128xf32>
    %108 = arith.mulf %3, %107 : vector<4x128xf32>
    %109 = vector.extract_strided_slice %5 {offsets = [16, 0], sizes = [8, 128], strides = [1, 1]} : vector<128x128xf32> to vector<8x128xf32>
    %110 = vector.extract_strided_slice %6 {offsets = [2, 0, 0], sizes = [1, 18, 8], strides = [1, 1, 1]} : vector<4x18x8xf32> to vector<1x18x8xf32>
    %111 = vector.shape_cast %110 : vector<1x18x8xf32> to vector<18x8xf32>
    %cst_33 = arith.constant dense<0.000000e+00> : vector<18x128xf32>
    %112 = tpu.matmul %111, %109, %cst_33 {dimension_numbers = #tpu.dot_dimension_numbers<[1], [0], [0], [1], [0, 0, 1, 1], [], []>} : vector<18x8xf32>, vector<8x128xf32>, vector<18x128xf32> -> vector<18x128xf32>
    %113 = vector.extract_strided_slice %0 {offsets = [0, 0, 0], sizes = [1, 18, 128], strides = [1, 1, 1]} : vector<4x18x128xf32> to vector<1x18x128xf32>
    %114 = vector.shape_cast %113 : vector<1x18x128xf32> to vector<18x128xf32>
    %115 = arith.mulf %114, %112 : vector<18x128xf32>
    %cst_34 = arith.constant dense<0.000000e+00> : vector<128xf32>
    %116 = vector.multi_reduction <add>, %115, %cst_34 [0] : vector<18x128xf32> to vector<128xf32>
    %117 = vector.shape_cast %116 : vector<128xf32> to vector<1x128xf32>
    %118 = vector.extract_strided_slice %0 {offsets = [1, 0, 0], sizes = [1, 18, 128], strides = [1, 1, 1]} : vector<4x18x128xf32> to vector<1x18x128xf32>
    %119 = vector.shape_cast %118 : vector<1x18x128xf32> to vector<18x128xf32>
    %120 = arith.mulf %119, %112 : vector<18x128xf32>
    %cst_35 = arith.constant dense<0.000000e+00> : vector<128xf32>
    %121 = vector.multi_reduction <add>, %120, %cst_35 [0] : vector<18x128xf32> to vector<128xf32>
    %122 = vector.shape_cast %121 : vector<128xf32> to vector<1x128xf32>
    %123 = vector.extract_strided_slice %0 {offsets = [2, 0, 0], sizes = [1, 18, 128], strides = [1, 1, 1]} : vector<4x18x128xf32> to vector<1x18x128xf32>
    %124 = vector.shape_cast %123 : vector<1x18x128xf32> to vector<18x128xf32>
    %125 = arith.mulf %124, %112 : vector<18x128xf32>
    %cst_36 = arith.constant dense<0.000000e+00> : vector<128xf32>
    %126 = vector.multi_reduction <add>, %125, %cst_36 [0] : vector<18x128xf32> to vector<128xf32>
    %127 = vector.shape_cast %126 : vector<128xf32> to vector<1x128xf32>
    %128 = vector.extract_strided_slice %0 {offsets = [3, 0, 0], sizes = [1, 18, 128], strides = [1, 1, 1]} : vector<4x18x128xf32> to vector<1x18x128xf32>
    %129 = vector.shape_cast %128 : vector<1x18x128xf32> to vector<18x128xf32>
    %130 = arith.mulf %129, %112 : vector<18x128xf32>
    %cst_37 = arith.constant dense<0.000000e+00> : vector<128xf32>
    %131 = vector.multi_reduction <add>, %130, %cst_37 [0] : vector<18x128xf32> to vector<128xf32>
    %132 = vector.shape_cast %131 : vector<128xf32> to vector<1x128xf32>
    %133 = tpu.concatenate %117, %122, %127, %132 in 0 : vector<1x128xf32>, vector<1x128xf32>, vector<1x128xf32>, vector<1x128xf32> -> vector<4x128xf32>
    %134 = vector.extract_strided_slice %1 {offsets = [1, 0, 0], sizes = [1, 4, 128], strides = [1, 1, 1]} : vector<2x4x128xf32> to vector<1x4x128xf32>
    %135 = vector.shape_cast %134 : vector<1x4x128xf32> to vector<4x128xf32>
    %136 = arith.mulf %133, %135 : vector<4x128xf32>
    %cst_38 = arith.constant 0.353553385 : f32
    %137 = vector.broadcast %cst_38 : f32 to vector<4x128xf32>
    %138 = arith.mulf %136, %137 : vector<4x128xf32>
    %cst_39 = arith.constant dense<0xFF800000> : vector<128xf32>
    %139 = vector.multi_reduction <maximumf>, %138, %cst_39 [0] : vector<4x128xf32> to vector<128xf32>
    %140 = vector.shape_cast %139 : vector<128xf32> to vector<1x128xf32>
    %141 = vector.broadcast %140 : vector<1x128xf32> to vector<4x128xf32>
    %142 = arith.subf %138, %141 : vector<4x128xf32>
    %143 = math.exp %142 : vector<4x128xf32>
    %cst_40 = arith.constant dense<0.000000e+00> : vector<128xf32>
    %144 = vector.multi_reduction <add>, %143, %cst_40 [0] : vector<4x128xf32> to vector<128xf32>
    %145 = vector.shape_cast %144 : vector<128xf32> to vector<1x128xf32>
    %146 = vector.broadcast %145 : vector<1x128xf32> to vector<4x128xf32>
    %147 = arith.divf %143, %146 : vector<4x128xf32>
    %148 = arith.mulf %108, %147 : vector<4x128xf32>
    %cst_41 = arith.constant dense<0.000000e+00> : vector<128xf32>
    %149 = vector.multi_reduction <add>, %148, %cst_41 [0] : vector<4x128xf32> to vector<128xf32>
    %150 = vector.shape_cast %149 : vector<128xf32> to vector<1x128xf32>
    %151 = vector.extract_strided_slice %105 {offsets = [0, 0], sizes = [1, 128], strides = [1, 1]} : vector<2x128xf32> to vector<1x128xf32>
    %152 = arith.mulf %151, %150 : vector<1x128xf32>
    %153 = arith.addf %103, %152 : vector<1x128xf32>
    %154 = vector.extract_strided_slice %5 {offsets = [24, 0], sizes = [8, 128], strides = [1, 1]} : vector<128x128xf32> to vector<8x128xf32>
    %155 = vector.extract_strided_slice %6 {offsets = [3, 0, 0], sizes = [1, 18, 8], strides = [1, 1, 1]} : vector<4x18x8xf32> to vector<1x18x8xf32>
    %156 = vector.shape_cast %155 : vector<1x18x8xf32> to vector<18x8xf32>
    %cst_42 = arith.constant dense<0.000000e+00> : vector<18x128xf32>
    %157 = tpu.matmul %156, %154, %cst_42 {dimension_numbers = #tpu.dot_dimension_numbers<[1], [0], [0], [1], [0, 0, 1, 1], [], []>} : vector<18x8xf32>, vector<8x128xf32>, vector<18x128xf32> -> vector<18x128xf32>
    %158 = vector.extract_strided_slice %0 {offsets = [0, 0, 0], sizes = [1, 18, 128], strides = [1, 1, 1]} : vector<4x18x128xf32> to vector<1x18x128xf32>
    %159 = vector.shape_cast %158 : vector<1x18x128xf32> to vector<18x128xf32>
    %160 = arith.mulf %159, %157 : vector<18x128xf32>
    %cst_43 = arith.constant dense<0.000000e+00> : vector<128xf32>
    %161 = vector.multi_reduction <add>, %160, %cst_43 [0] : vector<18x128xf32> to vector<128xf32>
    %162 = vector.shape_cast %161 : vector<128xf32> to vector<1x128xf32>
    %163 = vector.extract_strided_slice %0 {offsets = [1, 0, 0], sizes = [1, 18, 128], strides = [1, 1, 1]} : vector<4x18x128xf32> to vector<1x18x128xf32>
    %164 = vector.shape_cast %163 : vector<1x18x128xf32> to vector<18x128xf32>
    %165 = arith.mulf %164, %157 : vector<18x128xf32>
    %cst_44 = arith.constant dense<0.000000e+00> : vector<128xf32>
    %166 = vector.multi_reduction <add>, %165, %cst_44 [0] : vector<18x128xf32> to vector<128xf32>
    %167 = vector.shape_cast %166 : vector<128xf32> to vector<1x128xf32>
    %168 = vector.extract_strided_slice %0 {offsets = [2, 0, 0], sizes = [1, 18, 128], strides = [1, 1, 1]} : vector<4x18x128xf32> to vector<1x18x128xf32>
    %169 = vector.shape_cast %168 : vector<1x18x128xf32> to vector<18x128xf32>
    %170 = arith.mulf %169, %157 : vector<18x128xf32>
    %cst_45 = arith.constant dense<0.000000e+00> : vector<128xf32>
    %171 = vector.multi_reduction <add>, %170, %cst_45 [0] : vector<18x128xf32> to vector<128xf32>
    %172 = vector.shape_cast %171 : vector<128xf32> to vector<1x128xf32>
    %173 = vector.extract_strided_slice %0 {offsets = [3, 0, 0], sizes = [1, 18, 128], strides = [1, 1, 1]} : vector<4x18x128xf32> to vector<1x18x128xf32>
    %174 = vector.shape_cast %173 : vector<1x18x128xf32> to vector<18x128xf32>
    %175 = arith.mulf %174, %157 : vector<18x128xf32>
    %cst_46 = arith.constant dense<0.000000e+00> : vector<128xf32>
    %176 = vector.multi_reduction <add>, %175, %cst_46 [0] : vector<18x128xf32> to vector<128xf32>
    %177 = vector.shape_cast %176 : vector<128xf32> to vector<1x128xf32>
    %178 = tpu.concatenate %162, %167, %172, %177 in 0 : vector<1x128xf32>, vector<1x128xf32>, vector<1x128xf32>, vector<1x128xf32> -> vector<4x128xf32>
    %179 = vector.extract_strided_slice %1 {offsets = [1, 0, 0], sizes = [1, 4, 128], strides = [1, 1, 1]} : vector<2x4x128xf32> to vector<1x4x128xf32>
    %180 = vector.shape_cast %179 : vector<1x4x128xf32> to vector<4x128xf32>
    %181 = arith.mulf %178, %180 : vector<4x128xf32>
    %cst_47 = arith.constant 0.353553385 : f32
    %182 = vector.broadcast %cst_47 : f32 to vector<4x128xf32>
    %183 = arith.mulf %181, %182 : vector<4x128xf32>
    %cst_48 = arith.constant dense<0xFF800000> : vector<128xf32>
    %184 = vector.multi_reduction <maximumf>, %183, %cst_48 [0] : vector<4x128xf32> to vector<128xf32>
    %185 = vector.shape_cast %184 : vector<128xf32> to vector<1x128xf32>
    %186 = vector.broadcast %185 : vector<1x128xf32> to vector<4x128xf32>
    %187 = arith.subf %183, %186 : vector<4x128xf32>
    %188 = math.exp %187 : vector<4x128xf32>
    %cst_49 = arith.constant dense<0.000000e+00> : vector<128xf32>
    %189 = vector.multi_reduction <add>, %188, %cst_49 [0] : vector<4x128xf32> to vector<128xf32>
    %190 = vector.shape_cast %189 : vector<128xf32> to vector<1x128xf32>
    %191 = vector.broadcast %190 : vector<1x128xf32> to vector<4x128xf32>
    %192 = arith.divf %188, %191 : vector<4x128xf32>
    %193 = arith.mulf %108, %192 : vector<4x128xf32>
    %cst_50 = arith.constant dense<0.000000e+00> : vector<128xf32>
    %194 = vector.multi_reduction <add>, %193, %cst_50 [0] : vector<4x128xf32> to vector<128xf32>
    %195 = vector.shape_cast %194 : vector<128xf32> to vector<1x128xf32>
    %196 = vector.extract_strided_slice %105 {offsets = [1, 0], sizes = [1, 128], strides = [1, 1]} : vector<2x128xf32> to vector<1x128xf32>
    %197 = arith.mulf %196, %195 : vector<1x128xf32>
    %198 = arith.addf %153, %197 : vector<1x128xf32>
    %199 = vector.extract_strided_slice %5 {offsets = [32, 0], sizes = [8, 128], strides = [1, 1]} : vector<128x128xf32> to vector<8x128xf32>
    %200 = vector.extract_strided_slice %5 {offsets = [40, 0], sizes = [8, 128], strides = [1, 1]} : vector<128x128xf32> to vector<8x128xf32>
    %201 = math.absf %200 : vector<8x128xf32>
    %202 = vector.broadcast %102 : vector<1x128xf32> to vector<8x128xf32>
    %203 = arith.mulf %202, %201 : vector<8x128xf32>
    %204 = arith.addf %199, %203 : vector<8x128xf32>
    %205 = vector.extract_strided_slice %5 {offsets = [48, 0], sizes = [8, 128], strides = [1, 1]} : vector<128x128xf32> to vector<8x128xf32>
    %206 = math.absf %205 : vector<8x128xf32>
    %207 = vector.broadcast %198 : vector<1x128xf32> to vector<8x128xf32>
    %208 = arith.mulf %207, %206 : vector<8x128xf32>
    %209 = arith.addf %204, %208 : vector<8x128xf32>
    %cst_51 = arith.constant 0.000000e+00 : f32
    %210 = vector.broadcast %cst_51 : f32 to vector<8x128xf32>
    %211 = arith.cmpf ogt, %209, %210 : vector<8x128xf32>
    %212 = math.exp %209 : vector<8x128xf32>
    %cst_52 = arith.constant 1.000000e+00 : f32
    %213 = vector.broadcast %cst_52 : f32 to vector<8x128xf32>
    %214 = arith.subf %212, %213 : vector<8x128xf32>
    %215 = arith.select %211, %209, %214 : vector<8x128xi1>, vector<8x128xf32>
    %216 = vector.extract_strided_slice %5 {offsets = [56, 0], sizes = [8, 128], strides = [1, 1]} : vector<128x128xf32> to vector<8x128xf32>
    %217 = math.absf %216 : vector<8x128xf32>
    %218 = arith.mulf %215, %217 : vector<8x128xf32>
    %cst_53 = arith.constant dense<0.000000e+00> : vector<128xf32>
    %219 = vector.multi_reduction <add>, %218, %cst_53 [0] : vector<8x128xf32> to vector<128xf32>
    %220 = vector.shape_cast %219 : vector<128xf32> to vector<1x128xf32>
    %221 = vector.extract_strided_slice %5 {offsets = [96, 0], sizes = [1, 128], strides = [1, 1]} : vector<128x128xf32> to vector<1x128xf32>
    %222 = arith.addf %220, %221 : vector<1x128xf32>
    %c0_54 = arith.constant 0 : index
    %c0_55 = arith.constant 0 : index
    %223 = vector.load %arg7[%c0_54, %c0_55] : memref<1x128xf32, #tpu.memory_space<vmem>>, vector<1x128xf32>
    tpu.vector_store %arg7[%c0_54, %c0_55], %222 {strides = array<i32>} : memref<1x128xf32, #tpu.memory_space<vmem>>, vector<1x128xf32>,
    return
  }
  func.func @transform_0(%arg0: i32) -> (i32, i32, i32) {
    %c0_i32 = arith.constant 0 : i32
    %c0_i32_0 = arith.constant 0 : i32
    %c0_i32_1 = arith.constant 0 : i32
    return %c0_i32, %c0_i32_0, %arg0 : i32, i32, i32
  }
  func.func @transform_1(%arg0: i32) -> (i32, i32, i32) {
    %c0_i32 = arith.constant 0 : i32
    %c0_i32_0 = arith.constant 0 : i32
    %c0_i32_1 = arith.constant 0 : i32
    return %c0_i32, %c0_i32_0, %arg0 : i32, i32, i32
  }
  func.func @transform_2(%arg0: i32) -> (i32, i32, i32) {
    %c0_i32 = arith.constant 0 : i32
    %c0_i32_0 = arith.constant 0 : i32
    %c0_i32_1 = arith.constant 0 : i32
    return %c0_i32, %c0_i32_0, %arg0 : i32, i32, i32
  }
  func.func @transform_3(%arg0: i32) -> (i32, i32, i32) {
    %c0_i32 = arith.constant 0 : i32
    %c0_i32_0 = arith.constant 0 : i32
    %c0_i32_1 = arith.constant 0 : i32
    return %c0_i32, %c0_i32_0, %arg0 : i32, i32, i32
  }
  func.func @transform_4(%arg0: i32) -> (i32, i32) {
    %c0_i32 = arith.constant 0 : i32
    %c0_i32_0 = arith.constant 0 : i32
    return %c0_i32, %arg0 : i32, i32
  }
  func.func @transform_5(%arg0: i32) -> (i32, i32, i32) {
    %c0_i32 = arith.constant 0 : i32
    %c0_i32_0 = arith.constant 0 : i32
    %c0_i32_1 = arith.constant 0 : i32
    %c0_i32_2 = arith.constant 0 : i32
    return %c0_i32, %c0_i32_0, %c0_i32_1 : i32, i32, i32
  }
  func.func @transform_6(%arg0: i32) -> (i32, i32) {
    %c0_i32 = arith.constant 0 : i32
    %c0_i32_0 = arith.constant 0 : i32
    return %c0_i32, %arg0 : i32, i32
  }
}

</mosaic_0001>

<bundles_post_ra>
// kernel: squeeze.17
= control target key start
LH: loop header
LB: loop body
LE: loop exit
PB: predicated region body
PF: predicated region fallthrough
CT: control target
= control target key end

     0   :  { %s85_s0 = inlined_call_operand.vmem [shape: f32[6], index: 0, kind: input, shape index: {}]   ;;  %s86_s1 = inlined_call_operand.hbm [shape: f32[2,3,1], index: 1, kind: output, shape index: {}]  }
   0x1   :  { %v5_v0 = vld [vmem:[%s85_s0] sm:$0x1] }
   0x2   :  { %2 = vsyncpa [#allocation1], 0  ;;  %6 = vst [vmem:[#allocation3] sm:$0x1] %v5_v0  ;;  %vm8_vm0 = vcmask 23552   ;;  %s58_s0 = smov 125  }
   0x3   :  { %s59_s8 = smov [#allocation0]  }
   0x4   :  { %s26_s9 = sshll.u32 %s59_s8, 4  ;;  %s27_s9 = int_to_ptr.vmem [resolvable:$true] %s26_s9 }
   0x5   :  { %s34_s10 = scalar_lea.vmem %s27_s9, 32  ;;  %p39_p1 = scmp.lt.s32.totalorder %s27_s9, %s27_s9 }
   0x6   :  { %p35_p0 = scmp.ne.s32.totalorder %s27_s9, %s34_s10  ;;  %p40_p2 = scmp.lt.s32.totalorder %s34_s10, %s34_s10 }
   0x8   :  { %p41_p3 = por %p40_p2, %p39_p1 }
   0x9   :  { %v10_v1 = vld [vmem:[#allocation3] sm:$0x1]  }
   0xa   :  { %v7_v2 = vld [vmem:[#allocation3] sm:$0x1]   ;;  %11 = vrot.lane.b32.xlu0 %v10_v1, %s58_s0  ;;  %p42_p4 = pnand %p41_p3, %p35_p0 }
   0xb   :  { %9 = vst.msk [vmem:[#allocation2] sm:$0x1] %vm8_vm0, %v7_v2  }
  0x7c   :  { %v12_v3 = vpop.permute.xlu0 %11  }
  0x7d   :  { %15 = vst.msk [vmem:[#allocation2 + $0x1] sm:$0x1] %vm8_vm0, %v12_v3  }
  0x84   :  { %v19_v4 = vld [vmem:[#allocation2] sm:$0x3] }
  0x85   :  { %21 = vst [vmem:[#allocation0] sm:$0x3] %v19_v4 }
  0x86   :  { %45 = shalt.err (!%p42_p4)
}
  0x87   :  { %s46_s13 = scalar_lea.hbm %s86_s1, 32 }
  0x88   :  { %p47_p5 = scmp.ne.s32.totalorder %s86_s1, %s46_s13  ;;  %p50_p6 = scmp.lt.u32.totalorder %s46_s13, %s86_s1 }
  0x8a   :  { %p52_p7 = pnand %p50_p6, %p47_p5 }
  0x8c   :  { %55 = shalt.err (!%p52_p7)
}
  0x8d   :  { %29 = dma.vmem_to_hbm [thread:$0]  %s27_s9, 32, %s86_s1, [#allocation1]  }
  0x8e   :  { %56 = dma.done.wait [#allocation1], 32  }
  0x8f   :  { %57 = vsyncadd [#allocation1], 4294967264 }
  0x90   :  { %31 = vsyncpa [#allocation1], 1 }

// kernel: gattenmixer_forward.3
= control target key start
LH: loop header
LB: loop body
LE: loop exit
PB: predicated region body
PF: predicated region fallthrough
CT: control target
= control target key end

     0   :  { %v890_v0 = vmov 0.0   ;;  %vm67_vm0 = vcmask 64512   ;;  %vm891_vm1 = vmmov 0   ;;  %vm161_vm2 = vcmask 1041408   ;;  %s1242_s4 = inlined_call_operand.vmem [shape: f32[128,128], index: 4, kind: input, shape index: {}]   ;;  %s1243_s5 = inlined_call_operand.vmem [shape: f32[4,18,8], index: 5, kind: input, shape index: {}]   ;;  %s1244_s0 = inlined_call_operand.vmem [shape: f32[4,18,128], index: 0, kind: input, shape index: {}]   ;;  %s1245_s1 = inlined_call_operand.vmem [shape: f32[2,4,128], index: 1, kind: input, shape index: {}]   ;;  %s1246_s2 = inlined_call_operand.vmem [shape: f32[1,4,128], index: 2, kind: input, shape index: {}]   ;;  %s1247_s3 = inlined_call_operand.vmem [shape: f32[2,4,128], index: 3, kind: input, shape index: {}]   ;;  %s1248_s6 = inlined_call_operand.vmem [shape: f32[1,128], index: 6, kind: output, shape index: {}]  }
   0x1   :  { %826 = vmatprep.subr.mxu0 %v890_v0  ;;  %837 = vmatprep.subr.mxu1 %v890_v0  ;;  %v40_v1 = vld [vmem:[%s1242_s4] sm:$0xff]  ;;  %v41_v2 = vld [vmem:[%s1242_s4 + $0x8] sm:$0xff]  ;;  %v56_v4 = vld [vmem:[%s1243_s5 + $0x18] sm:$0xff]  ;;  %vm206_vm3 = vcmask 1040384   ;;  %vm209_vm4 = vcmask 1042432   ;;  %vm213_vm5 = vcmask 1043456  }
   0x2   :  { %v53_v3 = vld [vmem:[%s1243_s5] sm:$0xff]  ;;  %827 = vmatpush3.msra.mxu0 %v40_v1  ;;  %828 = vmatprep.mubr.msk.f32.mxu0 %vm891_vm1, %v890_v0  ;;  %v42_v5 = vld [vmem:[%s1242_s4 + $0x10] sm:$0xff]  ;;  %v43_v6 = vld [vmem:[%s1242_s4 + $0x18] sm:$0xff] }
   0x3   :  { %838 = vmatpush3.msra.mxu1 %v41_v2  ;;  %839 = vmatprep.mubr.msk.f32.mxu1 %vm891_vm1, %v890_v0  ;;  %v54_v7 = vld [vmem:[%s1243_s5 + $0x8] sm:$0xff]  ;;  %v57_v8 = vld [vmem:[%s1243_s5 + $0x20] sm:$0xff]  ;;  %v55_v9 = vld [vmem:[%s1243_s5 + $0x10] sm:$0x3] }
   0x4   :  { %829 = vmatmul.mubr.msk.f32.vlgmr.msra.gmra.mrb[0].mxu0 %vm67_vm0, %v53_v3  ;;  %840 = vmatmul.mubr.msk.f32.vlgmr.msra.gmra.mrb[0].mxu1 %vm67_vm0, %v56_v4  ;;  %v58_v10 = vld [vmem:[%s1243_s5 + $0x28] sm:$0x3]  ;;  %v59_v11 = vld [vmem:[%s1243_s5 + $0x30] sm:$0xff]  ;;  %v60_v13 = vld [vmem:[%s1243_s5 + $0x38] sm:$0xff] }
   0x5   :  { %848 = vmatprep.subr.mxu0 %v890_v0  ;;  %859 = vmatprep.subr.mxu1 %v890_v0  ;;  %v62_v12 = vld [vmem:[%s1243_s5 + $0x48] sm:$0xff]  ;;  %v63_v14 = vld [vmem:[%s1243_s5 + $0x50] sm:$0xff]  ;;  %v61_v15 = vld [vmem:[%s1243_s5 + $0x40] sm:$0x3] }
   0x6   :  { %849 = vmatpush3.msra.mxu0 %v42_v5  ;;  %860 = vmatpush3.msra.mxu1 %v43_v6  ;;  %v64_v16 = vld [vmem:[%s1243_s5 + $0x58] sm:$0x3]  ;;  %v1002_v17 = vld [vmem:[%s1244_s0] sm:$0xff]  ;;  %v1012_v19 = vld [vmem:[%s1244_s0 + $0x30] sm:$0xff] }
   0x7   :  { %831 = vmatprep.mubr.msk.f32.mxu0 %vm891_vm1, %v890_v0  ;;  %842 = vmatprep.mubr.msk.f32.mxu1 %vm891_vm1, %v890_v0  ;;  %v1007_v18 = vld [vmem:[%s1244_s0 + $0x18] sm:$0xff]  ;;  %v1017_v20 = vld [vmem:[%s1244_s0 + $0x48] sm:$0xff]  ;;  %v1027_v26 = vld [vmem:[%s1244_s0 + $0x20] sm:$0xff] }
   0x8   :  { %832 = vmatmul.mubr.msk.f32.gmra.mrb[2].mxu0 %vm67_vm0, %v54_v7  ;;  %843 = vmatmul.mubr.msk.f32.gmra.mrb[2].mxu1 %vm67_vm0, %v57_v8  ;;  %v1022_v25 = vld [vmem:[%s1244_s0 + $0x8] sm:$0xff]  ;;  %v1032_v27 = vld [vmem:[%s1244_s0 + $0x38] sm:$0xff]  ;;  %v1037_v28 = vld [vmem:[%s1244_s0 + $0x50] sm:$0xff] }
   0x9   :  { %834 = vmatprep.mubr.msk.f32.mxu0 %vm891_vm1, %v890_v0  ;;  %845 = vmatprep.mubr.msk.f32.mxu1 %vm891_vm1, %v890_v0  ;;  %v1054_v45 = vld [vmem:[%s1244_s0 + $0x10] sm:$0x3]  ;;  %v1063_v50 = vld [vmem:[%s1244_s0 + $0x28] sm:$0x3]  ;;  %v1068_v51 = vld [vmem:[%s1244_s0 + $0x40] sm:$0x3] }
   0xa   :  { %v1073_v52 = vld [vmem:[%s1244_s0 + $0x58] sm:$0x3] }
   0xc   :  { %835 = vmatmul.mubr.msk.f32.gmra.mrb[4].mxu0 %vm67_vm0, %v55_v9  ;;  %846 = vmatmul.mubr.msk.f32.gmra.mrb[4].mxu1 %vm67_vm0, %v58_v10 }
   0xd   :  { %850 = vmatprep.mubr.msk.f32.mxu0 %vm891_vm1, %v890_v0  ;;  %861 = vmatprep.mubr.msk.f32.mxu1 %vm891_vm1, %v890_v0 }
  0x10   :  { %851 = vmatmul.mubr.msk.f32.vlgmr.msra.gmra.mrb[6].mxu0 %vm67_vm0, %v59_v11  ;;  %862 = vmatmul.mubr.msk.f32.vlgmr.msra.gmra.mrb[6].mxu1 %vm67_vm0, %v62_v12 }
  0x11   :  { %853 = vmatprep.mubr.msk.f32.mxu0 %vm891_vm1, %v890_v0  ;;  %864 = vmatprep.mubr.msk.f32.mxu1 %vm891_vm1, %v890_v0 }
  0x14   :  { %854 = vmatmul.mubr.msk.f32.gmra.mrb[8].mxu0 %vm67_vm0, %v60_v13  ;;  %865 = vmatmul.mubr.msk.f32.gmra.mrb[8].mxu1 %vm67_vm0, %v63_v14 }
  0x15   :  { %856 = vmatprep.mubr.msk.f32.mxu0 %vm891_vm1, %v890_v0  ;;  %867 = vmatprep.mubr.msk.f32.mxu1 %vm891_vm1, %v890_v0 }
  0x18   :  { %857 = vmatmul.mubr.msk.f32.gmra.mrb[10].mxu0 %vm67_vm0, %v61_v15  ;;  %868 = vmatmul.mubr.msk.f32.gmra.mrb[10].mxu1 %vm67_vm0, %v64_v16 }
  0xd7   :  { %v143_v21 = vpop.f32.mrb[0].mxu0  ;;  %v318_v22 = vpop.f32.mrb[0].mxu1 }
  0xd8   :  { %v830_v23 = vpop.f32.mrb[1].mxu0  ;;  %v841_v24 = vpop.f32.mrb[1].mxu1  ;;  %v157_v29 = vmul.f32 %v143_v21, %v1002_v17  ;;  %v170_v30 = vmul.f32 %v143_v21, %v1007_v18  ;;  %v182_v31 = vmul.f32 %v143_v21, %v1012_v19  ;;  %v194_v32 = vmul.f32 %v143_v21, %v1017_v20 }
  0xd9   :  { %v332_v33 = vmul.f32 %v318_v22, %v1002_v17  ;;  %v344_v34 = vmul.f32 %v318_v22, %v1007_v18  ;;  %v356_v35 = vmul.f32 %v318_v22, %v1012_v19  ;;  %v368_v36 = vmul.f32 %v318_v22, %v1017_v20 }
  0xdb   :  { %v148_v37 = vpop.f32.mrb[2].mxu0  ;;  %v323_v38 = vpop.f32.mrb[2].mxu1 }
  0xdc   :  { %v158_v39 = vmul.f32 %v148_v37, %v1022_v25  ;;  %v171_v40 = vmul.f32 %v148_v37, %v1027_v26  ;;  %v183_v41 = vmul.f32 %v148_v37, %v1032_v27  ;;  %v195_v42 = vmul.f32 %v148_v37, %v1037_v28  ;;  %v833_v43 = vpop.f32.mrb[3].mxu0  ;;  %v844_v44 = vpop.f32.mrb[3].mxu1 }
  0xdd   :  { %v333_v46 = vmul.f32 %v323_v38, %v1022_v25  ;;  %v345_v47 = vmul.f32 %v323_v38, %v1027_v26  ;;  %v357_v48 = vmul.f32 %v323_v38, %v1032_v27  ;;  %v369_v49 = vmul.f32 %v323_v38, %v1037_v28 }
  0xde   :  { %v160_v53 = vadd.f32 %v158_v39, %v157_v29  ;;  %v173_v54 = vadd.f32 %v171_v40, %v170_v30  ;;  %v185_v55 = vadd.f32 %v183_v41, %v182_v31  ;;  %v197_v56 = vadd.f32 %v195_v42, %v194_v32 }
  0xdf   :  { %v335_v57 = vadd.f32 %v333_v46, %v332_v33  ;;  %v347_v58 = vadd.f32 %v345_v47, %v344_v34  ;;  %v359_v59 = vadd.f32 %v357_v48, %v356_v35  ;;  %v371_v60 = vadd.f32 %v369_v49, %v368_v36  ;;  %v153_v61 = vpop.f32.mrb[4].mxu0  ;;  %v328_v62 = vpop.f32.mrb[4].mxu1 }
  0xe0   :  { %v159_v63 = vmul.f32 %v153_v61, %v1054_v45  ;;  %v172_v0 = vmul.f32 %v153_v61, %v1063_v50  ;;  %v184_v1 = vmul.f32 %v153_v61, %v1068_v51  ;;  %v196_v2 = vmul.f32 %v153_v61, %v1073_v52  ;;  %v836_v3 = vpop.f32.mrb[5].mxu0  ;;  %v847_v4 = vpop.f32.mrb[5].mxu1 }
  0xe1   :  { %v334_v5 = vmul.f32 %v328_v62, %v1054_v45  ;;  %v346_v6 = vmul.f32 %v328_v62, %v1063_v50  ;;  %v358_v7 = vmul.f32 %v328_v62, %v1068_v51  ;;  %v370_v8 = vmul.f32 %v328_v62, %v1073_v52 }
  0xe2   :  { %v162_v9 = vsel %vm161_vm2, %v159_v63, 0.0  ;;  %v174_v10 = vsel %vm161_vm2, %v172_v0, 0.0  ;;  %v186_v11 = vsel %vm161_vm2, %v184_v1, 0.0  ;;  %v198_v12 = vsel %vm161_vm2, %v196_v2, 0.0 }
  0xe3   :  { %v163_v13 = vadd.f32 %v162_v9, %v160_v53  ;;  %v175_v14 = vadd.f32 %v174_v10, %v173_v54  ;;  %v187_v15 = vadd.f32 %v186_v11, %v185_v55  ;;  %v199_v16 = vadd.f32 %v198_v12, %v197_v56  ;;  %v1087_v21 = vpop.f32.mrb[6].mxu0  ;;  %v1089_v22 = vpop.f32.mrb[6].mxu1 }
  0xe4   :  { %v336_v23 = vsel %vm161_vm2, %v334_v5, 0.0  ;;  %v348_v24 = vsel %vm161_vm2, %v346_v6, 0.0  ;;  %v360_v29 = vsel %vm161_vm2, %v358_v7, 0.0  ;;  %v372_v30 = vsel %vm161_vm2, %v370_v8, 0.0  ;;  %v852_v31 = vpop.f32.mrb[7].mxu0  ;;  %v863_v32 = vpop.f32.mrb[7].mxu1 }
  0xe5   :  { %v164_v33 = vrot.slane %v163_v13, 4  ;;  %v176_v34 = vrot.slane %v175_v14, 4  ;;  %v188_v35 = vrot.slane %v187_v15, 4  ;;  %v200_v36 = vrot.slane %v199_v16, 4 }
  0xe6   :  { %v337_v37 = vadd.f32 %v336_v23, %v335_v57  ;;  %v349_v38 = vadd.f32 %v348_v24, %v347_v58  ;;  %v361_v39 = vadd.f32 %v360_v29, %v359_v59  ;;  %v373_v40 = vadd.f32 %v372_v30, %v371_v60 }
  0xe7   :  { %v165_v41 = vadd.f32 %v164_v33, %v163_v13  ;;  %v177_v42 = vadd.f32 %v176_v34, %v175_v14  ;;  %v189_v43 = vadd.f32 %v188_v35, %v187_v15  ;;  %v201_v44 = vadd.f32 %v200_v36, %v199_v16  ;;  %v1095_v46 = vpop.f32.mrb[8].mxu0  ;;  %v1097_v47 = vpop.f32.mrb[8].mxu1 }
  0xe8   :  { %v338_v48 = vrot.slane %v337_v37, 4  ;;  %v350_v49 = vrot.slane %v349_v38, 4  ;;  %v362_v53 = vrot.slane %v361_v39, 4  ;;  %v374_v54 = vrot.slane %v373_v40, 4  ;;  %v855_v55 = vpop.f32.mrb[9].mxu0  ;;  %v866_v56 = vpop.f32.mrb[9].mxu1 }
  0xe9   :  { %v166_v61 = vrot.slane %v165_v41, 2  ;;  %v178_v57 = vrot.slane %v177_v42, 2  ;;  %v190_v58 = vrot.slane %v189_v43, 2  ;;  %v202_v59 = vrot.slane %v201_v44, 2 }
  0xea   :  { %v339_v60 = vadd.f32 %v338_v48, %v337_v37  ;;  %v351_v62 = vadd.f32 %v350_v49, %v349_v38  ;;  %v363_v63 = vadd.f32 %v362_v53, %v361_v39  ;;  %v375_v0 = vadd.f32 %v374_v54, %v373_v40  ;;  %v35_v39 = vld [vmem:[%s1245_s1] sm:$0xf] }
  0xeb   :  { %v167_v1 = vadd.f32 %v166_v61, %v165_v41  ;;  %v179_v2 = vadd.f32 %v178_v57, %v177_v42  ;;  %v191_v3 = vadd.f32 %v190_v58, %v189_v43  ;;  %v203_v4 = vadd.f32 %v202_v59, %v201_v44  ;;  %v1099_v5 = vpop.f32.mrb[10].mxu0  ;;  %v1101_v6 = vpop.f32.mrb[10].mxu1 }
  0xec   :  { %v340_v7 = vrot.slane %v339_v60, 2  ;;  %v352_v8 = vrot.slane %v351_v62, 2  ;;  %v364_v9 = vrot.slane %v363_v63, 2  ;;  %v376_v10 = vrot.slane %v375_v0, 2  ;;  %v858_v11 = vpop.f32.mrb[11].mxu0  ;;  %v869_v12 = vpop.f32.mrb[11].mxu1 }
  0xed   :  { %v168_v13 = vrot.slane %v167_v1, 1  ;;  %v180_v14 = vrot.slane %v179_v2, 1  ;;  %v192_v15 = vrot.slane %v191_v3, 1  ;;  %v204_v16 = vrot.slane %v203_v4, 1 }
  0xee   :  { %v341_v23 = vadd.f32 %v340_v7, %v339_v60  ;;  %v353_v24 = vadd.f32 %v352_v8, %v351_v62  ;;  %v365_v29 = vadd.f32 %v364_v9, %v363_v63  ;;  %v377_v30 = vadd.f32 %v376_v10, %v375_v0 }
  0xef   :  { %v169_v31 = vadd.f32 %v168_v13, %v167_v1  ;;  %v181_v32 = vadd.f32 %v180_v14, %v179_v2  ;;  %v193_v33 = vadd.f32 %v192_v15, %v191_v3  ;;  %v205_v34 = vadd.f32 %v204_v16, %v203_v4 }
  0xf0   :  { %v342_v35 = vrot.slane %v341_v23, 1  ;;  %v354_v36 = vrot.slane %v353_v24, 1  ;;  %v366_v37 = vrot.slane %v365_v29, 1  ;;  %v378_v38 = vrot.slane %v377_v30, 1 }
  0xf1   :  { %v207_v40 = vsel %vm206_vm3, %v169_v31, %v181_v32  ;;  %v508_v41 = vmul.f32 %v1087_v21, %v1002_v17  ;;  %v520_v42 = vmul.f32 %v1087_v21, %v1007_v18  ;;  %v532_v43 = vmul.f32 %v1087_v21, %v1012_v19 }
  0xf2   :  { %v208_v44 = vsel %vm161_vm2, %v207_v40, %v193_v33  ;;  %v343_v48 = vadd.f32 %v342_v35, %v341_v23  ;;  %v355_v49 = vadd.f32 %v354_v36, %v353_v24  ;;  %v367_v53 = vadd.f32 %v366_v37, %v365_v29 }
  0xf3   :  { %v210_v54 = vsel %vm209_vm4, %v208_v44, %v205_v34  ;;  %v379_v55 = vadd.f32 %v378_v38, %v377_v30  ;;  %v544_v56 = vmul.f32 %v1087_v21, %v1017_v20  ;;  %v679_v61 = vmul.f32 %v1089_v22, %v1002_v17 }
  0xf4   :  { %v211_v57 = vmul.f32 %v210_v54, %v35_v39  ;;  %v380_v58 = vsel %vm206_vm3, %v343_v48, %v355_v49  ;;  %v691_v59 = vmul.f32 %v1089_v22, %v1007_v18  ;;  %v703_v60 = vmul.f32 %v1089_v22, %v1012_v19 }
  0xf5   :  { %v381_v62 = vsel %vm161_vm2, %v380_v58, %v367_v53  ;;  %v715_v63 = vmul.f32 %v1089_v22, %v1017_v20  ;;  %v509_v21 = vmul.f32 %v1095_v46, %v1022_v25  ;;  %v521_v17 = vmul.f32 %v1095_v46, %v1027_v26 }
  0xf6   :  { %v1131_v0 = vmul.f32 0.35355338, %v211_v57  ;;  %v382_v1 = vsel %vm209_vm4, %v381_v62, %v379_v55  ;;  %v533_v18 = vmul.f32 %v1095_v46, %v1032_v27  ;;  %v545_v19 = vmul.f32 %v1095_v46, %v1037_v28 }
  0xf7   :  { %v383_v2 = vmul.f32 %v382_v1, %v35_v39  ;;  %v511_v3 = vadd.f32 %v509_v21, %v508_v41  ;;  %v523_v4 = vadd.f32 %v521_v17, %v520_v42  ;;  %v680_v20 = vmul.f32 %v1097_v47, %v1022_v25 }
  0xf8   :  { %v214_v22 = vsel %vm213_vm5, %v1131_v0, -inf  ;;  %v535_v7 = vadd.f32 %v533_v18, %v532_v43  ;;  %v547_v8 = vadd.f32 %v545_v19, %v544_v56  ;;  %v692_v9 = vmul.f32 %v1097_v47, %v1027_v26 }
  0xf9   :  { %v215_v10 = vrot.slane %v214_v22, 4  ;;  %v1144_v11 = vmul.f32 0.35355338, %v383_v2  ;;  %v682_v12 = vadd.f32 %v680_v20, %v679_v61  ;;  %v704_v46 = vmul.f32 %v1097_v47, %v1032_v27 }
  0xfa   :  { %v694_v13 = vadd.f32 %v692_v9, %v691_v59  ;;  %v716_v14 = vmul.f32 %v1097_v47, %v1037_v28  ;;  %v510_v25 = vmul.f32 %v1099_v5, %v1054_v45  ;;  %v522_v15 = vmul.f32 %v1099_v5, %v1063_v50 }
  0xfb   :  { %v216_v16 = vmax.f32 %v214_v22, %v215_v10  ;;  %v385_v26 = vsel %vm213_vm5, %v1144_v11, -inf  ;;  %v1156_v23 = vadd.f32 %v704_v46, %v703_v60  ;;  %v534_v24 = vmul.f32 %v1099_v5, %v1068_v51 }
  0xfc   :  { %v386_v27 = vrot.slane %v385_v26, 4  ;;  %v1160_v29 = vadd.f32 %v716_v14, %v715_v63  ;;  %v512_v28 = vsel %vm161_vm2, %v510_v25, 0.0  ;;  %v524_v47 = vsel %vm161_vm2, %v522_v15, 0.0 }
  0xfd   :  { %v217_v30 = vrot.slane %v216_v16, 2  ;;  %v513_v31 = vadd.f32 %v512_v28, %v511_v3  ;;  %v525_v32 = vadd.f32 %v524_v47, %v523_v4  ;;  %v536_v33 = vsel %vm161_vm2, %v534_v24, 0.0 }
  0xfe   :  { %v387_v34 = vmax.f32 %v385_v26, %v386_v27  ;;  %v537_v35 = vadd.f32 %v536_v33, %v535_v7  ;;  %v546_v36 = vmul.f32 %v1099_v5, %v1073_v52  ;;  %v681_v37 = vmul.f32 %v1101_v6, %v1054_v45  ;;  %v36_v33 = vld [vmem:[%s1245_s1 + $0x4] sm:$0xf] }
  0xff   :  { %v218_v38 = vmax.f32 %v216_v16, %v217_v30  ;;  %v514_v39 = vrot.slane %v513_v31, 4  ;;  %v526_v40 = vrot.slane %v525_v32, 4  ;;  %v693_v41 = vmul.f32 %v1101_v6, %v1063_v50 }
 0x100   :  { %v388_v42 = vrot.slane %v387_v34, 2  ;;  %v538_v43 = vrot.slane %v537_v35, 4  ;;  %v548_v44 = vsel %vm161_vm2, %v546_v36, 0.0  ;;  %v683_v48 = vsel %vm161_vm2, %v681_v37, 0.0 }
 0x101   :  { %v219_v49 = vrot.slane %v218_v38, 1  ;;  %v515_v53 = vadd.f32 %v514_v39, %v513_v31  ;;  %v527_v54 = vadd.f32 %v526_v40, %v525_v32  ;;  %v549_v55 = vadd.f32 %v548_v44, %v547_v8 }
 0x102   :  { %v389_v5 = vmax.f32 %v387_v34, %v388_v42  ;;  %v539_v56 = vadd.f32 %v538_v43, %v537_v35  ;;  %v684_v61 = vadd.f32 %v683_v48, %v682_v12  ;;  %v695_v45 = vsel %vm161_vm2, %v693_v41, 0.0 }
 0x103   :  { %v220_v57 = vmax.f32 %v218_v38, %v219_v49  ;;  %v516_v58 = vrot.slane %v515_v53, 2  ;;  %v528_v59 = vrot.slane %v527_v54, 2  ;;  %v550_v60 = vrot.slane %v549_v55, 4 }
 0x104   :  { %v390_v50 = vrot.slane %v389_v5, 1  ;;  %v540_v62 = vrot.slane %v539_v56, 2  ;;  %v685_v63 = vrot.slane %v684_v61, 4  ;;  %v696_v21 = vadd.f32 %v695_v45, %v694_v13 }
 0x105   :  { %v221_v17 = vsub.f32 %v1131_v0, %v220_v57  ;;  %v517_v1 = vadd.f32 %v516_v58, %v515_v53  ;;  %v529_v18 = vadd.f32 %v528_v59, %v527_v54  ;;  %v551_v19 = vadd.f32 %v550_v60, %v549_v55 }
 0x106   :  { %v391_v2 = vmax.f32 %v389_v5, %v390_v50  ;;  %v541_v3 = vadd.f32 %v540_v62, %v539_v56  ;;  %v686_v4 = vadd.f32 %v685_v63, %v684_v61  ;;  %v697_v20 = vrot.slane %v696_v21, 4 }
 0x107   :  { %v222_v22 = vmul.f32 1.442695, %v221_v17  ;;  %v518_v7 = vrot.slane %v517_v1, 1  ;;  %v530_v8 = vrot.slane %v529_v18, 1  ;;  %v552_v9 = vrot.slane %v551_v19, 2 }
 0x108   :  { %v392_v10 = vsub.f32 %v1144_v11, %v391_v2  ;;  %v542_v12 = vrot.slane %v541_v3, 1  ;;  %v687_v46 = vrot.slane %v686_v4, 2  ;;  %v698_v14 = vadd.f32 %v697_v20, %v696_v21 }
 0x109   :  { %872 = vpow2.f32 %v222_v22  ;;  %v519_v13 = vadd.f32 %v518_v7, %v517_v1  ;;  %v531_v25 = vadd.f32 %v530_v8, %v529_v18  ;;  %v553_v0 = vadd.f32 %v552_v9, %v551_v19 }
 0x10a   :  { %v393_v15 = vmul.f32 1.442695, %v392_v10  ;;  %v543_v16 = vadd.f32 %v542_v12, %v541_v3  ;;  %v688_v26 = vadd.f32 %v687_v46, %v686_v4  ;;  %v699_v24 = vrot.slane %v698_v14, 2 }
 0x10b   :  { %v554_v27 = vrot.slane %v553_v0, 1  ;;  %v556_v28 = vsel %vm206_vm3, %v519_v13, %v531_v25  ;;  %v705_v47 = vmul.f32 %v1101_v6, %v1068_v51  ;;  %v717_v11 = vmul.f32 %v1101_v6, %v1073_v52 }
 0x10c   :  { %874 = vpow2.f32 %v393_v15  ;;  %v557_v30 = vsel %vm161_vm2, %v556_v28, %v543_v16  ;;  %v689_v31 = vrot.slane %v688_v26, 1  ;;  %v700_v32 = vadd.f32 %v699_v24, %v698_v14  ;;  %v38_v28 = vld [vmem:[%s1247_s3] sm:$0xf] }
 0x10d   :  { %v555_v34 = vadd.f32 %v554_v27, %v553_v0  ;;  %v707_v35 = vsel %vm161_vm2, %v705_v47, 0.0  ;;  %v719_v36 = vsel %vm161_vm2, %v717_v11, 0.0  ;;  %v37_v27 = vld [vmem:[%s1246_s2] sm:$0xf] }
 0x10e   :  { %v690_v37 = vadd.f32 %v689_v31, %v688_v26  ;;  %v701_v38 = vrot.slane %v700_v32, 1  ;;  %v708_v51 = vadd.f32 %v707_v35, %v1156_v23  ;;  %v720_v52 = vadd.f32 %v719_v36, %v1160_v29 }
 0x10f   :  { %v558_v6 = vsel %vm209_vm4, %v557_v30, %v555_v34  ;;  %v66_v30 = vmul.f32 %v38_v28, %v37_v27 }
 0x110   :  { %v559_v39 = vmul.f32 %v558_v6, %v36_v33  ;;  %v702_v40 = vadd.f32 %v701_v38, %v700_v32  ;;  %v709_v41 = vrot.slane %v708_v51, 4  ;;  %v721_v42 = vrot.slane %v720_v52, 4 }
 0x112   :  { %v560_v43 = vmul.f32 0.35355338, %v559_v39  ;;  %v710_v44 = vadd.f32 %v709_v41, %v708_v51  ;;  %v722_v48 = vadd.f32 %v721_v42, %v720_v52  ;;  %v727_v49 = vsel %vm206_vm3, %v690_v37, %v702_v40 }
 0x113   :  { %v873_v53 = vpop.eup %872 }
 0x114   :  { %v224_v54 = vsel %vm213_vm5, %v873_v53, 0.0  ;;  %v561_v55 = vsel %vm213_vm5, %v560_v43, -inf  ;;  %v711_v5 = vrot.slane %v710_v44, 2  ;;  %v723_v23 = vrot.slane %v722_v48, 2 }
 0x115   :  { %v225_v56 = vrot.slane %v224_v54, 4  ;;  %v562_v29 = vrot.slane %v561_v55, 4 }
 0x116   :  { %v875_v61 = vpop.eup %874  ;;  %v712_v45 = vadd.f32 %v711_v5, %v710_v44  ;;  %v724_v57 = vadd.f32 %v723_v23, %v722_v48 }
 0x117   :  { %v226_v58 = vadd.f32 %v225_v56, %v224_v54  ;;  %v395_v59 = vsel %vm213_vm5, %v875_v61, 0.0  ;;  %v563_v60 = vmax.f32 %v561_v55, %v562_v29  ;;  %v48_v55 = vld [vmem:[%s1242_s4 + $0x40] sm:$0xff] }
 0x118   :  { %v396_v50 = vrot.slane %v395_v59, 4  ;;  %v713_v62 = vrot.slane %v712_v45, 1  ;;  %v725_v63 = vrot.slane %v724_v57, 1 }
 0x119   :  { %v227_v21 = vrot.slane %v226_v58, 2  ;;  %v564_v17 = vrot.slane %v563_v60, 2 }
 0x11a   :  { %v397_v1 = vadd.f32 %v396_v50, %v395_v59  ;;  %v714_v18 = vadd.f32 %v713_v62, %v712_v45  ;;  %v726_v3 = vadd.f32 %v725_v63, %v724_v57  ;;  %v50_v63 = vld [vmem:[%s1242_s4 + $0x50] sm:$0xff] }
 0x11b   :  { %v228_v19 = vadd.f32 %v227_v21, %v226_v58  ;;  %v565_v2 = vmax.f32 %v563_v60, %v564_v17 }
 0x11c   :  { %v398_v4 = vrot.slane %v397_v1, 2  ;;  %v728_v20 = vsel %vm161_vm2, %v727_v49, %v714_v18 }
 0x11d   :  { %v229_v22 = vrot.slane %v228_v19, 1  ;;  %v566_v7 = vrot.slane %v565_v2, 1  ;;  %v729_v8 = vsel %vm209_vm4, %v728_v20, %v726_v3  ;;  %v39_v20 = vld [vmem:[%s1247_s3 + $0x4] sm:$0xf] }
 0x11e   :  { %v399_v9 = vadd.f32 %v398_v4, %v397_v1  ;;  %v730_v10 = vmul.f32 %v729_v8, %v36_v33 }
 0x11f   :  { %v230_v12 = vadd.f32 %v229_v22, %v228_v19  ;;  %v567_v46 = vmax.f32 %v565_v2, %v566_v7 }
 0x120   :  { %v400_v14 = vrot.slane %v399_v9, 1  ;;  %v731_v13 = vmul.f32 0.35355338, %v730_v10 }
 0x121   :  { %876 = vrcp.f32 %v230_v12  ;;  %v568_v25 = vsub.f32 %v560_v43, %v567_v46 }
 0x122   :  { %v401_v0 = vadd.f32 %v400_v14, %v399_v9  ;;  %v732_v15 = vsel %vm213_vm5, %v731_v13, -inf  ;;  %v418_v9 = vmul.f32 %v39_v20, %v37_v27 }
 0x123   :  { %v569_v16 = vmul.f32 1.442695, %v568_v25  ;;  %v733_v26 = vrot.slane %v732_v15, 4 }
 0x124   :  { %878 = vrcp.f32 %v401_v0 }
 0x125   :  { %880 = vpow2.f32 %v569_v16  ;;  %v734_v24 = vmax.f32 %v732_v15, %v733_v26 }
 0x127   :  { %v735_v47 = vrot.slane %v734_v24, 2 }
 0x129   :  { %v736_v11 = vmax.f32 %v734_v24, %v735_v47 }
 0x12b   :  { %v877_v31 = vpop.eup %876  ;;  %v737_v32 = vrot.slane %v736_v11, 1 }
 0x12c   :  { %v232_v33 = vmul.f32 %v877_v31, %v873_v53 }
 0x12d   :  { %v738_v34 = vmax.f32 %v736_v11, %v737_v32  ;;  %v49_v32 = vld [vmem:[%s1242_s4 + $0x48] sm:$0xff] }
 0x12e   :  { %v879_v35 = vpop.eup %878  ;;  %v233_v36 = vmul.f32 %v232_v33, %v66_v30 }
 0x12f   :  { %v881_v37 = vpop.eup %880  ;;  %v403_v38 = vmul.f32 %v879_v35, %v875_v61  ;;  %v739_v51 = vsub.f32 %v731_v13, %v738_v34  ;;  %v65_v61 = vand.u32 2147483647, %v48_v55  ;;  %v417_v35 = vand.u32 2147483647, %v49_v32 }
 0x130   :  { %v234_v52 = vsel %vm213_vm5, %v233_v36, 0.0  ;;  %v571_v6 = vsel %vm213_vm5, %v881_v37, 0.0 }
 0x131   :  { %v235_v39 = vrot.slane %v234_v52, 4  ;;  %v404_v40 = vmul.f32 %v403_v38, %v66_v30  ;;  %v572_v41 = vrot.slane %v571_v6, 4  ;;  %v740_v42 = vmul.f32 1.442695, %v739_v51 }
 0x132   :  { %v765_v30 = vlaneseq }
 0x133   :  { %v236_v43 = vadd.f32 %v235_v39, %v234_v52  ;;  %v405_v44 = vsel %vm213_vm5, %v404_v40, 0.0  ;;  %v573_v48 = vadd.f32 %v572_v41, %v571_v6  ;;  %882 = vpow2.f32 %v740_v42  ;;  %v45_v39 = vld [vmem:[%s1242_s4 + $0x28] sm:$0xff]  ;;  %v51_v40 = vld [vmem:[%s1242_s4 + $0x58] sm:$0xff] }
 0x134   :  { %v406_v49 = vrot.slane %v405_v44, 4  ;;  %v766_v34 = vshrl.u32 %v765_v30, 7  ;;  %v764_v42 = vand.u32 2147483647, %v45_v39 }
 0x135   :  { %v237_v53 = vrot.slane %v236_v43, 2  ;;  %v574_v54 = vrot.slane %v573_v48, 2 }
 0x136   :  { %v407_v5 = vadd.f32 %v406_v49, %v405_v44  ;;  %v767_v51 = vsub.s32 0, %v766_v34  ;;  %v46_v49 = vld [vmem:[%s1242_s4 + $0x30] sm:$0xff] }
 0x137   :  { %v238_v23 = vadd.f32 %v237_v53, %v236_v43  ;;  %v575_v56 = vadd.f32 %v574_v54, %v573_v48 }
 0x138   :  { %v408_v29 = vrot.slane %v407_v5, 2 }
 0x139   :  { %v239_v45 = vrot.slane %v238_v23, 1  ;;  %v576_v57 = vrot.slane %v575_v56, 1 }
 0x13a   :  { %v409_v58 = vadd.f32 %v408_v29, %v407_v5  ;;  %v771_v5 = vand.u32 2147483647, %v46_v49 }
 0x13b   :  { %v240_v59 = vadd.f32 %v239_v45, %v238_v23  ;;  %v577_v60 = vadd.f32 %v576_v57, %v575_v56  ;;  %v44_v23 = vld [vmem:[%s1242_s4 + $0x20] sm:$0xff] }
 0x13c   :  { %v410_v50 = vrot.slane %v409_v58, 1 }
 0x13d   :  { %v883_v62 = vpop.eup %882  ;;  %v241_v21 = vmul.f32 %v240_v59, %v65_v61  ;;  %884 = vrcp.f32 %v577_v60 }
 0x13e   :  { %v411_v17 = vadd.f32 %v410_v50, %v409_v58  ;;  %v742_v1 = vsel %vm213_vm5, %v883_v62, 0.0  ;;  %v47_v58 = vld [vmem:[%s1242_s4 + $0x38] sm:$0xff] }
 0x13f   :  { %v743_v18 = vrot.slane %v742_v1, 4  ;;  %v242_v19 = vadd.f32 %v241_v21, %v50_v63  ;;  %v783_v60 = vand.u32 2147483647, %v47_v58 }
 0x140   :  { %v412_v2 = vmul.f32 %v411_v17, %v65_v61 }
 0x141   :  { %v744_v3 = vadd.f32 %v743_v18, %v742_v1 }
 0x142   :  { %v414_v4 = vrot.slane %v412_v2, 1  ;;  %v52_v2 = vld [vmem:[%s1242_s4 + $0x60] sm:$0xff] }
 0x143   :  { %v745_v22 = vrot.slane %v744_v3, 2 }
 0x144   :  { %v416_v7 = vadd.f32 %v414_v4, %v242_v19 }
 0x145   :  { %v746_v8 = vadd.f32 %v745_v22, %v744_v3 }
 0x146   :  { %v768_v43 = vrot.slane %v416_v7, %v767_v51 }
 0x147   :  { %v885_v10 = vpop.eup %884  ;;  %v747_v12 = vrot.slane %v746_v8, 1 }
 0x148   :  { %v579_v46 = vmul.f32 %v885_v10, %v881_v37  ;;  %v769_v54 = vmul.f32 %v768_v43, %v764_v42 }
 0x149   :  { %v748_v14 = vadd.f32 %v747_v12, %v746_v8 }
 0x14a   :  { %v580_v13 = vmul.f32 %v579_v46, %v418_v9  ;;  %v770_v29 = vadd.f32 %v769_v54, %v44_v23 }
 0x14b   :  { %886 = vrcp.f32 %v748_v14 }
 0x14c   :  { %v581_v25 = vsel %vm213_vm5, %v580_v13, 0.0 }
 0x14d   :  { %v582_v0 = vrot.slane %v581_v25, 4 }
 0x14f   :  { %v583_v15 = vadd.f32 %v582_v0, %v581_v25 }
 0x151   :  { %v584_v16 = vrot.slane %v583_v15, 2 }
 0x153   :  { %v585_v28 = vadd.f32 %v584_v16, %v583_v15 }
 0x155   :  { %v887_v26 = vpop.eup %886  ;;  %v586_v31 = vrot.slane %v585_v28, 1 }
 0x156   :  { %v750_v24 = vmul.f32 %v887_v26, %v883_v62 }
 0x157   :  { %v587_v36 = vadd.f32 %v586_v31, %v585_v28 }
 0x158   :  { %v751_v47 = vmul.f32 %v750_v24, %v418_v9 }
 0x159   :  { %v588_v52 = vmul.f32 %v587_v36, %v417_v35 }
 0x15a   :  { %v752_v11 = vsel %vm213_vm5, %v751_v47, 0.0 }
 0x15b   :  { %v753_v27 = vrot.slane %v752_v11, 4  ;;  %v589_v44 = vadd.f32 %v588_v52, %v51_v40 }
 0x15d   :  { %v754_v33 = vadd.f32 %v753_v27, %v752_v11 }
 0x15f   :  { %v755_v37 = vrot.slane %v754_v33, 2 }
 0x161   :  { %v756_v38 = vadd.f32 %v755_v37, %v754_v33 }
 0x163   :  { %v757_v6 = vrot.slane %v756_v38, 1 }
 0x165   :  { %v758_v41 = vadd.f32 %v757_v6, %v756_v38 }
 0x167   :  { %v759_v48 = vmul.f32 %v758_v41, %v417_v35 }
 0x169   :  { %v761_v53 = vrot.slane %v759_v48, 1 }
 0x16b   :  { %v763_v55 = vadd.f32 %v761_v53, %v589_v44 }
 0x16d   :  { %v775_v56 = vrot.slane %v763_v55, %v767_v51 }
 0x16f   :  { %v776_v61 = vmul.f32 %v775_v56, %v771_v5 }
 0x171   :  { %v777_v45 = vadd.f32 %v776_v61, %v770_v29 }
 0x173   :  { %v779_v57 = vmul.f32 1.442695, %v777_v45  ;;  %vm778_vm6 = vcmp.gt.f32.partialorder %v777_v45, 0.0 }
 0x175   :  { %888 = vpow2.f32 %v779_v57 }
 0x17f   :  { %v889_v59 = vpop.eup %888 }
 0x180   :  { %v809_v50 = vadd.f32 -1.0, %v889_v59 }
 0x182   :  { %v782_v62 = vsel %vm778_vm6, %v777_v45, %v809_v50 }
 0x183   :  { %v784_v63 = vmul.f32 %v783_v60, %v782_v62 }
 0x185   :  { %v785_v21 = vrot.slane %v784_v63, 4 }
 0x187   :  { %v786_v17 = vadd.f32 %v785_v21, %v784_v63 }
 0x189   :  { %v787_v1 = vrot.slane %v786_v17, 2 }
 0x18b   :  { %v788_v18 = vadd.f32 %v787_v1, %v786_v17 }
 0x18d   :  { %v789_v19 = vrot.slane %v788_v18, 1 }
 0x18f   :  { %v790_v3 = vadd.f32 %v789_v19, %v788_v18 }
 0x191   :  { %v791_v4 = vadd.f32 %v790_v3, %v52_v2 }
 0x193   :  { %792 = vst [vmem:[%s1248_s6] sm:$0x1] %v791_v4 }

// kernel: gattenmixer_forward.2
= control target key start
LH: loop header
LB: loop body
LE: loop exit
PB: predicated region body
PF: predicated region fallthrough
CT: control target
= control target key end

     0   :  { %v5921_v0 = vmov 0   ;;  %vm499_vm0 = vcmask 392192   ;;  %vm2662_vm1 = vcmask 64512   ;;  %vm2806_vm4 = vcmask 130048   ;;  %s9431_s5 = inlined_call_operand.vmem [shape: f32[512,1], index: 5, kind: input, shape index: {}]   ;;  %s9432_s0 = inlined_call_operand.vmem [shape: f32[48,128], index: 0, kind: input, shape index: {}]   ;;  %s9433_s4 = inlined_call_operand.vmem [shape: f32[512,48], index: 4, kind: input, shape index: {}]   ;;  %s9434_s7 = inlined_call_operand.vmem [shape: f32[512,1], index: 7, kind: input, shape index: {}]   ;;  %s9435_s11 = inlined_call_operand.vmem [shape: f32[48,1], index: 11, kind: input, shape index: {}]   ;;  %s9436_s10 = inlined_call_operand.vmem [shape: f32[48,1], index: 10, kind: input, shape index: {}]   ;;  %s9437_s6 = inlined_call_operand.vmem [shape: f32[512,512], index: 6, kind: input, shape index: {}]   ;;  %s9438_s14 = inlined_call_operand.vmem [shape: f32[128,128], index: 14, kind: output, shape index: {2}]   ;;  %s9439_s8 = inlined_call_operand.vmem [shape: f32[48,8], index: 8, kind: input, shape index: {}]   ;;  %s9440_s1 = inlined_call_operand.vmem [shape: f32[4,10,128], index: 1, kind: input, shape index: {}]   ;;  %s9441_s2 = inlined_call_operand.vmem [shape: f32[4,16,128], index: 2, kind: input, shape index: {}, may-alias: {2,12}]   ;;  %s9442_s9 = inlined_call_operand.vmem [shape: f32[48,16], index: 9, kind: input, shape index: {}]   ;;  %s9443_s12 = inlined_call_operand.vmem [shape: f32[4,16,128], index: 12, kind: output, shape index: {0}, may-alias: {2,12}]   ;;  %s9444_s3 = inlined_call_operand.vmem [shape: f32[2,4,128], index: 3, kind: input, shape index: {}]   ;;  %s9445_s13 = inlined_call_operand.vmem [shape: f32[4,8,128], index: 13, kind: output, shape index: {1}]   ;;  %s9446_s15 = inlined_call_operand.vmem [shape: f32[8,6], index: 15, kind: output, shape index: {3}]  }
   0x1   :  { %5752 = vset.pattern.permute.xlu1 %v5921_v0  ;;  %5751 = vset.pattern.permute.xlu0 %v5921_v0  ;;  %v117_v1 = vld [vmem:[%s9431_s5 + $0x10] sm:$0xff]  ;;  %v115_v2 = vld [vmem:[%s9431_s5] sm:$0xff]  ;;  %v110_v4 = vld [vmem:[%s9432_s0 + $0x8] sm:$0xff] }
   0x2   :  { %v109_v3 = vld [vmem:[%s9432_s0] sm:$0xff]  ;;  %191 = vperm.xlu1 %5752, %v117_v1   ;;  %181 = vperm.xlu0 %5751, %v115_v2   ;;  %v118_v6 = vld [vmem:[%s9431_s5 + $0x18] sm:$0xff]  ;;  %v111_v7 = vld [vmem:[%s9432_s0 + $0x10] sm:$0xff] }
   0x3   :  { %v5456_v5 = vpack.c.bf16 %v110_v4, %v109_v3  ;;  %v112_v8 = vld [vmem:[%s9432_s0 + $0x18] sm:$0xff]  ;;  %v116_v9 = vld [vmem:[%s9431_s5 + $0x8] sm:$0xff]  ;;  %v113_v11 = vld [vmem:[%s9432_s0 + $0x20] sm:$0xff] }
   0x4   :  { %v5460_v10 = vpack.c.bf16 %v112_v8, %v111_v7  ;;  %v114_v12 = vld [vmem:[%s9432_s0 + $0x28] sm:$0xff]  ;;  %v45_v13 = vld [vmem:[%s9433_s4] sm:$0xff]  ;;  %v122_v17 = vld [vmem:[%s9431_s5 + $0x38] sm:$0xff] }
   0x5   :  { %5457 = vmatprep.subr.bf16.mxu0 %v5456_v5  ;;  %v120_v14 = vld [vmem:[%s9431_s5 + $0x28] sm:$0xff]  ;;  %v5464_v15 = vpack.c.bf16 %v114_v12, %v113_v11  ;;  %v119_v16 = vld [vmem:[%s9431_s5 + $0x20] sm:$0xff]  ;;  %5264 = vmatprep.mubr.msk.f32.mxu0 %vm499_vm0, %v45_v13  ;;  %v121_v18 = vld [vmem:[%s9431_s5 + $0x30] sm:$0xff] }
   0x6   :  { %5459 = vmatpush3.bf16.msra.mxu0 %v5456_v5  ;;  %196 = vperm.xlu1 %5752, %v118_v6   ;;  %v46_v19 = vld [vmem:[%s9433_s4 + $0x8] sm:$0xff]  ;;  %v47_v21 = vld [vmem:[%s9433_s4 + $0x10] sm:$0xff]  ;;  %v123_v22 = vld [vmem:[%s9431_s5 + $0x40] sm:$0xff] }
   0x7   :  { %186 = vperm.xlu0 %5751, %v116_v9   ;;  %5461 = vmatprep.subr.bf16.mxu0 %v5460_v10  ;;  %v124_v20 = vld [vmem:[%s9431_s5 + $0x48] sm:$0xff]  ;;  %v48_v23 = vld [vmem:[%s9433_s4 + $0x18] sm:$0xff]  ;;  %v49_v25 = vld [vmem:[%s9433_s4 + $0x20] sm:$0xff] }
   0x8   :  { %v126_v24 = vld [vmem:[%s9431_s5 + $0x58] sm:$0xff]  ;;  %v125_v26 = vld [vmem:[%s9431_s5 + $0x50] sm:$0xff]  ;;  %v50_v27 = vld [vmem:[%s9433_s4 + $0x28] sm:$0xff] }
   0x9   :  { %v128_v28 = vld [vmem:[%s9431_s5 + $0x68] sm:$0xff]  ;;  %v51_v29 = vld [vmem:[%s9433_s4 + $0x30] sm:$0xff]  ;;  %v127_v30 = vld [vmem:[%s9431_s5 + $0x60] sm:$0xff] }
   0xa   :  { %5463 = vmatpush3.bf16.msra.mxu0 %v5460_v10  ;;  %206 = vperm.xlu1 %5752, %v120_v14   ;;  %v52_v31 = vld [vmem:[%s9433_s4 + $0x38] sm:$0xff]  ;;  %v53_v33 = vld [vmem:[%s9433_s4 + $0x40] sm:$0xff]  ;;  %v129_v34 = vld [vmem:[%s9431_s5 + $0x70] sm:$0xff] }
   0xb   :  { %201 = vperm.xlu0 %5751, %v119_v16   ;;  %5465 = vmatprep.subr.bf16.mxu0 %v5464_v15  ;;  %v130_v32 = vld [vmem:[%s9431_s5 + $0x78] sm:$0xff]  ;;  %v54_v35 = vld [vmem:[%s9433_s4 + $0x48] sm:$0xff]  ;;  %v55_v37 = vld [vmem:[%s9433_s4 + $0x50] sm:$0xff] }
   0xc   :  { %v132_v36 = vld [vmem:[%s9431_s5 + $0x88] sm:$0xff]  ;;  %v131_v38 = vld [vmem:[%s9431_s5 + $0x80] sm:$0xff]  ;;  %v56_v39 = vld [vmem:[%s9433_s4 + $0x58] sm:$0xff] }
   0xd   :  { %v134_v40 = vld [vmem:[%s9431_s5 + $0x98] sm:$0xff]  ;;  %v57_v41 = vld [vmem:[%s9433_s4 + $0x60] sm:$0xff]  ;;  %v133_v42 = vld [vmem:[%s9431_s5 + $0x90] sm:$0xff] }
   0xe   :  { %5467 = vmatpush3.bf16.msra.mxu0 %v5464_v15  ;;  %216 = vperm.xlu1 %5752, %v122_v17   ;;  %v58_v43 = vld [vmem:[%s9433_s4 + $0x68] sm:$0xff]  ;;  %v59_v45 = vld [vmem:[%s9433_s4 + $0x70] sm:$0xff]  ;;  %v135_v46 = vld [vmem:[%s9431_s5 + $0xa0] sm:$0xff] }
   0xf   :  { %211 = vperm.xlu0 %5751, %v121_v18   ;;  %v136_v44 = vld [vmem:[%s9431_s5 + $0xa8] sm:$0xff]  ;;  %v60_v47 = vld [vmem:[%s9433_s4 + $0x78] sm:$0xff]  ;;  %v61_v49 = vld [vmem:[%s9433_s4 + $0x80] sm:$0xff] }
  0x10   :  { %v138_v48 = vld [vmem:[%s9431_s5 + $0xb8] sm:$0xff]  ;;  %v137_v50 = vld [vmem:[%s9431_s5 + $0xb0] sm:$0xff]  ;;  %v62_v51 = vld [vmem:[%s9433_s4 + $0x88] sm:$0xff] }
  0x11   :  { %5265 = vmatmul.mubr.msk.f32.vlgmr.msra.gmra.mrb[0].mxu0 %vm499_vm0, %v46_v19  ;;  %v140_v52 = vld [vmem:[%s9431_s5 + $0xc8] sm:$0xff]  ;;  %v63_v53 = vld [vmem:[%s9433_s4 + $0x90] sm:$0xff]  ;;  %v139_v54 = vld [vmem:[%s9431_s5 + $0xc0] sm:$0xff] }
  0x12   :  { %226 = vperm.xlu1 %5752, %v124_v20   ;;  %5267 = vmatprep.mubr.msk.f32.mxu0 %vm499_vm0, %v47_v21  ;;  %v64_v55 = vld [vmem:[%s9433_s4 + $0x98] sm:$0xff]  ;;  %v65_v57 = vld [vmem:[%s9433_s4 + $0xa0] sm:$0xff]  ;;  %v141_v58 = vld [vmem:[%s9431_s5 + $0xd0] sm:$0xff] }
  0x13   :  { %221 = vperm.xlu0 %5751, %v123_v22   ;;  %v142_v56 = vld [vmem:[%s9431_s5 + $0xd8] sm:$0xff]  ;;  %v66_v59 = vld [vmem:[%s9433_s4 + $0xa8] sm:$0xff]  ;;  %v67_v61 = vld [vmem:[%s9433_s4 + $0xb0] sm:$0xff] }
  0x14   :  { %v144_v60 = vld [vmem:[%s9431_s5 + $0xe8] sm:$0xff]  ;;  %v143_v62 = vld [vmem:[%s9431_s5 + $0xe0] sm:$0xff]  ;;  %v68_v63 = vld [vmem:[%s9433_s4 + $0xb8] sm:$0xff] }
  0x15   :  { %5268 = vmatmul.mubr.msk.f32.gmra.mrb[2].mxu0 %vm499_vm0, %v48_v23  ;;  %v146_v0 = vld [vmem:[%s9431_s5 + $0xf8] sm:$0xff]  ;;  %v69_v1 = vld [vmem:[%s9433_s4 + $0xc0] sm:$0xff]  ;;  %v145_v2 = vld [vmem:[%s9431_s5 + $0xf0] sm:$0xff] }
  0x16   :  { %236 = vperm.xlu1 %5752, %v126_v24   ;;  %5270 = vmatprep.mubr.msk.f32.mxu0 %vm499_vm0, %v49_v25  ;;  %v70_v3 = vld [vmem:[%s9433_s4 + $0xc8] sm:$0xff]  ;;  %v71_v5 = vld [vmem:[%s9433_s4 + $0xd0] sm:$0xff]  ;;  %v147_v6 = vld [vmem:[%s9431_s5 + $0x100] sm:$0xff] }
  0x17   :  { %231 = vperm.xlu0 %5751, %v125_v26   ;;  %v148_v4 = vld [vmem:[%s9431_s5 + $0x108] sm:$0xff]  ;;  %v72_v7 = vld [vmem:[%s9433_s4 + $0xd8] sm:$0xff]  ;;  %v73_v9 = vld [vmem:[%s9433_s4 + $0xe0] sm:$0xff] }
  0x18   :  { %v150_v8 = vld [vmem:[%s9431_s5 + $0x118] sm:$0xff]  ;;  %v149_v10 = vld [vmem:[%s9431_s5 + $0x110] sm:$0xff]  ;;  %v74_v11 = vld [vmem:[%s9433_s4 + $0xe8] sm:$0xff] }
  0x19   :  { %5271 = vmatmul.mubr.msk.f32.gmra.mrb[4].mxu0 %vm499_vm0, %v50_v27  ;;  %v152_v12 = vld [vmem:[%s9431_s5 + $0x128] sm:$0xff]  ;;  %v75_v13 = vld [vmem:[%s9433_s4 + $0xf0] sm:$0xff]  ;;  %v151_v14 = vld [vmem:[%s9431_s5 + $0x120] sm:$0xff] }
  0x1a   :  { %246 = vperm.xlu1 %5752, %v128_v28   ;;  %5273 = vmatprep.mubr.msk.f32.mxu0 %vm499_vm0, %v51_v29  ;;  %v76_v15 = vld [vmem:[%s9433_s4 + $0xf8] sm:$0xff]  ;;  %v77_v17 = vld [vmem:[%s9433_s4 + $0x100] sm:$0xff]  ;;  %v153_v18 = vld [vmem:[%s9431_s5 + $0x130] sm:$0xff] }
  0x1b   :  { %241 = vperm.xlu0 %5751, %v127_v30   ;;  %v154_v16 = vld [vmem:[%s9431_s5 + $0x138] sm:$0xff]  ;;  %v78_v19 = vld [vmem:[%s9433_s4 + $0x108] sm:$0xff]  ;;  %v79_v21 = vld [vmem:[%s9433_s4 + $0x110] sm:$0xff] }
  0x1c   :  { %v156_v20 = vld [vmem:[%s9431_s5 + $0x148] sm:$0xff]  ;;  %v155_v22 = vld [vmem:[%s9431_s5 + $0x140] sm:$0xff]  ;;  %v80_v23 = vld [vmem:[%s9433_s4 + $0x118] sm:$0xff] }
  0x1d   :  { %5274 = vmatmul.mubr.msk.f32.gmra.mrb[6].mxu0 %vm499_vm0, %v52_v31  ;;  %v158_v24 = vld [vmem:[%s9431_s5 + $0x158] sm:$0xff]  ;;  %v81_v25 = vld [vmem:[%s9433_s4 + $0x120] sm:$0xff]  ;;  %v157_v26 = vld [vmem:[%s9431_s5 + $0x150] sm:$0xff] }
  0x1e   :  { %256 = vperm.xlu1 %5752, %v130_v32   ;;  %5276 = vmatprep.mubr.msk.f32.mxu0 %vm499_vm0, %v53_v33  ;;  %v82_v27 = vld [vmem:[%s9433_s4 + $0x128] sm:$0xff]  ;;  %v83_v29 = vld [vmem:[%s9433_s4 + $0x130] sm:$0xff]  ;;  %v159_v30 = vld [vmem:[%s9431_s5 + $0x160] sm:$0xff] }
  0x1f   :  { %251 = vperm.xlu0 %5751, %v129_v34   ;;  %v160_v28 = vld [vmem:[%s9431_s5 + $0x168] sm:$0xff]  ;;  %v84_v31 = vld [vmem:[%s9433_s4 + $0x138] sm:$0xff]  ;;  %v85_v33 = vld [vmem:[%s9433_s4 + $0x140] sm:$0xff] }
  0x20   :  { %v162_v32 = vld [vmem:[%s9431_s5 + $0x178] sm:$0xff]  ;;  %v161_v34 = vld [vmem:[%s9431_s5 + $0x170] sm:$0xff] }
  0x21   :  { %5277 = vmatmul.mubr.msk.f32.gmra.mrb[8].mxu0 %vm499_vm0, %v54_v35  ;;  %v86_v35 = vld [vmem:[%s9433_s4 + $0x148] sm:$0xff] }
  0x22   :  { %266 = vperm.xlu1 %5752, %v132_v36   ;;  %5279 = vmatprep.mubr.msk.f32.mxu0 %vm499_vm0, %v55_v37  ;;  %v164_v36 = vld [vmem:[%s9431_s5 + $0x188] sm:$0xff]  ;;  %v87_v37 = vld [vmem:[%s9433_s4 + $0x150] sm:$0xff] }
  0x23   :  { %261 = vperm.xlu0 %5751, %v131_v38   ;;  %v163_v38 = vld [vmem:[%s9431_s5 + $0x180] sm:$0xff] }
  0x25   :  { %5280 = vmatmul.mubr.msk.f32.gmra.mrb[10].mxu0 %vm499_vm0, %v56_v39  ;;  %v88_v39 = vld [vmem:[%s9433_s4 + $0x158] sm:$0xff] }
  0x26   :  { %276 = vperm.xlu1 %5752, %v134_v40   ;;  %5282 = vmatprep.mubr.msk.f32.mxu0 %vm499_vm0, %v57_v41  ;;  %v166_v40 = vld [vmem:[%s9431_s5 + $0x198] sm:$0xff]  ;;  %v89_v41 = vld [vmem:[%s9433_s4 + $0x160] sm:$0xff] }
  0x27   :  { %271 = vperm.xlu0 %5751, %v133_v42   ;;  %v165_v42 = vld [vmem:[%s9431_s5 + $0x190] sm:$0xff] }
  0x29   :  { %5283 = vmatmul.mubr.msk.f32.gmra.mrb[12].mxu0 %vm499_vm0, %v58_v43  ;;  %v90_v43 = vld [vmem:[%s9433_s4 + $0x168] sm:$0xff] }
  0x2a   :  { %286 = vperm.xlu1 %5752, %v136_v44   ;;  %5285 = vmatprep.mubr.msk.f32.mxu0 %vm499_vm0, %v59_v45  ;;  %v168_v44 = vld [vmem:[%s9431_s5 + $0x1a8] sm:$0xff]  ;;  %v91_v45 = vld [vmem:[%s9433_s4 + $0x170] sm:$0xff] }
  0x2b   :  { %281 = vperm.xlu0 %5751, %v135_v46   ;;  %v167_v46 = vld [vmem:[%s9431_s5 + $0x1a0] sm:$0xff] }
  0x2d   :  { %5286 = vmatmul.mubr.msk.f32.gmra.mrb[14].mxu0 %vm499_vm0, %v60_v47  ;;  %v92_v47 = vld [vmem:[%s9433_s4 + $0x178] sm:$0xff] }
  0x2e   :  { %296 = vperm.xlu1 %5752, %v138_v48   ;;  %5288 = vmatprep.mubr.msk.f32.mxu0 %vm499_vm0, %v61_v49  ;;  %v170_v48 = vld [vmem:[%s9431_s5 + $0x1b8] sm:$0xff]  ;;  %v93_v49 = vld [vmem:[%s9433_s4 + $0x180] sm:$0xff] }
  0x2f   :  { %291 = vperm.xlu0 %5751, %v137_v50   ;;  %v9447_v50 = vmov 0.0|0.0  }
  0x30   :  { %5580 = vmatprep.subr.bf16.mxu1 %v9447_v50  ;;  %5468 = vmatprep.subr.bf16.mxu0 %v9447_v50 }
  0x31   :  { %5289 = vmatmul.mubr.msk.f32.gmra.mrb[16].mxu0 %vm499_vm0, %v62_v51  ;;  %v169_v51 = vld [vmem:[%s9431_s5 + $0x1b0] sm:$0xff] }
  0x32   :  { %306 = vperm.xlu1 %5752, %v140_v52   ;;  %5291 = vmatprep.mubr.msk.f32.mxu0 %vm499_vm0, %v63_v53  ;;  %v94_v52 = vld [vmem:[%s9433_s4 + $0x188] sm:$0xff] }
  0x33   :  { %301 = vperm.xlu0 %5751, %v139_v54   ;;  %v172_v53 = vld [vmem:[%s9431_s5 + $0x1c8] sm:$0xff]  ;;  %v95_v54 = vld [vmem:[%s9433_s4 + $0x190] sm:$0xff] }
  0x35   :  { %5292 = vmatmul.mubr.msk.f32.gmra.mrb[18].mxu0 %vm499_vm0, %v64_v55  ;;  %v171_v55 = vld [vmem:[%s9431_s5 + $0x1c0] sm:$0xff] }
  0x36   :  { %316 = vperm.xlu1 %5752, %v142_v56   ;;  %5294 = vmatprep.mubr.msk.f32.mxu0 %vm499_vm0, %v65_v57  ;;  %v96_v56 = vld [vmem:[%s9433_s4 + $0x198] sm:$0xff] }
  0x37   :  { %311 = vperm.xlu0 %5751, %v141_v58   ;;  %v174_v57 = vld [vmem:[%s9431_s5 + $0x1d8] sm:$0xff]  ;;  %v97_v58 = vld [vmem:[%s9433_s4 + $0x1a0] sm:$0xff] }
  0x39   :  { %5295 = vmatmul.mubr.msk.f32.gmra.mrb[20].mxu0 %vm499_vm0, %v66_v59  ;;  %v173_v59 = vld [vmem:[%s9431_s5 + $0x1d0] sm:$0xff] }
  0x3a   :  { %326 = vperm.xlu1 %5752, %v144_v60   ;;  %5297 = vmatprep.mubr.msk.f32.mxu0 %vm499_vm0, %v67_v61  ;;  %v98_v60 = vld [vmem:[%s9433_s4 + $0x1a8] sm:$0xff] }
  0x3b   :  { %321 = vperm.xlu0 %5751, %v143_v62   ;;  %v176_v61 = vld [vmem:[%s9431_s5 + $0x1e8] sm:$0xff]  ;;  %v99_v62 = vld [vmem:[%s9433_s4 + $0x1b0] sm:$0xff] }
  0x3d   :  { %5298 = vmatmul.mubr.msk.f32.gmra.mrb[22].mxu0 %vm499_vm0, %v68_v63  ;;  %v175_v63 = vld [vmem:[%s9431_s5 + $0x1e0] sm:$0xff] }
  0x3e   :  { %336 = vperm.xlu1 %5752, %v146_v0   ;;  %5300 = vmatprep.mubr.msk.f32.mxu0 %vm499_vm0, %v69_v1  ;;  %v100_v0 = vld [vmem:[%s9433_s4 + $0x1b8] sm:$0xff] }
  0x3f   :  { %331 = vperm.xlu0 %5751, %v145_v2   ;;  %v178_v1 = vld [vmem:[%s9431_s5 + $0x1f8] sm:$0xff]  ;;  %v101_v2 = vld [vmem:[%s9433_s4 + $0x1c0] sm:$0xff] }
  0x41   :  { %5301 = vmatmul.mubr.msk.f32.gmra.mrb[24].mxu0 %vm499_vm0, %v70_v3  ;;  %v177_v3 = vld [vmem:[%s9431_s5 + $0x1f0] sm:$0xff] }
  0x42   :  { %346 = vperm.xlu1 %5752, %v148_v4   ;;  %5303 = vmatprep.mubr.msk.f32.mxu0 %vm499_vm0, %v71_v5  ;;  %v102_v4 = vld [vmem:[%s9433_s4 + $0x1c8] sm:$0xff] }
  0x43   :  { %341 = vperm.xlu0 %5751, %v147_v6   ;;  %v1414_v5 = vld [vmem:[%s9434_s7 + $0x88] sm:$0xff]  ;;  %v103_v6 = vld [vmem:[%s9433_s4 + $0x1d0] sm:$0xff] }
  0x45   :  { %5304 = vmatmul.mubr.msk.f32.gmra.mrb[26].mxu0 %vm499_vm0, %v72_v7  ;;  %v1413_v7 = vld [vmem:[%s9434_s7 + $0x80] sm:$0xff] }
  0x46   :  { %356 = vperm.xlu1 %5752, %v150_v8   ;;  %5306 = vmatprep.mubr.msk.f32.mxu0 %vm499_vm0, %v73_v9 }
  0x47   :  { %351 = vperm.xlu0 %5751, %v149_v10   ;;  %v104_v10 = vld [vmem:[%s9433_s4 + $0x1d8] sm:$0xff] }
  0x49   :  { %5307 = vmatmul.mubr.msk.f32.gmra.mrb[28].mxu0 %vm499_vm0, %v74_v11  ;;  %v1415_v11 = vld [vmem:[%s9434_s7 + $0x90] sm:$0xff] }
  0x4a   :  { %366 = vperm.xlu1 %5752, %v152_v12   ;;  %5309 = vmatprep.mubr.msk.f32.mxu0 %vm499_vm0, %v75_v13  ;;  %v105_v12 = vld [vmem:[%s9433_s4 + $0x1e0] sm:$0xff]  ;;  %v1423_v13 = vld [vmem:[%s9434_s7 + $0xd0] sm:$0xff] }
  0x4b   :  { %361 = vperm.xlu0 %5751, %v151_v14  }
  0x4d   :  { %5310 = vmatmul.mubr.msk.f32.gmra.mrb[30].mxu0 %vm499_vm0, %v76_v15 }
  0x4e   :  { %376 = vperm.xlu1 %5752, %v154_v16   ;;  %5312 = vmatprep.mubr.msk.f32.mxu0 %vm499_vm0, %v77_v17  ;;  %v106_v16 = vld [vmem:[%s9433_s4 + $0x1e8] sm:$0xff]  ;;  %v1417_v17 = vld [vmem:[%s9434_s7 + $0xa0] sm:$0xff] }
  0x4f   :  { %371 = vperm.xlu0 %5751, %v153_v18   ;;  %v107_v18 = vld [vmem:[%s9433_s4 + $0x1f0] sm:$0xff] }
  0x51   :  { %5313 = vmatmul.mubr.msk.f32.gmra.mrb[32].mxu0 %vm499_vm0, %v78_v19  ;;  %v1416_v19 = vld [vmem:[%s9434_s7 + $0x98] sm:$0xff] }
  0x52   :  { %386 = vperm.xlu1 %5752, %v156_v20   ;;  %5315 = vmatprep.mubr.msk.f32.mxu0 %vm499_vm0, %v79_v21 }
  0x53   :  { %381 = vperm.xlu0 %5751, %v155_v22   ;;  %v108_v22 = vld [vmem:[%s9433_s4 + $0x1f8] sm:$0xff] }
  0x55   :  { %5316 = vmatmul.mubr.msk.f32.gmra.mrb[34].mxu0 %vm499_vm0, %v80_v23  ;;  %v1419_v23 = vld [vmem:[%s9434_s7 + $0xb0] sm:$0xff] }
  0x56   :  { %396 = vperm.xlu1 %5752, %v158_v24   ;;  %5318 = vmatprep.mubr.msk.f32.mxu0 %vm499_vm0, %v81_v25  ;;  %v1418_v24 = vld [vmem:[%s9434_s7 + $0xa8] sm:$0xff] }
  0x57   :  { %391 = vperm.xlu0 %5751, %v157_v26  }
  0x59   :  { %5319 = vmatmul.mubr.msk.f32.gmra.mrb[36].mxu0 %vm499_vm0, %v82_v27  ;;  %v1421_v27 = vld [vmem:[%s9434_s7 + $0xc0] sm:$0xff] }
  0x5a   :  { %406 = vperm.xlu1 %5752, %v160_v28   ;;  %5321 = vmatprep.mubr.msk.f32.mxu0 %vm499_vm0, %v83_v29  ;;  %v1420_v28 = vld [vmem:[%s9434_s7 + $0xb8] sm:$0xff] }
  0x5b   :  { %401 = vperm.xlu0 %5751, %v159_v30  }
  0x5d   :  { %5322 = vmatmul.mubr.msk.f32.gmra.mrb[38].mxu0 %vm499_vm0, %v84_v31  ;;  %v1424_v31 = vld [vmem:[%s9434_s7 + $0xd8] sm:$0xff] }
  0x5e   :  { %416 = vperm.xlu1 %5752, %v162_v32   ;;  %5324 = vmatprep.mubr.msk.f32.mxu0 %vm499_vm0, %v85_v33  ;;  %v1422_v32 = vld [vmem:[%s9434_s7 + $0xc8] sm:$0xff] }
  0x5f   :  { %411 = vperm.xlu0 %5751, %v161_v34  }
  0x61   :  { %5325 = vmatmul.mubr.msk.f32.gmra.mrb[40].mxu0 %vm499_vm0, %v86_v35  ;;  %v1426_v35 = vld [vmem:[%s9434_s7 + $0xe8] sm:$0xff] }
  0x62   :  { %426 = vperm.xlu1 %5752, %v164_v36   ;;  %5327 = vmatprep.mubr.msk.f32.mxu0 %vm499_vm0, %v87_v37  ;;  %v1425_v36 = vld [vmem:[%s9434_s7 + $0xe0] sm:$0xff] }
  0x63   :  { %421 = vperm.xlu0 %5751, %v163_v38  }
  0x65   :  { %5328 = vmatmul.mubr.msk.f32.gmra.mrb[42].mxu0 %vm499_vm0, %v88_v39  ;;  %v2561_v39 = vld [vmem:[%s9435_s11] sm:$0xff] }
  0x66   :  { %436 = vperm.xlu1 %5752, %v166_v40   ;;  %5330 = vmatprep.mubr.msk.f32.mxu0 %vm499_vm0, %v89_v41  ;;  %v2555_v40 = vld [vmem:[%s9436_s10] sm:$0xff] }
  0x67   :  { %431 = vperm.xlu0 %5751, %v165_v42  }
  0x69   :  { %5331 = vmatmul.mubr.msk.f32.gmra.mrb[44].mxu0 %vm499_vm0, %v90_v43  ;;  %v2563_v43 = vld [vmem:[%s9435_s11 + $0x10] sm:$0xff] }
  0x6a   :  { %446 = vperm.xlu1 %5752, %v168_v44   ;;  %5333 = vmatprep.mubr.msk.f32.mxu0 %vm499_vm0, %v91_v45  ;;  %v2557_v44 = vld [vmem:[%s9436_s10 + $0x10] sm:$0xff] }
  0x6b   :  { %441 = vperm.xlu0 %5751, %v167_v46  }
  0x6d   :  { %5334 = vmatmul.mubr.msk.f32.gmra.mrb[46].mxu0 %vm499_vm0, %v92_v47  ;;  %v2562_v47 = vld [vmem:[%s9435_s11 + $0x8] sm:$0xff] }
  0x6e   :  { %456 = vperm.xlu1 %5752, %v170_v48   ;;  %5336 = vmatprep.mubr.msk.f32.mxu0 %vm499_vm0, %v93_v49  ;;  %v2556_v48 = vld [vmem:[%s9436_s10 + $0x8] sm:$0xff] }
  0x6f   :  { %451 = vperm.xlu0 %5751, %v169_v51  }
  0x71   :  { %5337 = vmatmul.mubr.msk.f32.gmra.mrb[48].mxu0 %vm499_vm0, %v94_v52  ;;  %v2564_v52 = vld [vmem:[%s9435_s11 + $0x18] sm:$0xff] }
  0x72   :  { %466 = vperm.xlu1 %5752, %v172_v53   ;;  %5339 = vmatprep.mubr.msk.f32.mxu0 %vm499_vm0, %v95_v54  ;;  %v2558_v53 = vld [vmem:[%s9436_s10 + $0x18] sm:$0xff] }
  0x73   :  { %461 = vperm.xlu0 %5751, %v171_v55   ;;  %v1310_v55 = vld [vmem:[%s9437_s6 + $0x548] sm:$0xff] }
  0x74   :  { %2041 = vmatprep.mubr.f32.mxu1 %v1310_v55 }
  0x75   :  { %5340 = vmatmul.mubr.msk.f32.gmra.mrb[50].mxu0 %vm499_vm0, %v96_v56  ;;  %v1142_v56 = vld [vmem:[%s9437_s6 + $0x8] sm:$0xff] }
  0x76   :  { %476 = vperm.xlu1 %5752, %v174_v57   ;;  %5342 = vmatprep.mubr.msk.f32.mxu0 %vm499_vm0, %v97_v58  ;;  %v2559_v58 = vld [vmem:[%s9436_s10 + $0x20] sm:$0xff] }
  0x77   :  { %471 = vperm.xlu0 %5751, %v173_v59   ;;  %v2565_v59 = vld [vmem:[%s9435_s11 + $0x20] sm:$0xff] }
  0x79   :  { %5343 = vmatmul.mubr.msk.f32.gmra.mrb[52].mxu0 %vm499_vm0, %v98_v60 }
  0x7a   :  { %486 = vperm.xlu1 %5752, %v176_v61   ;;  %5345 = vmatprep.mubr.msk.f32.mxu0 %vm499_vm0, %v99_v62  ;;  %v2560_v62 = vld [vmem:[%s9436_s10 + $0x28] sm:$0xff] }
  0x7b   :  { %481 = vperm.xlu0 %5751, %v175_v63   ;;  %v2566_v63 = vld [vmem:[%s9435_s11 + $0x28] sm:$0xff] }
  0x7d   :  { %5346 = vmatmul.mubr.msk.f32.gmra.mrb[54].mxu0 %vm499_vm0, %v100_v0 }
  0x7e   :  { %496 = vperm.xlu1 %5752, %v178_v1   ;;  %5348 = vmatprep.mubr.msk.f32.mxu0 %vm499_vm0, %v101_v2  ;;  %v1428_v2 = vld [vmem:[%s9434_s7 + $0xf8] sm:$0xff] }
  0x7f   :  { %491 = vperm.xlu0 %5751, %v177_v3   ;;  %v1427_v3 = vld [vmem:[%s9434_s7 + $0xf0] sm:$0xff] }
  0x81   :  { %5349 = vmatmul.mubr.msk.f32.gmra.mrb[56].mxu0 %vm499_vm0, %v102_v4  ;;  %v6457_v8 = vpop.permute.xlu1 %191  ;;  %v6459_v9 = vpop.permute.xlu0 %181 }
  0x82   :  { %1548 = vperm.xlu1 %5752, %v1414_v5   ;;  %5351 = vmatprep.mubr.msk.f32.mxu0 %vm499_vm0, %v103_v6  ;;  %v1444_v6 = vld [vmem:[%s9434_s7 + $0x178] sm:$0xff] }
  0x83   :  { %1543 = vperm.xlu0 %5751, %v1413_v7   ;;  %v1443_v7 = vld [vmem:[%s9434_s7 + $0x170] sm:$0xff] }
  0x85   :  { %5352 = vmatmul.mubr.msk.f32.gmra.mrb[58].mxu0 %vm499_vm0, %v104_v10  ;;  %v6475_v14 = vpop.permute.xlu1 %196 }
  0x86   :  { %v6477_v15 = vpop.permute.xlu0 %186  ;;  %1553 = vperm.xlu1 %5752, %v1415_v11   ;;  %5354 = vmatprep.mubr.msk.f32.mxu0 %vm499_vm0, %v105_v12  ;;  %v1445_v12 = vld [vmem:[%s9434_s7 + $0x180] sm:$0xff] }
  0x87   :  { %1593 = vperm.xlu0 %5751, %v1423_v13   ;;  %v1429_v13 = vld [vmem:[%s9434_s7 + $0x100] sm:$0xff] }
  0x89   :  { %5355 = vmatmul.mubr.msk.f32.gmra.mrb[60].mxu0 %vm499_vm0, %v106_v16  ;;  %v6493_v20 = vpop.permute.xlu1 %206 }
  0x8a   :  { %v6495_v21 = vpop.permute.xlu0 %201  ;;  %1563 = vperm.xlu1 %5752, %v1417_v17   ;;  %5357 = vmatprep.mubr.msk.f32.mxu0 %vm499_vm0, %v107_v18  ;;  %v1446_v18 = vld [vmem:[%s9434_s7 + $0x188] sm:$0xff] }
  0x8b   :  { %1558 = vperm.xlu0 %5751, %v1416_v19   ;;  %v1430_v19 = vld [vmem:[%s9434_s7 + $0x108] sm:$0xff] }
  0x8d   :  { %5358 = vmatmul.mubr.msk.f32.gmra.mrb[62].mxu0 %vm499_vm0, %v108_v22  ;;  %v6508_v25 = vpop.permute.xlu1 %216 }
  0x8e   :  { %v6510_v26 = vpop.permute.xlu0 %211  ;;  %1573 = vperm.xlu1 %5752, %v1419_v23   ;;  %1831 = vmatprep.mubr.f32.mxu0 %v1142_v56  ;;  %v1440_v56 = vld [vmem:[%s9434_s7 + $0x158] sm:$0xff] }
  0x8f   :  { %1568 = vperm.xlu0 %5751, %v1418_v24   ;;  %v1432_v24 = vld [vmem:[%s9434_s7 + $0x118] sm:$0xff] }
  0x91   :  { %v6518_v29 = vpop.permute.xlu1 %226 }
  0x92   :  { %v6520_v30 = vpop.permute.xlu0 %221  ;;  %1583 = vperm.xlu1 %5752, %v1421_v27   ;;  %v1431_v27 = vld [vmem:[%s9434_s7 + $0x110] sm:$0xff] }
  0x93   :  { %1578 = vperm.xlu0 %5751, %v1420_v28  }
  0x95   :  { %v6528_v33 = vpop.permute.xlu1 %236 }
  0x96   :  { %v6530_v34 = vpop.permute.xlu0 %231  ;;  %1598 = vperm.xlu1 %5752, %v1424_v31  }
  0x97   :  { %1588 = vperm.xlu0 %5751, %v1422_v32   ;;  %v1434_v32 = vld [vmem:[%s9434_s7 + $0x128] sm:$0xff] }
  0x99   :  { %v6538_v37 = vpop.permute.xlu1 %246 }
  0x9a   :  { %v6540_v38 = vpop.permute.xlu0 %241  ;;  %1608 = vperm.xlu1 %5752, %v1426_v35   ;;  %v1433_v35 = vld [vmem:[%s9434_s7 + $0x120] sm:$0xff] }
  0x9b   :  { %1603 = vperm.xlu0 %5751, %v1425_v36  }
  0x9d   :  { %v6548_v41 = vpop.permute.xlu1 %256 }
  0x9e   :  { %v6550_v42 = vpop.permute.xlu0 %251  ;;  %2778 = vperm.xlu1 %5752, %v2561_v39  }
  0x9f   :  { %2634 = vperm.xlu0 %5751, %v2555_v40   ;;  %v1436_v40 = vld [vmem:[%s9434_s7 + $0x138] sm:$0xff] }
  0xa1   :  { %v6558_v45 = vpop.permute.xlu1 %266 }
  0xa2   :  { %v6560_v46 = vpop.permute.xlu0 %261  ;;  %2788 = vperm.xlu1 %5752, %v2563_v43   ;;  %v1435_v43 = vld [vmem:[%s9434_s7 + $0x130] sm:$0xff] }
  0xa3   :  { %2644 = vperm.xlu0 %5751, %v2557_v44  }
  0xa5   :  { %v6568_v49 = vpop.permute.xlu1 %276 }
  0xa6   :  { %v6570_v51 = vpop.permute.xlu0 %271  ;;  %2783 = vperm.xlu1 %5752, %v2562_v47  }
  0xa7   :  { %2639 = vperm.xlu0 %5751, %v2556_v48   ;;  %v1438_v48 = vld [vmem:[%s9434_s7 + $0x148] sm:$0xff] }
  0xa9   :  { %v6578_v54 = vpop.permute.xlu1 %286 }
  0xaa   :  { %v6586_v57 = vpop.permute.xlu0 %281  ;;  %2793 = vperm.xlu1 %5752, %v2564_v52   ;;  %v1437_v52 = vld [vmem:[%s9434_s7 + $0x140] sm:$0xff] }
  0xab   :  { %2649 = vperm.xlu0 %5751, %v2558_v53  }
  0xad   :  { %v6594_v60 = vpop.permute.xlu1 %296 }
  0xae   :  { %v6596_v61 = vpop.permute.xlu0 %291  ;;  %2654 = vperm.xlu1 %5752, %v2559_v58   ;;  %v1439_v58 = vld [vmem:[%s9434_s7 + $0x150] sm:$0xff] }
  0xaf   :  { %2798 = vperm.xlu0 %5751, %v2565_v59  }
  0xb1   :  { %v6604_v0 = vpop.permute.xlu1 %306 }
  0xb2   :  { %v6606_v1 = vpop.permute.xlu0 %301  ;;  %2659 = vperm.xlu1 %5752, %v2560_v62  }
  0xb3   :  { %2803 = vperm.xlu0 %5751, %v2566_v63   ;;  %v1442_v63 = vld [vmem:[%s9434_s7 + $0x168] sm:$0xff] }
  0xb5   :  { %v6614_v4 = vpop.permute.xlu1 %316 }
  0xb6   :  { %v6616_v5 = vpop.permute.xlu0 %311  ;;  %1618 = vperm.xlu1 %5752, %v1428_v2   ;;  %v1441_v2 = vld [vmem:[%s9434_s7 + $0x160] sm:$0xff] }
  0xb7   :  { %1613 = vperm.xlu0 %5751, %v1427_v3  }
  0xb9   :  { %v6624_v10 = vpop.permute.xlu1 %326 }
  0xba   :  { %v6626_v11 = vpop.permute.xlu0 %321  ;;  %1698 = vperm.xlu1 %5752, %v1444_v6  }
  0xbb   :  { %1693 = vperm.xlu0 %5751, %v1443_v7   ;;  %v1398_v7 = vld [vmem:[%s9434_s7 + $0x8] sm:$0xff] }
  0xbd   :  { %v6634_v16 = vpop.permute.xlu1 %336 }
  0xbe   :  { %v6636_v17 = vpop.permute.xlu0 %331  ;;  %1703 = vperm.xlu1 %5752, %v1445_v12   ;;  %v1397_v12 = vld [vmem:[%s9434_s7] sm:$0xff] }
  0xbf   :  { %1623 = vperm.xlu0 %5751, %v1429_v13  }
  0xc1   :  { %v6644_v22 = vpop.permute.xlu1 %346 }
  0xc2   :  { %v6646_v23 = vpop.permute.xlu0 %341  ;;  %1708 = vperm.xlu1 %5752, %v1446_v18  }
  0xc3   :  { %1628 = vperm.xlu0 %5751, %v1430_v19   ;;  %v1401_v19 = vld [vmem:[%s9434_s7 + $0x20] sm:$0xff] }
  0xc5   :  { %v6654_v28 = vpop.permute.xlu1 %356 }
  0xc6   :  { %v6656_v31 = vpop.permute.xlu0 %351  ;;  %1638 = vperm.xlu1 %5752, %v1432_v24   ;;  %v1399_v24 = vld [vmem:[%s9434_s7 + $0x10] sm:$0xff] }
  0xc7   :  { %1633 = vperm.xlu0 %5751, %v1431_v27  }
  0xc9   :  { %v6664_v36 = vpop.permute.xlu1 %366 }
  0xca   :  { %v6666_v39 = vpop.permute.xlu0 %361  ;;  %1648 = vperm.xlu1 %5752, %v1434_v32  }
  0xcb   :  { %1643 = vperm.xlu0 %5751, %v1433_v35   ;;  %v1402_v35 = vld [vmem:[%s9434_s7 + $0x28] sm:$0xff] }
  0xcd   :  { %v6674_v44 = vpop.permute.xlu1 %376 }
  0xce   :  { %v6676_v47 = vpop.permute.xlu0 %371  ;;  %1658 = vperm.xlu1 %5752, %v1436_v40  }
  0xcf   :  { %1653 = vperm.xlu0 %5751, %v1435_v43   ;;  %v1400_v43 = vld [vmem:[%s9434_s7 + $0x18] sm:$0xff] }
  0xd1   :  { %v6684_v53 = vpop.permute.xlu1 %386 }
  0xd2   :  { %v6686_v55 = vpop.permute.xlu0 %381  ;;  %1668 = vperm.xlu1 %5752, %v1438_v48  }
  0xd3   :  { %1663 = vperm.xlu0 %5751, %v1437_v52  }
  0xd5   :  { %v6694_v59 = vpop.permute.xlu1 %396 }
  0xd6   :  { %v6696_v62 = vpop.permute.xlu0 %391  ;;  %1678 = vperm.xlu1 %5752, %v1440_v56  }
  0xd7   :  { %1673 = vperm.xlu0 %5751, %v1439_v58  }
  0xd9   :  { %v6704_v3 = vpop.permute.xlu1 %406 }
  0xda   :  { %v6706_v6 = vpop.permute.xlu0 %401  ;;  %1688 = vperm.xlu1 %5752, %v1442_v63  }
  0xdb   :  { %1683 = vperm.xlu0 %5751, %v1441_v2  }
  0xdd   :  { %v6714_v13 = vpop.permute.xlu1 %416 }
  0xde   :  { %v6716_v18 = vpop.permute.xlu0 %411  ;;  %1468 = vperm.xlu1 %5752, %v1398_v7   ;;  %v1404_v7 = vld [vmem:[%s9434_s7 + $0x38] sm:$0xff] }
  0xdf   :  { %1463 = vperm.xlu0 %5751, %v1397_v12  }
  0xe1   :  { %v6724_v27 = vpop.permute.xlu1 %426 }
  0xe2   :  { %v6726_v32 = vpop.permute.xlu0 %421  ;;  %1483 = vperm.xlu1 %5752, %v1401_v19  }
  0xe3   :  { %1473 = vperm.xlu0 %5751, %v1399_v24  }
  0xe4   :  { %v5266_v40 = vpop.f32.mrb[0].mxu0 }
  0xe5   :  { %v764_v48 = vadd.f32 %v5266_v40, %v6477_v15  ;;  %v758_v52 = vpop.f32.mrb[1].mxu0  ;;  %v6735_v56 = vpop.permute.xlu1 %436  ;;  %v1403_v15 = vld [vmem:[%s9434_s7 + $0x30] sm:$0xff] }
  0xe6   :  { %v759_v58 = vadd.f32 %v758_v52, %v6459_v9  ;;  %v6738_v63 = vpop.permute.xlu0 %431  ;;  %1488 = vperm.xlu1 %5752, %v1402_v35   ;;  %v1406_v52 = vld [vmem:[%s9434_s7 + $0x48] sm:$0xff] }
  0xe7   :  { %9470 = vst [vmem:[#allocation2_spill] sm:$0xff] %v6738_v63  ;;  %v1078_v2 = vmax.f32 %v764_v48, 0.0  ;;  %1478 = vperm.xlu0 %5751, %v1400_v43  }
  0xe8   :  { %v1077_v12 = vmax.f32 %v759_v58, 0.0  ;;  %v5269_v19 = vpop.f32.mrb[2].mxu0 }
  0xe9   :  { %v774_v24 = vadd.f32 %v5269_v19, %v6475_v14  ;;  %v768_v40 = vpop.f32.mrb[3].mxu0  ;;  %v6747_v50 = vpop.permute.xlu1 %446  ;;  %v1405_v14 = vld [vmem:[%s9434_s7 + $0x40] sm:$0xff] }
  0xea   :  { %v5469_v9 = vpack.c.bf16 %v1078_v2, %v1077_v12  ;;  %v769_v35 = vadd.f32 %v768_v40, %v6457_v8  ;;  %v6750_v48 = vpop.permute.xlu0 %441  ;;  %1498 = vperm.xlu1 %5752, %v1404_v7   ;;  %v9471_v7 = vmov 0.0|0.0  }
  0xeb   :  { %v1080_v43 = vmax.f32 %v774_v24, 0.0  ;;  %1493 = vperm.xlu0 %5751, %v1403_v15  }
  0xec   :  { %v1079_v58 = vmax.f32 %v769_v35, 0.0  ;;  %v5272_v63 = vpop.f32.mrb[4].mxu0  ;;  %5470 = vmatpush1.bf16.msra.mxu0 %v5469_v9  ;;  %5596 = vmatpush1.bf16.msra.mxu1 %v5469_v9  ;;  %v1408_v9 = vld [vmem:[%s9434_s7 + $0x58] sm:$0xff]  ;;  %v1407_v35 = vld [vmem:[%s9434_s7 + $0x50] sm:$0xff] }
  0xed   :  { %v784_v2 = vadd.f32 %v5272_v63, %v6493_v20  ;;  %v778_v8 = vpop.f32.mrb[5].mxu0  ;;  %v6759_v12 = vpop.permute.xlu1 %456  ;;  %5471 = vmatprep.subr.bf16.mxu0 %v9471_v7  ;;  %5581 = vmatprep.subr.bf16.mxu1 %v9471_v7 }
  0xee   :  { %v5472_v19 = vpack.c.bf16 %v1080_v43, %v1079_v58  ;;  %v779_v15 = vadd.f32 %v778_v8, %v6495_v21  ;;  %v6764_v24 = vpop.permute.xlu0 %451  ;;  %1508 = vperm.xlu1 %5752, %v1406_v52  }
  0xef   :  { %v1082_v40 = vmax.f32 %v784_v2, 0.0  ;;  %1503 = vperm.xlu0 %5751, %v1405_v14  }
  0xf0   :  { %v1081_v20 = vmax.f32 %v779_v15, 0.0  ;;  %v5275_v63 = vpop.f32.mrb[6].mxu0  ;;  %5473 = vmatpush1.bf16.msra.mxu0 %v5472_v19  ;;  %5597 = vmatpush1.bf16.msra.mxu1 %v5472_v19  ;;  %v1410_v19 = vld [vmem:[%s9434_s7 + $0x68] sm:$0xff] }
  0xf1   :  { %v794_v43 = vadd.f32 %v5275_v63, %v6508_v25  ;;  %v788_v21 = vpop.f32.mrb[7].mxu0  ;;  %v6773_v58 = vpop.permute.xlu1 %466  ;;  %5474 = vmatprep.subr.bf16.mxu0 %v9471_v7  ;;  %5582 = vmatprep.subr.bf16.mxu1 %v9471_v7  ;;  %v1409_v63 = vld [vmem:[%s9434_s7 + $0x60] sm:$0xff] }
  0xf2   :  { %v5475_v52 = vpack.c.bf16 %v1082_v40, %v1081_v20  ;;  %v789_v14 = vadd.f32 %v788_v21, %v6510_v26  ;;  %v6778_v2 = vpop.permute.xlu0 %461  ;;  %1518 = vperm.xlu1 %5752, %v1408_v9  }
  0xf3   :  { %v1084_v8 = vmax.f32 %v794_v43, 0.0  ;;  %1513 = vperm.xlu0 %5751, %v1407_v35  }
  0xf4   :  { %v1083_v25 = vmax.f32 %v789_v14, 0.0  ;;  %v5278_v15 = vpop.f32.mrb[8].mxu0  ;;  %5476 = vmatpush1.bf16.msra.mxu0 %v5475_v52  ;;  %5598 = vmatpush1.bf16.msra.mxu1 %v5475_v52 }
  0xf5   :  { %v804_v40 = vadd.f32 %v5278_v15, %v6518_v29  ;;  %v798_v26 = vpop.f32.mrb[9].mxu0  ;;  %v6787_v20 = vpop.permute.xlu1 %476  ;;  %5477 = vmatprep.subr.bf16.mxu0 %v9471_v7  ;;  %5583 = vmatprep.subr.bf16.mxu1 %v9471_v7 }
  0xf6   :  { %9472 = vst [vmem:[#allocation3_spill] sm:$0xff] %v6787_v20  ;;  %v5478_v9 = vpack.c.bf16 %v1084_v8, %v1083_v25  ;;  %v799_v35 = vadd.f32 %v798_v26, %v6520_v30  ;;  %v6792_v43 = vpop.permute.xlu0 %471  ;;  %1528 = vperm.xlu1 %5752, %v1410_v19  }
  0xf7   :  { %v1086_v21 = vmax.f32 %v804_v40, 0.0  ;;  %1523 = vperm.xlu0 %5751, %v1409_v63  }
  0xf8   :  { %v1085_v52 = vmax.f32 %v799_v35, 0.0  ;;  %v5281_v14 = vpop.f32.mrb[10].mxu0  ;;  %5479 = vmatpush1.bf16.msra.mxu0 %v5478_v9  ;;  %5599 = vmatpush1.bf16.msra.mxu1 %v5478_v9 }
  0xf9   :  { %v814_v29 = vadd.f32 %v5281_v14, %v6528_v33  ;;  %v808_v15 = vpop.f32.mrb[11].mxu0  ;;  %v6795_v20 = vpop.permute.xlu1 %486  ;;  %5480 = vmatprep.subr.bf16.mxu0 %v9471_v7  ;;  %5584 = vmatprep.subr.bf16.mxu1 %v9471_v7 }
  0xfa   :  { %v5481_v8 = vpack.c.bf16 %v1086_v21, %v1085_v52  ;;  %v809_v30 = vadd.f32 %v808_v15, %v6530_v34  ;;  %v6800_v25 = vpop.permute.xlu0 %481 }
  0xfb   :  { %v1088_v19 = vmax.f32 %v814_v29, 0.0 }
  0xfc   :  { %v1087_v63 = vmax.f32 %v809_v30, 0.0  ;;  %v5284_v40 = vpop.f32.mrb[12].mxu0  ;;  %5482 = vmatpush1.bf16.msra.mxu0 %v5481_v8  ;;  %5600 = vmatpush1.bf16.msra.mxu1 %v5481_v8 }
  0xfd   :  { %v824_v26 = vadd.f32 %v5284_v40, %v6538_v37  ;;  %v818_v33 = vpop.f32.mrb[13].mxu0  ;;  %v6803_v9 = vpop.permute.xlu1 %496  ;;  %5483 = vmatprep.subr.bf16.mxu0 %v9471_v7  ;;  %5585 = vmatprep.subr.bf16.mxu1 %v9471_v7 }
  0xfe   :  { %v5484_v35 = vpack.c.bf16 %v1088_v19, %v1087_v63  ;;  %v819_v21 = vadd.f32 %v818_v33, %v6540_v38  ;;  %v6808_v34 = vpop.permute.xlu0 %491 }
  0xff   :  { %v1090_v52 = vmax.f32 %v824_v26, 0.0 }
 0x100   :  { %v1089_v14 = vmax.f32 %v819_v21, 0.0  ;;  %v5287_v29 = vpop.f32.mrb[14].mxu0  ;;  %5485 = vmatpush1.bf16.msra.mxu0 %v5484_v35  ;;  %5601 = vmatpush1.bf16.msra.mxu1 %v5484_v35 }
 0x101   :  { %v834_v15 = vadd.f32 %v5287_v29, %v6548_v41  ;;  %v828_v37 = vpop.f32.mrb[15].mxu0  ;;  %v6811_v8 = vpop.permute.xlu1 %1548  ;;  %5486 = vmatprep.subr.bf16.mxu0 %v9471_v7  ;;  %5586 = vmatprep.subr.bf16.mxu1 %v9471_v7 }
 0x102   :  { %v5487_v30 = vpack.c.bf16 %v1090_v52, %v1089_v14  ;;  %v829_v19 = vadd.f32 %v828_v37, %v6550_v42  ;;  %v6816_v38 = vpop.permute.xlu0 %1543 }
 0x103   :  { %v1092_v63 = vmax.f32 %v834_v15, 0.0 }
 0x104   :  { %v1091_v40 = vmax.f32 %v829_v19, 0.0  ;;  %v5290_v26 = vpop.f32.mrb[16].mxu0  ;;  %5488 = vmatpush1.bf16.msra.mxu0 %v5487_v30  ;;  %5602 = vmatpush1.bf16.msra.mxu1 %v5487_v30 }
 0x105   :  { %v844_v33 = vadd.f32 %v5290_v26, %v6558_v45  ;;  %v838_v41 = vpop.f32.mrb[17].mxu0  ;;  %v6819_v35 = vpop.permute.xlu1 %1553  ;;  %5489 = vmatprep.subr.bf16.mxu0 %v9471_v7  ;;  %5587 = vmatprep.subr.bf16.mxu1 %v9471_v7 }
 0x106   :  { %v5490_v21 = vpack.c.bf16 %v1092_v63, %v1091_v40  ;;  %v839_v52 = vadd.f32 %v838_v41, %v6560_v46  ;;  %v6824_v42 = vpop.permute.xlu0 %1593 }
 0x107   :  { %v1094_v14 = vmax.f32 %v844_v33, 0.0 }
 0x108   :  { %v1093_v29 = vmax.f32 %v839_v52, 0.0  ;;  %v5293_v15 = vpop.f32.mrb[18].mxu0  ;;  %5491 = vmatpush1.bf16.msra.mxu0 %v5490_v21  ;;  %5603 = vmatpush1.bf16.msra.mxu1 %v5490_v21 }
 0x109   :  { %v854_v37 = vadd.f32 %v5293_v15, %v6568_v49  ;;  %v848_v45 = vpop.f32.mrb[19].mxu0  ;;  %v6827_v30 = vpop.permute.xlu1 %1563  ;;  %5492 = vmatprep.subr.bf16.mxu0 %v9471_v7  ;;  %5588 = vmatprep.subr.bf16.mxu1 %v9471_v7 }
 0x10a   :  { %v5493_v19 = vpack.c.bf16 %v1094_v14, %v1093_v29  ;;  %v849_v63 = vadd.f32 %v848_v45, %v6570_v51  ;;  %v6832_v46 = vpop.permute.xlu0 %1558 }
 0x10b   :  { %v1096_v40 = vmax.f32 %v854_v37, 0.0 }
 0x10c   :  { %v1095_v26 = vmax.f32 %v849_v63, 0.0  ;;  %v5296_v33 = vpop.f32.mrb[20].mxu0  ;;  %5494 = vmatpush1.bf16.msra.mxu0 %v5493_v19  ;;  %5604 = vmatpush1.bf16.msra.mxu1 %v5493_v19 }
 0x10d   :  { %v864_v41 = vadd.f32 %v5296_v33, %v6578_v54  ;;  %v858_v49 = vpop.f32.mrb[21].mxu0  ;;  %v6835_v21 = vpop.permute.xlu1 %1573  ;;  %5495 = vmatprep.subr.bf16.mxu0 %v9471_v7  ;;  %5589 = vmatprep.subr.bf16.mxu1 %v9471_v7 }
 0x10e   :  { %v5496_v52 = vpack.c.bf16 %v1096_v40, %v1095_v26  ;;  %v859_v14 = vadd.f32 %v858_v49, %v6586_v57  ;;  %v6840_v51 = vpop.permute.xlu0 %1568 }
 0x10f   :  { %v1098_v29 = vmax.f32 %v864_v41, 0.0 }
 0x110   :  { %v1097_v15 = vmax.f32 %v859_v14, 0.0  ;;  %v5299_v37 = vpop.f32.mrb[22].mxu0  ;;  %5497 = vmatpush1.bf16.msra.mxu0 %v5496_v52  ;;  %5605 = vmatpush1.bf16.msra.mxu1 %v5496_v52 }
 0x111   :  { %v874_v45 = vadd.f32 %v5299_v37, %v6594_v60  ;;  %v868_v54 = vpop.f32.mrb[23].mxu0  ;;  %v6843_v19 = vpop.permute.xlu1 %1583  ;;  %5498 = vmatprep.subr.bf16.mxu0 %v9471_v7  ;;  %5590 = vmatprep.subr.bf16.mxu1 %v9471_v7 }
 0x112   :  { %v5499_v63 = vpack.c.bf16 %v1098_v29, %v1097_v15  ;;  %v869_v40 = vadd.f32 %v868_v54, %v6596_v61  ;;  %v6848_v57 = vpop.permute.xlu0 %1578 }
 0x113   :  { %v1100_v26 = vmax.f32 %v874_v45, 0.0 }
 0x114   :  { %v1099_v33 = vmax.f32 %v869_v40, 0.0  ;;  %v5302_v41 = vpop.f32.mrb[24].mxu0  ;;  %5500 = vmatpush1.bf16.msra.mxu0 %v5499_v63  ;;  %5606 = vmatpush1.bf16.msra.mxu1 %v5499_v63 }
 0x115   :  { %v884_v49 = vadd.f32 %v5302_v41, %v6604_v0  ;;  %v878_v60 = vpop.f32.mrb[25].mxu0  ;;  %v6851_v52 = vpop.permute.xlu1 %1598  ;;  %5501 = vmatprep.subr.bf16.mxu0 %v9471_v7  ;;  %5591 = vmatprep.subr.bf16.mxu1 %v9471_v7 }
 0x116   :  { %v5502_v14 = vpack.c.bf16 %v1100_v26, %v1099_v33  ;;  %v879_v29 = vadd.f32 %v878_v60, %v6606_v1  ;;  %v6856_v61 = vpop.permute.xlu0 %1588 }
 0x117   :  { %v1102_v15 = vmax.f32 %v884_v49, 0.0 }
 0x118   :  { %v1101_v37 = vmax.f32 %v879_v29, 0.0  ;;  %v5305_v45 = vpop.f32.mrb[26].mxu0  ;;  %5503 = vmatpush1.bf16.msra.mxu0 %v5502_v14  ;;  %5607 = vmatpush1.bf16.msra.mxu1 %v5502_v14 }
 0x119   :  { %v894_v54 = vadd.f32 %v5305_v45, %v6614_v4  ;;  %v888_v0 = vpop.f32.mrb[27].mxu0  ;;  %v6859_v63 = vpop.permute.xlu1 %1608  ;;  %5504 = vmatprep.subr.bf16.mxu0 %v9471_v7  ;;  %5592 = vmatprep.subr.bf16.mxu1 %v9471_v7 }
 0x11a   :  { %v5505_v40 = vpack.c.bf16 %v1102_v15, %v1101_v37  ;;  %v889_v26 = vadd.f32 %v888_v0, %v6616_v5  ;;  %v6864_v1 = vpop.permute.xlu0 %1603 }
 0x11b   :  { %v1104_v33 = vmax.f32 %v894_v54, 0.0 }
 0x11c   :  { %v1103_v41 = vmax.f32 %v889_v26, 0.0  ;;  %v5308_v49 = vpop.f32.mrb[28].mxu0  ;;  %5506 = vmatpush1.bf16.msra.mxu0 %v5505_v40  ;;  %5608 = vmatpush1.bf16.msra.mxu1 %v5505_v40 }
 0x11d   :  { %v904_v60 = vadd.f32 %v5308_v49, %v6624_v10  ;;  %v898_v4 = vpop.f32.mrb[29].mxu0  ;;  %v2779_v14 = vpop.permute.xlu1 %2778  ;;  %5507 = vmatprep.subr.bf16.mxu0 %v9471_v7  ;;  %5593 = vmatprep.subr.bf16.mxu1 %v9471_v7 }
 0x11e   :  { %v5508_v29 = vpack.c.bf16 %v1104_v33, %v1103_v41  ;;  %v899_v15 = vadd.f32 %v898_v4, %v6626_v11  ;;  %v2635_v37 = vpop.permute.xlu0 %2634 }
 0x11f   :  { %v1106_v5 = vmax.f32 %v904_v60, 0.0  ;;  %v6870_v45 = vadd.f32 %v2779_v14, %v2635_v37 }
 0x120   :  { %v1105_v54 = vmax.f32 %v899_v15, 0.0  ;;  %v5311_v0 = vpop.f32.mrb[30].mxu0  ;;  %5509 = vmatpush1.bf16.msra.mxu0 %v5508_v29  ;;  %5609 = vmatpush1.bf16.msra.mxu1 %v5508_v29 }
 0x121   :  { %9473 = vst [vmem:[#allocation4_spill] sm:$0xff] %v6870_v45  ;;  %v914_v40 = vadd.f32 %v5311_v0, %v6634_v16  ;;  %v908_v10 = vpop.f32.mrb[31].mxu0  ;;  %v2789_v26 = vpop.permute.xlu1 %2788  ;;  %5510 = vmatprep.subr.bf16.mxu0 %v9471_v7  ;;  %5594 = vmatprep.subr.bf16.mxu1 %v9471_v7 }
 0x122   :  { %v5511_v49 = vpack.c.bf16 %v1106_v5, %v1105_v54  ;;  %v909_v33 = vadd.f32 %v908_v10, %v6636_v17  ;;  %v2645_v11 = vpop.permute.xlu0 %2644 }
 0x123   :  { %v1108_v41 = vmax.f32 %v914_v40, 0.0  ;;  %v6876_v60 = vadd.f32 %v2789_v26, %v2645_v11  ;;  %v1309_v26 = vld [vmem:[%s9437_s6 + $0x540] sm:$0xff]  ;;  %v1146_v11 = vld [vmem:[%s9437_s6 + $0x28] sm:$0xff] }
 0x124   :  { %v1107_v4 = vmax.f32 %v909_v33, 0.0  ;;  %v5314_v14 = vpop.f32.mrb[32].mxu0  ;;  %5512 = vmatpush1.bf16.msra.mxu0 %v5511_v49  ;;  %5610 = vmatpush1.bf16.msra.mxu1 %v5511_v49 }
 0x125   :  { %9474 = vst [vmem:[#allocation5_spill] sm:$0xff] %v6876_v60  ;;  %v924_v29 = vadd.f32 %v5314_v14, %v6644_v22  ;;  %v918_v16 = vpop.f32.mrb[33].mxu0  ;;  %v2784_v15 = vpop.permute.xlu1 %2783  ;;  %5513 = vmatprep.subr.bf16.mxu0 %v9471_v7  ;;  %5595 = vmatprep.subr.bf16.mxu1 %v9471_v7  ;;  %v1141_v22 = vld [vmem:[%s9437_s6] sm:$0xff] }
 0x126   :  { %v5514_v37 = vpack.c.bf16 %v1108_v41, %v1107_v4  ;;  %v919_v5 = vadd.f32 %v918_v16, %v6646_v23  ;;  %v2640_v17 = vpop.permute.xlu0 %2639 }
 0x127   :  { %v1110_v54 = vmax.f32 %v924_v29, 0.0  ;;  %v6882_v0 = vadd.f32 %v2784_v15, %v2640_v17  ;;  %v1314_v29 = vld [vmem:[%s9437_s6 + $0x568] sm:$0xff] }
 0x128   :  { %v1109_v40 = vmax.f32 %v919_v5, 0.0  ;;  %v5317_v10 = vpop.f32.mrb[34].mxu0  ;;  %5515 = vmatpush1.bf16.msra.mxu0 %v5514_v37  ;;  %5611 = vmatpush1.bf16.msra.mxu1 %v5514_v37  ;;  %v1145_v5 = vld [vmem:[%s9437_s6 + $0x20] sm:$0xff] }
 0x129   :  { %9475 = vst [vmem:[#allocation6_spill] sm:$0xff] %v6882_v0  ;;  %v934_v49 = vadd.f32 %v5317_v10, %v6654_v28  ;;  %v928_v33 = vpop.f32.mrb[35].mxu0  ;;  %v2794_v23 = vpop.permute.xlu1 %2793  ;;  %5516 = vmatprep.subr.bf16.mxu1 %v9471_v7 }
 0x12a   :  { %v5517_v41 = vpack.c.bf16 %v1110_v54, %v1109_v40  ;;  %v929_v4 = vadd.f32 %v928_v33, %v6656_v31  ;;  %v2650_v14 = vpop.permute.xlu0 %2649  ;;  %v1313_v31 = vld [vmem:[%s9437_s6 + $0x560] sm:$0xff]  ;;  %v1150_v40 = vld [vmem:[%s9437_s6 + $0x48] sm:$0xff] }
 0x12b   :  { %v1112_v16 = vmax.f32 %v934_v49, 0.0  ;;  %v6899_v15 = vadd.f32 %v2794_v23, %v2650_v14  ;;  %1832 = vmatmul.mubr.f32.vlgmr.msra.gmra.mrb[64].mxu0 %v1141_v22  ;;  %2042 = vmatmul.mubr.f32.vlgmr.msra.gmra.mrb[0].mxu1 %v1309_v26  ;;  %v1318_v26 = vld [vmem:[%s9437_s6 + $0x588] sm:$0xff]  ;;  %v1149_v23 = vld [vmem:[%s9437_s6 + $0x40] sm:$0xff] }
 0x12c   :  { %v1111_v28 = vmax.f32 %v929_v4, 0.0  ;;  %v5320_v37 = vpop.f32.mrb[36].mxu0  ;;  %5518 = vmatpush1.bf16.msra.mxu1 %v5517_v41  ;;  %1836 = vmatprep.mubr.f32.mxu0 %v1146_v11  ;;  %v1317_v11 = vld [vmem:[%s9437_s6 + $0x580] sm:$0xff]  ;;  %v1154_v4 = vld [vmem:[%s9437_s6 + $0x68] sm:$0xff] }
 0x12d   :  { %9476 = vst [vmem:[#allocation7_spill] sm:$0xff] %v6899_v15  ;;  %v944_v17 = vadd.f32 %v5320_v37, %v6664_v36  ;;  %v938_v54 = vpop.f32.mrb[37].mxu0  ;;  %2046 = vmatprep.mubr.f32.mxu1 %v1314_v29  ;;  %5519 = vmatprep.subr.bf16.mxu1 %v9471_v7 }
 0x12e   :  { %v5520_v10 = vpack.c.bf16 %v1112_v16, %v1111_v28  ;;  %v939_v22 = vadd.f32 %v938_v54, %v6666_v39  ;;  %v1322_v16 = vld [vmem:[%s9437_s6 + $0x5a8] sm:$0xff] }
 0x12f   :  { %v1114_v49 = vmax.f32 %v944_v17, 0.0  ;;  %1837 = vmatmul.mubr.f32.gmra.mrb[66].mxu0 %v1145_v5  ;;  %2047 = vmatmul.mubr.f32.gmra.mrb[2].mxu1 %v1313_v31  ;;  %v1153_v5 = vld [vmem:[%s9437_s6 + $0x60] sm:$0xff]  ;;  %v1158_v54 = vld [vmem:[%s9437_s6 + $0x88] sm:$0xff] }
 0x130   :  { %v1113_v33 = vmax.f32 %v939_v22, 0.0  ;;  %v5323_v36 = vpop.f32.mrb[38].mxu0  ;;  %5521 = vmatpush1.bf16.msra.mxu1 %v5520_v10  ;;  %1841 = vmatprep.mubr.f32.mxu0 %v1150_v40  ;;  %v1321_v31 = vld [vmem:[%s9437_s6 + $0x5a0] sm:$0xff]  ;;  %v1326_v22 = vld [vmem:[%s9437_s6 + $0x5c8] sm:$0xff] }
 0x131   :  { %v954_v39 = vadd.f32 %v5323_v36, %v6674_v44  ;;  %v948_v41 = vpop.f32.mrb[39].mxu0  ;;  %2051 = vmatprep.mubr.f32.mxu1 %v1318_v26  ;;  %5522 = vmatprep.subr.bf16.mxu1 %v9471_v7  ;;  %v1325_v36 = vld [vmem:[%s9437_s6 + $0x5c0] sm:$0xff] }
 0x132   :  { %v5523_v14 = vpack.c.bf16 %v1114_v49, %v1113_v33  ;;  %v949_v29 = vadd.f32 %v948_v41, %v6676_v47  ;;  %v1157_v33 = vld [vmem:[%s9437_s6 + $0x80] sm:$0xff] }
 0x133   :  { %v1116_v28 = vmax.f32 %v954_v39, 0.0  ;;  %1842 = vmatmul.mubr.f32.gmra.mrb[68].mxu0 %v1149_v23  ;;  %2052 = vmatmul.mubr.f32.gmra.mrb[4].mxu1 %v1317_v11  ;;  %v1162_v11 = vld [vmem:[%s9437_s6 + $0xa8] sm:$0xff] }
 0x134   :  { %v1115_v37 = vmax.f32 %v949_v29, 0.0  ;;  %v5326_v44 = vpop.f32.mrb[40].mxu0  ;;  %5524 = vmatpush1.bf16.msra.mxu1 %v5523_v14  ;;  %1846 = vmatprep.mubr.f32.mxu0 %v1154_v4  ;;  %v1330_v4 = vld [vmem:[%s9437_s6 + $0x5e8] sm:$0xff] }
 0x135   :  { %v964_v47 = vadd.f32 %v5326_v44, %v6684_v53  ;;  %v958_v17 = vpop.f32.mrb[41].mxu0  ;;  %2056 = vmatprep.mubr.f32.mxu1 %v1322_v16  ;;  %5525 = vmatprep.subr.bf16.mxu1 %v9471_v7  ;;  %v1161_v16 = vld [vmem:[%s9437_s6 + $0xa0] sm:$0xff]  ;;  %v1166_v44 = vld [vmem:[%s9437_s6 + $0xc8] sm:$0xff] }
 0x136   :  { %v5526_v40 = vpack.c.bf16 %v1116_v28, %v1115_v37  ;;  %v959_v10 = vadd.f32 %v958_v17, %v6686_v55  ;;  %v1329_v28 = vld [vmem:[%s9437_s6 + $0x5e0] sm:$0xff] }
 0x137   :  { %v1118_v26 = vmax.f32 %v964_v47, 0.0  ;;  %1847 = vmatmul.mubr.f32.gmra.mrb[70].mxu0 %v1153_v5  ;;  %2057 = vmatmul.mubr.f32.gmra.mrb[6].mxu1 %v1321_v31  ;;  %v1334_v47 = vld [vmem:[%s9437_s6 + $0x608] sm:$0xff] }
 0x138   :  { %v1117_v49 = vmax.f32 %v959_v10, 0.0  ;;  %v5329_v53 = vpop.f32.mrb[42].mxu0  ;;  %5527 = vmatpush1.bf16.msra.mxu1 %v5526_v40  ;;  %1851 = vmatprep.mubr.f32.mxu0 %v1158_v54  ;;  %v1165_v40 = vld [vmem:[%s9437_s6 + $0xc0] sm:$0xff] }
 0x139   :  { %v974_v55 = vadd.f32 %v5329_v53, %v6694_v59  ;;  %v968_v23 = vpop.f32.mrb[43].mxu0  ;;  %2061 = vmatprep.mubr.f32.mxu1 %v1326_v22  ;;  %5528 = vmatprep.subr.bf16.mxu1 %v9471_v7  ;;  %v1333_v10 = vld [vmem:[%s9437_s6 + $0x600] sm:$0xff] }
 0x13a   :  { %v5529_v39 = vpack.c.bf16 %v1118_v26, %v1117_v49  ;;  %v969_v41 = vadd.f32 %v968_v23, %v6696_v62  ;;  %v1170_v26 = vld [vmem:[%s9437_s6 + $0xe8] sm:$0xff]  ;;  %v1169_v23 = vld [vmem:[%s9437_s6 + $0xe0] sm:$0xff] }
 0x13b   :  { %v1120_v14 = vmax.f32 %v974_v55, 0.0  ;;  %1852 = vmatmul.mubr.f32.gmra.mrb[72].mxu0 %v1157_v33  ;;  %2062 = vmatmul.mubr.f32.gmra.mrb[8].mxu1 %v1325_v36  ;;  %v1338_v33 = vld [vmem:[%s9437_s6 + $0x628] sm:$0xff] }
 0x13c   :  { %v1119_v29 = vmax.f32 %v969_v41, 0.0  ;;  %v5332_v59 = vpop.f32.mrb[44].mxu0  ;;  %5530 = vmatpush1.bf16.msra.mxu1 %v5529_v39  ;;  %1856 = vmatprep.mubr.f32.mxu0 %v1162_v11  ;;  %v1337_v11 = vld [vmem:[%s9437_s6 + $0x620] sm:$0xff]  ;;  %v1174_v41 = vld [vmem:[%s9437_s6 + $0x108] sm:$0xff] }
 0x13d   :  { %v984_v62 = vadd.f32 %v5332_v59, %v6704_v3  ;;  %v978_v37 = vpop.f32.mrb[45].mxu0  ;;  %2066 = vmatprep.mubr.f32.mxu1 %v1330_v4  ;;  %5531 = vmatprep.subr.bf16.mxu1 %v9471_v7 }
 0x13e   :  { %v5532_v5 = vpack.c.bf16 %v1120_v14, %v1119_v29  ;;  %v979_v31 = vadd.f32 %v978_v37, %v6706_v6  ;;  %v1342_v29 = vld [vmem:[%s9437_s6 + $0x648] sm:$0xff] }
 0x13f   :  { %v1122_v17 = vmax.f32 %v984_v62, 0.0  ;;  %1857 = vmatmul.mubr.f32.gmra.mrb[74].mxu0 %v1161_v16  ;;  %2067 = vmatmul.mubr.f32.gmra.mrb[10].mxu1 %v1329_v28  ;;  %v1173_v28 = vld [vmem:[%s9437_s6 + $0x100] sm:$0xff] }
 0x140   :  { %v1121_v54 = vmax.f32 %v979_v31, 0.0  ;;  %v5335_v3 = vpop.f32.mrb[46].mxu0  ;;  %5533 = vmatpush1.bf16.msra.mxu1 %v5532_v5  ;;  %1861 = vmatprep.mubr.f32.mxu0 %v1166_v44  ;;  %v1341_v62 = vld [vmem:[%s9437_s6 + $0x640] sm:$0xff]  ;;  %v1178_v44 = vld [vmem:[%s9437_s6 + $0x128] sm:$0xff] }
 0x141   :  { %v994_v6 = vadd.f32 %v5335_v3, %v6714_v13  ;;  %v988_v22 = vpop.f32.mrb[47].mxu0  ;;  %2071 = vmatprep.mubr.f32.mxu1 %v1334_v47  ;;  %5534 = vmatprep.subr.bf16.mxu1 %v9471_v7  ;;  %v9477_v31 = vld [vmem:[#allocation2_spill] sm:$0xff] }
 0x142   :  { %v5535_v49 = vpack.c.bf16 %v1122_v17, %v1121_v54  ;;  %v989_v53 = vadd.f32 %v988_v22, %v6716_v18  ;;  %v1346_v17 = vld [vmem:[%s9437_s6 + $0x668] sm:$0xff] }
 0x143   :  { %v1124_v36 = vmax.f32 %v994_v6, 0.0  ;;  %1862 = vmatmul.mubr.f32.gmra.mrb[76].mxu0 %v1165_v40  ;;  %2072 = vmatmul.mubr.f32.gmra.mrb[12].mxu1 %v1333_v10  ;;  %v1177_v40 = vld [vmem:[%s9437_s6 + $0x120] sm:$0xff] }
 0x144   :  { %v1123_v55 = vmax.f32 %v989_v53, 0.0  ;;  %v5338_v13 = vpop.f32.mrb[48].mxu0  ;;  %5536 = vmatpush1.bf16.msra.mxu1 %v5535_v49  ;;  %1866 = vmatprep.mubr.f32.mxu0 %v1170_v26  ;;  %v1345_v10 = vld [vmem:[%s9437_s6 + $0x660] sm:$0xff]  ;;  %v1182_v26 = vld [vmem:[%s9437_s6 + $0x148] sm:$0xff] }
 0x145   :  { %v1004_v18 = vadd.f32 %v5338_v13, %v6724_v27  ;;  %v998_v39 = vpop.f32.mrb[49].mxu0  ;;  %2076 = vmatprep.mubr.f32.mxu1 %v1338_v33  ;;  %5537 = vmatprep.subr.bf16.mxu1 %v9471_v7  ;;  %v1350_v33 = vld [vmem:[%s9437_s6 + $0x688] sm:$0xff]  ;;  %v1181_v13 = vld [vmem:[%s9437_s6 + $0x140] sm:$0xff] }
 0x146   :  { %v5538_v4 = vpack.c.bf16 %v1124_v36, %v1123_v55  ;;  %v999_v14 = vadd.f32 %v998_v39, %v6726_v32 }
 0x147   :  { %v1126_v59 = vmax.f32 %v1004_v18, 0.0  ;;  %1867 = vmatmul.mubr.f32.gmra.mrb[78].mxu0 %v1169_v23  ;;  %2077 = vmatmul.mubr.f32.gmra.mrb[14].mxu1 %v1337_v11  ;;  %v1349_v23 = vld [vmem:[%s9437_s6 + $0x680] sm:$0xff]  ;;  %v1186_v18 = vld [vmem:[%s9437_s6 + $0x168] sm:$0xff] }
 0x148   :  { %v1125_v16 = vmax.f32 %v999_v14, 0.0  ;;  %v5341_v27 = vpop.f32.mrb[50].mxu0  ;;  %5539 = vmatpush1.bf16.msra.mxu1 %v5538_v4  ;;  %1871 = vmatprep.mubr.f32.mxu0 %v1174_v41  ;;  %v1354_v4 = vld [vmem:[%s9437_s6 + $0x6a8] sm:$0xff] }
 0x149   :  { %v1014_v32 = vadd.f32 %v5341_v27, %v6735_v56  ;;  %v1008_v37 = vpop.f32.mrb[51].mxu0  ;;  %2081 = vmatprep.mubr.f32.mxu1 %v1342_v29  ;;  %5540 = vmatprep.subr.bf16.mxu1 %v9471_v7 }
 0x14a   :  { %v5541_v5 = vpack.c.bf16 %v1126_v59, %v1125_v16  ;;  %v1009_v47 = vadd.f32 %v1008_v37, %v9477_v31  ;;  %v1185_v59 = vld [vmem:[%s9437_s6 + $0x160] sm:$0xff]  ;;  %v1358_v37 = vld [vmem:[%s9437_s6 + $0x6c8] sm:$0xff] }
 0x14b   :  { %v1128_v54 = vmax.f32 %v1014_v32, 0.0  ;;  %1872 = vmatmul.mubr.f32.gmra.mrb[80].mxu0 %v1173_v28  ;;  %2082 = vmatmul.mubr.f32.gmra.mrb[16].mxu1 %v1341_v62  ;;  %v1353_v16 = vld [vmem:[%s9437_s6 + $0x6a0] sm:$0xff]  ;;  %v1190_v28 = vld [vmem:[%s9437_s6 + $0x188] sm:$0xff] }
 0x14c   :  { %v1127_v3 = vmax.f32 %v1009_v47, 0.0  ;;  %v5344_v56 = vpop.f32.mrb[52].mxu0  ;;  %5542 = vmatpush1.bf16.msra.mxu1 %v5541_v5  ;;  %1876 = vmatprep.mubr.f32.mxu0 %v1178_v44  ;;  %v1189_v31 = vld [vmem:[%s9437_s6 + $0x180] sm:$0xff] }
 0x14d   :  { %v1024_v6 = vadd.f32 %v5344_v56, %v6747_v50  ;;  %v1018_v22 = vpop.f32.mrb[53].mxu0  ;;  %2085 = vmatprep.mubr.f32.mxu1 %v1346_v17  ;;  %5543 = vmatprep.subr.bf16.mxu1 %v9471_v7  ;;  %v1357_v47 = vld [vmem:[%s9437_s6 + $0x6c0] sm:$0xff] }
 0x14e   :  { %v5544_v49 = vpack.c.bf16 %v1128_v54, %v1127_v3  ;;  %v1019_v53 = vadd.f32 %v1018_v22, %v6750_v48  ;;  %v1194_v3 = vld [vmem:[%s9437_s6 + $0x1a8] sm:$0xff] }
 0x14f   :  { %v1130_v36 = vmax.f32 %v1024_v6, 0.0  ;;  %1877 = vmatmul.mubr.f32.gmra.mrb[82].mxu0 %v1177_v40  ;;  %2086 = vmatmul.mubr.f32.gmra.mrb[18].mxu1 %v1345_v10  ;;  %v1362_v10 = vld [vmem:[%s9437_s6 + $0x6e8] sm:$0xff] }
 0x150   :  { %v1129_v55 = vmax.f32 %v1019_v53, 0.0  ;;  %v5347_v50 = vpop.f32.mrb[54].mxu0  ;;  %5545 = vmatpush1.bf16.msra.mxu1 %v5544_v49  ;;  %1881 = vmatprep.mubr.f32.mxu0 %v1182_v26  ;;  %v1193_v49 = vld [vmem:[%s9437_s6 + $0x1a0] sm:$0xff] }
 0x151   :  { %v1034_v48 = vadd.f32 %v5347_v50, %v6759_v12  ;;  %v1028_v11 = vpop.f32.mrb[55].mxu0  ;;  %2089 = vmatprep.mubr.f32.mxu1 %v1350_v33  ;;  %5546 = vmatprep.subr.bf16.mxu1 %v9471_v7  ;;  %v1361_v53 = vld [vmem:[%s9437_s6 + $0x6e0] sm:$0xff] }
 0x152   :  { %v5547_v39 = vpack.c.bf16 %v1130_v36, %v1129_v55  ;;  %v1029_v41 = vadd.f32 %v1028_v11, %v6764_v24  ;;  %v1198_v36 = vld [vmem:[%s9437_s6 + $0x1c8] sm:$0xff]  ;;  %v1197_v11 = vld [vmem:[%s9437_s6 + $0x1c0] sm:$0xff] }
 0x153   :  { %v1132_v14 = vmax.f32 %v1034_v48, 0.0  ;;  %1882 = vmatmul.mubr.f32.gmra.mrb[84].mxu0 %v1181_v13  ;;  %2090 = vmatmul.mubr.f32.gmra.mrb[20].mxu1 %v1349_v23  ;;  %v1366_v13 = vld [vmem:[%s9437_s6 + $0x708] sm:$0xff] }
 0x154   :  { %v1131_v29 = vmax.f32 %v1029_v41, 0.0  ;;  %v5350_v12 = vpop.f32.mrb[56].mxu0  ;;  %5548 = vmatpush1.bf16.msra.mxu1 %v5547_v39  ;;  %1886 = vmatprep.mubr.f32.mxu0 %v1186_v18  ;;  %v1365_v18 = vld [vmem:[%s9437_s6 + $0x700] sm:$0xff]  ;;  %v1202_v41 = vld [vmem:[%s9437_s6 + $0x1e8] sm:$0xff] }
 0x155   :  { %v1044_v24 = vadd.f32 %v5350_v12, %v6773_v58  ;;  %v1038_v27 = vpop.f32.mrb[57].mxu0  ;;  %2093 = vmatprep.mubr.f32.mxu1 %v1354_v4  ;;  %5549 = vmatprep.subr.bf16.mxu1 %v9471_v7 }
 0x156   :  { %v5550_v62 = vpack.c.bf16 %v1132_v14, %v1131_v29  ;;  %v1039_v32 = vadd.f32 %v1038_v27, %v6778_v2  ;;  %v9478_v2 = vld [vmem:[#allocation3_spill] sm:$0xff] }
 0x157   :  { %v1134_v44 = vmax.f32 %v1044_v24, 0.0  ;;  %1887 = vmatmul.mubr.f32.gmra.mrb[86].mxu0 %v1185_v59  ;;  %2094 = vmatmul.mubr.f32.gmra.mrb[22].mxu1 %v1353_v16  ;;  %v1370_v29 = vld [vmem:[%s9437_s6 + $0x728] sm:$0xff]  ;;  %v1369_v16 = vld [vmem:[%s9437_s6 + $0x720] sm:$0xff] }
 0x158   :  { %v1133_v5 = vmax.f32 %v1039_v32, 0.0  ;;  %v5353_v58 = vpop.f32.mrb[58].mxu0  ;;  %5551 = vmatpush1.bf16.msra.mxu1 %v5550_v62  ;;  %1891 = vmatprep.mubr.f32.mxu0 %v1190_v28  ;;  %v1374_v27 = vld [vmem:[%s9437_s6 + $0x748] sm:$0xff]  ;;  %v1205_v28 = vld [vmem:[%s9437_s6 + $0x200] sm:$0xff] }
 0x159   :  { %v1054_v17 = vadd.f32 %v5353_v58, %v9478_v2  ;;  %v1048_v54 = vpop.f32.mrb[59].mxu0  ;;  %2097 = vmatprep.mubr.f32.mxu1 %v1358_v37  ;;  %5552 = vmatprep.subr.bf16.mxu1 %v9471_v7  ;;  %v1210_v62 = vld [vmem:[%s9437_s6 + $0x228] sm:$0xff]  ;;  %v1209_v37 = vld [vmem:[%s9437_s6 + $0x220] sm:$0xff] }
 0x15a   :  { %v5553_v56 = vpack.c.bf16 %v1134_v44, %v1133_v5  ;;  %v1049_v40 = vadd.f32 %v1048_v54, %v6792_v43  ;;  %v1378_v32 = vld [vmem:[%s9437_s6 + $0x768] sm:$0xff]  ;;  %v1377_v44 = vld [vmem:[%s9437_s6 + $0x760] sm:$0xff] }
 0x15b   :  { %v1136_v6 = vmax.f32 %v1054_v17, 0.0  ;;  %1892 = vmatmul.mubr.f32.gmra.mrb[88].mxu0 %v1189_v31  ;;  %2098 = vmatmul.mubr.f32.gmra.mrb[24].mxu1 %v1357_v47  ;;  %v1214_v5 = vld [vmem:[%s9437_s6 + $0x248] sm:$0xff]  ;;  %v1213_v31 = vld [vmem:[%s9437_s6 + $0x240] sm:$0xff] }
 0x15c   :  { %v1135_v22 = vmax.f32 %v1049_v40, 0.0  ;;  %v5356_v26 = vpop.f32.mrb[60].mxu0  ;;  %5554 = vmatpush1.bf16.msra.mxu1 %v5553_v56  ;;  %1896 = vmatprep.mubr.f32.mxu0 %v1194_v3  ;;  %v1382_v58 = vld [vmem:[%s9437_s6 + $0x788] sm:$0xff]  ;;  %v1381_v47 = vld [vmem:[%s9437_s6 + $0x780] sm:$0xff] }
 0x15d   :  { %v1064_v43 = vadd.f32 %v5356_v26, %v6795_v20  ;;  %v1058_v33 = vpop.f32.mrb[61].mxu0  ;;  %2101 = vmatprep.mubr.f32.mxu1 %v1362_v10  ;;  %5555 = vmatprep.subr.bf16.mxu1 %v9471_v7  ;;  %v1218_v2 = vld [vmem:[%s9437_s6 + $0x268] sm:$0xff]  ;;  %v1217_v54 = vld [vmem:[%s9437_s6 + $0x260] sm:$0xff] }
 0x15e   :  { %v5556_v55 = vpack.c.bf16 %v1136_v6, %v1135_v22  ;;  %v1059_v50 = vadd.f32 %v1058_v33, %v6800_v25  ;;  %v1386_v17 = vld [vmem:[%s9437_s6 + $0x7a8] sm:$0xff]  ;;  %v1385_v3 = vld [vmem:[%s9437_s6 + $0x7a0] sm:$0xff]  ;;  %v1144_v33 = vld [vmem:[%s9437_s6 + $0x18] sm:$0xff] }
 0x15f   :  { %v1138_v23 = vmax.f32 %v1064_v43, 0.0  ;;  %1897 = vmatmul.mubr.f32.gmra.mrb[90].mxu0 %v1193_v49  ;;  %2102 = vmatmul.mubr.f32.gmra.mrb[26].mxu1 %v1361_v53  ;;  %v1222_v56 = vld [vmem:[%s9437_s6 + $0x288] sm:$0xff]  ;;  %v1221_v10 = vld [vmem:[%s9437_s6 + $0x280] sm:$0xff] }
 0x160   :  { %v1137_v48 = vmax.f32 %v1059_v50, 0.0  ;;  %v5359_v20 = vpop.f32.mrb[62].mxu0  ;;  %5557 = vmatpush1.bf16.msra.mxu1 %v5556_v55  ;;  %1901 = vmatprep.mubr.f32.mxu0 %v1198_v36  ;;  %v1390_v40 = vld [vmem:[%s9437_s6 + $0x7c8] sm:$0xff]  ;;  %v1389_v6 = vld [vmem:[%s9437_s6 + $0x7c0] sm:$0xff]  ;;  %v1143_v55 = vld [vmem:[%s9437_s6 + $0x10] sm:$0xff] }
 0x161   :  { %v1074_v25 = vadd.f32 %v5359_v20, %v6803_v9  ;;  %v1068_v39 = vpop.f32.mrb[63].mxu0  ;;  %2105 = vmatprep.mubr.f32.mxu1 %v1366_v13  ;;  %5558 = vmatprep.subr.bf16.mxu1 %v9471_v7  ;;  %v1201_v9 = vld [vmem:[%s9437_s6 + $0x1e0] sm:$0xff]  ;;  %v1226_v22 = vld [vmem:[%s9437_s6 + $0x2a8] sm:$0xff]  ;;  %v1148_v13 = vld [vmem:[%s9437_s6 + $0x38] sm:$0xff] }
 0x162   :  { %v5559_v4 = vpack.c.bf16 %v1138_v23, %v1137_v48  ;;  %v1069_v14 = vadd.f32 %v1068_v39, %v6808_v34  ;;  %v1206_v34 = vld [vmem:[%s9437_s6 + $0x208] sm:$0xff]  ;;  %v1225_v49 = vld [vmem:[%s9437_s6 + $0x2a0] sm:$0xff]  ;;  %v1147_v48 = vld [vmem:[%s9437_s6 + $0x30] sm:$0xff] }
 0x163   :  { %v1140_v12 = vmax.f32 %v1074_v25, 0.0  ;;  %1902 = vmatmul.mubr.f32.gmra.mrb[92].mxu0 %v1197_v11  ;;  %2106 = vmatmul.mubr.f32.gmra.mrb[28].mxu1 %v1365_v18  ;;  %v1394_v26 = vld [vmem:[%s9437_s6 + $0x7e8] sm:$0xff]  ;;  %v1393_v53 = vld [vmem:[%s9437_s6 + $0x7e0] sm:$0xff]  ;;  %v1152_v11 = vld [vmem:[%s9437_s6 + $0x58] sm:$0xff] }
 0x164   :  { %v1139_v59 = vmax.f32 %v1069_v14, 0.0  ;;  %5560 = vmatpush1.bf16.msra.mxu1 %v5559_v4  ;;  %1906 = vmatprep.mubr.f32.mxu0 %v1202_v41  ;;  %v1230_v43 = vld [vmem:[%s9437_s6 + $0x2c8] sm:$0xff]  ;;  %v1229_v36 = vld [vmem:[%s9437_s6 + $0x2c0] sm:$0xff]  ;;  %v1151_v25 = vld [vmem:[%s9437_s6 + $0x50] sm:$0xff] }
 0x165   :  { %2109 = vmatprep.mubr.f32.mxu1 %v1370_v29  ;;  %5561 = vmatprep.subr.bf16.mxu1 %v9471_v7  ;;  %v1373_v7 = vld [vmem:[%s9437_s6 + $0x740] sm:$0xff]  ;;  %v1234_v50 = vld [vmem:[%s9437_s6 + $0x2e8] sm:$0xff]  ;;  %v1156_v41 = vld [vmem:[%s9437_s6 + $0x78] sm:$0xff] }
 0x166   :  { %v5562_v24 = vpack.c.bf16 %v1140_v12, %v1139_v59  ;;  %v1233_v23 = vld [vmem:[%s9437_s6 + $0x2e0] sm:$0xff]  ;;  %v1238_v20 = vld [vmem:[%s9437_s6 + $0x308] sm:$0xff]  ;;  %v1155_v14 = vld [vmem:[%s9437_s6 + $0x70] sm:$0xff] }
 0x167   :  { %1907 = vmatmul.mubr.f32.gmra.mrb[94].mxu0 %v1201_v9  ;;  %2110 = vmatmul.mubr.f32.gmra.mrb[30].mxu1 %v1369_v16  ;;  %v1237_v18 = vld [vmem:[%s9437_s6 + $0x300] sm:$0xff]  ;;  %v1242_v39 = vld [vmem:[%s9437_s6 + $0x328] sm:$0xff]  ;;  %v1160_v12 = vld [vmem:[%s9437_s6 + $0x98] sm:$0xff] }
 0x168   :  { %5563 = vmatpush1.bf16.msra.mxu1 %v5562_v24  ;;  %1911 = vmatprep.mubr.f32.mxu0 %v1206_v34  ;;  %v1241_v4 = vld [vmem:[%s9437_s6 + $0x320] sm:$0xff]  ;;  %v1246_v29 = vld [vmem:[%s9437_s6 + $0x348] sm:$0xff]  ;;  %v1159_v9 = vld [vmem:[%s9437_s6 + $0x90] sm:$0xff] }
 0x169   :  { %2113 = vmatprep.mubr.f32.mxu1 %v1374_v27  ;;  %v1245_v59 = vld [vmem:[%s9437_s6 + $0x340] sm:$0xff]  ;;  %v1250_v16 = vld [vmem:[%s9437_s6 + $0x368] sm:$0xff]  ;;  %v1164_v34 = vld [vmem:[%s9437_s6 + $0xb8] sm:$0xff] }
 0x16a   :  { %v1249_v24 = vld [vmem:[%s9437_s6 + $0x360] sm:$0xff]  ;;  %v1163_v27 = vld [vmem:[%s9437_s6 + $0xb0] sm:$0xff] }
 0x16b   :  { %1912 = vmatmul.mubr.f32.gmra.mrb[96].mxu0 %v1205_v28  ;;  %2114 = vmatmul.mubr.f32.gmra.mrb[32].mxu1 %v1373_v7  ;;  %v1254_v28 = vld [vmem:[%s9437_s6 + $0x388] sm:$0xff]  ;;  %v1168_v7 = vld [vmem:[%s9437_s6 + $0xd8] sm:$0xff] }
 0x16c   :  { %1916 = vmatprep.mubr.f32.mxu0 %v1210_v62  ;;  %2117 = vmatprep.mubr.f32.mxu1 %v1378_v32  ;;  %v1253_v62 = vld [vmem:[%s9437_s6 + $0x380] sm:$0xff]  ;;  %v1167_v32 = vld [vmem:[%s9437_s6 + $0xd0] sm:$0xff] }
 0x16f   :  { %1917 = vmatmul.mubr.f32.gmra.mrb[98].mxu0 %v1209_v37  ;;  %2118 = vmatmul.mubr.f32.gmra.mrb[34].mxu1 %v1377_v44  ;;  %v1258_v37 = vld [vmem:[%s9437_s6 + $0x3a8] sm:$0xff]  ;;  %v1172_v44 = vld [vmem:[%s9437_s6 + $0xf8] sm:$0xff] }
 0x170   :  { %1921 = vmatprep.mubr.f32.mxu0 %v1214_v5  ;;  %2121 = vmatprep.mubr.f32.mxu1 %v1382_v58  ;;  %v1257_v5 = vld [vmem:[%s9437_s6 + $0x3a0] sm:$0xff]  ;;  %v1171_v58 = vld [vmem:[%s9437_s6 + $0xf0] sm:$0xff] }
 0x173   :  { %1922 = vmatmul.mubr.f32.gmra.mrb[100].mxu0 %v1213_v31  ;;  %2122 = vmatmul.mubr.f32.gmra.mrb[36].mxu1 %v1381_v47  ;;  %v1262_v31 = vld [vmem:[%s9437_s6 + $0x3c8] sm:$0xff]  ;;  %v1176_v47 = vld [vmem:[%s9437_s6 + $0x118] sm:$0xff] }
 0x174   :  { %1926 = vmatprep.mubr.f32.mxu0 %v1218_v2  ;;  %2125 = vmatprep.mubr.f32.mxu1 %v1386_v17  ;;  %v1261_v2 = vld [vmem:[%s9437_s6 + $0x3c0] sm:$0xff]  ;;  %v1175_v17 = vld [vmem:[%s9437_s6 + $0x110] sm:$0xff] }
 0x177   :  { %1927 = vmatmul.mubr.f32.gmra.mrb[102].mxu0 %v1217_v54  ;;  %2126 = vmatmul.mubr.f32.gmra.mrb[38].mxu1 %v1385_v3  ;;  %v1266_v54 = vld [vmem:[%s9437_s6 + $0x3e8] sm:$0xff]  ;;  %v1180_v3 = vld [vmem:[%s9437_s6 + $0x138] sm:$0xff] }
 0x178   :  { %1931 = vmatprep.mubr.f32.mxu0 %v1222_v56  ;;  %2129 = vmatprep.mubr.f32.mxu1 %v1390_v40  ;;  %v1265_v56 = vld [vmem:[%s9437_s6 + $0x3e0] sm:$0xff]  ;;  %v1179_v40 = vld [vmem:[%s9437_s6 + $0x130] sm:$0xff] }
 0x17b   :  { %1932 = vmatmul.mubr.f32.gmra.mrb[104].mxu0 %v1221_v10  ;;  %2130 = vmatmul.mubr.f32.gmra.mrb[40].mxu1 %v1389_v6  ;;  %v1270_v10 = vld [vmem:[%s9437_s6 + $0x408] sm:$0xff]  ;;  %v1184_v6 = vld [vmem:[%s9437_s6 + $0x158] sm:$0xff] }
 0x17c   :  { %1936 = vmatprep.mubr.f32.mxu0 %v1226_v22  ;;  %2133 = vmatprep.mubr.f32.mxu1 %v1394_v26  ;;  %v1269_v22 = vld [vmem:[%s9437_s6 + $0x400] sm:$0xff]  ;;  %v1183_v26 = vld [vmem:[%s9437_s6 + $0x150] sm:$0xff] }
 0x17f   :  { %1937 = vmatmul.mubr.f32.gmra.mrb[106].mxu0 %v1225_v49  ;;  %2134 = vmatmul.mubr.f32.gmra.mrb[42].mxu1 %v1393_v53  ;;  %v1274_v49 = vld [vmem:[%s9437_s6 + $0x428] sm:$0xff]  ;;  %v1188_v53 = vld [vmem:[%s9437_s6 + $0x178] sm:$0xff] }
 0x180   :  { %1941 = vmatprep.mubr.f32.mxu0 %v1230_v43  ;;  %2202 = vmatprep.mubr.f32.mxu1 %v1144_v33  ;;  %v1273_v43 = vld [vmem:[%s9437_s6 + $0x420] sm:$0xff]  ;;  %v1187_v33 = vld [vmem:[%s9437_s6 + $0x170] sm:$0xff] }
 0x183   :  { %1942 = vmatmul.mubr.f32.gmra.mrb[108].mxu0 %v1229_v36  ;;  %2203 = vmatmul.mubr.f32.vlgmr.msra.gmra.mrb[44].mxu1 %v1143_v55  ;;  %v1278_v36 = vld [vmem:[%s9437_s6 + $0x448] sm:$0xff]  ;;  %v1192_v55 = vld [vmem:[%s9437_s6 + $0x198] sm:$0xff] }
 0x184   :  { %1946 = vmatprep.mubr.f32.mxu0 %v1234_v50  ;;  %2207 = vmatprep.mubr.f32.mxu1 %v1148_v13  ;;  %v1277_v50 = vld [vmem:[%s9437_s6 + $0x440] sm:$0xff]  ;;  %v1191_v13 = vld [vmem:[%s9437_s6 + $0x190] sm:$0xff] }
 0x187   :  { %1947 = vmatmul.mubr.f32.gmra.mrb[110].mxu0 %v1233_v23  ;;  %2208 = vmatmul.mubr.f32.gmra.mrb[46].mxu1 %v1147_v48  ;;  %v1282_v23 = vld [vmem:[%s9437_s6 + $0x468] sm:$0xff]  ;;  %v1196_v48 = vld [vmem:[%s9437_s6 + $0x1b8] sm:$0xff] }
 0x188   :  { %1951 = vmatprep.mubr.f32.mxu0 %v1238_v20  ;;  %2212 = vmatprep.mubr.f32.mxu1 %v1152_v11  ;;  %v1281_v20 = vld [vmem:[%s9437_s6 + $0x460] sm:$0xff]  ;;  %v1195_v11 = vld [vmem:[%s9437_s6 + $0x1b0] sm:$0xff] }
 0x18b   :  { %1952 = vmatmul.mubr.f32.gmra.mrb[112].mxu0 %v1237_v18  ;;  %2213 = vmatmul.mubr.f32.gmra.mrb[48].mxu1 %v1151_v25  ;;  %v1286_v18 = vld [vmem:[%s9437_s6 + $0x488] sm:$0xff]  ;;  %v1200_v25 = vld [vmem:[%s9437_s6 + $0x1d8] sm:$0xff] }
 0x18c   :  { %1956 = vmatprep.mubr.f32.mxu0 %v1242_v39  ;;  %2217 = vmatprep.mubr.f32.mxu1 %v1156_v41  ;;  %v1285_v39 = vld [vmem:[%s9437_s6 + $0x480] sm:$0xff]  ;;  %v1199_v41 = vld [vmem:[%s9437_s6 + $0x1d0] sm:$0xff] }
 0x18f   :  { %1957 = vmatmul.mubr.f32.gmra.mrb[114].mxu0 %v1241_v4  ;;  %2218 = vmatmul.mubr.f32.gmra.mrb[50].mxu1 %v1155_v14  ;;  %v1290_v4 = vld [vmem:[%s9437_s6 + $0x4a8] sm:$0xff]  ;;  %v1204_v14 = vld [vmem:[%s9437_s6 + $0x1f8] sm:$0xff] }
 0x190   :  { %1961 = vmatprep.mubr.f32.mxu0 %v1246_v29  ;;  %2222 = vmatprep.mubr.f32.mxu1 %v1160_v12  ;;  %v1289_v29 = vld [vmem:[%s9437_s6 + $0x4a0] sm:$0xff]  ;;  %v1203_v12 = vld [vmem:[%s9437_s6 + $0x1f0] sm:$0xff] }
 0x193   :  { %1962 = vmatmul.mubr.f32.gmra.mrb[116].mxu0 %v1245_v59  ;;  %2223 = vmatmul.mubr.f32.gmra.mrb[52].mxu1 %v1159_v9  ;;  %v1294_v59 = vld [vmem:[%s9437_s6 + $0x4c8] sm:$0xff]  ;;  %v1208_v9 = vld [vmem:[%s9437_s6 + $0x218] sm:$0xff] }
 0x194   :  { %1966 = vmatprep.mubr.f32.mxu0 %v1250_v16  ;;  %2227 = vmatprep.mubr.f32.mxu1 %v1164_v34  ;;  %v1293_v16 = vld [vmem:[%s9437_s6 + $0x4c0] sm:$0xff]  ;;  %v1207_v34 = vld [vmem:[%s9437_s6 + $0x210] sm:$0xff] }
 0x197   :  { %1967 = vmatmul.mubr.f32.gmra.mrb[118].mxu0 %v1249_v24  ;;  %2228 = vmatmul.mubr.f32.gmra.mrb[54].mxu1 %v1163_v27  ;;  %v1298_v24 = vld [vmem:[%s9437_s6 + $0x4e8] sm:$0xff]  ;;  %v1212_v27 = vld [vmem:[%s9437_s6 + $0x238] sm:$0xff] }
 0x198   :  { %1971 = vmatprep.mubr.f32.mxu0 %v1254_v28  ;;  %2232 = vmatprep.mubr.f32.mxu1 %v1168_v7  ;;  %v1297_v28 = vld [vmem:[%s9437_s6 + $0x4e0] sm:$0xff]  ;;  %v1211_v7 = vld [vmem:[%s9437_s6 + $0x230] sm:$0xff] }
 0x19b   :  { %1972 = vmatmul.mubr.f32.gmra.mrb[120].mxu0 %v1253_v62  ;;  %2233 = vmatmul.mubr.f32.gmra.mrb[56].mxu1 %v1167_v32  ;;  %v1302_v62 = vld [vmem:[%s9437_s6 + $0x508] sm:$0xff]  ;;  %v1216_v32 = vld [vmem:[%s9437_s6 + $0x258] sm:$0xff] }
 0x19c   :  { %1976 = vmatprep.mubr.f32.mxu0 %v1258_v37  ;;  %2237 = vmatprep.mubr.f32.mxu1 %v1172_v44  ;;  %v1301_v37 = vld [vmem:[%s9437_s6 + $0x500] sm:$0xff]  ;;  %v1215_v44 = vld [vmem:[%s9437_s6 + $0x250] sm:$0xff] }
 0x19f   :  { %1977 = vmatmul.mubr.f32.gmra.mrb[122].mxu0 %v1257_v5  ;;  %2238 = vmatmul.mubr.f32.gmra.mrb[58].mxu1 %v1171_v58  ;;  %v1306_v5 = vld [vmem:[%s9437_s6 + $0x528] sm:$0xff]  ;;  %v1220_v58 = vld [vmem:[%s9437_s6 + $0x278] sm:$0xff] }
 0x1a0   :  { %1981 = vmatprep.mubr.f32.mxu0 %v1262_v31  ;;  %2242 = vmatprep.mubr.f32.mxu1 %v1176_v47  ;;  %v1305_v31 = vld [vmem:[%s9437_s6 + $0x520] sm:$0xff]  ;;  %v1219_v47 = vld [vmem:[%s9437_s6 + $0x270] sm:$0xff] }
 0x1a3   :  { %1982 = vmatmul.mubr.f32.gmra.mrb[124].mxu0 %v1261_v2  ;;  %2243 = vmatmul.mubr.f32.gmra.mrb[60].mxu1 %v1175_v17  ;;  %v1224_v2 = vld [vmem:[%s9437_s6 + $0x298] sm:$0xff]  ;;  %v1223_v17 = vld [vmem:[%s9437_s6 + $0x290] sm:$0xff] }
 0x1a4   :  { %1986 = vmatprep.mubr.f32.mxu0 %v1266_v54  ;;  %2247 = vmatprep.mubr.f32.mxu1 %v1180_v3  ;;  %v1228_v54 = vld [vmem:[%s9437_s6 + $0x2b8] sm:$0xff]  ;;  %v1227_v3 = vld [vmem:[%s9437_s6 + $0x2b0] sm:$0xff] }
 0x1a7   :  { %1987 = vmatmul.mubr.f32.gmra.mrb[126].mxu0 %v1265_v56  ;;  %2248 = vmatmul.mubr.f32.gmra.mrb[62].mxu1 %v1179_v40  ;;  %v1232_v56 = vld [vmem:[%s9437_s6 + $0x2d8] sm:$0xff]  ;;  %v1231_v40 = vld [vmem:[%s9437_s6 + $0x2d0] sm:$0xff] }
 0x1a8   :  { %1991 = vmatprep.mubr.f32.mxu0 %v1270_v10  ;;  %2252 = vmatprep.mubr.f32.mxu1 %v1184_v6  ;;  %v1236_v10 = vld [vmem:[%s9437_s6 + $0x2f8] sm:$0xff]  ;;  %v1235_v6 = vld [vmem:[%s9437_s6 + $0x2f0] sm:$0xff] }
 0x1ab   :  { %1992 = vmatmul.mubr.f32.gmra.mrb[128].mxu0 %v1269_v22  ;;  %2253 = vmatmul.mubr.f32.gmra.mrb[64].mxu1 %v1183_v26  ;;  %v1240_v22 = vld [vmem:[%s9437_s6 + $0x318] sm:$0xff]  ;;  %v1239_v26 = vld [vmem:[%s9437_s6 + $0x310] sm:$0xff] }
 0x1ac   :  { %1996 = vmatprep.mubr.f32.mxu0 %v1274_v49  ;;  %2257 = vmatprep.mubr.f32.mxu1 %v1188_v53  ;;  %v1244_v49 = vld [vmem:[%s9437_s6 + $0x338] sm:$0xff]  ;;  %v1243_v53 = vld [vmem:[%s9437_s6 + $0x330] sm:$0xff] }
 0x1af   :  { %1997 = vmatmul.mubr.f32.gmra.mrb[130].mxu0 %v1273_v43  ;;  %2258 = vmatmul.mubr.f32.gmra.mrb[66].mxu1 %v1187_v33  ;;  %v1248_v43 = vld [vmem:[%s9437_s6 + $0x358] sm:$0xff]  ;;  %v1247_v33 = vld [vmem:[%s9437_s6 + $0x350] sm:$0xff] }
 0x1b0   :  { %2001 = vmatprep.mubr.f32.mxu0 %v1278_v36  ;;  %2262 = vmatprep.mubr.f32.mxu1 %v1192_v55  ;;  %v1252_v36 = vld [vmem:[%s9437_s6 + $0x378] sm:$0xff]  ;;  %v1251_v55 = vld [vmem:[%s9437_s6 + $0x370] sm:$0xff] }
 0x1b3   :  { %2002 = vmatmul.mubr.f32.gmra.mrb[132].mxu0 %v1277_v50  ;;  %2263 = vmatmul.mubr.f32.gmra.mrb[68].mxu1 %v1191_v13  ;;  %v1256_v50 = vld [vmem:[%s9437_s6 + $0x398] sm:$0xff]  ;;  %v1255_v13 = vld [vmem:[%s9437_s6 + $0x390] sm:$0xff] }
 0x1b4   :  { %2006 = vmatprep.mubr.f32.mxu0 %v1282_v23  ;;  %2267 = vmatprep.mubr.f32.mxu1 %v1196_v48  ;;  %v1260_v23 = vld [vmem:[%s9437_s6 + $0x3b8] sm:$0xff]  ;;  %v1259_v48 = vld [vmem:[%s9437_s6 + $0x3b0] sm:$0xff] }
 0x1b7   :  { %2007 = vmatmul.mubr.f32.gmra.mrb[134].mxu0 %v1281_v20  ;;  %2268 = vmatmul.mubr.f32.gmra.mrb[70].mxu1 %v1195_v11  ;;  %v1264_v20 = vld [vmem:[%s9437_s6 + $0x3d8] sm:$0xff]  ;;  %v1263_v11 = vld [vmem:[%s9437_s6 + $0x3d0] sm:$0xff] }
 0x1b8   :  { %2011 = vmatprep.mubr.f32.mxu0 %v1286_v18  ;;  %2272 = vmatprep.mubr.f32.mxu1 %v1200_v25  ;;  %v7496_v18 = vpop.permute.xlu0 %2798  ;;  %v1268_v25 = vld [vmem:[%s9437_s6 + $0x3f8] sm:$0xff] }
 0x1b9   :  { %9479 = vst [vmem:[#allocation2_spill] sm:$0xff] %v7496_v18 }
 0x1bb   :  { %2012 = vmatmul.mubr.f32.gmra.mrb[136].mxu0 %v1285_v39  ;;  %2273 = vmatmul.mubr.f32.gmra.mrb[72].mxu1 %v1199_v41  ;;  %v1267_v39 = vld [vmem:[%s9437_s6 + $0x3f0] sm:$0xff]  ;;  %v1272_v41 = vld [vmem:[%s9437_s6 + $0x418] sm:$0xff] }
 0x1bc   :  { %2016 = vmatprep.mubr.f32.mxu0 %v1290_v4  ;;  %2277 = vmatprep.mubr.f32.mxu1 %v1204_v14  ;;  %v7507_v4 = vpop.permute.xlu1 %2654 }
 0x1bd   :  { %9480 = vst [vmem:[#allocation3_spill] sm:$0xff] %v7507_v4 }
 0x1bf   :  { %2017 = vmatmul.mubr.f32.gmra.mrb[138].mxu0 %v1289_v29  ;;  %2278 = vmatmul.mubr.f32.gmra.mrb[74].mxu1 %v1203_v12  ;;  %v7511_v29 = vpop.permute.xlu0 %2803 }
 0x1c0   :  { %2021 = vmatprep.mubr.f32.mxu0 %v1294_v59  ;;  %2282 = vmatprep.mubr.f32.mxu1 %v1208_v9  ;;  %9481 = vst [vmem:[#allocation8_spill] sm:$0xff] %v7511_v29  ;;  %v1271_v59 = vld [vmem:[%s9437_s6 + $0x410] sm:$0xff]  ;;  %v1276_v9 = vld [vmem:[%s9437_s6 + $0x438] sm:$0xff] }
 0x1c3   :  { %2022 = vmatmul.mubr.f32.gmra.mrb[140].mxu0 %v1293_v16  ;;  %2283 = vmatmul.mubr.f32.gmra.mrb[76].mxu1 %v1207_v34 }
 0x1c4   :  { %2026 = vmatprep.mubr.f32.mxu0 %v1298_v24  ;;  %2287 = vmatprep.mubr.f32.mxu1 %v1212_v27  ;;  %v7521_v24 = vpop.permute.xlu1 %2659  ;;  %v1275_v27 = vld [vmem:[%s9437_s6 + $0x430] sm:$0xff] }
 0x1c5   :  { %9482 = vst [vmem:[#allocation9_spill] sm:$0xff] %v7521_v24 }
 0x1c7   :  { %2027 = vmatmul.mubr.f32.gmra.mrb[142].mxu0 %v1297_v28  ;;  %2288 = vmatmul.mubr.f32.gmra.mrb[78].mxu1 %v1211_v7  ;;  %v7526_v28 = vpop.permute.xlu0 %1613  ;;  %v1280_v7 = vld [vmem:[%s9437_s6 + $0x458] sm:$0xff] }
 0x1c8   :  { %2031 = vmatprep.mubr.f32.mxu0 %v1302_v62  ;;  %2292 = vmatprep.mubr.f32.mxu1 %v1216_v32 }
 0x1cb   :  { %2032 = vmatmul.mubr.f32.gmra.mrb[144].mxu0 %v1301_v37  ;;  %2293 = vmatmul.mubr.f32.gmra.mrb[80].mxu1 %v1215_v44  ;;  %v1279_v37 = vld [vmem:[%s9437_s6 + $0x450] sm:$0xff]  ;;  %v1284_v44 = vld [vmem:[%s9437_s6 + $0x478] sm:$0xff] }
 0x1cc   :  { %2036 = vmatprep.mubr.f32.mxu0 %v1306_v5  ;;  %2297 = vmatprep.mubr.f32.mxu1 %v1220_v58  ;;  %v7539_v5 = vpop.permute.xlu1 %1618 }
 0x1cf   :  { %2037 = vmatmul.mubr.f32.gmra.mrb[146].mxu0 %v1305_v31  ;;  %2298 = vmatmul.mubr.f32.gmra.mrb[82].mxu1 %v1219_v47  ;;  %v7543_v31 = vpop.permute.xlu0 %1693 }
 0x1d0   :  { %2302 = vmatprep.mubr.f32.mxu1 %v1224_v2  ;;  %9483 = vst [vmem:[#allocation10_spill] sm:$0xff] %v7543_v31  ;;  %v1283_v2 = vld [vmem:[%s9437_s6 + $0x470] sm:$0xff] }
 0x1d3   :  { %2303 = vmatmul.mubr.f32.gmra.mrb[84].mxu1 %v1223_v17  ;;  %v1288_v17 = vld [vmem:[%s9437_s6 + $0x498] sm:$0xff] }
 0x1d4   :  { %2307 = vmatprep.mubr.f32.mxu1 %v1228_v54 }
 0x1d7   :  { %2308 = vmatmul.mubr.f32.gmra.mrb[86].mxu1 %v1227_v3 }
 0x1d8   :  { %2312 = vmatprep.mubr.f32.mxu1 %v1232_v56 }
 0x1db   :  { %2313 = vmatmul.mubr.f32.gmra.mrb[88].mxu1 %v1231_v40 }
 0x1dc   :  { %2317 = vmatprep.mubr.f32.mxu1 %v1236_v10  ;;  %v1287_v10 = vld [vmem:[%s9437_s6 + $0x490] sm:$0xff] }
 0x1df   :  { %2318 = vmatmul.mubr.f32.gmra.mrb[90].mxu1 %v1235_v6  ;;  %v7558_v6 = vpop.permute.xlu1 %1698 }
 0x1e0   :  { %2322 = vmatprep.mubr.f32.mxu1 %v1240_v22  ;;  %9485 = vst [vmem:[#allocation12_spill] sm:$0xff] %v7558_v6  ;;  %v7560_v22 = vpop.permute.xlu0 %1623 }
 0x1e3   :  { %2323 = vmatmul.mubr.f32.gmra.mrb[92].mxu1 %v1239_v26  ;;  %v1292_v26 = vld [vmem:[%s9437_s6 + $0x4b8] sm:$0xff] }
 0x1e4   :  { %2327 = vmatprep.mubr.f32.mxu1 %v1244_v49 }
 0x1e7   :  { %2328 = vmatmul.mubr.f32.gmra.mrb[94].mxu1 %v1243_v53 }
 0x1e8   :  { %2332 = vmatprep.mubr.f32.mxu1 %v1248_v43 }
 0x1eb   :  { %2333 = vmatmul.mubr.f32.gmra.mrb[96].mxu1 %v1247_v33 }
 0x1ec   :  { %2337 = vmatprep.mubr.f32.mxu1 %v1252_v36  ;;  %v1291_v36 = vld [vmem:[%s9437_s6 + $0x4b0] sm:$0xff] }
 0x1ef   :  { %2338 = vmatmul.mubr.f32.gmra.mrb[98].mxu1 %v1251_v55  ;;  %v1296_v55 = vld [vmem:[%s9437_s6 + $0x4d8] sm:$0xff] }
 0x1f0   :  { %2342 = vmatprep.mubr.f32.mxu1 %v1256_v50 }
 0x1f3   :  { %2343 = vmatmul.mubr.f32.gmra.mrb[100].mxu1 %v1255_v13 }
 0x1f4   :  { %2347 = vmatprep.mubr.f32.mxu1 %v1260_v23 }
 0x1f7   :  { %2348 = vmatmul.mubr.f32.gmra.mrb[102].mxu1 %v1259_v48 }
 0x1f8   :  { %2352 = vmatprep.mubr.f32.mxu1 %v1264_v20  ;;  %v1295_v20 = vld [vmem:[%s9437_s6 + $0x4d0] sm:$0xff] }
 0x1fb   :  { %2353 = vmatmul.mubr.f32.gmra.mrb[104].mxu1 %v1263_v11  ;;  %v7582_v11 = vpop.permute.xlu1 %1703 }
 0x1fc   :  { %2357 = vmatprep.mubr.f32.mxu1 %v1268_v25  ;;  %9488 = vst [vmem:[#allocation15_spill] sm:$0xff] %v7582_v11  ;;  %v7584_v25 = vpop.permute.xlu0 %1628 }
 0x1fe   :  { %v7509_v14 = vpop.f32.mrb[64].mxu0 }
 0x1ff   :  { %2358 = vmatmul.mubr.f32.gmra.mrb[106].mxu1 %v1267_v39  ;;  %v1835_v12 = vpop.f32.mrb[65].mxu0  ;;  %v1300_v39 = vld [vmem:[%s9437_s6 + $0x4f8] sm:$0xff] }
 0x200   :  { %2362 = vmatprep.mubr.f32.mxu1 %v1272_v41 }
 0x202   :  { %v7519_v16 = vpop.f32.mrb[66].mxu0 }
 0x203   :  { %2363 = vmatmul.mubr.f32.gmra.mrb[108].mxu1 %v1271_v59  ;;  %v1840_v34 = vpop.f32.mrb[67].mxu0 }
 0x204   :  { %2367 = vmatprep.mubr.f32.mxu1 %v1276_v9  ;;  %v1299_v34 = vld [vmem:[%s9437_s6 + $0x4f0] sm:$0xff] }
 0x206   :  { %v7531_v62 = vpop.f32.mrb[68].mxu0 }
 0x207   :  { %2368 = vmatmul.mubr.f32.gmra.mrb[110].mxu1 %v1275_v27  ;;  %v1845_v32 = vpop.f32.mrb[69].mxu0  ;;  %v1304_v27 = vld [vmem:[%s9437_s6 + $0x518] sm:$0xff] }
 0x208   :  { %2372 = vmatprep.mubr.f32.mxu1 %v1280_v7 }
 0x20a   :  { %v7541_v58 = vpop.f32.mrb[70].mxu0 }
 0x20b   :  { %2373 = vmatmul.mubr.f32.gmra.mrb[112].mxu1 %v1279_v37  ;;  %v1850_v47 = vpop.f32.mrb[71].mxu0 }
 0x20c   :  { %2377 = vmatprep.mubr.f32.mxu1 %v1284_v44  ;;  %v1303_v47 = vld [vmem:[%s9437_s6 + $0x510] sm:$0xff] }
 0x20e   :  { %v7551_v54 = vpop.f32.mrb[72].mxu0  ;;  %v7553_v3 = vpop.f32.mrb[8].mxu1 }
 0x20f   :  { %9484 = vst [vmem:[#allocation11_spill] sm:$0xff] %v7553_v3  ;;  %v2065_v56 = vpop.f32.mrb[9].mxu1  ;;  %2378 = vmatmul.mubr.f32.gmra.mrb[114].mxu1 %v1283_v2  ;;  %v1855_v40 = vpop.f32.mrb[73].mxu0 }
 0x210   :  { %2382 = vmatprep.mubr.f32.mxu1 %v1288_v17  ;;  %v7604_v2 = vpop.permute.xlu1 %1708  ;;  %v7606_v17 = vpop.permute.xlu0 %1633  ;;  %v1308_v56 = vld [vmem:[%s9437_s6 + $0x538] sm:$0xff] }
 0x211   :  { %9490 = vst [vmem:[#allocation17_spill] sm:$0xff] %v7604_v2 }
 0x212   :  { %v7565_v49 = vpop.f32.mrb[74].mxu0  ;;  %v7567_v53 = vpop.f32.mrb[10].mxu1 }
 0x213   :  { %9486 = vst [vmem:[#allocation13_spill] sm:$0xff] %v7567_v53  ;;  %v2070_v43 = vpop.f32.mrb[11].mxu1  ;;  %2383 = vmatmul.mubr.f32.gmra.mrb[116].mxu1 %v1287_v10  ;;  %v1860_v33 = vpop.f32.mrb[75].mxu0 }
 0x214   :  { %2387 = vmatprep.mubr.f32.mxu1 %v1292_v26  ;;  %v1307_v33 = vld [vmem:[%s9437_s6 + $0x530] sm:$0xff] }
 0x216   :  { %v7575_v50 = vpop.f32.mrb[76].mxu0  ;;  %v7577_v13 = vpop.f32.mrb[12].mxu1 }
 0x217   :  { %9487 = vst [vmem:[#allocation14_spill] sm:$0xff] %v7577_v13  ;;  %v2075_v23 = vpop.f32.mrb[13].mxu1  ;;  %2388 = vmatmul.mubr.f32.gmra.mrb[118].mxu1 %v1291_v36  ;;  %v1865_v48 = vpop.f32.mrb[77].mxu0  ;;  %v1312_v36 = vld [vmem:[%s9437_s6 + $0x558] sm:$0xff] }
 0x218   :  { %2392 = vmatprep.mubr.f32.mxu1 %v1296_v55 }
 0x21a   :  { %v7589_v41 = vpop.f32.mrb[78].mxu0  ;;  %v7591_v12 = vpop.f32.mrb[14].mxu1 }
 0x21b   :  { %9489 = vst [vmem:[#allocation16_spill] sm:$0xff] %v7591_v12  ;;  %v2080_v59 = vpop.f32.mrb[15].mxu1  ;;  %2393 = vmatmul.mubr.f32.gmra.mrb[120].mxu1 %v1295_v20  ;;  %v1870_v9 = vpop.f32.mrb[79].mxu0 }
 0x21c   :  { %2397 = vmatprep.mubr.f32.mxu1 %v1300_v39  ;;  %v1311_v39 = vld [vmem:[%s9437_s6 + $0x550] sm:$0xff]  ;;  %v7624_v59 = vpop.permute.xlu1 %1638  ;;  %v7626_v9 = vpop.permute.xlu0 %1643 }
 0x21d   :  { %9491 = vst [vmem:[#allocation18_spill] sm:$0xff] %v7626_v9 }
 0x21e   :  { %v7599_v7 = vpop.f32.mrb[80].mxu0  ;;  %v2083_v32 = vpop.f32.mrb[16].mxu1 }
 0x21f   :  { %v2084_v37 = vpop.f32.mrb[17].mxu1  ;;  %2398 = vmatmul.mubr.f32.gmra.mrb[122].mxu1 %v1299_v34  ;;  %v1875_v44 = vpop.f32.mrb[81].mxu0  ;;  %v1316_v34 = vld [vmem:[%s9437_s6 + $0x578] sm:$0xff] }
 0x220   :  { %2402 = vmatprep.mubr.f32.mxu1 %v1304_v27 }
 0x222   :  { %v7611_v40 = vpop.f32.mrb[82].mxu0  ;;  %v2087_v10 = vpop.f32.mrb[18].mxu1 }
 0x223   :  { %v2088_v26 = vpop.f32.mrb[19].mxu1  ;;  %2403 = vmatmul.mubr.f32.gmra.mrb[124].mxu1 %v1303_v47  ;;  %v1880_v43 = vpop.f32.mrb[83].mxu0  ;;  %v1315_v47 = vld [vmem:[%s9437_s6 + $0x570] sm:$0xff] }
 0x224   :  { %2407 = vmatprep.mubr.f32.mxu1 %v1308_v56  ;;  %v1320_v56 = vld [vmem:[%s9437_s6 + $0x598] sm:$0xff] }
 0x226   :  { %v7619_v55 = vpop.f32.mrb[84].mxu0  ;;  %v2091_v23 = vpop.f32.mrb[20].mxu1 }
 0x227   :  { %v2092_v48 = vpop.f32.mrb[21].mxu1  ;;  %2408 = vmatmul.mubr.f32.gmra.mrb[126].mxu1 %v1307_v33  ;;  %v1885_v20 = vpop.f32.mrb[85].mxu0 }
 0x228   :  { %2412 = vmatprep.mubr.f32.mxu1 %v1312_v36  ;;  %v1319_v36 = vld [vmem:[%s9437_s6 + $0x590] sm:$0xff]  ;;  %v7644_v23 = vpop.permute.xlu1 %1648  ;;  %v7646_v48 = vpop.permute.xlu0 %1653  ;;  %v1324_v20 = vld [vmem:[%s9437_s6 + $0x5b8] sm:$0xff] }
 0x229   :  { %9492 = vst [vmem:[#allocation19_spill] sm:$0xff] %v7644_v23  ;;  %9493 = vst [vmem:[#allocation20_spill] sm:$0xff] %v7646_v48 }
 0x22a   :  { %v7631_v27 = vpop.f32.mrb[86].mxu0  ;;  %v2095_v32 = vpop.f32.mrb[22].mxu1 }
 0x22b   :  { %v2096_v37 = vpop.f32.mrb[23].mxu1  ;;  %2413 = vmatmul.mubr.f32.gmra.mrb[0].mxu1 %v1311_v39  ;;  %v1890_v44 = vpop.f32.mrb[87].mxu0 }
 0x22c   :  { %2417 = vmatprep.mubr.f32.mxu1 %v1316_v34  ;;  %v1323_v44 = vld [vmem:[%s9437_s6 + $0x5b0] sm:$0xff] }
 0x22e   :  { %v7639_v10 = vpop.f32.mrb[88].mxu0  ;;  %v2099_v26 = vpop.f32.mrb[24].mxu1 }
 0x22f   :  { %v2100_v43 = vpop.f32.mrb[25].mxu1  ;;  %2418 = vmatmul.mubr.f32.gmra.mrb[2].mxu1 %v1315_v47  ;;  %v1895_v33 = vpop.f32.mrb[89].mxu0  ;;  %v1328_v47 = vld [vmem:[%s9437_s6 + $0x5d8] sm:$0xff] }
 0x230   :  { %2422 = vmatprep.mubr.f32.mxu1 %v1320_v56 }
 0x232   :  { %v7651_v39 = vpop.f32.mrb[90].mxu0  ;;  %v2103_v34 = vpop.f32.mrb[26].mxu1 }
 0x233   :  { %v2104_v32 = vpop.f32.mrb[27].mxu1  ;;  %2423 = vmatmul.mubr.f32.gmra.mrb[4].mxu1 %v1319_v36  ;;  %v1900_v37 = vpop.f32.mrb[91].mxu0  ;;  %v1327_v36 = vld [vmem:[%s9437_s6 + $0x5d0] sm:$0xff] }
 0x234   :  { %2427 = vmatprep.mubr.f32.mxu1 %v1324_v20  ;;  %v7664_v20 = vpop.permute.xlu1 %1658  ;;  %v7666_v34 = vpop.permute.xlu0 %1663  ;;  %v1332_v32 = vld [vmem:[%s9437_s6 + $0x5f8] sm:$0xff] }
 0x235   :  { %9495 = vst [vmem:[#allocation22_spill] sm:$0xff] %v7664_v20  ;;  %9496 = vst [vmem:[#allocation23_spill] sm:$0xff] %v7666_v34 }
 0x236   :  { %v2107_v56 = vpop.f32.mrb[28].mxu1  ;;  %v7659_v26 = vpop.f32.mrb[92].mxu0 }
 0x237   :  { %9494 = vst [vmem:[#allocation21_spill] sm:$0xff] %v7659_v26  ;;  %v2108_v43 = vpop.f32.mrb[29].mxu1  ;;  %2428 = vmatmul.mubr.f32.gmra.mrb[6].mxu1 %v1323_v44  ;;  %v1905_v33 = vpop.f32.mrb[93].mxu0 }
 0x238   :  { %2432 = vmatprep.mubr.f32.mxu1 %v1328_v47  ;;  %v1331_v47 = vld [vmem:[%s9437_s6 + $0x5f0] sm:$0xff]  ;;  %v1336_v43 = vld [vmem:[%s9437_s6 + $0x618] sm:$0xff] }
 0x23a   :  { %v2111_v37 = vpop.f32.mrb[30].mxu1  ;;  %v7671_v56 = vpop.f32.mrb[94].mxu0 }
 0x23b   :  { %9497 = vst [vmem:[#allocation24_spill] sm:$0xff] %v7671_v56  ;;  %v2112_v26 = vpop.f32.mrb[31].mxu1  ;;  %2433 = vmatmul.mubr.f32.gmra.mrb[128].mxu1 %v1327_v36  ;;  %v1910_v44 = vpop.f32.mrb[95].mxu0 }
 0x23c   :  { %2437 = vmatprep.mubr.f32.mxu1 %v1332_v32  ;;  %v1335_v26 = vld [vmem:[%s9437_s6 + $0x610] sm:$0xff]  ;;  %v7684_v36 = vpop.permute.xlu1 %1668  ;;  %v7686_v32 = vpop.permute.xlu0 %1673  ;;  %v1340_v44 = vld [vmem:[%s9437_s6 + $0x638] sm:$0xff] }
 0x23d   :  { %9498 = vst [vmem:[#allocation25_spill] sm:$0xff] %v7684_v36  ;;  %9499 = vst [vmem:[#allocation26_spill] sm:$0xff] %v7686_v32 }
 0x23e   :  { %v7679_v33 = vpop.f32.mrb[96].mxu0  ;;  %v2115_v4 = vpop.f32.mrb[32].mxu1 }
 0x23f   :  { %v2116_v24 = vpop.f32.mrb[33].mxu1  ;;  %2438 = vmatmul.mubr.f32.gmra.mrb[130].mxu1 %v1331_v47  ;;  %v1915_v37 = vpop.f32.mrb[97].mxu0  ;;  %v1339_v47 = vld [vmem:[%s9437_s6 + $0x630] sm:$0xff] }
 0x240   :  { %2442 = vmatprep.mubr.f32.mxu1 %v1336_v43  ;;  %v7698_v60 = vpop.permute.xlu1 %1678  ;;  %v7700_v15 = vpop.permute.xlu0 %1683 }
 0x241   :  { %9500 = vst [vmem:[#allocation27_spill] sm:$0xff] %v7698_v60  ;;  %9501 = vst [vmem:[#allocation28_spill] sm:$0xff] %v7700_v15 }
 0x242   :  { %v7691_v56 = vpop.f32.mrb[98].mxu0  ;;  %v2119_v18 = vpop.f32.mrb[34].mxu1 }
 0x243   :  { %v2120_v4 = vpop.f32.mrb[35].mxu1  ;;  %2443 = vmatmul.mubr.f32.gmra.mrb[132].mxu1 %v1335_v26  ;;  %v1920_v24 = vpop.f32.mrb[99].mxu0 }
 0x244   :  { %2447 = vmatprep.mubr.f32.mxu1 %v1340_v44  ;;  %v7706_v2 = vpop.permute.xlu1 %1688 }
 0x245   :  { %9502 = vst [vmem:[#allocation29_spill] sm:$0xff] %v7706_v2 }
 0x246   :  { %v7696_v43 = vpop.f32.mrb[100].mxu0  ;;  %v2123_v37 = vpop.f32.mrb[36].mxu1 }
 0x247   :  { %v2124_v29 = vpop.f32.mrb[37].mxu1  ;;  %2448 = vmatmul.mubr.f32.gmra.mrb[134].mxu1 %v1339_v47  ;;  %v1925_v32 = vpop.f32.mrb[101].mxu0 }
 0x248   :  { %v1464_v37 = vpop.permute.xlu0 %1463  ;;  %v1469_v53 = vpop.permute.xlu1 %1468 }
 0x249   :  { %v1834_v15 = vadd.f32 %v7509_v14, %v1464_v37 }
 0x24a   :  { %v7702_v45 = vpop.f32.mrb[102].mxu0  ;;  %v2127_v18 = vpop.f32.mrb[38].mxu1 }
 0x24b   :  { %v2128_v26 = vpop.f32.mrb[39].mxu1  ;;  %v1930_v4 = vpop.f32.mrb[103].mxu0 }
 0x24e   :  { %v7704_v44 = vpop.f32.mrb[104].mxu0  ;;  %v2131_v24 = vpop.f32.mrb[40].mxu1 }
 0x24f   :  { %v2132_v0 = vpop.f32.mrb[41].mxu1  ;;  %v1935_v12 = vpop.f32.mrb[105].mxu0 }
 0x250   :  { %v1474_v24 = vpop.permute.xlu0 %1473  ;;  %v1839_v0 = vadd.f32 %v7519_v16, %v1469_v53 }
 0x251   :  { %v1844_v37 = vadd.f32 %v7531_v62, %v1474_v24 }
 0x252   :  { %v7708_v29 = vpop.f32.mrb[106].mxu0  ;;  %v2135_v32 = vpop.f32.mrb[42].mxu1 }
 0x253   :  { %v2136_v47 = vpop.f32.mrb[43].mxu1  ;;  %v1940_v60 = vpop.f32.mrb[107].mxu0 }
 0x256   :  { %v7711_v13 = vpop.f32.mrb[108].mxu0  ;;  %v2204_v18 = vpop.f32.mrb[44].mxu1 }
 0x257   :  { %v2205_v26 = vadd.f32 %v2204_v18, %v1834_v15  ;;  %v2206_v4 = vpop.f32.mrb[45].mxu1  ;;  %v1945_v11 = vpop.f32.mrb[109].mxu0 }
 0x258   :  { %v1479_v4 = vpop.permute.xlu0 %1478 }
 0x259   :  { %2509 = vst [vmem:[%s9438_s14] sm:$0xff] %v2205_v26  ;;  %v1484_v26 = vpop.permute.xlu1 %1483  ;;  %v1849_v2 = vadd.f32 %v7541_v58, %v1479_v4  ;;  %v7740_v58 = vld [vmem:[%s9439_s8] sm:$0xff] }
 0x25a   :  { %v7717_v12 = vpop.f32.mrb[110].mxu0  ;;  %v2209_v32 = vpop.f32.mrb[46].mxu1  ;;  %9503 = vst [vmem:[#allocation30_spill] sm:$0xff] %v7740_v58  ;;  %5362 = vmatprep.mubr.msk.f32.mxu0 %vm2662_vm1, %v7740_v58 }
 0x25b   :  { %v2210_v60 = vadd.f32 %v2209_v32, %v1839_v0  ;;  %v2211_v47 = vpop.f32.mrb[47].mxu1  ;;  %v1950_v14 = vpop.f32.mrb[111].mxu0 }
 0x25c   :  { %v1854_v47 = vadd.f32 %v7551_v54, %v1484_v26 }
 0x25d   :  { %2510 = vst [vmem:[%s9438_s14 + $0x8] sm:$0xff] %v2210_v60  ;;  %v1489_v54 = vpop.permute.xlu1 %1488 }
 0x25e   :  { %v7723_v15 = vpop.f32.mrb[112].mxu0  ;;  %v2214_v11 = vpop.f32.mrb[48].mxu1 }
 0x25f   :  { %v2215_v16 = vadd.f32 %v2214_v11, %v1844_v37  ;;  %v2216_v53 = vpop.f32.mrb[49].mxu1  ;;  %v1955_v18 = vpop.f32.mrb[113].mxu0 }
 0x260   :  { %v1859_v53 = vadd.f32 %v7565_v49, %v1489_v54 }
 0x261   :  { %2511 = vst [vmem:[%s9438_s14 + $0x10] sm:$0xff] %v2215_v16 }
 0x262   :  { %v7729_v0 = vpop.f32.mrb[114].mxu0  ;;  %v2219_v62 = vpop.f32.mrb[50].mxu1 }
 0x263   :  { %v2220_v24 = vadd.f32 %v2219_v62, %v1849_v2  ;;  %v2221_v32 = vpop.f32.mrb[51].mxu1  ;;  %v1960_v60 = vpop.f32.mrb[115].mxu0 }
 0x264   :  { %v1494_v32 = vpop.permute.xlu0 %1493 }
 0x265   :  { %2512 = vst [vmem:[%s9438_s14 + $0x18] sm:$0xff] %v2220_v24  ;;  %v1864_v60 = vadd.f32 %v7575_v50, %v1494_v32 }
 0x266   :  { %v7735_v14 = vpop.f32.mrb[116].mxu0  ;;  %v2224_v37 = vpop.f32.mrb[52].mxu1 }
 0x267   :  { %v2225_v11 = vadd.f32 %v2224_v37, %v1854_v47  ;;  %v2226_v16 = vpop.f32.mrb[53].mxu1  ;;  %v1965_v2 = vpop.f32.mrb[117].mxu0 }
 0x269   :  { %2513 = vst [vmem:[%s9438_s14 + $0x20] sm:$0xff] %v2225_v11  ;;  %v1499_v11 = vpop.permute.xlu1 %1498 }
 0x26a   :  { %v7748_v18 = vpop.f32.mrb[118].mxu0  ;;  %v2229_v4 = vpop.f32.mrb[54].mxu1  ;;  %v1869_v54 = vadd.f32 %v7589_v41, %v1499_v11 }
 0x26b   :  { %v2230_v26 = vadd.f32 %v2229_v4, %v1859_v53  ;;  %v2231_v62 = vpop.f32.mrb[55].mxu1  ;;  %v1970_v24 = vpop.f32.mrb[119].mxu0  ;;  %v1969_v9 = vadd.f32 %v7748_v18, %v6851_v52 }
 0x26d   :  { %2514 = vst [vmem:[%s9438_s14 + $0x28] sm:$0xff] %v2230_v26  ;;  %v1504_v26 = vpop.permute.xlu0 %1503 }
 0x26e   :  { %v7754_v47 = vpop.f32.mrb[120].mxu0  ;;  %v2234_v49 = vpop.f32.mrb[56].mxu1  ;;  %v1874_v32 = vadd.f32 %v7599_v7, %v1504_v26 }
 0x26f   :  { %v2235_v37 = vadd.f32 %v2234_v49, %v1864_v60  ;;  %v2236_v16 = vpop.f32.mrb[57].mxu1  ;;  %v1975_v2 = vpop.f32.mrb[121].mxu0 }
 0x271   :  { %2515 = vst [vmem:[%s9438_s14 + $0x30] sm:$0xff] %v2235_v37  ;;  %v1509_v37 = vpop.permute.xlu1 %1508 }
 0x272   :  { %v7760_v53 = vpop.f32.mrb[122].mxu0  ;;  %v2239_v50 = vpop.f32.mrb[58].mxu1  ;;  %v1879_v11 = vadd.f32 %v7611_v40, %v1509_v37 }
 0x273   :  { %v2240_v4 = vadd.f32 %v2239_v50, %v1869_v54  ;;  %v2241_v62 = vpop.f32.mrb[59].mxu1  ;;  %v1980_v24 = vpop.f32.mrb[123].mxu0 }
 0x275   :  { %2516 = vst [vmem:[%s9438_s14 + $0x38] sm:$0xff] %v2240_v4  ;;  %v1514_v4 = vpop.permute.xlu0 %1513 }
 0x276   :  { %v7766_v60 = vpop.f32.mrb[124].mxu0  ;;  %v2244_v41 = vpop.f32.mrb[60].mxu1  ;;  %v1884_v26 = vadd.f32 %v7619_v55, %v1514_v4 }
 0x277   :  { %v2245_v49 = vadd.f32 %v2244_v41, %v1874_v32  ;;  %v2246_v16 = vpop.f32.mrb[61].mxu1  ;;  %v1985_v2 = vpop.f32.mrb[125].mxu0 }
 0x279   :  { %2517 = vst [vmem:[%s9438_s14 + $0x40] sm:$0xff] %v2245_v49  ;;  %v1519_v49 = vpop.permute.xlu1 %1518 }
 0x27a   :  { %v7772_v54 = vpop.f32.mrb[126].mxu0  ;;  %v2249_v7 = vpop.f32.mrb[62].mxu1  ;;  %v1889_v37 = vadd.f32 %v7631_v27, %v1519_v49 }
 0x27b   :  { %v2250_v50 = vadd.f32 %v2249_v7, %v1879_v11  ;;  %v2251_v62 = vpop.f32.mrb[63].mxu1  ;;  %v1990_v24 = vpop.f32.mrb[127].mxu0 }
 0x27d   :  { %2518 = vst [vmem:[%s9438_s14 + $0x48] sm:$0xff] %v2250_v50  ;;  %v1524_v50 = vpop.permute.xlu0 %1523 }
 0x27e   :  { %v7778_v32 = vpop.f32.mrb[128].mxu0  ;;  %v2254_v40 = vpop.f32.mrb[64].mxu1  ;;  %v1894_v4 = vadd.f32 %v7639_v10, %v1524_v50 }
 0x27f   :  { %v2255_v41 = vadd.f32 %v2254_v40, %v1884_v26  ;;  %v2256_v16 = vpop.f32.mrb[65].mxu1  ;;  %v1995_v2 = vpop.f32.mrb[129].mxu0 }
 0x281   :  { %2519 = vst [vmem:[%s9438_s14 + $0x50] sm:$0xff] %v2255_v41  ;;  %v1529_v41 = vpop.permute.xlu1 %1528 }
 0x282   :  { %v7784_v11 = vpop.f32.mrb[130].mxu0  ;;  %v2259_v55 = vpop.f32.mrb[66].mxu1  ;;  %v1899_v49 = vadd.f32 %v7651_v39, %v1529_v41  ;;  %v1914_v41 = vadd.f32 %v7679_v33, %v6816_v38  ;;  %v1924_v38 = vadd.f32 %v7696_v43, %v6819_v35  ;;  %v1934_v35 = vadd.f32 %v7704_v44, %v6827_v30 }
 0x283   :  { %v2260_v7 = vadd.f32 %v2259_v55, %v1889_v37  ;;  %v2261_v62 = vpop.f32.mrb[67].mxu1  ;;  %v2000_v24 = vpop.f32.mrb[131].mxu0  ;;  %v1949_v44 = vadd.f32 %v7717_v12, %v6848_v57  ;;  %v7865_v57 = vld [vmem:[%s9440_s1 + $0x20] sm:$0xff] }
 0x285   :  { %2520 = vst [vmem:[%s9438_s14 + $0x58] sm:$0xff] %v2260_v7 }
 0x286   :  { %v7790_v26 = vpop.f32.mrb[132].mxu0  ;;  %v2264_v27 = vpop.f32.mrb[68].mxu1 }
 0x287   :  { %v2265_v40 = vadd.f32 %v2264_v27, %v1894_v4  ;;  %v2266_v16 = vpop.f32.mrb[69].mxu1  ;;  %v2005_v2 = vpop.f32.mrb[133].mxu0 }
 0x289   :  { %2521 = vst [vmem:[%s9438_s14 + $0x60] sm:$0xff] %v2265_v40 }
 0x28a   :  { %v7796_v37 = vpop.f32.mrb[134].mxu0  ;;  %v2269_v10 = vpop.f32.mrb[70].mxu1 }
 0x28b   :  { %9504 = vst [vmem:[#allocation31_spill] sm:$0xff] %v7796_v37  ;;  %v2270_v55 = vadd.f32 %v2269_v10, %v1899_v49  ;;  %v2271_v62 = vpop.f32.mrb[71].mxu1  ;;  %v2010_v24 = vpop.f32.mrb[135].mxu0 }
 0x28d   :  { %2522 = vst [vmem:[%s9438_s14 + $0x68] sm:$0xff] %v2270_v55 }
 0x28e   :  { %v7801_v7 = vpop.f32.mrb[136].mxu0  ;;  %v7803_v50 = vpop.f32.mrb[72].mxu1 }
 0x28f   :  { %9505 = vst [vmem:[#allocation32_spill] sm:$0xff] %v7801_v7  ;;  %9506 = vst [vmem:[#allocation33_spill] sm:$0xff] %v7803_v50  ;;  %v2276_v4 = vpop.f32.mrb[73].mxu1  ;;  %v2015_v39 = vpop.f32.mrb[137].mxu0 }
 0x290   :  { %v1919_v4 = vadd.f32 %v7691_v56, %v6811_v8  ;;  %v1929_v8 = vadd.f32 %v7702_v45, %v6832_v46 }
 0x292   :  { %v7805_v27 = vpop.f32.mrb[138].mxu0  ;;  %v7807_v16 = vpop.f32.mrb[74].mxu1 }
 0x293   :  { %9507 = vst [vmem:[#allocation34_spill] sm:$0xff] %v7805_v27  ;;  %9508 = vst [vmem:[#allocation35_spill] sm:$0xff] %v7807_v16  ;;  %v2281_v40 = vpop.f32.mrb[75].mxu1  ;;  %v2020_v2 = vpop.f32.mrb[139].mxu0 }
 0x296   :  { %v7811_v49 = vpop.f32.mrb[140].mxu0  ;;  %v2284_v10 = vpop.f32.mrb[76].mxu1 }
 0x297   :  { %9509 = vst [vmem:[#allocation36_spill] sm:$0xff] %v7811_v49  ;;  %v7813_v62 = vadd.f32 %v2284_v10, %v1914_v41  ;;  %v2286_v55 = vpop.f32.mrb[77].mxu1  ;;  %v2025_v24 = vpop.f32.mrb[141].mxu0  ;;  %v1964_v49 = vadd.f32 %v7735_v14, %v6824_v42 }
 0x29a   :  { %v7817_v39 = vpop.f32.mrb[142].mxu0  ;;  %v2289_v50 = vpop.f32.mrb[78].mxu1 }
 0x29b   :  { %9510 = vst [vmem:[#allocation37_spill] sm:$0xff] %v7817_v39  ;;  %v7819_v6 = vadd.f32 %v2289_v50, %v1919_v4  ;;  %v2291_v40 = vpop.f32.mrb[79].mxu1  ;;  %v2030_v2 = vpop.f32.mrb[143].mxu0 }
 0x29e   :  { %v7823_v33 = vpop.f32.mrb[144].mxu0  ;;  %v2294_v16 = vpop.f32.mrb[80].mxu1 }
 0x29f   :  { %9511 = vst [vmem:[#allocation38_spill] sm:$0xff] %v7823_v33  ;;  %v7825_v41 = vadd.f32 %v2294_v16, %v1924_v38  ;;  %v2296_v10 = vpop.f32.mrb[81].mxu1  ;;  %v2035_v55 = vpop.f32.mrb[145].mxu0  ;;  %v1939_v38 = vadd.f32 %v7708_v29, %v6840_v51  ;;  %v2532_v51 = vld [vmem:[%s9440_s1 + $0x38] sm:$0x3] }
 0x2a0   :  { %v2567_v10 = vlaneseq }
 0x2a2   :  { %v7829_v56 = vpop.f32.mrb[146].mxu0  ;;  %v2299_v24 = vpop.f32.mrb[82].mxu1 }
 0x2a3   :  { %9512 = vst [vmem:[#allocation39_spill] sm:$0xff] %v7829_v56  ;;  %v7831_v50 = vadd.f32 %v2299_v24, %v1929_v8  ;;  %v2301_v4 = vpop.f32.mrb[83].mxu1  ;;  %v2040_v40 = vpop.f32.mrb[147].mxu0  ;;  %v1944_v8 = vadd.f32 %v7711_v13, %v6835_v21  ;;  %v2568_v24 = vshrl.u32 %v2567_v10, 7  ;;  %v7860_v21 = vld [vmem:[%s9440_s1 + $0x10] sm:$0xff]  ;;  %v1954_v10 = vadd.f32 %v7723_v15, %v6843_v19 }
 0x2a5   :  { %v7850_v29 = vsub.s32 0, %v2568_v24  ;;  %v7895_v31 = vsub.s32 4, %v2568_v24  ;;  %v7911_v36 = vsub.s32 5, %v2568_v24  ;;  %v7923_v33 = vsub.s32 6, %v2568_v24 }
 0x2a6   :  { %v2304_v43 = vpop.f32.mrb[84].mxu1  ;;  %v7933_v20 = vsub.s32 7, %v2568_v24 }
 0x2a7   :  { %v7835_v2 = vadd.f32 %v2304_v43, %v1934_v35  ;;  %v2306_v16 = vpop.f32.mrb[85].mxu1  ;;  %v7855_v43 = vld [vmem:[%s9440_s1] sm:$0xff] }
 0x2a8   :  { %v7869_v16 = vsub.s32 1, %v2568_v24 }
 0x2aa   :  { %v2309_v55 = vpop.f32.mrb[86].mxu1  ;;  %v2576_v19 = vrot.slane %v7855_v43, %v7869_v16  ;;  %v3929_v15 = vrot.slane %v2532_v51, %v7869_v16 }
 0x2ab   :  { %v7839_v46 = vadd.f32 %v2309_v55, %v1939_v38  ;;  %v2311_v45 = vpop.f32.mrb[87].mxu1  ;;  %v7874_v38 = vld [vmem:[%s9440_s1 + $0x30] sm:$0xff]  ;;  %v3923_v55 = vrot.slane %v2532_v51, %v7850_v29 }
 0x2ac   :  { %v7879_v45 = vsub.s32 2, %v2568_v24 }
 0x2ae   :  { %v2314_v4 = vpop.f32.mrb[88].mxu1  ;;  %v3081_v56 = vrot.slane %v7860_v21, %v7879_v45 }
 0x2af   :  { %v7843_v40 = vadd.f32 %v2314_v4, %v1944_v8  ;;  %v2316_v30 = vpop.f32.mrb[89].mxu1  ;;  %v2570_v4 = vrot.slane %v7855_v43, %v7850_v29 }
 0x2b0   :  { %v3069_v30 = vrot.slane %v7860_v21, %v7850_v29 }
 0x2b1   :  { %v2571_v42 = vmul.f32 %v2570_v4, %v7813_v62 }
 0x2b2   :  { %v2319_v35 = vpop.f32.mrb[90].mxu1 }
 0x2b3   :  { %v7867_v13 = vadd.f32 %v2319_v35, %v1949_v44  ;;  %v2321_v12 = vpop.f32.mrb[91].mxu1  ;;  %v7887_v35 = vsub.s32 3, %v2568_v24  ;;  %v2600_v44 = vrot.slane %v7855_v43, %v7911_v36 }
 0x2b6   :  { %v2324_v8 = vpop.f32.mrb[92].mxu1 }
 0x2b7   :  { %v7889_v12 = vadd.f32 %v2324_v8, %v1954_v10  ;;  %v2326_v3 = vpop.f32.mrb[93].mxu1  ;;  %v2582_v8 = vrot.slane %v7855_v43, %v7879_v45 }
 0x2b8   :  { %v1959_v3 = vadd.f32 %v7729_v0, %v6856_v61  ;;  %v2588_v0 = vrot.slane %v7855_v43, %v7887_v35  ;;  %v2594_v61 = vrot.slane %v7855_v43, %v7895_v31 }
 0x2b9   :  { %v7906_v10 = vmul.f32 %v3923_v55, %v7889_v12  ;;  %v3093_v55 = vrot.slane %v7860_v21, %v7895_v31  ;;  %v2583_v39 = vmul.f32 %v2582_v8, %v7825_v41 }
 0x2ba   :  { %v2329_v58 = vpop.f32.mrb[94].mxu1 }
 0x2bb   :  { %v7925_v51 = vadd.f32 %v2329_v58, %v1959_v3  ;;  %v2331_v34 = vpop.f32.mrb[95].mxu1  ;;  %v7959_v3 = vld [vmem:[%s9440_s1 + $0x8] sm:$0x3] }
 0x2bc   :  { %v7964_v34 = vld [vmem:[%s9440_s1 + $0x18] sm:$0x3]  ;;  %v2618_v52 = vrot.slane %v7959_v3, %v7850_v29  ;;  %v2624_v23 = vrot.slane %v7959_v3, %v7869_v16 }
 0x2bd   :  { %v7942_v58 = vmul.f32 %v3929_v15, %v7925_v51  ;;  %v2606_v15 = vrot.slane %v7855_v43, %v7923_v33  ;;  %v3123_v18 = vrot.slane %v7964_v34, %v7869_v16 }
 0x2be   :  { %v2334_v14 = vpop.f32.mrb[96].mxu1 }
 0x2bf   :  { %v2335_v24 = vadd.f32 %v2334_v14, %v1964_v49  ;;  %v2336_v48 = vpop.f32.mrb[97].mxu1  ;;  %v2577_v14 = vmul.f32 %v2576_v19, %v7819_v6 }
 0x2c0   :  { %v7982_v48 = vld [vmem:[%s9440_s1 + $0x28] sm:$0x3] }
 0x2c1   :  { %v2572_v4 = vadd.f32 %v2571_v42, %v2335_v24  ;;  %v3070_v24 = vmul.f32 %v3069_v30, %v7813_v62  ;;  %v1974_v42 = vadd.f32 %v7754_v47, %v6864_v1  ;;  %v1979_v1 = vadd.f32 %v7760_v53, %v6859_v63 }
 0x2c2   :  { %v2339_v49 = vpop.f32.mrb[98].mxu1  ;;  %v3082_v47 = vmul.f32 %v3081_v56, %v7825_v41  ;;  %v1984_v63 = vadd.f32 %v7766_v60, %v7526_v28  ;;  %v1989_v53 = vadd.f32 %v7772_v54, %v7539_v5  ;;  %v9515_v56 = vrot.slane %v7860_v21, %v7887_v35 }
 0x2c3   :  { %v2578_v7 = vadd.f32 %v2577_v14, %v2572_v4  ;;  %v2340_v37 = vadd.f32 %v2339_v49, %v1969_v9  ;;  %v2341_v19 = vpop.f32.mrb[99].mxu1  ;;  %v2589_v4 = vmul.f32 %v2588_v0, %v7831_v50  ;;  %v9513_v9 = vrot.slane %v7860_v21, %v7869_v16 }
 0x2c4   :  { %v9514_v19 = vrot.slane %v7865_v57, %v7850_v29  ;;  %v3094_v28 = vmul.f32 %v3093_v55, %v7835_v2  ;;  %v2607_v60 = vmul.f32 %v2606_v15, %v7843_v40  ;;  %v9517_v5 = vrot.slane %v7865_v57, %v7879_v45 }
 0x2c5   :  { %v2584_v14 = vadd.f32 %v2583_v39, %v2578_v7  ;;  %v3071_v8 = vadd.f32 %v3070_v24, %v2340_v37  ;;  %v3076_v30 = vmul.f32 %v9513_v9, %v7819_v6  ;;  %v2595_v37 = vmul.f32 %v2594_v61, %v7835_v2 }
 0x2c6   :  { %v2344_v49 = vpop.f32.mrb[100].mxu1  ;;  %v3473_v27 = vmul.f32 %v9514_v19, %v7813_v62  ;;  %v3088_v19 = vmul.f32 %v9515_v56, %v7831_v50  ;;  %v9516_v7 = vrot.slane %v7865_v57, %v7869_v16  ;;  %v3485_v54 = vmul.f32 %v9517_v5, %v7825_v41 }
 0x2c7   :  { %v2590_v39 = vadd.f32 %v2589_v4, %v2584_v14  ;;  %v3077_v0 = vadd.f32 %v3076_v30, %v3071_v8  ;;  %v2345_v24 = vadd.f32 %v2344_v49, %v1974_v42  ;;  %v2346_v9 = vpop.f32.mrb[101].mxu1  ;;  %v2601_v4 = vmul.f32 %v2600_v44, %v7839_v46 }
 0x2c8   :  { %v3479_v61 = vmul.f32 %v9516_v7, %v7819_v6  ;;  %v9518_v49 = vrot.slane %v7874_v38, %v7850_v29  ;;  %v9519_v55 = vrot.slane %v7865_v57, %v7887_v35  ;;  %v9524_v5 = vrot.slane %v7865_v57, %v7895_v31 }
 0x2c9   :  { %v2596_v42 = vadd.f32 %v2595_v37, %v2590_v39  ;;  %v3083_v14 = vadd.f32 %v3082_v47, %v3077_v0  ;;  %v3474_v8 = vadd.f32 %v3473_v27, %v2345_v24  ;;  %v9520_v39 = vrot.slane %v7860_v21, %v7911_v36 }
 0x2ca   :  { %v2349_v30 = vpop.f32.mrb[102].mxu1  ;;  %v3876_v7 = vmul.f32 %v9518_v49, %v7813_v62  ;;  %v3491_v15 = vmul.f32 %v9519_v55, %v7831_v50  ;;  %v9521_v24 = vrot.slane %v7874_v38, %v7869_v16 }
 0x2cb   :  { %v2602_v9 = vadd.f32 %v2601_v4, %v2596_v42  ;;  %v3089_v44 = vadd.f32 %v3088_v19, %v3083_v14  ;;  %v3480_v37 = vadd.f32 %v3479_v61, %v3474_v8  ;;  %v2350_v47 = vadd.f32 %v2349_v30, %v1979_v1  ;;  %v2351_v27 = vpop.f32.mrb[103].mxu1 }
 0x2cc   :  { %v3100_v0 = vmul.f32 %v9520_v39, %v7839_v46  ;;  %v3882_v62 = vmul.f32 %v9521_v24, %v7819_v6  ;;  %v9522_v1 = vrot.slane %v7874_v38, %v7879_v45  ;;  %v9523_v14 = vrot.slane %v7874_v38, %v7887_v35 }
 0x2cd   :  { %v3095_v19 = vadd.f32 %v3094_v28, %v3089_v44  ;;  %v3486_v61 = vadd.f32 %v3485_v54, %v3480_v37  ;;  %v3877_v4 = vadd.f32 %v3876_v7, %v2350_v47  ;;  %v2608_v42 = vadd.f32 %v2607_v60, %v2602_v9 }
 0x2ce   :  { %v3888_v56 = vmul.f32 %v9522_v1, %v7825_v41  ;;  %v3894_v8 = vmul.f32 %v9523_v14, %v7831_v50  ;;  %v3497_v30 = vmul.f32 %v9524_v5, %v7835_v2  ;;  %v9525_v6 = vrot.slane %v7860_v21, %v7923_v33  ;;  %v2354_v60 = vpop.f32.mrb[104].mxu1 }
 0x2cf   :  { %v9526_v41 = vrot.slane %v7855_v43, %v7933_v20  ;;  %v3101_v54 = vadd.f32 %v3100_v0, %v3095_v19  ;;  %v3492_v7 = vadd.f32 %v3491_v15, %v3486_v61  ;;  %v3883_v9 = vadd.f32 %v3882_v62, %v3877_v4  ;;  %v2356_v44 = vpop.f32.mrb[105].mxu1 }
 0x2d0   :  { %v3106_v49 = vmul.f32 %v9525_v6, %v7843_v40  ;;  %v8073_v50 = vadd.f32 %v2354_v60, %v1984_v63  ;;  %v9527_v37 = vrot.slane %v7874_v38, %v7895_v31  ;;  %v9528_v27 = vrot.slane %v7865_v57, %v7911_v36 }
 0x2d1   :  { %v2613_v28 = vmul.f32 %v9526_v41, %v7867_v13  ;;  %v2619_v43 = vmul.f32 %v2618_v52, %v7889_v12  ;;  %v9529_v63 = vrot.slane %v7860_v21, %v7933_v20  ;;  %v3498_v0 = vadd.f32 %v3497_v30, %v3492_v7 }
 0x2d2   :  { %v3900_v47 = vmul.f32 %v9527_v37, %v7835_v2  ;;  %v3503_v55 = vmul.f32 %v9528_v27, %v7839_v46  ;;  %v3889_v24 = vadd.f32 %v3888_v56, %v3883_v9  ;;  %v3107_v62 = vadd.f32 %v3106_v49, %v3101_v54  ;;  %v2359_v52 = vpop.f32.mrb[106].mxu1 }
 0x2d3   :  { %v2614_v15 = vadd.f32 %v2613_v28, %v2608_v42  ;;  %v3112_v39 = vmul.f32 %v9529_v63, %v7867_v13  ;;  %v9530_v2 = vrot.slane %v7865_v57, %v7923_v33  ;;  %v9531_v19 = vrot.slane %v7964_v34, %v7850_v29  ;;  %v2361_v5 = vpop.f32.mrb[107].mxu1 }
 0x2d4   :  { %v2625_v21 = vmul.f32 %v2624_v23, %v7925_v51  ;;  %v3504_v42 = vadd.f32 %v3503_v55, %v3498_v0  ;;  %v3895_v56 = vadd.f32 %v3894_v8, %v3889_v24  ;;  %v8103_v14 = vadd.f32 %v2359_v52, %v1989_v53  ;;  %v8156_v52 = vld [vmem:[%s9441_s2] sm:$0xff]  ;;  %v9540_v5 = vld [vmem:[#allocation32_spill] sm:$0xff] }
 0x2d5   :  { %v3509_v1 = vmul.f32 %v9530_v2, %v7843_v40  ;;  %v3118_v61 = vmul.f32 %v9531_v19, %v7889_v12  ;;  %v2620_v4 = vadd.f32 %v2619_v43, %v2614_v15  ;;  %v3113_v30 = vadd.f32 %v3112_v39, %v3107_v62 }
 0x2d6   :  { %v1994_v6 = vadd.f32 %v7778_v32, %v7560_v22  ;;  %v9532_v49 = vrot.slane %v7874_v38, %v7911_v36  ;;  %v9533_v28 = vrot.slane %v7865_v57, %v7933_v20  ;;  %v3901_v60 = vadd.f32 %v3900_v47, %v3895_v56  ;;  %v2364_v7 = vpop.f32.mrb[108].mxu1  ;;  %v9539_v56 = vld [vmem:[#allocation18_spill] sm:$0xff] }
 0x2d7   :  { %v2626_v23 = vadd.f32 %v2625_v21, %v2620_v4  ;;  %v3119_v8 = vadd.f32 %v3118_v61, %v3113_v30  ;;  %v3124_v53 = vmul.f32 %v3123_v18, %v7925_v51  ;;  %v3510_v54 = vadd.f32 %v3509_v1, %v3504_v42  ;;  %v2366_v47 = vpop.f32.mrb[109].mxu1 }
 0x2d8   :  { %v3906_v41 = vmul.f32 %v9532_v49, %v7839_v46  ;;  %v3515_v3 = vmul.f32 %v9533_v28, %v7867_v13  ;;  %v9534_v22 = vrot.slane %v7874_v38, %v7923_v33  ;;  %v9535_v46 = vrot.slane %v7982_v48, %v7850_v29  ;;  %v8172_v49 = vld [vmem:[%s9439_s8 + $0x8] sm:$0xff]  ;;  %v9543_v47 = vld [vmem:[#allocation20_spill] sm:$0xff] }
 0x2d9   :  { %v2628_v9 = vmul.f32 1.442695, %v2626_v23  ;;  %v8127_v37 = vadd.f32 %v2364_v7, %v1994_v6  ;;  %v3125_v27 = vadd.f32 %v3124_v53, %v3119_v8  ;;  %v1999_v18 = vadd.f32 %v7784_v11, %v7584_v25  ;;  %v9541_v53 = vld [vmem:[#allocation19_spill] sm:$0xff] }
 0x2da   :  { %v3912_v32 = vmul.f32 %v9534_v22, %v7843_v40  ;;  %v3521_v57 = vmul.f32 %v9535_v46, %v7889_v12  ;;  %v3907_v44 = vadd.f32 %v3906_v41, %v3901_v60  ;;  %v3516_v34 = vadd.f32 %v3515_v3, %v3510_v54  ;;  %v2369_v0 = vpop.f32.mrb[110].mxu1  ;;  %v8177_v3 = vld [vmem:[%s9439_s8 + $0x10] sm:$0xff]  ;;  %v9542_v54 = vld [vmem:[#allocation34_spill] sm:$0xff] }
 0x2db   :  { %v9536_v40 = vrot.slane %v7874_v38, %v7933_v20  ;;  %5753 = vpow2.f32 %v2628_v9  ;;  %v3127_v43 = vmul.f32 1.442695, %v3125_v27  ;;  %v9537_v12 = vrot.slane %v7982_v48, %v7869_v16  ;;  %v2371_v62 = vpop.f32.mrb[111].mxu1  ;;  %v9538_v48 = vld [vmem:[#allocation31_spill] sm:$0xff] }
 0x2dc   :  { %v3522_v15 = vadd.f32 %v3521_v57, %v3516_v34  ;;  %v3913_v39 = vadd.f32 %v3912_v32, %v3907_v44  ;;  %v8139_v24 = vadd.f32 %v2369_v0, %v1999_v18  ;;  %v2009_v61 = vadd.f32 %v9538_v48, %v7624_v59  ;;  %v8190_v32 = vld [vmem:[%s9439_s8 + $0x18] sm:$0xff]  ;;  %v8195_v57 = vld [vmem:[%s9439_s8 + $0x20] sm:$0xff]  ;;  %v8209_v18 = vld [vmem:[%s9439_s8 + $0x28] sm:$0xff] }
 0x2dd   :  { %v3918_v55 = vmul.f32 %v9536_v40, %v7867_v13  ;;  %v3527_v63 = vmul.f32 %v9537_v12, %v7925_v51  ;;  %5755 = vpow2.f32 %v3127_v43  ;;  %v2004_v13 = vadd.f32 %v7790_v26, %v7606_v17  ;;  %v8161_v17 = vld [vmem:[%s9441_s2 + $0x8] sm:$0xff]  ;;  %v8221_v12 = vld [vmem:[%s9441_s2 + $0x10] sm:$0xff]  ;;  %v9546_v0 = vld [vmem:[#allocation37_spill] sm:$0xff] }
 0x2de   :  { %v2374_v2 = vpop.f32.mrb[112].mxu1  ;;  %vm2627_vm2 = vcmp.gt.f32.partialorder %v2626_v23, 0.0  ;;  %v5564_v59 = vpack.c.bf16 %v8161_v17, %v8156_v52  ;;  %v2014_v30 = vadd.f32 %v9540_v5, %v9539_v56  ;;  %vm3126_vm3 = vcmp.gt.f32.partialorder %v3125_v27, 0.0  ;;  %v9549_v5 = vld [vmem:[#allocation25_spill] sm:$0xff] }
 0x2df   :  { %v8141_v25 = vadd.f32 %v3527_v63, %v3522_v15  ;;  %v3919_v11 = vadd.f32 %v3918_v55, %v3913_v39  ;;  %v8146_v1 = vadd.f32 %v2374_v2, %v2004_v13  ;;  %v2376_v19 = vpop.f32.mrb[113].mxu1  ;;  %v2019_v22 = vadd.f32 %v9542_v54, %v9541_v53  ;;  %v8214_v55 = vld [vmem:[%s9442_s9] sm:$0xff]  ;;  %v8226_v63 = vld [vmem:[%s9441_s2 + $0x18] sm:$0xff] }
 0x2e0   :  { %v9545_v39 = vld [vmem:[#allocation22_spill] sm:$0xff]  ;;  %v5568_v2 = vpack.c.bf16 %v8226_v63, %v8221_v12 }
 0x2e1   :  { %v3925_v38 = vadd.f32 %v7906_v10, %v3919_v11  ;;  %v3530_v44 = vmul.f32 1.442695, %v8141_v25  ;;  %v2029_v62 = vadd.f32 %v9546_v0, %v9545_v39  ;;  %v8237_v11 = vld [vmem:[%s9442_s9 + $0x8] sm:$0xff]  ;;  %v9552_v54 = vld [vmem:[#allocation30_spill] sm:$0xff]  ;;  %vm3529_vm5 = vcmp.gt.f32.partialorder %v8141_v25, 0.0 }
 0x2e2   :  { %v2379_v10 = vpop.f32.mrb[114].mxu1  ;;  %v8308_v39 = vld [vmem:[%s9441_s2 + $0x28] sm:$0xff] }
 0x2e3   :  { %v8149_v51 = vadd.f32 %v7942_v58, %v3925_v38  ;;  %v8163_v4 = vadd.f32 %v2379_v10, %v2009_v61  ;;  %v2381_v21 = vpop.f32.mrb[115].mxu1  ;;  %5757 = vpow2.f32 %v3530_v44  ;;  %v8242_v38 = vld [vmem:[%s9442_s9 + $0x10] sm:$0xff]  ;;  %v9547_v61 = vld [vmem:[#allocation23_spill] sm:$0xff]  ;;  %9554 = vst [vmem:[#allocation32_spill] sm:$0xff] %v8308_v39 }
 0x2e4   :  { %v8257_v21 = vld [vmem:[%s9442_s9 + $0x18] sm:$0xff] }
 0x2e5   :  { %v5754_v26 = vpop.eup %5753  ;;  %vm3932_vm6 = vcmp.gt.f32.partialorder %v8149_v51, 0.0 }
 0x2e6   :  { %v5021_v58 = vadd.f32 -1.0, %v5754_v26  ;;  %v2384_v41 = vpop.f32.mrb[116].mxu1  ;;  %v9548_v26 = vld [vmem:[#allocation38_spill] sm:$0xff] }
 0x2e7   :  { %v5756_v42 = vpop.eup %5755  ;;  %v8179_v60 = vadd.f32 %v2384_v41, %v2014_v30  ;;  %v2386_v8 = vpop.f32.mrb[117].mxu1  ;;  %v2034_v10 = vadd.f32 %v9548_v26, %v9547_v61  ;;  %v9550_v30 = vld [vmem:[#allocation39_spill] sm:$0xff] }
 0x2e8   :  { %v2631_v6 = vsel %vm2627_vm2, %v2626_v23, %v5021_v58  ;;  %v5035_v28 = vadd.f32 -1.0, %v5756_v42  ;;  %v8275_v41 = vld [vmem:[%s9442_s9 + $0x28] sm:$0xff] }
 0x2e9   :  { %5360 = vmatprep.subr.mxu0 %v2631_v6 }
 0x2ea   :  { %5361 = vmatpush3.msra.mxu0 %v2631_v6  ;;  %v3130_v23 = vsel %vm3126_vm3, %v3125_v27, %v5035_v28  ;;  %v2389_v46 = vpop.f32.mrb[118].mxu1  ;;  %v9544_v27 = vld [vmem:[#allocation36_spill] sm:$0xff]  ;;  %v2039_v6 = vadd.f32 %v9550_v30, %v9549_v5  ;;  %v9558_v5 = vld [vmem:[#allocation13_spill] sm:$0xff] }
 0x2eb   :  { %5363 = vmatmul.mubr.msk.f32.vlgmr.msra.gmra.mrb[148].mxu0 %vm2662_vm1, %v8172_v49  ;;  %5565 = vmatprep.subr.bf16.mxu0 %v5564_v59  ;;  %v8197_v7 = vadd.f32 %v2389_v46, %v2019_v22  ;;  %v2391_v9 = vpop.f32.mrb[119].mxu1  ;;  %v2024_v34 = vadd.f32 %v9544_v27, %v9543_v47 }
 0x2ec   :  { %5567 = vmatpush3.bf16.msra.mxu0 %v5564_v59  ;;  %5365 = vmatprep.mubr.msk.f32.mxu0 %vm2662_vm1, %v8177_v3  ;;  %v8262_v59 = vld [vmem:[%s9442_s9 + $0x20] sm:$0xff] }
 0x2ed   :  { %5384 = vmatprep.subr.mxu0 %v3130_v23  ;;  %v5758_v28 = vpop.eup %5757 }
 0x2ee   :  { %v2394_v40 = vpop.f32.mrb[120].mxu1  ;;  %v5052_v22 = vadd.f32 -1.0, %v5758_v28 }
 0x2ef   :  { %5366 = vmatmul.mubr.msk.f32.gmra.mrb[150].mxu0 %vm2662_vm1, %v8190_v32  ;;  %v8216_v43 = vadd.f32 %v2394_v40, %v2024_v34  ;;  %v2396_v15 = vpop.f32.mrb[121].mxu1  ;;  %v3933_v34 = vmul.f32 1.442695, %v8149_v51 }
 0x2f0   :  { %5368 = vmatprep.mubr.msk.f32.mxu0 %vm2662_vm1, %v8195_v57  ;;  %v3533_v44 = vsel %vm3529_vm5, %v8141_v25, %v5052_v22  ;;  %v8303_v25 = vld [vmem:[%s9441_s2 + $0x20] sm:$0xff]  ;;  %v9559_v22 = vld [vmem:[#allocation15_spill] sm:$0xff] }
 0x2f1   :  { %9553 = vst [vmem:[#allocation18_spill] sm:$0xff] %v8303_v25  ;;  %5759 = vpow2.f32 %v3933_v34 }
 0x2f2   :  { %v2399_v13 = vpop.f32.mrb[122].mxu1 }
 0x2f3   :  { %5369 = vmatmul.mubr.msk.f32.gmra.mrb[152].mxu0 %vm2662_vm1, %v8209_v18  ;;  %v8246_v19 = vadd.f32 %v2399_v13, %v2029_v62  ;;  %v2401_v48 = vpop.f32.mrb[123].mxu1  ;;  %v5572_v62 = vpack.c.bf16 %v8308_v39, %v8303_v25 }
 0x2f4   :  { %5375 = vmatprep.mubr.msk.f32.mxu0 %vm2806_vm4, %v8214_v55  ;;  %v9556_v48 = vld [vmem:[#allocation11_spill] sm:$0xff] }
 0x2f6   :  { %v2404_v58 = vpop.f32.mrb[124].mxu1 }
 0x2f7   :  { %5376 = vmatmul.mubr.msk.f32.vlgmr.msra.gmra.mrb[148].mxu0 %vm2806_vm4, %v8237_v11  ;;  %v8264_v42 = vadd.f32 %v2404_v58, %v2034_v10  ;;  %v2406_v56 = vpop.f32.mrb[125].mxu1 }
 0x2f8   :  { %5385 = vmatpush3.msra.mxu0 %v3130_v23  ;;  %5378 = vmatprep.mubr.msk.f32.mxu0 %vm2806_vm4, %v8242_v38  ;;  %v9557_v56 = vld [vmem:[#allocation12_spill] sm:$0xff] }
 0x2f9   :  { %5569 = vmatprep.subr.bf16.mxu0 %v5568_v2  ;;  %v2069_v30 = vadd.f32 %v9558_v5, %v9557_v56 }
 0x2fa   :  { %v2409_v8 = vpop.f32.mrb[126].mxu1 }
 0x2fb   :  { %5379 = vmatmul.mubr.msk.f32.gmra.mrb[150].mxu0 %vm2806_vm4, %v8257_v21  ;;  %v8277_v23 = vadd.f32 %v2409_v8, %v2039_v6  ;;  %v2411_v53 = vpop.f32.mrb[127].mxu1  ;;  %v5760_v6 = vpop.eup %5759 }
 0x2fc   :  { %5381 = vmatprep.mubr.msk.f32.mxu0 %vm2806_vm4, %v8262_v59 }
 0x2fd   :  { %9551 = vst [vmem:[#allocation31_spill] sm:$0xff] %v8277_v23 }
 0x2fe   :  { %v8283_v46 = vpop.f32.mrb[0].mxu1 }
 0x2ff   :  { %5382 = vmatmul.mubr.msk.f32.gmra.mrb[154].mxu0 %vm2806_vm4, %v8275_v41  ;;  %v2416_v9 = vpop.f32.mrb[1].mxu1 }
 0x300   :  { %5386 = vmatprep.mubr.msk.f32.mxu0 %vm2662_vm1, %v9552_v54  ;;  %v9560_v9 = vld [vmem:[#allocation14_spill] sm:$0xff] }
 0x302   :  { %v8291_v47 = vpop.f32.mrb[2].mxu1 }
 0x303   :  { %5387 = vmatmul.mubr.msk.f32.vlgmr.msra.gmra.mrb[156].mxu0 %vm2662_vm1, %v8172_v49  ;;  %v2421_v27 = vpop.f32.mrb[3].mxu1 }
 0x304   :  { %5571 = vmatpush3.bf16.msra.mxu0 %v5568_v2  ;;  %5389 = vmatprep.mubr.msk.f32.mxu0 %vm2662_vm1, %v8177_v3  ;;  %v9555_v2 = vld [vmem:[#allocation10_spill] sm:$0xff]  ;;  %v5069_v27 = vadd.f32 -1.0, %v5760_v6 }
 0x305   :  { %5408 = vmatprep.subr.mxu0 %v3533_v44  ;;  %v2064_v61 = vadd.f32 %v9556_v48, %v9555_v2  ;;  %v9562_v2 = vld [vmem:[#allocation17_spill] sm:$0xff]  ;;  %v9563_v48 = vld [vmem:[#allocation16_spill] sm:$0xff] }
 0x306   :  { %v8298_v40 = vpop.f32.mrb[4].mxu1 }
 0x307   :  { %5390 = vmatmul.mubr.msk.f32.gmra.mrb[158].mxu0 %vm2662_vm1, %v8190_v32  ;;  %v2426_v15 = vpop.f32.mrb[5].mxu1 }
 0x308   :  { %5392 = vmatprep.mubr.msk.f32.mxu0 %vm2662_vm1, %v8195_v57 }
 0x30a   :  { %v8314_v0 = vpop.f32.mrb[6].mxu1 }
 0x30b   :  { %5393 = vmatmul.mubr.msk.f32.gmra.mrb[160].mxu0 %vm2662_vm1, %v8209_v18  ;;  %v2431_v13 = vpop.f32.mrb[7].mxu1 }
 0x30c   :  { %5399 = vmatprep.mubr.msk.f32.mxu0 %vm2806_vm4, %v8214_v55 }
 0x30e   :  { %v2434_v26 = vpop.f32.mrb[128].mxu1 }
 0x30f   :  { %5400 = vmatmul.mubr.msk.f32.vlgmr.msra.gmra.mrb[156].mxu0 %vm2806_vm4, %v8237_v11  ;;  %v8324_v10 = vadd.f32 %v2434_v26, %v2064_v61  ;;  %v2436_v58 = vpop.f32.mrb[129].mxu1  ;;  %v2079_v61 = vadd.f32 %v9563_v48, %v9562_v2  ;;  %v3936_v26 = vsel %vm3932_vm6, %v8149_v51, %v5069_v27  ;;  %v8364_v51 = vld [vmem:[%s9441_s2 + $0x38] sm:$0xff] }
 0x310   :  { %5409 = vmatpush3.msra.mxu0 %v3533_v44  ;;  %5402 = vmatprep.mubr.msk.f32.mxu0 %vm2806_vm4, %v8242_v38  ;;  %v2074_v44 = vadd.f32 %v9560_v9, %v9559_v22  ;;  %9566 = vst [vmem:[#allocation36_spill] sm:$0xff] %v8364_v51  ;;  %v9569_v22 = vld [vmem:[#allocation7_spill] sm:$0xff] }
 0x311   :  { %5573 = vmatprep.subr.bf16.mxu0 %v5572_v62 }
 0x312   :  { %v2439_v28 = vpop.f32.mrb[130].mxu1 }
 0x313   :  { %5403 = vmatmul.mubr.msk.f32.gmra.mrb[158].mxu0 %vm2806_vm4, %v8257_v21  ;;  %v8332_v8 = vadd.f32 %v2439_v28, %v2069_v30  ;;  %v2441_v53 = vpop.f32.mrb[131].mxu1 }
 0x314   :  { %5405 = vmatprep.mubr.msk.f32.mxu0 %vm2806_vm4, %v8262_v59 }
 0x316   :  { %v2444_v34 = vpop.f32.mrb[132].mxu1 }
 0x317   :  { %5406 = vmatmul.mubr.msk.f32.gmra.mrb[162].mxu0 %vm2806_vm4, %v8275_v41  ;;  %v8340_v15 = vadd.f32 %v2444_v34, %v2074_v44  ;;  %v2446_v13 = vpop.f32.mrb[133].mxu1 }
 0x318   :  { %5410 = vmatprep.mubr.msk.f32.mxu0 %vm2662_vm1, %v9552_v54 }
 0x319   :  { %9561 = vst [vmem:[#allocation19_spill] sm:$0xff] %v8340_v15 }
 0x31a   :  { %v2449_v58 = vpop.f32.mrb[134].mxu1 }
 0x31b   :  { %5411 = vmatmul.mubr.msk.f32.vlgmr.msra.gmra.mrb[164].mxu0 %vm2662_vm1, %v8172_v49  ;;  %v8350_v56 = vadd.f32 %v2449_v58, %v2079_v61  ;;  %v2451_v5 = vpop.f32.mrb[135].mxu1 }
 0x31c   :  { %5575 = vmatpush3.bf16.msra.mxu0 %v5572_v62  ;;  %5413 = vmatprep.mubr.msk.f32.mxu0 %vm2662_vm1, %v8177_v3  ;;  %v8359_v62 = vld [vmem:[%s9441_s2 + $0x30] sm:$0xff] }
 0x31d   :  { %5432 = vmatprep.subr.mxu0 %v3936_v26  ;;  %9564 = vst [vmem:[#allocation34_spill] sm:$0xff] %v8350_v56  ;;  %9565 = vst [vmem:[#allocation20_spill] sm:$0xff] %v8359_v62  ;;  %v5576_v30 = vpack.c.bf16 %v8364_v51, %v8359_v62  ;;  %v9573_v62 = vld [vmem:[#allocation9_spill] sm:$0xff] }
 0x31f   :  { %5414 = vmatmul.mubr.msk.f32.gmra.mrb[166].mxu0 %vm2662_vm1, %v8190_v32 }
 0x320   :  { %5416 = vmatprep.mubr.msk.f32.mxu0 %vm2662_vm1, %v8195_v57 }
 0x323   :  { %5417 = vmatmul.mubr.msk.f32.gmra.mrb[168].mxu0 %vm2662_vm1, %v8209_v18 }
 0x324   :  { %5423 = vmatprep.mubr.msk.f32.mxu0 %vm2806_vm4, %v8214_v55 }
 0x327   :  { %5424 = vmatmul.mubr.msk.f32.vlgmr.msra.gmra.mrb[164].mxu0 %vm2806_vm4, %v8237_v11 }
 0x328   :  { %5433 = vmatpush3.msra.mxu0 %v3936_v26  ;;  %5426 = vmatprep.mubr.msk.f32.mxu0 %vm2806_vm4, %v8242_v38 }
 0x329   :  { %5577 = vmatprep.subr.bf16.mxu0 %v5576_v30 }
 0x32b   :  { %5427 = vmatmul.mubr.msk.f32.gmra.mrb[166].mxu0 %vm2806_vm4, %v8257_v21 }
 0x32c   :  { %5429 = vmatprep.mubr.msk.f32.mxu0 %vm2806_vm4, %v8262_v59 }
 0x32f   :  { %5430 = vmatmul.mubr.msk.f32.gmra.mrb[170].mxu0 %vm2806_vm4, %v8275_v41 }
 0x330   :  { %5434 = vmatprep.mubr.msk.f32.mxu0 %vm2662_vm1, %v9552_v54  ;;  %v9568_v54 = vld [vmem:[#allocation4_spill] sm:$0xff] }
 0x333   :  { %5435 = vmatmul.mubr.msk.f32.vlgmr.msra.gmra.mrb[172].mxu0 %vm2662_vm1, %v8172_v49 }
 0x334   :  { %5437 = vmatprep.mubr.msk.f32.mxu0 %vm2662_vm1, %v8177_v3  ;;  %5579 = vmatpush3.bf16.msra.mxu0 %v5576_v30 }
 0x337   :  { %5438 = vmatmul.mubr.msk.f32.gmra.mrb[174].mxu0 %vm2662_vm1, %v8190_v32 }
 0x338   :  { %5440 = vmatprep.mubr.msk.f32.mxu0 %vm2662_vm1, %v8195_v57  ;;  %v9567_v57 = vld [vmem:[#allocation6_spill] sm:$0xff] }
 0x33b   :  { %5441 = vmatmul.mubr.msk.f32.gmra.mrb[176].mxu0 %vm2662_vm1, %v8209_v18 }
 0x33c   :  { %5447 = vmatprep.mubr.msk.f32.mxu0 %vm2806_vm4, %v8214_v55 }
 0x33f   :  { %5448 = vmatmul.mubr.msk.f32.vlgmr.msra.gmra.mrb[172].mxu0 %vm2806_vm4, %v8237_v11 }
 0x340   :  { %5450 = vmatprep.mubr.msk.f32.mxu0 %vm2806_vm4, %v8242_v38 }
 0x343   :  { %5451 = vmatmul.mubr.msk.f32.gmra.mrb[174].mxu0 %vm2806_vm4, %v8257_v21 }
 0x344   :  { %5453 = vmatprep.mubr.msk.f32.mxu0 %vm2806_vm4, %v8262_v59  ;;  %v9570_v59 = vld [vmem:[#allocation5_spill] sm:$0xff] }
 0x347   :  { %5454 = vmatmul.mubr.msk.f32.gmra.mrb[178].mxu0 %vm2806_vm4, %v8275_v41 }
 0x3c6   :  { %v5370_v49 = vpop.f32.mrb[152].mxu0 }
 0x3c7   :  { %v2767_v3 = vpop.f32.mrb[153].mxu0 }
 0x3ca   :  { %v5377_v32 = vpop.f32.mrb[148].mxu0 }
 0x3cb   :  { %v5693_v18 = vadd.f32 %v9567_v57, %v5377_v32  ;;  %v2891_v55 = vpop.f32.mrb[149].mxu0 }
 0x3cc   :  { %v5695_v11 = vadd.f32 %v9568_v54, %v2891_v55 }
 0x3cd   :  { %v2923_v6 = vsub.f32 0.0, %v5693_v18 }
 0x3ce   :  { %v2922_v28 = vsub.f32 0.0, %v5695_v11  ;;  %v5380_v38 = vpop.f32.mrb[150].mxu0 }
 0x3cf   :  { %v2926_v53 = vmul.f32 1.442695, %v2923_v6  ;;  %v5697_v21 = vadd.f32 %v9569_v22, %v5380_v38  ;;  %v2901_v9 = vpop.f32.mrb[151].mxu0 }
 0x3d0   :  { %v2924_v44 = vmul.f32 1.442695, %v2922_v28  ;;  %v5699_v27 = vadd.f32 %v9570_v59, %v2901_v9 }
 0x3d1   :  { %5761 = vpow2.f32 %v2926_v53  ;;  %v2937_v41 = vsub.f32 0.0, %v5697_v21 }
 0x3d2   :  { %5763 = vpow2.f32 %v2924_v44  ;;  %v2936_v34 = vsub.f32 0.0, %v5699_v27  ;;  %v5383_v13 = vpop.f32.mrb[154].mxu0 }
 0x3d3   :  { %v2940_v2 = vmul.f32 1.442695, %v2937_v41  ;;  %v2911_v48 = vpop.f32.mrb[155].mxu0 }
 0x3d4   :  { %v2938_v61 = vmul.f32 1.442695, %v2936_v34  ;;  %v9571_v34 = vld [vmem:[#allocation8_spill] sm:$0xff] }
 0x3d5   :  { %5765 = vpow2.f32 %v2940_v2  ;;  %v2917_v2 = vadd.f32 %v5383_v13, %v9571_v34 }
 0x3d6   :  { %5767 = vpow2.f32 %v2938_v61 }
 0x3db   :  { %v5762_v26 = vpop.eup %5761 }
 0x3dc   :  { %v5764_v58 = vpop.eup %5763  ;;  %v2929_v5 = vadd.f32 1.0, %v5762_v26 }
 0x3dd   :  { %v2928_v30 = vadd.f32 1.0, %v5764_v58 }
 0x3de   :  { %5769 = vrcp.f32 %v2929_v5  ;;  %v8410_v32 = vpop.f32.mrb[160].mxu0 }
 0x3df   :  { %5771 = vrcp.f32 %v2928_v30  ;;  %v8412_v18 = vpop.f32.mrb[161].mxu0  ;;  %v5766_v55 = vpop.eup %5765  ;;  %v9572_v30 = vld [vmem:[#allocation2_spill] sm:$0xff] }
 0x3e0   :  { %v5768_v11 = vpop.eup %5767  ;;  %v2943_v28 = vadd.f32 1.0, %v5766_v55  ;;  %v2912_v55 = vadd.f32 %v2911_v48, %v9572_v30 }
 0x3e1   :  { %v2942_v21 = vadd.f32 1.0, %v5768_v11 }
 0x3e2   :  { %v5401_v6 = vpop.f32.mrb[156].mxu0  ;;  %5773 = vrcp.f32 %v2943_v28 }
 0x3e3   :  { %v5701_v38 = vadd.f32 %v9567_v57, %v5401_v6  ;;  %v3292_v53 = vpop.f32.mrb[157].mxu0  ;;  %5775 = vrcp.f32 %v2942_v21 }
 0x3e4   :  { %v5703_v9 = vadd.f32 %v9568_v54, %v3292_v53  ;;  %v2773_v53 = vadd.f32 %v5370_v49, %v9573_v62 }
 0x3e5   :  { %v3324_v44 = vsub.f32 0.0, %v5701_v38 }
 0x3e6   :  { %v3323_v27 = vsub.f32 0.0, %v5703_v9  ;;  %v5404_v41 = vpop.f32.mrb[158].mxu0  ;;  %v9574_v9 = vld [vmem:[#allocation3_spill] sm:$0xff] }
 0x3e7   :  { %v3327_v61 = vmul.f32 1.442695, %v3324_v44  ;;  %v5705_v26 = vadd.f32 %v9569_v22, %v5404_v41  ;;  %v3302_v58 = vpop.f32.mrb[159].mxu0  ;;  %v2768_v28 = vadd.f32 %v2767_v3, %v9574_v9 }
 0x3e8   :  { %v5770_v5 = vpop.eup %5769  ;;  %v3325_v56 = vmul.f32 1.442695, %v3323_v27  ;;  %v5707_v6 = vadd.f32 %v9570_v59, %v3302_v58 }
 0x3e9   :  { %v5772_v11 = vpop.eup %5771  ;;  %v2949_v38 = vmul.f32 %v5770_v5, %v2917_v2  ;;  %5777 = vpow2.f32 %v3327_v61  ;;  %v3338_v41 = vsub.f32 0.0, %v5705_v26 }
 0x3ea   :  { %v2948_v51 = vmul.f32 %v5772_v11, %v2912_v55  ;;  %5779 = vpow2.f32 %v3325_v56  ;;  %v5407_v13 = vpop.f32.mrb[162].mxu0  ;;  %v3337_v21 = vsub.f32 0.0, %v5707_v6 }
 0x3eb   :  { %v2951_v44 = vadd.f32 %v2949_v38, %v2773_v53  ;;  %v3312_v15 = vpop.f32.mrb[163].mxu0  ;;  %v3341_v48 = vmul.f32 1.442695, %v3338_v41 }
 0x3ec   :  { %v2950_v25 = vadd.f32 %v2948_v51, %v2768_v28  ;;  %v3339_v27 = vmul.f32 1.442695, %v3337_v21  ;;  %v5774_v58 = vpop.eup %5773 }
 0x3ed   :  { %5781 = vtanh.f32 %v2951_v44  ;;  %v5776_v39 = vpop.eup %5775  ;;  %v2955_v61 = vsub.f32 1.0, %v5774_v58  ;;  %v2959_v55 = vmul.f32 %v5774_v58, %v8161_v17 }
 0x3ee   :  { %5783 = vtanh.f32 %v2950_v25  ;;  %v2954_v5 = vsub.f32 1.0, %v5776_v39  ;;  %v2958_v11 = vmul.f32 %v5776_v39, %v8156_v52 }
 0x3ef   :  { %5785 = vpow2.f32 %v3341_v48 }
 0x3f0   :  { %5787 = vpow2.f32 %v3339_v27 }
 0x3f3   :  { %v5778_v23 = vpop.eup %5777 }
 0x3f4   :  { %v5780_v49 = vpop.eup %5779  ;;  %v3330_v2 = vadd.f32 1.0, %v5778_v23 }
 0x3f5   :  { %v3329_v3 = vadd.f32 1.0, %v5780_v49 }
 0x3f6   :  { %5789 = vrcp.f32 %v3330_v2  ;;  %v8422_v56 = vpop.f32.mrb[168].mxu0 }
 0x3f7   :  { %v5782_v26 = vpop.eup %5781  ;;  %5791 = vrcp.f32 %v3329_v3  ;;  %v8424_v51 = vpop.f32.mrb[169].mxu0 }
 0x3f8   :  { %9575 = vst [vmem:[#allocation22_spill] sm:$0xff] %v8424_v51  ;;  %v5784_v25 = vpop.eup %5783  ;;  %v2957_v6 = vmul.f32 %v5782_v26, %v2955_v61  ;;  %v3318_v26 = vadd.f32 %v5407_v13, %v9571_v34 }
 0x3f9   :  { %v2956_v53 = vmul.f32 %v5784_v25, %v2954_v5  ;;  %v5786_v41 = vpop.eup %5785  ;;  %v3313_v5 = vadd.f32 %v3312_v15, %v9572_v30 }
 0x3fa   :  { %v8428_v38 = vadd.f32 %v2959_v55, %v2957_v6  ;;  %v5425_v23 = vpop.f32.mrb[164].mxu0  ;;  %v5788_v17 = vpop.eup %5787  ;;  %v3344_v58 = vadd.f32 1.0, %v5786_v41  ;;  %v3218_v41 = vadd.f32 %v8412_v18, %v9574_v9 }
 0x3fb   :  { %v8430_v28 = vadd.f32 %v2958_v11, %v2956_v53  ;;  %v3695_v44 = vpop.f32.mrb[165].mxu0  ;;  %v3343_v3 = vadd.f32 1.0, %v5788_v17  ;;  %v5709_v25 = vadd.f32 %v9567_v57, %v5425_v23  ;;  %v3223_v53 = vadd.f32 %v8410_v32, %v9573_v62 }
 0x3fc   :  { %2963 = vst [vmem:[%s9443_s12 + $0x8] sm:$0xff] %v8428_v38  ;;  %5793 = vrcp.f32 %v3344_v58  ;;  %v5711_v30 = vadd.f32 %v9568_v54, %v3695_v44 }
 0x3fd   :  { %2962 = vst [vmem:[%s9443_s12] sm:$0xff] %v8430_v28  ;;  %v2967_v48 = vrot.slane %v8430_v28, %v7850_v29  ;;  %v2973_v27 = vrot.slane %v8430_v28, %v7869_v16  ;;  %v2979_v2 = vrot.slane %v8430_v28, %v7879_v45  ;;  %v2985_v11 = vrot.slane %v8430_v28, %v7887_v35 }
 0x3fe   :  { %v5428_v52 = vpop.f32.mrb[166].mxu0  ;;  %5795 = vrcp.f32 %v3343_v3  ;;  %v3727_v51 = vsub.f32 0.0, %v5709_v25  ;;  %v3726_v18 = vsub.f32 0.0, %v5711_v30  ;;  %v3009_v30 = vrot.slane %v8430_v28, %v7933_v20 }
 0x3ff   :  { %v3705_v39 = vpop.f32.mrb[167].mxu0  ;;  %v2968_v61 = vmul.f32 %v2967_v48, %v8073_v50  ;;  %v2974_v6 = vmul.f32 %v2973_v27, %v8103_v14  ;;  %v2980_v48 = vmul.f32 %v2979_v2, %v8127_v37  ;;  %v2991_v27 = vrot.slane %v8430_v28, %v7895_v31 }
 0x400   :  { %v5790_v21 = vpop.eup %5789  ;;  %v3730_v44 = vmul.f32 1.442695, %v3727_v51  ;;  %v3728_v2 = vmul.f32 1.442695, %v3726_v18 }
 0x401   :  { %v5792_v49 = vpop.eup %5791  ;;  %v2969_v13 = vadd.f32 %v2968_v61, %v8324_v10  ;;  %v3350_v15 = vmul.f32 %v5790_v21, %v3318_v26  ;;  %v2997_v10 = vrot.slane %v8430_v28, %v7911_v36  ;;  %v2992_v58 = vmul.f32 %v2991_v27, %v8146_v1 }
 0x402   :  { %v8450_v55 = vpop.f32.mrb[170].mxu0  ;;  %v3349_v23 = vmul.f32 %v5792_v49, %v3313_v5  ;;  %v3003_v49 = vrot.slane %v8430_v28, %v7923_v33  ;;  %v3015_v26 = vrot.slane %v8428_v38, %v7850_v29  ;;  %v5713_v5 = vadd.f32 %v9569_v22, %v5428_v52 }
 0x403   :  { %9576 = vst [vmem:[#allocation37_spill] sm:$0xff] %v8450_v55  ;;  %v8459_v17 = vpop.f32.mrb[171].mxu0  ;;  %v2975_v55 = vadd.f32 %v2974_v6, %v2969_v13  ;;  %v3352_v32 = vadd.f32 %v3350_v15, %v3223_v53  ;;  %v2998_v61 = vmul.f32 %v2997_v10, %v8163_v4  ;;  %v3021_v28 = vrot.slane %v8428_v38, %v7869_v16 }
 0x404   :  { %9577 = vst [vmem:[#allocation23_spill] sm:$0xff] %v8459_v17  ;;  %v3351_v34 = vadd.f32 %v3349_v23, %v3218_v41  ;;  %v2986_v17 = vmul.f32 %v2985_v11, %v8139_v24  ;;  %v3004_v25 = vmul.f32 %v3003_v49, %v8179_v60  ;;  %v3010_v41 = vmul.f32 %v3009_v30, %v8197_v7 }
 0x405   :  { %v2981_v9 = vadd.f32 %v2980_v48, %v2975_v55  ;;  %5797 = vtanh.f32 %v3352_v32  ;;  %v5715_v55 = vadd.f32 %v9570_v59, %v3705_v39  ;;  %v3027_v52 = vrot.slane %v8428_v38, %v7879_v45 }
 0x406   :  { %5799 = vtanh.f32 %v3351_v34  ;;  %v5794_v34 = vpop.eup %5793  ;;  %v3741_v13 = vsub.f32 0.0, %v5713_v5  ;;  %v3016_v39 = vmul.f32 %v3015_v26, %v8216_v43  ;;  %v3022_v49 = vmul.f32 %v3021_v28, %v8246_v19 }
 0x407   :  { %v2987_v21 = vadd.f32 %v2986_v17, %v2981_v9  ;;  %5801 = vpow2.f32 %v3730_v44  ;;  %v3356_v17 = vsub.f32 1.0, %v5794_v34  ;;  %v3740_v27 = vsub.f32 0.0, %v5715_v55 }
 0x408   :  { %v5796_v6 = vpop.eup %5795  ;;  %5803 = vpow2.f32 %v3728_v2  ;;  %v3360_v10 = vmul.f32 %v5794_v34, %v8226_v63  ;;  %v3744_v30 = vmul.f32 1.442695, %v3741_v13  ;;  %v3028_v26 = vmul.f32 %v3027_v52, %v8264_v42 }
 0x409   :  { %v2993_v3 = vadd.f32 %v2992_v58, %v2987_v21  ;;  %v3355_v48 = vsub.f32 1.0, %v5796_v6  ;;  %v3359_v2 = vmul.f32 %v5796_v6, %v8221_v12 }
 0x40a   :  { %5805 = vpow2.f32 %v3744_v30 }
 0x40b   :  { %v2999_v9 = vadd.f32 %v2998_v61, %v2993_v3 }
 0x40d   :  { %v3005_v53 = vadd.f32 %v3004_v25, %v2999_v9  ;;  %v3742_v25 = vmul.f32 1.442695, %v3740_v27 }
 0x40e   :  { %v8480_v51 = vpop.f32.mrb[176].mxu0 }
 0x40f   :  { %v8482_v11 = vpop.f32.mrb[177].mxu0  ;;  %v5798_v15 = vpop.eup %5797  ;;  %v3011_v23 = vadd.f32 %v3010_v41, %v3005_v53  ;;  %5807 = vpow2.f32 %v3742_v25 }
 0x410   :  { %v5800_v18 = vpop.eup %5799  ;;  %v3358_v21 = vmul.f32 %v5798_v15, %v3356_v17 }
 0x411   :  { %v3017_v44 = vadd.f32 %v3016_v39, %v3011_v23  ;;  %v3357_v3 = vmul.f32 %v5800_v18, %v3355_v48  ;;  %v5802_v12 = vpop.eup %5801  ;;  %v3033_v39 = vrot.slane %v8428_v38, %v7887_v35  ;;  %v9578_v48 = vld [vmem:[#allocation26_spill] sm:$0xff] }
 0x412   :  { %v5449_v32 = vpop.f32.mrb[172].mxu0  ;;  %v8493_v61 = vadd.f32 %v3360_v10, %v3358_v21  ;;  %v5804_v53 = vpop.eup %5803  ;;  %v3733_v13 = vadd.f32 1.0, %v5802_v12  ;;  %v8524_v27 = vadd.f32 %v8283_v46, %v9578_v48  ;;  %v3039_v46 = vrot.slane %v8428_v38, %v7895_v31 }
 0x413   :  { %v4098_v58 = vpop.f32.mrb[173].mxu0  ;;  %v3023_v5 = vadd.f32 %v3022_v49, %v3017_v44  ;;  %v8496_v9 = vadd.f32 %v3359_v2, %v3357_v3  ;;  %v5717_v6 = vadd.f32 %v9567_v57, %v5449_v32  ;;  %v3732_v57 = vadd.f32 1.0, %v5804_v53  ;;  %v9579_v32 = vld [vmem:[#allocation27_spill] sm:$0xff]  ;;  %v9581_v44 = vld [vmem:[#allocation29_spill] sm:$0xff] }
 0x414   :  { %5049 = vst [vmem:[%s9443_s12 + $0x18] sm:$0xff] %v8493_v61  ;;  %v5719_v28 = vadd.f32 %v9568_v54, %v4098_v58  ;;  %v8528_v18 = vadd.f32 %v8291_v47, %v9579_v32  ;;  %v9580_v58 = vld [vmem:[#allocation28_spill] sm:$0xff]  ;;  %v8539_v2 = vadd.f32 %v8314_v0, %v9581_v44  ;;  %v3045_v47 = vrot.slane %v8428_v38, %v7911_v36 }
 0x415   :  { %v3029_v34 = vadd.f32 %v3028_v26, %v3023_v5  ;;  %5048 = vst [vmem:[%s9443_s12 + $0x10] sm:$0xff] %v8496_v9  ;;  %v3369_v52 = vrot.slane %v8496_v9, %v7850_v29  ;;  %v3375_v17 = vrot.slane %v8496_v9, %v7869_v16  ;;  %v4130_v23 = vsub.f32 0.0, %v5717_v6 }
 0x416   :  { %v8498_v55 = vpop.f32.mrb[174].mxu0  ;;  %v4129_v54 = vsub.f32 0.0, %v5719_v28  ;;  %v3381_v21 = vrot.slane %v8496_v9, %v7879_v45  ;;  %v8535_v49 = vadd.f32 %v8298_v40, %v9580_v58  ;;  %v3387_v26 = vrot.slane %v8496_v9, %v7887_v35  ;;  %v9582_v40 = vld [vmem:[#allocation31_spill] sm:$0xff] }
 0x417   :  { %v8504_v63 = vpop.f32.mrb[175].mxu0  ;;  %v3370_v10 = vmul.f32 %v3369_v52, %v8073_v50  ;;  %v3376_v30 = vmul.f32 %v3375_v17, %v8103_v14  ;;  %5809 = vrcp.f32 %v3733_v13  ;;  %v3034_v5 = vmul.f32 %v3033_v39, %v9582_v40  ;;  %v5806_v39 = vpop.eup %5805 }
 0x418   :  { %5811 = vrcp.f32 %v3732_v57  ;;  %v4133_v25 = vmul.f32 1.442695, %v4130_v23  ;;  %v4131_v0 = vmul.f32 1.442695, %v4129_v54  ;;  %v3051_v12 = vrot.slane %v8428_v38, %v7923_v33 }
 0x419   :  { %v3371_v3 = vadd.f32 %v3370_v10, %v8332_v8  ;;  %v3382_v28 = vmul.f32 %v3381_v21, %v8127_v37  ;;  %v3393_v8 = vrot.slane %v8496_v9, %v7895_v31  ;;  %v3040_v53 = vmul.f32 %v8524_v27, %v3039_v46  ;;  %v5808_v48 = vpop.eup %5807  ;;  %v9583_v10 = vld [vmem:[#allocation3_spill] sm:$0xff]  ;;  %v9584_v21 = vld [vmem:[#allocation22_spill] sm:$0xff] }
 0x41a   :  { %v8512_v41 = vpop.f32.mrb[178].mxu0  ;;  %v3057_v52 = vrot.slane %v8428_v38, %v7933_v20  ;;  %v3626_v17 = vadd.f32 %v8422_v56, %v9573_v62  ;;  %v3035_v13 = vadd.f32 %v3034_v5, %v3029_v34  ;;  %v3388_v23 = vmul.f32 %v3387_v26, %v8139_v24 }
 0x41b   :  { %v8518_v15 = vpop.f32.mrb[179].mxu0  ;;  %v3377_v6 = vadd.f32 %v3376_v30, %v3371_v3  ;;  %v3399_v54 = vrot.slane %v8496_v9, %v7911_v36  ;;  %5813 = vpow2.f32 %v4133_v25  ;;  %v3046_v32 = vmul.f32 %v8528_v18, %v3045_v47 }
 0x41c   :  { %v3621_v58 = vadd.f32 %v9584_v21, %v9583_v10  ;;  %5815 = vpow2.f32 %v4131_v0  ;;  %v3041_v38 = vadd.f32 %v3040_v53, %v3035_v13  ;;  %v3052_v44 = vmul.f32 %v8535_v49, %v3051_v12  ;;  %v9587_v53 = vld [vmem:[#allocation2_spill] sm:$0xff]  ;;  %v9588_v13 = vld [vmem:[#allocation23_spill] sm:$0xff] }
 0x41d   :  { %v3383_v57 = vadd.f32 %v3382_v28, %v3377_v6  ;;  %v3394_v34 = vmul.f32 %v3393_v8, %v8146_v1  ;;  %v3405_v46 = vrot.slane %v8496_v9, %v7923_v33  ;;  %v3058_v3 = vmul.f32 %v8539_v2, %v3057_v52  ;;  %v9585_v6 = vld [vmem:[#allocation8_spill] sm:$0xff]  ;;  %v9586_v28 = vld [vmem:[#allocation37_spill] sm:$0xff] }
 0x41e   :  { %v3411_v30 = vrot.slane %v8496_v9, %v7933_v20  ;;  %v3747_v26 = vadd.f32 1.0, %v5806_v39  ;;  %v3047_v47 = vadd.f32 %v3046_v32, %v3041_v38  ;;  %v3400_v25 = vmul.f32 %v3399_v54, %v8163_v4 }
 0x41f   :  { %v3389_v56 = vadd.f32 %v3388_v23, %v3383_v57  ;;  %v3746_v0 = vadd.f32 1.0, %v5808_v48  ;;  %v5721_v12 = vadd.f32 %v9569_v22, %v8498_v55  ;;  %v3721_v8 = vadd.f32 %v9586_v28, %v9585_v6 }
 0x420   :  { %v3716_v57 = vadd.f32 %v9588_v13, %v9587_v53  ;;  %v5723_v52 = vadd.f32 %v9570_v59, %v8504_v63  ;;  %v3053_v23 = vadd.f32 %v3052_v44, %v3047_v47  ;;  %v3417_v39 = vrot.slane %v8493_v61, %v7850_v29 }
 0x421   :  { %v3395_v5 = vadd.f32 %v3394_v34, %v3389_v56  ;;  %v5810_v9 = vpop.eup %5809  ;;  %v3423_v54 = vrot.slane %v8493_v61, %v7869_v16  ;;  %v3406_v22 = vmul.f32 %v3405_v46, %v8179_v60  ;;  %v3412_v32 = vmul.f32 %v3411_v30, %v8197_v7 }
 0x422   :  { %v5812_v55 = vpop.eup %5811  ;;  %5817 = vrcp.f32 %v3747_v26  ;;  %v3753_v21 = vmul.f32 %v5810_v9, %v3721_v8  ;;  %v8588_v38 = vadd.f32 %v3058_v3, %v3053_v23  ;;  %v4144_v63 = vsub.f32 0.0, %v5721_v12 }
 0x423   :  { %v3401_v48 = vadd.f32 %v3400_v25, %v3395_v5  ;;  %5819 = vrcp.f32 %v3746_v0  ;;  %v3752_v59 = vmul.f32 %v5812_v55, %v3716_v57  ;;  %v4143_v34 = vsub.f32 0.0, %v5723_v52 }
 0x424   :  { %v3755_v44 = vadd.f32 %v3753_v21, %v3626_v17  ;;  %v3418_v28 = vmul.f32 %v3417_v39, %v8216_v43  ;;  %v3429_v5 = vrot.slane %v8493_v61, %v7879_v45  ;;  %v3424_v30 = vmul.f32 %v3423_v54, %v8246_v19 }
 0x425   :  { %v3407_v56 = vadd.f32 %v3406_v22, %v3401_v48  ;;  %v5814_v47 = vpop.eup %5813  ;;  %v3754_v25 = vadd.f32 %v3752_v59, %v3621_v58  ;;  %v3435_v3 = vrot.slane %v8493_v61, %v7887_v35  ;;  %v4147_v12 = vmul.f32 1.442695, %v4144_v63 }
 0x426   :  { %v5816_v13 = vpop.eup %5815  ;;  %5821 = vtanh.f32 %v3755_v44  ;;  %v4136_v26 = vadd.f32 1.0, %v5814_v47  ;;  %v4145_v8 = vmul.f32 1.442695, %v4143_v34  ;;  %v3430_v57 = vmul.f32 %v3429_v5, %v8264_v42 }
 0x427   :  { %v3413_v46 = vadd.f32 %v3412_v32, %v3407_v56  ;;  %5823 = vtanh.f32 %v3754_v25  ;;  %v4135_v17 = vadd.f32 1.0, %v5816_v13  ;;  %v3441_v52 = vrot.slane %v8493_v61, %v7895_v31 }
 0x428   :  { %5825 = vrcp.f32 %v4136_v26  ;;  %v3436_v23 = vmul.f32 %v3435_v3, %v9582_v40  ;;  %v3447_v9 = vrot.slane %v8493_v61, %v7911_v36  ;;  %v3453_v48 = vrot.slane %v8493_v61, %v7923_v33  ;;  %v9590_v26 = vld [vmem:[#allocation18_spill] sm:$0xff] }
 0x429   :  { %v3419_v0 = vadd.f32 %v3418_v28, %v3413_v46  ;;  %5827 = vrcp.f32 %v4135_v17  ;;  %v3442_v55 = vmul.f32 %v8524_v27, %v3441_v52  ;;  %v3061_v32 = vmul.f32 1.442695, %v8588_v38  ;;  %v9589_v46 = vld [vmem:[#allocation32_spill] sm:$0xff] }
 0x42a   :  { %5829 = vpow2.f32 %v4147_v12  ;;  %v3448_v56 = vmul.f32 %v8528_v18, %v3447_v9  ;;  %v3454_v34 = vmul.f32 %v8535_v49, %v3453_v48  ;;  %v4124_v28 = vadd.f32 %v8512_v41, %v9585_v6  ;;  %v8625_v9 = vld [vmem:[%s9444_s3 + $0x4] sm:$0xf] }
 0x42b   :  { %v3425_v58 = vadd.f32 %v3424_v30, %v3419_v0  ;;  %5831 = vpow2.f32 %v4145_v8  ;;  %v4119_v12 = vadd.f32 %v8518_v15, %v9587_v53  ;;  %v8630_v15 = vld [vmem:[%s9444_s3] sm:$0xf]  ;;  %v4298_v48 = vrot.slane %v8625_v9, %v7850_v29 }
 0x42c   :  { %v5818_v54 = vpop.eup %5817  ;;  %5833 = vpow2.f32 %v3061_v32  ;;  %vm3060_vm7 = vcmp.gt.f32.partialorder %v8588_v38, 0.0 }
 0x42d   :  { %v3431_v39 = vadd.f32 %v3430_v57, %v3425_v58  ;;  %v5820_v22 = vpop.eup %5819  ;;  %v3759_v59 = vsub.f32 1.0, %v5818_v54  ;;  %v3763_v25 = vmul.f32 %v5818_v54, %v9589_v46 }
 0x42e   :  { %v3758_v47 = vsub.f32 1.0, %v5820_v22  ;;  %v3762_v0 = vmul.f32 %v5820_v22, %v9590_v26  ;;  %v4278_v22 = vrot.slane %v8630_v15, %v7850_v29 }
 0x42f   :  { %v3437_v21 = vadd.f32 %v3436_v23, %v3431_v39 }
 0x430   :  { %v5822_v44 = vpop.eup %5821 }
 0x431   :  { %v3443_v63 = vadd.f32 %v3442_v55, %v3437_v21  ;;  %v5824_v5 = vpop.eup %5823  ;;  %v3761_v13 = vmul.f32 %v5822_v44, %v3759_v59  ;;  %v3459_v55 = vrot.slane %v8493_v61, %v7933_v20  ;;  %v4029_v61 = vadd.f32 %v8480_v51, %v9573_v62 }
 0x432   :  { %v5826_v3 = vpop.eup %5825  ;;  %v3760_v17 = vmul.f32 %v5824_v5, %v3758_v47 }
 0x433   :  { %v3449_v30 = vadd.f32 %v3448_v56, %v3443_v63  ;;  %v5828_v8 = vpop.eup %5827  ;;  %v8614_v57 = vadd.f32 %v3763_v25, %v3761_v13  ;;  %v4156_v52 = vmul.f32 %v5826_v3, %v4124_v28  ;;  %v4303_v63 = vrot.slane %v8625_v9, %v7869_v16  ;;  %v9591_v25 = vld [vmem:[#allocation19_spill] sm:$0xff] }
 0x434   :  { %v8616_v23 = vadd.f32 %v3762_v0, %v3760_v17  ;;  %v4155_v41 = vmul.f32 %v5828_v8, %v4119_v12  ;;  %v5830_v6 = vpop.eup %5829  ;;  %v4024_v28 = vadd.f32 %v8482_v11, %v9583_v10  ;;  %v3460_v26 = vmul.f32 %v8539_v2, %v3459_v55 }
 0x435   :  { %v3455_v58 = vadd.f32 %v3454_v34, %v3449_v30  ;;  %5066 = vst [vmem:[%s9443_s12 + $0x28] sm:$0xff] %v8614_v57  ;;  %v5832_v53 = vpop.eup %5831  ;;  %v4150_v54 = vadd.f32 1.0, %v5830_v6  ;;  %v4158_v10 = vadd.f32 %v4156_v52, %v4029_v61 }
 0x436   :  { %5065 = vst [vmem:[%s9443_s12 + $0x20] sm:$0xff] %v8616_v23  ;;  %v3772_v39 = vrot.slane %v8616_v23, %v7850_v29  ;;  %v3778_v32 = vrot.slane %v8616_v23, %v7869_v16  ;;  %v3784_v21 = vrot.slane %v8616_v23, %v7879_v45  ;;  %v4149_v56 = vadd.f32 1.0, %v5832_v53  ;;  %v5834_v47 = vpop.eup %5833 }
 0x437   :  { %v3790_v3 = vrot.slane %v8616_v23, %v7887_v35  ;;  %5835 = vrcp.f32 %v4150_v54  ;;  %v3796_v51 = vrot.slane %v8616_v23, %v7895_v31  ;;  %v4157_v0 = vadd.f32 %v4155_v41, %v4024_v28 }
 0x438   :  { %v3773_v59 = vmul.f32 %v3772_v39, %v8073_v50  ;;  %v3779_v30 = vmul.f32 %v3778_v32, %v8103_v14  ;;  %v3785_v62 = vmul.f32 %v3784_v21, %v8127_v37  ;;  %5837 = vrcp.f32 %v4149_v56 }
 0x439   :  { %v5034_v17 = vadd.f32 -1.0, %v5834_v47  ;;  %v3802_v12 = vrot.slane %v8616_v23, %v7911_v36  ;;  %v8674_v8 = vadd.f32 %v3460_v26, %v3455_v58  ;;  %v3791_v39 = vmul.f32 %v3790_v3, %v8139_v24 }
 0x43a   :  { %v3774_v13 = vadd.f32 %v3773_v59, %v9591_v25  ;;  %5839 = vtanh.f32 %v4158_v10  ;;  %v3797_v55 = vmul.f32 %v3796_v51, %v8146_v1  ;;  %v3808_v32 = vrot.slane %v8616_v23, %v7923_v33 }
 0x43b   :  { %v3064_v54 = vsel %vm3060_vm7, %v8588_v38, %v5034_v17  ;;  %5841 = vtanh.f32 %v4157_v0  ;;  %v3463_v52 = vmul.f32 1.442695, %v8674_v8  ;;  %v3820_v38 = vrot.slane %v8614_v57, %v7850_v29 }
 0x43c   :  { %v3780_v11 = vadd.f32 %v3779_v30, %v3774_v13  ;;  %v8681_v41 = vmul.f32 %v4298_v48, %v3064_v54  ;;  %3065 = vst [vmem:[%s9445_s13] sm:$0xff] %v3064_v54  ;;  %v8689_v21 = vmul.f32 %v4278_v22, %v3064_v54  ;;  %v3803_v56 = vmul.f32 %v3802_v12, %v8163_v4 }
 0x43d   :  { %v3814_v48 = vrot.slane %v8616_v23, %v7933_v20  ;;  %5843 = vpow2.f32 %v3463_v52  ;;  %v3826_v28 = vrot.slane %v8614_v57, %v7869_v16  ;;  %v3832_v25 = vrot.slane %v8614_v57, %v7879_v45 }
 0x43e   :  { %v3786_v53 = vadd.f32 %v3785_v62, %v3780_v11  ;;  %v4343_v59 = vmul.f32 %v8681_v41, %v8681_v41  ;;  %v4315_v61 = vmul.f32 %v8689_v21, %v8689_v21  ;;  %v4667_v22 = vmul.f32 %v8681_v41, %v8689_v21 }
 0x43f   :  { %v3838_v23 = vrot.slane %v8614_v57, %v7887_v35  ;;  %v3809_v26 = vmul.f32 %v3808_v32, %v8179_v60  ;;  %v3844_v10 = vrot.slane %v8614_v57, %v7895_v31  ;;  %v3850_v0 = vrot.slane %v8614_v57, %v7911_v36 }
 0x440   :  { %v3792_v58 = vadd.f32 %v3791_v39, %v3786_v53  ;;  %v4344_v13 = vrot.slane %v4343_v59, 4  ;;  %v4316_v62 = vrot.slane %v4315_v61, 4  ;;  %v4668_v51 = vrot.slane %v4667_v22, 4 }
 0x441   :  { %v5836_v30 = vpop.eup %5835  ;;  %v3856_v17 = vrot.slane %v8614_v57, %v7923_v33  ;;  %v3862_v53 = vrot.slane %v8614_v57, %v7933_v20  ;;  %v3815_v54 = vmul.f32 %v3814_v48, %v8197_v7  ;;  %v3827_v6 = vmul.f32 %v3826_v28, %v8246_v19 }
 0x442   :  { %v3798_v47 = vadd.f32 %v3797_v55, %v3792_v58  ;;  %v5838_v11 = vpop.eup %5837  ;;  %v4345_v12 = vadd.f32 %v4344_v13, %v4343_v59  ;;  %v4317_v52 = vadd.f32 %v4316_v62, %v4315_v61  ;;  %v3821_v58 = vmul.f32 %v3820_v38, %v8216_v43  ;;  %v9592_v13 = vld [vmem:[#allocation36_spill] sm:$0xff] }
 0x443   :  { %v4162_v55 = vsub.f32 1.0, %v5836_v30  ;;  %v4161_v46 = vsub.f32 1.0, %v5838_v11  ;;  %v3833_v59 = vmul.f32 %v3832_v25, %v8264_v42  ;;  %v8722_v57 = vmul.f32 %v3838_v23, %v9582_v40 }
 0x444   :  { %v3804_v3 = vadd.f32 %v3803_v56, %v3798_v47  ;;  %v4346_v32 = vrot.slane %v4345_v12, 2  ;;  %v4669_v56 = vadd.f32 %v4668_v51, %v4667_v22  ;;  %v5840_v47 = vpop.eup %5839  ;;  %v4318_v44 = vrot.slane %v4317_v52, 2  ;;  %v9593_v22 = vld [vmem:[#allocation20_spill] sm:$0xff] }
 0x445   :  { %v5842_v34 = vpop.eup %5841  ;;  %v4166_v48 = vmul.f32 %v5836_v30, %v9592_v13  ;;  %v4164_v61 = vmul.f32 %v5840_v47, %v4162_v55  ;;  %v8726_v38 = vmul.f32 %v8524_v27, %v3844_v10  ;;  %v8730_v28 = vmul.f32 %v8528_v18, %v3850_v0 }
 0x446   :  { %v3810_v39 = vadd.f32 %v3809_v26, %v3804_v3  ;;  %v4165_v26 = vmul.f32 %v5838_v11, %v9593_v22  ;;  %v4163_v62 = vmul.f32 %v5842_v34, %v4161_v46  ;;  %v4670_v25 = vrot.slane %v4669_v56, 2 }
 0x447   :  { %v8732_v51 = vadd.f32 %v4166_v48, %v4164_v61  ;;  %v8735_v23 = vmul.f32 %v8535_v49, %v3856_v17  ;;  %v4319_v10 = vadd.f32 %v4318_v44, %v4317_v52  ;;  %v8750_v11 = vmul.f32 %v8539_v2, %v3862_v53  ;;  %v1344_v17 = vld [vmem:[%s9437_s6 + $0x658] sm:$0xff] }
 0x448   :  { %v3816_v5 = vadd.f32 %v3815_v54, %v3810_v39  ;;  %v4347_v39 = vadd.f32 %v4346_v32, %v4345_v12  ;;  %v5844_v54 = vpop.eup %5843  ;;  %v8737_v55 = vadd.f32 %v4165_v26, %v4163_v62  ;;  %vm3462_vm8 = vcmp.gt.f32.partialorder %v8674_v8, 0.0  ;;  %2452 = vmatprep.mubr.f32.mxu1 %v1344_v17  ;;  %v1343_v32 = vld [vmem:[%s9437_s6 + $0x650] sm:$0xff] }
 0x449   :  { %5083 = vst [vmem:[%s9443_s12 + $0x38] sm:$0xff] %v8732_v51  ;;  %v4223_v34 = vrot.slane %v8732_v51, %v7850_v29  ;;  %v4235_v46 = vrot.slane %v8732_v51, %v7879_v45  ;;  %v4241_v44 = vrot.slane %v8732_v51, %v7887_v35  ;;  %v4253_v0 = vrot.slane %v8732_v51, %v7911_v36 }
 0x44a   :  { %v3822_v3 = vadd.f32 %v3821_v58, %v3816_v5  ;;  %v4229_v5 = vrot.slane %v8732_v51, %v7869_v16  ;;  %5082 = vst [vmem:[%s9443_s12 + $0x30] sm:$0xff] %v8737_v55  ;;  %v4259_v12 = vrot.slane %v8732_v51, %v7923_v33  ;;  %v5050_v53 = vadd.f32 -1.0, %v5844_v54  ;;  %2453 = vmatmul.mubr.f32.gmra.mrb[136].mxu1 %v1343_v32 }
 0x44b   :  { %v4348_v52 = vrot.slane %v4347_v39, 1  ;;  %v8768_v58 = vadd.f32 %v4670_v25, %v4669_v56  ;;  %v8774_v47 = vmul.f32 %v4223_v34, %v8216_v43  ;;  %v4265_v13 = vrot.slane %v8732_v51, %v7933_v20 }
 0x44c   :  { %v3828_v30 = vadd.f32 %v3827_v6, %v3822_v3  ;;  %v4247_v6 = vrot.slane %v8732_v51, %v7895_v31  ;;  %v4175_v48 = vrot.slane %v8737_v55, %v7850_v29  ;;  %v4320_v61 = vrot.slane %v4319_v10, 1 }
 0x44d   :  { %v8781_v3 = vmul.f32 %v4229_v5, %v8246_v19  ;;  %v8784_v56 = vmul.f32 %v4235_v46, %v8264_v42  ;;  %v4181_v22 = vrot.slane %v8737_v55, %v7869_v16  ;;  %v4187_v43 = vrot.slane %v8737_v55, %v7879_v45  ;;  %v1348_v42 = vld [vmem:[%s9437_s6 + $0x678] sm:$0xff] }
 0x44e   :  { %v8791_v26 = vmul.f32 %v4241_v44, %v9582_v40  ;;  %v8794_v62 = vmul.f32 %v8524_v27, %v4247_v6  ;;  %v8797_v29 = vmul.f32 %v8528_v18, %v4253_v0  ;;  %v4176_v19 = vmul.f32 %v4175_v48, %v8073_v50  ;;  %2456 = vmatprep.mubr.f32.mxu1 %v1348_v42  ;;  %v1347_v50 = vld [vmem:[%s9437_s6 + $0x670] sm:$0xff]  ;;  %v9594_v18 = vld [vmem:[#allocation34_spill] sm:$0xff] }
 0x44f   :  { %v8804_v25 = vmul.f32 %v8535_v49, %v4259_v12  ;;  %v4193_v54 = vrot.slane %v8737_v55, %v7887_v35  ;;  %v4199_v40 = vrot.slane %v8737_v55, %v7895_v31  ;;  %v4205_v27 = vrot.slane %v8737_v55, %v7911_v36  ;;  %2457 = vmatmul.mubr.f32.gmra.mrb[138].mxu1 %v1347_v50 }
 0x450   :  { %v4177_v34 = vadd.f32 %v4176_v19, %v9594_v18  ;;  %v4182_v5 = vmul.f32 %v4181_v22, %v8103_v14  ;;  %v4211_v49 = vrot.slane %v8737_v55, %v7923_v33  ;;  %v4217_v46 = vrot.slane %v8737_v55, %v7933_v20  ;;  %v1356_v22 = vld [vmem:[%s9437_s6 + $0x6b8] sm:$0xff] }
 0x451   :  { %v4188_v31 = vmul.f32 %v4187_v43, %v8127_v37  ;;  %v3466_v36 = vsel %vm3462_vm8, %v8674_v8, %v5050_v53  ;;  %v3834_v44 = vadd.f32 %v3833_v59, %v3828_v30  ;;  %v8825_v6 = vadd.f32 %v4348_v52, %v4347_v39  ;;  %v1352_v8 = vld [vmem:[%s9437_s6 + $0x698] sm:$0xff] }
 0x452   :  { %v4183_v0 = vadd.f32 %v4182_v5, %v4177_v34  ;;  %5051 = vst [vmem:[%s9445_s13 + $0x8] sm:$0xff] %v3466_v36  ;;  %v8833_v33 = vmul.f32 %v4303_v63, %v3466_v36  ;;  %v9595_v14 = vrot.slane %v8630_v15, %v7869_v16  ;;  %v8840_v55 = vadd.f32 %v4320_v61, %v4319_v10  ;;  %v1351_v16 = vld [vmem:[%s9437_s6 + $0x690] sm:$0xff] }
 0x453   :  { %v4194_v59 = vmul.f32 %v4193_v54, %v8139_v24  ;;  %v4200_v39 = vmul.f32 %v4199_v40, %v8146_v1  ;;  %v4206_v30 = vmul.f32 %v4205_v27, %v8163_v4  ;;  %v3840_v63 = vadd.f32 %v8722_v57, %v3834_v44  ;;  %2460 = vmatprep.mubr.f32.mxu1 %v1352_v8  ;;  %v1355_v54 = vld [vmem:[%s9437_s6 + $0x6b0] sm:$0xff] }
 0x454   :  { %v8838_v37 = vmul.f32 %v9595_v14, %v3466_v36  ;;  %v4189_v17 = vadd.f32 %v4188_v31, %v4183_v0  ;;  %v4350_v10 = vmul.f32 %v8833_v33, %v8833_v33  ;;  %v4528_v12 = vmul.f32 %v8833_v33, %v8681_v41  ;;  %2461 = vmatmul.mubr.f32.gmra.mrb[140].mxu1 %v1351_v16  ;;  %v1360_v0 = vld [vmem:[%s9437_s6 + $0x6d8] sm:$0xff] }
 0x455   :  { %v3846_v1 = vadd.f32 %v8726_v38, %v3840_v63  ;;  %v4519_v4 = vmul.f32 %v8825_v6, %v8825_v6  ;;  %v4371_v57 = vmul.f32 %v8840_v55, %v8840_v55  ;;  %v4212_v43 = vmul.f32 %v4211_v49, %v8179_v60  ;;  %2464 = vmatprep.mubr.f32.mxu1 %v1356_v22 }
 0x456   :  { %v4322_v24 = vmul.f32 %v8838_v37, %v8838_v37  ;;  %v4380_v53 = vmul.f32 %v8838_v37, %v8689_v21  ;;  %v4195_v52 = vadd.f32 %v4194_v59, %v4189_v17  ;;  %v4351_v32 = vrot.slane %v4350_v10, 4 }
 0x457   :  { %v4529_v48 = vrot.slane %v4528_v12, 4  ;;  %v3852_v38 = vadd.f32 %v8730_v28, %v3846_v1  ;;  %v4372_v19 = vmax.f32 %v4371_v57, 1e-16  ;;  %v4218_v34 = vmul.f32 %v4217_v46, %v8197_v7  ;;  %v1364_v1 = vld [vmem:[%s9437_s6 + $0x6f8] sm:$0xff] }
 0x458   :  { %v4323_v61 = vrot.slane %v4322_v24, 4  ;;  %v4381_v42 = vrot.slane %v4380_v53, 4  ;;  %v4201_v40 = vadd.f32 %v4200_v39, %v4195_v52  ;;  %v4352_v27 = vadd.f32 %v4351_v32, %v4350_v10  ;;  %2465 = vmatmul.mubr.f32.gmra.mrb[142].mxu1 %v1355_v54  ;;  %v1363_v52 = vld [vmem:[%s9437_s6 + $0x6f0] sm:$0xff] }
 0x459   :  { %v4530_v50 = vadd.f32 %v4529_v48, %v4528_v12  ;;  %v3858_v5 = vadd.f32 %v8735_v23, %v3852_v38  ;;  %v4520_v31 = vmax.f32 %v4519_v4, 1e-16  ;;  %5845 = vrsqrt.f32 %v4372_v19  ;;  %2468 = vmatprep.mubr.f32.mxu1 %v1360_v0  ;;  %v1359_v23 = vld [vmem:[%s9437_s6 + $0x6d0] sm:$0xff]  ;;  %v1368_v19 = vld [vmem:[%s9437_s6 + $0x718] sm:$0xff] }
 0x45a   :  { %v4324_v18 = vadd.f32 %v4323_v61, %v4322_v24  ;;  %v4382_v60 = vadd.f32 %v4381_v42, %v4380_v53  ;;  %v4207_v49 = vadd.f32 %v4206_v30, %v4201_v40  ;;  %v4353_v28 = vrot.slane %v4352_v27, 2  ;;  %v1367_v40 = vld [vmem:[%s9437_s6 + $0x710] sm:$0xff] }
 0x45b   :  { %v4531_v36 = vrot.slane %v4530_v50, 2  ;;  %v8879_v14 = vadd.f32 %v8750_v11, %v3858_v5  ;;  %v4674_v8 = vmul.f32 %v8825_v6, %v8840_v55  ;;  %v4683_v7 = vmul.f32 %v8833_v33, %v8689_v21 }
 0x45c   :  { %v4325_v44 = vrot.slane %v4324_v18, 2  ;;  %v4213_v46 = vadd.f32 %v4212_v43, %v4207_v49  ;;  %v4354_v59 = vadd.f32 %v4353_v28, %v4352_v27  ;;  %v4383_v30 = vrot.slane %v4382_v60, 2  ;;  %2469 = vmatmul.mubr.f32.gmra.mrb[144].mxu1 %v1359_v23 }
 0x45d   :  { %v3866_v11 = vmul.f32 1.442695, %v8879_v14  ;;  %v4532_v63 = vadd.f32 %v4531_v36, %v4530_v50  ;;  %v4672_v16 = vrot.slane %v8768_v58, 1  ;;  %v4675_v17 = vmax.f32 %v4674_v8, 1e-16  ;;  %2472 = vmatprep.mubr.f32.mxu1 %v1364_v1 }
 0x45e   :  { %v4326_v39 = vadd.f32 %v4325_v44, %v4324_v18  ;;  %v4219_v10 = vadd.f32 %v4218_v34, %v4213_v46  ;;  %v4355_v12 = vrot.slane %v4354_v59, 1  ;;  %5847 = vrsqrt.f32 %v4520_v31 }
 0x45f   :  { %5849 = vpow2.f32 %v3866_v11  ;;  %v8897_v4 = vmul.f32 %v8539_v2, %v4265_v13  ;;  %v4684_v57 = vrot.slane %v4683_v7, 4  ;;  %v4731_v53 = vmul.f32 %v8681_v41, %v8838_v37 }
 0x460   :  { %v4327_v24 = vrot.slane %v4326_v39, 1  ;;  %v4225_v32 = vadd.f32 %v8774_v47, %v4219_v10  ;;  %v8905_v48 = vadd.f32 %v4355_v12, %v4354_v59  ;;  %v4384_v22 = vadd.f32 %v4383_v30, %v4382_v60  ;;  %2473 = vmatmul.mubr.f32.gmra.mrb[146].mxu1 %v1363_v52 }
 0x461   :  { %v4533_v20 = vrot.slane %v4532_v63, 1  ;;  %v8910_v2 = vadd.f32 %v4672_v16, %v8768_v58  ;;  %5851 = vrsqrt.f32 %v4675_v17  ;;  %v4685_v51 = vadd.f32 %v4684_v57, %v4683_v7  ;;  %2476 = vmatprep.mubr.f32.mxu1 %v1368_v19 }
 0x462   :  { %v8907_v61 = vadd.f32 %v4327_v24, %v4326_v39  ;;  %v4231_v13 = vadd.f32 %v8781_v3, %v4225_v32  ;;  %v4535_v43 = vmul.f32 %v8905_v48, %v8825_v6  ;;  %v4578_v47 = vmul.f32 %v8905_v48, %v8905_v48 }
 0x463   :  { %v4732_v38 = vrot.slane %v4731_v53, 4  ;;  %vm3865_vm9 = vcmp.gt.f32.partialorder %v8879_v14, 0.0  ;;  %v4686_v3 = vrot.slane %v4685_v51, 2  ;;  %v4690_v54 = vmul.f32 %v8905_v48, %v8840_v55  ;;  %v5846_v5 = vpop.eup %5845 }
 0x464   :  { %v4387_v58 = vmul.f32 %v8907_v61, %v8840_v55  ;;  %v4430_v42 = vmul.f32 %v8907_v61, %v8907_v61  ;;  %v4237_v27 = vadd.f32 %v8784_v56, %v4231_v13  ;;  %v4536_v50 = vmax.f32 %v4535_v43, 1e-16  ;;  %2477 = vmatmul.mubr.f32.gmra.mrb[148].mxu1 %v1367_v40  ;;  %v1372_v56 = vld [vmem:[%s9437_s6 + $0x738] sm:$0xff] }
 0x465   :  { %v4579_v18 = vmax.f32 %v4578_v47, 1e-16  ;;  %v4385_v34 = vrot.slane %v4384_v22, 1  ;;  %v8931_v31 = vadd.f32 %v4533_v20, %v4532_v63  ;;  %v4687_v49 = vadd.f32 %v4686_v3, %v4685_v51  ;;  %2480 = vmatprep.mubr.f32.mxu1 %v1372_v56  ;;  %v1375_v20 = vld [vmem:[%s9437_s6 + $0x750] sm:$0xff] }
 0x466   :  { %v4388_v60 = vmax.f32 %v4387_v58, 1e-16  ;;  %v4691_v28 = vmax.f32 %v4690_v54, 1e-16  ;;  %v4243_v36 = vadd.f32 %v8791_v26, %v4237_v27  ;;  %5853 = vrsqrt.f32 %v4536_v50  ;;  %v1371_v26 = vld [vmem:[%s9437_s6 + $0x730] sm:$0xff] }
 0x467   :  { %v4733_v44 = vadd.f32 %v4732_v38, %v4731_v53  ;;  %v4738_v0 = vmul.f32 %v8825_v6, %v8907_v61  ;;  %5855 = vrsqrt.f32 %v4579_v18  ;;  %v4431_v8 = vmax.f32 %v4430_v42, 1e-16  ;;  %v1380_v42 = vld [vmem:[%s9437_s6 + $0x778] sm:$0xff]  ;;  %v1379_v54 = vld [vmem:[%s9437_s6 + $0x770] sm:$0xff] }
 0x468   :  { %v4747_v7 = vmul.f32 %v8833_v33, %v8838_v37  ;;  %v4754_v23 = vmul.f32 %v8905_v48, %v8907_v61  ;;  %v5848_v46 = vpop.eup %5847  ;;  %v4249_v59 = vadd.f32 %v8794_v62, %v4243_v36  ;;  %5857 = vrsqrt.f32 %v4388_v60  ;;  %2481 = vmatmul.mubr.f32.gmra.mrb[150].mxu1 %v1371_v26  ;;  %v1376_v62 = vld [vmem:[%s9437_s6 + $0x758] sm:$0xff] }
 0x469   :  { %v4688_v39 = vrot.slane %v4687_v49, 1  ;;  %v4734_v30 = vrot.slane %v4733_v44, 2  ;;  %v5850_v11 = vpop.eup %5849  ;;  %v8948_v63 = vmul.f32 %v5846_v5, %v8840_v55  ;;  %v4739_v16 = vmax.f32 %v4738_v0, 1e-16  ;;  %2484 = vmatprep.mubr.f32.mxu1 %v1376_v62 }
 0x46a   :  { %v4748_v17 = vrot.slane %v4747_v7, 4  ;;  %v4755_v10 = vmax.f32 %v4754_v23, 1e-16  ;;  %v5067_v12 = vadd.f32 -1.0, %v5850_v11  ;;  %v4255_v24 = vadd.f32 %v8797_v29, %v4249_v59  ;;  %v1384_v23 = vld [vmem:[%s9437_s6 + $0x798] sm:$0xff] }
 0x46b   :  { %5859 = vrsqrt.f32 %v4691_v28  ;;  %v4735_v1 = vadd.f32 %v4734_v30, %v4733_v44  ;;  %v5852_v57 = vpop.eup %5851  ;;  %v8955_v53 = vmul.f32 %v5848_v46, %v8825_v6  ;;  %v4386_v52 = vadd.f32 %v4385_v34, %v4384_v22 }
 0x46c   :  { %5861 = vrsqrt.f32 %v4431_v8  ;;  %v8957_v32 = vadd.f32 %v4748_v17, %v4747_v7  ;;  %v3869_v29 = vsel %vm3865_vm9, %v8879_v14, %v5067_v12  ;;  %v4261_v51 = vadd.f32 %v8804_v25, %v4255_v24  ;;  %2485 = vmatmul.mubr.f32.gmra.mrb[152].mxu1 %v1375_v20 }
 0x46d   :  { %v4689_v13 = vadd.f32 %v4688_v39, %v4687_v49  ;;  %v4736_v43 = vrot.slane %v4735_v1, 1  ;;  %5068 = vst [vmem:[%s9445_s13 + $0x10] sm:$0xff] %v3869_v29  ;;  %v9596_v22 = vrot.slane %v8625_v9, %v7879_v45  ;;  %v9597_v38 = vrot.slane %v8630_v15, %v7879_v45  ;;  %2488 = vmatprep.mubr.f32.mxu1 %v1380_v42  ;;  %v1383_v39 = vld [vmem:[%s9437_s6 + $0x790] sm:$0xff] }
 0x46e   :  { %5863 = vrsqrt.f32 %v4739_v16  ;;  %vm4376_vm10 = vcmp.ne.f32.partialorder %v8948_v63, 0.0  ;;  %v8981_v25 = vadd.f32 %v8897_v4, %v4261_v51  ;;  %v8984_v14 = vmul.f32 %v5852_v57, %v8910_v2 }
 0x46f   :  { %v8972_v47 = vmul.f32 %v9596_v22, %v3869_v29  ;;  %v8977_v19 = vmul.f32 %v9597_v38, %v3869_v29  ;;  %v4750_v58 = vrot.slane %v8957_v32, 2  ;;  %5865 = vrsqrt.f32 %v4755_v10 }
 0x470   :  { %v5854_v40 = vpop.eup %5853  ;;  %v4269_v27 = vmul.f32 1.442695, %v8981_v25  ;;  %v4737_v34 = vadd.f32 %v4736_v43, %v4735_v1  ;;  %2489 = vmatmul.mubr.f32.gmra.mrb[154].mxu1 %v1379_v54  ;;  %v9467_v8 = vmov 0.0   ;;  %vm4268_vm11 = vcmp.gt.f32.partialorder %v8981_v25, 0.0 }
 0x471   :  { %v4357_v45 = vmul.f32 %v8972_v47, %v8972_v47  ;;  %v4544_v3 = vmul.f32 %v8972_v47, %v8681_v41  ;;  %v4587_v4 = vmul.f32 %v8972_v47, %v8833_v33  ;;  %v4329_v2 = vmul.f32 %v8977_v19, %v8977_v19  ;;  %v5856_v5 = vpop.eup %5855  ;;  %2492 = vmatprep.mubr.f32.mxu1 %v1384_v23 }
 0x472   :  { %v4396_v50 = vmul.f32 %v8977_v19, %v8689_v21  ;;  %v4439_v18 = vmul.f32 %v8977_v19, %v8838_v37  ;;  %v9007_v49 = vmul.f32 %v5854_v40, %v8931_v31  ;;  %v5858_v44 = vpop.eup %5857  ;;  %5867 = vpow2.f32 %v4269_v27 }
 0x473   :  { %v4358_v60 = vrot.slane %v4357_v45, 4  ;;  %v4545_v28 = vrot.slane %v4544_v3, 4  ;;  %v4588_v36 = vrot.slane %v4587_v4, 4  ;;  %v4330_v0 = vrot.slane %v4329_v2, 4 }
 0x474   :  { %v4397_v56 = vrot.slane %v4396_v50, 4  ;;  %v9012_v7 = vsel %vm4376_vm10, 1.0, %v9467_v8  ;;  %v9019_v31 = vadd.f32 %v9007_v49, %v8955_v53  ;;  %v9025_v11 = vmul.f32 %v5856_v5, %v8905_v48  ;;  %2493 = vmatmul.mubr.f32.gmra.mrb[156].mxu1 %v1383_v39 }
 0x475   :  { %v4359_v26 = vadd.f32 %v4358_v60, %v4357_v45  ;;  %v4546_v46 = vadd.f32 %v4545_v28, %v4544_v3  ;;  %v4589_v59 = vadd.f32 %v4588_v36, %v4587_v4  ;;  %v5860_v30 = vpop.eup %5859  ;;  %v4331_v16 = vadd.f32 %v4330_v0, %v4329_v2  ;;  %v1387_v4 = vld [vmem:[%s9437_s6 + $0x7b0] sm:$0xff]  ;;  %v1392_v0 = vld [vmem:[%s9437_s6 + $0x7d8] sm:$0xff] }
 0x476   :  { %v9027_v17 = vmul.f32 %v5858_v44, %v4386_v52  ;;  %v4398_v10 = vadd.f32 %v4397_v56, %v4396_v50  ;;  %v5862_v12 = vpop.eup %5861  ;;  %v4440_v57 = vrot.slane %v4439_v18, 4  ;;  %v9034_v43 = vmul.f32 %v5860_v30, %v4689_v13  ;;  %v1388_v52 = vld [vmem:[%s9437_s6 + $0x7b8] sm:$0xff] }
 0x477   :  { %v4360_v24 = vrot.slane %v4359_v26, 2  ;;  %v4547_v1 = vrot.slane %v4546_v46, 2  ;;  %v4590_v62 = vrot.slane %v4589_v59, 2  ;;  %v4332_v20 = vrot.slane %v4331_v16, 2  ;;  %2496 = vmatprep.mubr.f32.mxu1 %v1388_v52 }
 0x478   :  { %v9032_v29 = vadd.f32 %v9027_v17, %v8948_v63  ;;  %v4399_v51 = vrot.slane %v4398_v10, 2  ;;  %9598 = vst [vmem:[#allocation38_spill] sm:$0xff] %v9034_v43  ;;  %v5864_v22 = vpop.eup %5863  ;;  %v4441_v3 = vadd.f32 %v4440_v57, %v4439_v18  ;;  %v9046_v13 = vadd.f32 %v9034_v43, %v8984_v14  ;;  %2497 = vmatmul.mubr.f32.gmra.mrb[158].mxu1 %v1387_v4 }
 0x479   :  { %v4361_v38 = vadd.f32 %v4360_v24, %v4359_v26  ;;  %v4548_v42 = vadd.f32 %v4547_v1, %v4546_v46  ;;  %v4591_v45 = vadd.f32 %v4590_v62, %v4589_v59  ;;  %v9042_v2 = vpop.eup %5865  ;;  %v4333_v63 = vadd.f32 %v4332_v20, %v4331_v16  ;;  %2500 = vmatprep.mubr.f32.mxu1 %v1392_v0  ;;  %v1391_v59 = vld [vmem:[%s9437_s6 + $0x7d0] sm:$0xff] }
 0x47a   :  { %v4400_v54 = vadd.f32 %v4399_v51, %v4398_v10  ;;  %v4699_v40 = vmul.f32 %v8972_v47, %v8689_v21  ;;  %v4442_v5 = vrot.slane %v4441_v3, 2  ;;  %v9050_v44 = vmul.f32 %v5864_v22, %v4737_v34  ;;  %v1396_v22 = vld [vmem:[%s9437_s6 + $0x7f8] sm:$0xff] }
 0x47b   :  { %v4362_v27 = vrot.slane %v4361_v38, 1  ;;  %v4549_v50 = vrot.slane %v4548_v42, 1  ;;  %v4592_v18 = vrot.slane %v4591_v45, 1  ;;  %v4334_v60 = vrot.slane %v4333_v63, 1 }
 0x47c   :  { %v4401_v28 = vrot.slane %v4400_v54, 1  ;;  %v4700_v36 = vrot.slane %v4699_v40, 4  ;;  %v9060_v26 = vmul.f32 %v5862_v12, %v8907_v61  ;;  %v4443_v46 = vadd.f32 %v4442_v5, %v4441_v3  ;;  %v5868_v39 = vpop.eup %5867  ;;  %2501 = vmatmul.mubr.f32.gmra.mrb[160].mxu1 %v1391_v59 }
 0x47d   :  { %v9055_v56 = vadd.f32 %v4362_v27, %v4361_v38  ;;  %v9057_v23 = vadd.f32 %v4549_v50, %v4548_v42  ;;  %v9065_v34 = vadd.f32 %v4592_v18, %v4591_v45  ;;  %v9067_v30 = vadd.f32 %v4334_v60, %v4333_v63  ;;  %2504 = vmatprep.mubr.f32.mxu1 %v1396_v22  ;;  %v1395_v50 = vld [vmem:[%s9437_s6 + $0x7f0] sm:$0xff] }
 0x47e   :  { %v9069_v16 = vadd.f32 %v4401_v28, %v4400_v54  ;;  %v9071_v10 = vadd.f32 %v4700_v36, %v4699_v40  ;;  %v5084_v24 = vadd.f32 -1.0, %v5868_v39  ;;  %v4444_v20 = vrot.slane %v4443_v46, 1 }
 0x47f   :  { %v4551_v12 = vmul.f32 %v9055_v56, %v8825_v6  ;;  %v4594_v1 = vmul.f32 %v9055_v56, %v8905_v48  ;;  %v4623_v62 = vmul.f32 %v9055_v56, %v9055_v56  ;;  %v4403_v57 = vmul.f32 %v9067_v30, %v8840_v55 }
 0x480   :  { %v4446_v51 = vmul.f32 %v9067_v30, %v8907_v61  ;;  %v4475_v52 = vmul.f32 %v9067_v30, %v9067_v30  ;;  %v4272_v38 = vsel %vm4268_vm11, %v8981_v25, %v5084_v24  ;;  %v9599_v4 = vrot.slane %v8625_v9, %v7887_v35  ;;  %2505 = vmatmul.mubr.f32.gmra.mrb[162].mxu1 %v1395_v50 }
 0x481   :  { %v4552_v42 = vmax.f32 %v4551_v12, 1e-16  ;;  %v4595_v45 = vmax.f32 %v4594_v1, 1e-16  ;;  %v4624_v3 = vmax.f32 %v4623_v62, 1e-16  ;;  %v9600_v54 = vrot.slane %v8630_v15, %v7887_v35 }
 0x482   :  { %5085 = vst [vmem:[%s9445_s13 + $0x18] sm:$0xff] %v4272_v38  ;;  %v9097_v63 = vmul.f32 %v9599_v4, %v4272_v38  ;;  %v4404_v27 = vmax.f32 %v4403_v57, 1e-16  ;;  %v9107_v25 = vadd.f32 %v4750_v58, %v8957_v32  ;;  %v9112_v18 = vadd.f32 %v4444_v20, %v4443_v46 }
 0x483   :  { %v9102_v40 = vmul.f32 %v9600_v54, %v4272_v38  ;;  %5869 = vrsqrt.f32 %v4552_v42  ;;  %v4447_v9 = vmax.f32 %v4446_v51, 1e-16  ;;  %v4476_v5 = vmax.f32 %v4475_v52, 1e-16 }
 0x484   :  { %v4364_v35 = vmul.f32 %v9097_v63, %v9097_v63  ;;  %v4560_v15 = vmul.f32 %v9097_v63, %v8681_v41  ;;  %5871 = vrsqrt.f32 %v4595_v45  ;;  %v4603_v32 = vmul.f32 %v9097_v63, %v8833_v33 }
 0x485   :  { %5873 = vrsqrt.f32 %v4624_v3  ;;  %v4632_v58 = vmul.f32 %v9097_v63, %v8972_v47  ;;  %v4336_v60 = vmul.f32 %v9102_v40, %v9102_v40  ;;  %v4412_v28 = vmul.f32 %v9102_v40, %v8689_v21 }
 0x486   :  { %v4365_v36 = vrot.slane %v4364_v35, 4  ;;  %v4561_v0 = vrot.slane %v4560_v15, 4  ;;  %v4604_v46 = vrot.slane %v4603_v32, 4  ;;  %5875 = vrsqrt.f32 %v4404_v27 }
 0x487   :  { %v4633_v59 = vrot.slane %v4632_v58, 4  ;;  %v4337_v39 = vrot.slane %v4336_v60, 4  ;;  %v4413_v24 = vrot.slane %v4412_v28, 4  ;;  %5877 = vrsqrt.f32 %v4447_v9 }
 0x488   :  { %v4366_v12 = vadd.f32 %v4365_v36, %v4364_v35  ;;  %v4562_v1 = vadd.f32 %v4561_v0, %v4560_v15  ;;  %v4605_v62 = vadd.f32 %v4604_v46, %v4603_v32  ;;  %v4455_v57 = vmul.f32 %v9102_v40, %v8838_v37 }
 0x489   :  { %v4634_v20 = vadd.f32 %v4633_v59, %v4632_v58  ;;  %v4338_v51 = vadd.f32 %v4337_v39, %v4336_v60  ;;  %v4414_v52 = vadd.f32 %v4413_v24, %v4412_v28  ;;  %v4702_v22 = vrot.slane %v9071_v10, 2 }
 0x48a   :  { %v4367_v38 = vrot.slane %v4366_v12, 2  ;;  %v4563_v42 = vrot.slane %v4562_v1, 2  ;;  %v4606_v45 = vrot.slane %v4605_v62, 2  ;;  %v4456_v3 = vrot.slane %v4455_v57, 4 }
 0x48b   :  { %v4635_v4 = vrot.slane %v4634_v20, 2  ;;  %v4339_v54 = vrot.slane %v4338_v51, 2  ;;  %v4415_v27 = vrot.slane %v4414_v52, 2  ;;  %v4484_v50 = vmul.f32 %v9102_v40, %v8977_v19 }
 0x48c   :  { %v4368_v9 = vadd.f32 %v4367_v38, %v4366_v12  ;;  %v4564_v35 = vadd.f32 %v4563_v42, %v4562_v1  ;;  %v4607_v15 = vadd.f32 %v4606_v45, %v4605_v62  ;;  %5879 = vrsqrt.f32 %v4476_v5 }
 0x48d   :  { %v5870_v32 = vpop.eup %5869  ;;  %v4636_v58 = vadd.f32 %v4635_v4, %v4634_v20  ;;  %v4340_v60 = vadd.f32 %v4339_v54, %v4338_v51  ;;  %v4416_v28 = vadd.f32 %v4415_v27, %v4414_v52  ;;  %v4457_v36 = vadd.f32 %v4456_v3, %v4455_v57 }
 0x48e   :  { %v5872_v0 = vpop.eup %5871  ;;  %v4369_v46 = vrot.slane %v4368_v9, 1  ;;  %v9132_v59 = vmul.f32 %v5870_v32, %v9057_v23  ;;  %v4565_v39 = vrot.slane %v4564_v35, 1  ;;  %v4608_v24 = vrot.slane %v4607_v15, 1 }
 0x48f   :  { %v5874_v8 = vpop.eup %5873  ;;  %v9135_v43 = vmul.f32 %v5872_v0, %v9065_v34  ;;  %v4637_v12 = vrot.slane %v4636_v58, 1  ;;  %v4341_v1 = vrot.slane %v4340_v60, 1  ;;  %v4485_v62 = vrot.slane %v4484_v50, 4 }
 0x490   :  { %v5876_v5 = vpop.eup %5875  ;;  %v9137_v38 = vadd.f32 %v4369_v46, %v4368_v9  ;;  %v9141_v57 = vadd.f32 %v9132_v59, %v9019_v31  ;;  %v9143_v20 = vadd.f32 %v4565_v39, %v4564_v35  ;;  %v4417_v23 = vrot.slane %v4416_v28, 1 }
 0x491   :  { %v5878_v51 = vpop.eup %5877  ;;  %v9145_v52 = vadd.f32 %v4608_v24, %v4607_v15  ;;  %v9148_v42 = vmul.f32 %v5874_v8, %v9055_v56  ;;  %v9150_v34 = vadd.f32 %v4341_v1, %v4340_v60  ;;  %v9153_v45 = vmul.f32 %v5876_v5, %v9069_v16 }
 0x492   :  { %v4567_v3 = vmul.f32 %v9137_v38, %v8825_v6  ;;  %v4610_v31 = vmul.f32 %v9137_v38, %v8905_v48  ;;  %v4639_v4 = vmul.f32 %v9137_v38, %v9055_v56  ;;  %v4654_v54 = vmul.f32 %v9137_v38, %v9137_v38 }
 0x493   :  { %v9163_v27 = vadd.f32 %v4637_v12, %v4636_v58  ;;  %v9167_v8 = vadd.f32 %v9153_v45, %v9032_v29  ;;  %v4419_v16 = vmul.f32 %v9150_v34, %v8840_v55  ;;  %v9172_v9 = vmul.f32 %v5878_v51, %v9112_v18 }
 0x494   :  { %v4568_v35 = vmax.f32 %v4567_v3, 1e-16  ;;  %v4611_v15 = vmax.f32 %v4610_v31, 1e-16  ;;  %v4640_v32 = vmax.f32 %v4639_v4, 1e-16  ;;  %v4462_v60 = vmul.f32 %v9150_v34, %v8907_v61 }
 0x495   :  { %v4655_v0 = vmax.f32 %v4654_v54, 1e-16  ;;  %v9176_v46 = vadd.f32 %v4417_v23, %v4416_v28  ;;  %v4420_v58 = vmax.f32 %v4419_v16, 1e-16  ;;  %v4458_v39 = vrot.slane %v4457_v36, 2 }
 0x496   :  { %v5880_v24 = vpop.eup %5879  ;;  %5881 = vrsqrt.f32 %v4568_v35  ;;  %v4463_v29 = vmax.f32 %v4462_v60, 1e-16  ;;  %v4486_v12 = vadd.f32 %v4485_v62, %v4484_v50  ;;  %v4491_v1 = vmul.f32 %v9150_v34, %v9067_v30 }
 0x497   :  { %5883 = vrsqrt.f32 %v4611_v15  ;;  %v4459_v18 = vadd.f32 %v4458_v39, %v4457_v36  ;;  %v4506_v5 = vmul.f32 %v9150_v34, %v9150_v34  ;;  %v4703_v51 = vadd.f32 %v4702_v22, %v9071_v10 }
 0x498   :  { %5885 = vrsqrt.f32 %v4640_v32  ;;  %v4487_v3 = vrot.slane %v4486_v12, 2  ;;  %v4492_v28 = vmax.f32 %v4491_v1, 1e-16  ;;  %v4706_v23 = vmul.f32 %v9055_v56, %v8840_v55 }
 0x499   :  { %5887 = vrsqrt.f32 %v4655_v0  ;;  %v4460_v31 = vrot.slane %v4459_v18, 1  ;;  %v4507_v4 = vmax.f32 %v4506_v5, 1e-16  ;;  %v4704_v50 = vrot.slane %v4703_v51, 1 }
 0x49a   :  { %5889 = vrsqrt.f32 %v4420_v58  ;;  %v4488_v62 = vadd.f32 %v4487_v3, %v4486_v12  ;;  %v4707_v54 = vmax.f32 %v4706_v23, 1e-16  ;;  %v4715_v36 = vmul.f32 %v9097_v63, %v8689_v21 }
 0x49b   :  { %v4461_v16 = vadd.f32 %v4460_v31, %v4459_v18  ;;  %5891 = vrsqrt.f32 %v4463_v29  ;;  %v9188_v10 = vmul.f32 %v5880_v24, %v9067_v30  ;;  %v4722_v22 = vmul.f32 %v9137_v38, %v8840_v55 }
 0x49c   :  { %v4489_v35 = vrot.slane %v4488_v62, 1  ;;  %5893 = vrsqrt.f32 %v4492_v28  ;;  %v4716_v15 = vrot.slane %v4715_v36, 4  ;;  %v4752_v32 = vrot.slane %v9107_v25, 1 }
 0x49d   :  { %5895 = vrsqrt.f32 %v4507_v4  ;;  %v4723_v60 = vmax.f32 %v4722_v22, 1e-16  ;;  %v4763_v0 = vmul.f32 %v8972_v47, %v8838_v37  ;;  %v4770_v21 = vmul.f32 %v9055_v56, %v8907_v61 }
 0x49e   :  { %v4490_v58 = vadd.f32 %v4489_v35, %v4488_v62  ;;  %v4705_v39 = vadd.f32 %v4704_v50, %v4703_v51  ;;  %5897 = vrsqrt.f32 %v4707_v54  ;;  %v4717_v24 = vadd.f32 %v4716_v15, %v4715_v36 }
 0x49f   :  { %5899 = vrsqrt.f32 %v4723_v60  ;;  %v4764_v29 = vrot.slane %v4763_v0, 4  ;;  %v4771_v55 = vmax.f32 %v4770_v21, 1e-16  ;;  %v4779_v12 = vmul.f32 %v9097_v63, %v8838_v37 }
 0x4a0   :  { %v5882_v1 = vpop.eup %5881  ;;  %v4718_v18 = vrot.slane %v4717_v24, 2  ;;  %v4753_v5 = vadd.f32 %v4752_v32, %v9107_v25  ;;  %v4786_v3 = vmul.f32 %v9137_v38, %v8907_v61  ;;  %v4795_v28 = vmul.f32 %v8681_v41, %v8977_v19 }
 0x4a1   :  { %v5884_v23 = vpop.eup %5883  ;;  %v9205_v51 = vmul.f32 %v5882_v1, %v9143_v20  ;;  %v4765_v31 = vadd.f32 %v4764_v29, %v4763_v0  ;;  %5901 = vrsqrt.f32 %v4771_v55  ;;  %v4780_v4 = vrot.slane %v4779_v12, 4 }
 0x4a2   :  { %v5886_v50 = vpop.eup %5885  ;;  %v9208_v37 = vmul.f32 %v5884_v23, %v9145_v52  ;;  %v4719_v62 = vadd.f32 %v4718_v18, %v4717_v24  ;;  %v4787_v54 = vmax.f32 %v4786_v3, 1e-16  ;;  %v4796_v25 = vrot.slane %v4795_v28, 4 }
 0x4a3   :  { %v5888_v36 = vpop.eup %5887  ;;  %v4571_v61 = vadd.f32 %v9205_v51, %v9141_v57  ;;  %v9213_v22 = vmul.f32 %v5886_v50, %v9163_v27  ;;  %v4766_v35 = vrot.slane %v4765_v31, 2  ;;  %v4781_v20 = vadd.f32 %v4780_v4, %v4779_v12 }
 0x4a4   :  { %v5890_v15 = vpop.eup %5889  ;;  %v4720_v32 = vrot.slane %v4719_v62, 1  ;;  %v9216_v60 = vmul.f32 %v9042_v2, %v4753_v5  ;;  %5903 = vrsqrt.f32 %v4787_v54  ;;  %v4797_v52 = vadd.f32 %v4796_v25, %v4795_v28 }
 0x4a5   :  { %v5892_v0 = vpop.eup %5891  ;;  %v4576_v21 = vadd.f32 %v4571_v61, %v9007_v49  ;;  %v9220_v24 = vmul.f32 %v5890_v15, %v9176_v46  ;;  %v4767_v29 = vadd.f32 %v4766_v35, %v4765_v31  ;;  %v4782_v57 = vrot.slane %v4781_v20, 2 }
 0x4a6   :  { %v5894_v55 = vpop.eup %5893  ;;  %v9223_v27 = vmul.f32 %v5888_v36, %v9137_v38  ;;  %v9225_v12 = vmul.f32 %v5892_v0, %v4461_v16  ;;  %v4798_v1 = vrot.slane %v4797_v52, 2  ;;  %v4802_v2 = vmul.f32 %v8825_v6, %v9067_v30 }
 0x4a7   :  { %v9229_v18 = vpop.eup %5895  ;;  %v4582_v5 = vadd.f32 %v9025_v11, %v4576_v21  ;;  %v4423_v46 = vadd.f32 %v9220_v24, %v9167_v8  ;;  %v9234_v3 = vmul.f32 %v5894_v55, %v4490_v58  ;;  %v4768_v28 = vrot.slane %v4767_v29, 1 }
 0x4a8   :  { %v5898_v23 = vpop.eup %5897  ;;  %v4721_v31 = vadd.f32 %v4720_v32, %v4719_v62  ;;  %v4783_v4 = vadd.f32 %v4782_v57, %v4781_v20  ;;  %v4799_v50 = vadd.f32 %v4798_v1, %v4797_v52  ;;  %v4803_v16 = vmax.f32 %v4802_v2, 1e-16 }
 0x4a9   :  { %v5900_v54 = vpop.eup %5899  ;;  %v4598_v25 = vadd.f32 %v9135_v43, %v4582_v5  ;;  %v4428_v36 = vadd.f32 %v4423_v46, %v9027_v17  ;;  %v9238_v61 = vmul.f32 %v5898_v23, %v4705_v39  ;;  %v4769_v35 = vadd.f32 %v4768_v28, %v4767_v29 }
 0x4aa   :  { %v9240_v15 = vmul.f32 %v5900_v54, %v4721_v31  ;;  %v4784_v0 = vrot.slane %v4783_v4, 1  ;;  %v4800_v8 = vrot.slane %v4799_v50, 1  ;;  %5905 = vrsqrt.f32 %v4803_v16 }
 0x4ab   :  { %v5902_v58 = vpop.eup %5901  ;;  %v4614_v21 = vadd.f32 %v9208_v37, %v4598_v25  ;;  %v4434_v62 = vadd.f32 %v9060_v26, %v4428_v36  ;;  %v4710_v20 = vadd.f32 %v9238_v61, %v9046_v13  ;;  %v4811_v32 = vmul.f32 %v8833_v33, %v8977_v19 }
 0x4ac   :  { %v9248_v52 = vmul.f32 %v5902_v58, %v4769_v35  ;;  %v4785_v39 = vadd.f32 %v4784_v0, %v4783_v4  ;;  %v4801_v29 = vadd.f32 %v4800_v8, %v4799_v50  ;;  %v4818_v57 = vmul.f32 %v8905_v48, %v9067_v30 }
 0x4ad   :  { %v4619_v55 = vadd.f32 %v4614_v21, %v9132_v59  ;;  %v4450_v1 = vadd.f32 %v9172_v9, %v4434_v62  ;;  %v4726_v2 = vadd.f32 %v9240_v15, %v4710_v20  ;;  %v4812_v5 = vrot.slane %v4811_v32, 4 }
 0x4ae   :  { %v5904_v46 = vpop.eup %5903  ;;  %v4819_v28 = vmax.f32 %v4818_v57, 1e-16  ;;  %v4827_v13 = vmul.f32 %v8972_v47, %v8977_v19  ;;  %v4834_v23 = vmul.f32 %v9055_v56, %v9067_v30  ;;  %v4843_v31 = vmul.f32 %v9097_v63, %v8977_v19 }
 0x4af   :  { %v4621_v4 = vadd.f32 %v4619_v55, %v9135_v43  ;;  %v4466_v50 = vadd.f32 %v9225_v12, %v4450_v1  ;;  %v4742_v16 = vadd.f32 %v9050_v44, %v4726_v2  ;;  %v9264_v54 = vmul.f32 %v5904_v46, %v4785_v39 }
 0x4b0   :  { %v4813_v25 = vadd.f32 %v4812_v5, %v4811_v32  ;;  %5907 = vrsqrt.f32 %v4819_v28  ;;  %v4828_v36 = vrot.slane %v4827_v13, 4  ;;  %v4835_v35 = vmax.f32 %v4834_v23, 1e-16 }
 0x4b1   :  { %v4627_v0 = vadd.f32 %v9148_v42, %v4621_v4  ;;  %v4471_v8 = vadd.f32 %v4466_v50, %v9153_v45  ;;  %v4758_v58 = vadd.f32 %v9216_v60, %v4742_v16  ;;  %v4844_v21 = vrot.slane %v4843_v31, 4 }
 0x4b2   :  { %v4814_v19 = vrot.slane %v4813_v25, 2  ;;  %v4829_v62 = vadd.f32 %v4828_v36, %v4827_v13  ;;  %5909 = vrsqrt.f32 %v4835_v35  ;;  %v4850_v20 = vmul.f32 %v9137_v38, %v9067_v30 }
 0x4b3   :  { %v4643_v39 = vadd.f32 %v9213_v22, %v4627_v0  ;;  %v4473_v32 = vadd.f32 %v4471_v8, %v9172_v9  ;;  %v4774_v57 = vadd.f32 %v9248_v52, %v4758_v58  ;;  %v4845_v55 = vadd.f32 %v4844_v21, %v4843_v31 }
 0x4b4   :  { %v5906_v1 = vpop.eup %5905  ;;  %v4815_v2 = vadd.f32 %v4814_v19, %v4813_v25  ;;  %v4830_v5 = vrot.slane %v4829_v62, 2  ;;  %v4851_v46 = vmax.f32 %v4850_v20, 1e-16  ;;  %v4859_v28 = vmul.f32 %v8681_v41, %v9102_v40 }
 0x4b5   :  { %v4648_v13 = vadd.f32 %v4643_v39, %v9205_v51  ;;  %v4479_v23 = vadd.f32 %v9188_v10, %v4473_v32  ;;  %v4790_v30 = vadd.f32 %v9264_v54, %v4774_v57  ;;  %v9279_v4 = vmul.f32 %v5906_v1, %v4801_v29 }
 0x4b6   :  { %v4816_v50 = vrot.slane %v4815_v2, 1  ;;  %v4831_v16 = vadd.f32 %v4830_v5, %v4829_v62  ;;  %v4846_v36 = vrot.slane %v4845_v55, 2  ;;  %5911 = vrsqrt.f32 %v4851_v46 }
 0x4b7   :  { %v4650_v31 = vadd.f32 %v4648_v13, %v9208_v37  ;;  %v4495_v25 = vadd.f32 %v9234_v3, %v4479_v23  ;;  %v4806_v35 = vadd.f32 %v9279_v4, %v4790_v30  ;;  %v4860_v0 = vrot.slane %v4859_v28, 4 }
 0x4b8   :  { %v4817_v41 = vadd.f32 %v4816_v50, %v4815_v2  ;;  %v4832_v8 = vrot.slane %v4831_v16, 1  ;;  %v4847_v58 = vadd.f32 %v4846_v36, %v4845_v55  ;;  %v4866_v21 = vmul.f32 %v8825_v6, %v9150_v34 }
 0x4b9   :  { %v4652_v29 = vadd.f32 %v4650_v31, %v9213_v22  ;;  %v4500_v19 = vadd.f32 %v4495_v25, %v9220_v24  ;;  %v4861_v62 = vadd.f32 %v4860_v0, %v4859_v28  ;;  %v4875_v20 = vmul.f32 %v8833_v33, %v9102_v40 }
 0x4ba   :  { %v5908_v39 = vpop.eup %5907  ;;  %v4833_v32 = vadd.f32 %v4832_v8, %v4831_v16  ;;  %v4848_v57 = vrot.slane %v4847_v58, 1  ;;  %v4867_v1 = vmax.f32 %v4866_v21, 1e-16  ;;  %v4882_v2 = vmul.f32 %v8905_v48, %v9150_v34 }
 0x4bb   :  { %v4658_v55 = vadd.f32 %v9223_v27, %v4652_v29  ;;  %v4502_v5 = vadd.f32 %v4500_v19, %v9225_v12  ;;  %v9294_v6 = vmul.f32 %v5908_v39, %v4817_v41  ;;  %v4862_v46 = vrot.slane %v4861_v62, 2 }
 0x4bc   :  { %v5910_v13 = vpop.eup %5909  ;;  %v9298_v28 = vmul.f32 %v9229_v18, %v9150_v34  ;;  %5913 = vrsqrt.f32 %v4867_v1  ;;  %v4876_v33 = vrot.slane %v4875_v20, 4  ;;  %v4883_v23 = vmax.f32 %v4882_v2, 1e-16 }
 0x4bd   :  { %4663 = vadd.xlane.f32.xlu0 %v4658_v55  ;;  %v4504_v30 = vadd.f32 %v4502_v5, %v9234_v3  ;;  %v4822_v48 = vadd.f32 %v9294_v6, %v4806_v35  ;;  %v9302_v50 = vmul.f32 %v5910_v13, %v4833_v32  ;;  %v4863_v16 = vadd.f32 %v4862_v46, %v4861_v62 }
 0x4be   :  { %v4877_v36 = vadd.f32 %v4876_v33, %v4875_v20  ;;  %5915 = vrsqrt.f32 %v4883_v23  ;;  %v4891_v31 = vmul.f32 %v8972_v47, %v9102_v40  ;;  %v4898_v18 = vmul.f32 %v9055_v56, %v9150_v34 }
 0x4bf   :  { %v4510_v25 = vadd.f32 %v9298_v28, %v4504_v30  ;;  %v4838_v0 = vadd.f32 %v9302_v50, %v4822_v48  ;;  %v4849_v41 = vadd.f32 %v4848_v57, %v4847_v58  ;;  %v4907_v8 = vmul.f32 %v9097_v63, %v9102_v40 }
 0x4c0   :  { %v5912_v35 = vpop.eup %5911  ;;  %v4878_v21 = vrot.slane %v4877_v36, 2  ;;  %v4892_v29 = vrot.slane %v4891_v31, 4  ;;  %v4899_v19 = vmax.f32 %v4898_v18, 1e-16  ;;  %v4914_v62 = vmul.f32 %v9137_v38, %v9150_v34 }
 0x4c1   :  { %4515 = vadd.xlane.f32.xlu1 %v4510_v25  ;;  %v9314_v47 = vmul.f32 %v5912_v35, %v4849_v41  ;;  %v4864_v20 = vrot.slane %v4863_v16, 1  ;;  %v4908_v56 = vrot.slane %v4907_v8, 4  ;;  %vm4392_vm12 = vcmp.ne.f32.partialorder %v9027_v17, 0.0 }
 0x4c2   :  { %v4879_v39 = vadd.f32 %v4878_v21, %v4877_v36  ;;  %v4893_v32 = vadd.f32 %v4892_v29, %v4891_v31  ;;  %5917 = vrsqrt.f32 %v4899_v19  ;;  %v4915_v58 = vmax.f32 %v4914_v62, 1e-16 }
 0x4c3   :  { %v4854_v63 = vadd.f32 %v9314_v47, %v4838_v0  ;;  %v4909_v40 = vadd.f32 %v4908_v56, %v4907_v8  ;;  %v9601_v57 = vmov 0.0   ;;  %vm4408_vm13 = vcmp.ne.f32.partialorder %v9153_v45, 0.0 }
 0x4c4   :  { %v5087_v1 = vsel %vm4392_vm12, 1.0, %v9601_v57  ;;  %v4880_v2 = vrot.slane %v4879_v39, 1  ;;  %v4894_v38 = vrot.slane %v4893_v32, 2  ;;  %5919 = vrsqrt.f32 %v4915_v58 }
 0x4c5   :  { %v4395_v34 = vadd.f32 %v5087_v1, %v9012_v7  ;;  %v4865_v55 = vadd.f32 %v4864_v20, %v4863_v16  ;;  %v4910_v5 = vrot.slane %v4909_v40, 2  ;;  %v5088_v17 = vsel %vm4408_vm13, 1.0, %v9601_v57 }
 0x4c6   :  { %vm4424_vm14 = vcmp.ne.f32.partialorder %v9220_v24, 0.0  ;;  %v5914_v46 = vpop.eup %5913  ;;  %v4895_v13 = vadd.f32 %v4894_v38, %v4893_v32  ;;  %v4881_v45 = vadd.f32 %v4880_v2, %v4879_v39  ;;  %vm4524_vm15 = vcmp.ne.f32.partialorder %v8955_v53, 0.0 }
 0x4c7   :  { %v4411_v33 = vadd.f32 %v5088_v17, %v4395_v34  ;;  %v9324_v23 = vsel %vm4424_vm14, 1.0, %v9601_v57  ;;  %v9326_v30 = vmul.f32 %v5914_v46, %v4865_v55  ;;  %v4911_v48 = vadd.f32 %v4910_v5, %v4909_v40  ;;  %v9602_v34 = vld [vmem:[#allocation38_spill] sm:$0xff] }
 0x4c8   :  { %v5916_v36 = vpop.eup %5915  ;;  %v4896_v7 = vrot.slane %v4895_v13, 1  ;;  %vm4435_vm0 = vcmp.ne.f32.partialorder %v9060_v26, 0.0  ;;  %vm4451_vm1 = vcmp.ne.f32.partialorder %v9172_v9, 0.0  ;;  %v5096_v0 = vsel %vm4524_vm15, 1.0, %v9601_v57 }
 0x4c9   :  { %v4427_v16 = vadd.f32 %v9324_v23, %v4411_v33  ;;  %v4870_v24 = vadd.f32 %v9326_v30, %v4854_v63  ;;  %v9333_v31 = vmul.f32 %v5916_v36, %v4881_v45  ;;  %v4912_v18 = vrot.slane %v4911_v48, 1 }
 0x4ca   :  { %v4897_v8 = vadd.f32 %v4896_v7, %v4895_v13  ;;  %v5090_v53 = vsel %vm4435_vm0, 1.0, %v9601_v57  ;;  %v5091_v35 = vsel %vm4451_vm1, 1.0, %v9601_v57  ;;  %vm4467_vm2 = vcmp.ne.f32.partialorder %v9225_v12, 0.0 }
 0x4cb   :  { %v4429_v25 = vadd.f32 %v5087_v1, %v4427_v16  ;;  %v4886_v41 = vadd.f32 %v9333_v31, %v4870_v24  ;;  %vm4540_vm3 = vcmp.ne.f32.partialorder %v9007_v49, 0.0  ;;  %vm4556_vm4 = vcmp.ne.f32.partialorder %v9132_v59, 0.0 }
 0x4cc   :  { %v5918_v21 = vpop.eup %5917  ;;  %v4913_v9 = vadd.f32 %v4912_v18, %v4911_v48  ;;  %v5097_v19 = vsel %vm4540_vm3, 1.0, %v9601_v57  ;;  %v5098_v62 = vsel %vm4556_vm4, 1.0, %v9601_v57  ;;  %vm4572_vm5 = vcmp.ne.f32.partialorder %v9205_v51, 0.0 }
 0x4cd   :  { %v4438_v29 = vadd.f32 %v5090_v53, %v4429_v25  ;;  %v9342_v26 = vmul.f32 %v5918_v21, %v4897_v8  ;;  %v4543_v39 = vadd.f32 %v5097_v19, %v5096_v0  ;;  %v5092_v49 = vsel %vm4467_vm2, 1.0, %v9601_v57 }
 0x4ce   :  { %v5920_v20 = vpop.eup %5919  ;;  %v9352_v59 = vsel %vm4572_vm5, 1.0, %v9601_v57  ;;  %vm4480_vm6 = vcmp.ne.f32.partialorder %v9188_v10, 0.0  ;;  %vm4583_vm7 = vcmp.ne.f32.partialorder %v9025_v11, 0.0  ;;  %vm4496_vm8 = vcmp.ne.f32.partialorder %v9234_v3, 0.0 }
 0x4cf   :  { %v4454_v56 = vadd.f32 %v5091_v35, %v4438_v29  ;;  %v4902_v32 = vadd.f32 %v9342_v26, %v4886_v41  ;;  %v9348_v58 = vmul.f32 %v5920_v20, %v4913_v9  ;;  %v4559_v63 = vadd.f32 %v5098_v62, %v4543_v39 }
 0x4d0   :  { %v5093_v2 = vsel %vm4480_vm6, 1.0, %v9601_v57  ;;  %v5100_v38 = vsel %vm4583_vm7, 1.0, %v9601_v57  ;;  %vm4679_vm9 = vcmp.ne.f32.partialorder %v8984_v14, 0.0  ;;  %vm4695_vm10 = vcmp.ne.f32.partialorder %v9602_v34, 0.0 }
 0x4d1   :  { %v4470_v12 = vadd.f32 %v5092_v49, %v4454_v56  ;;  %v4918_v40 = vadd.f32 %v9348_v58, %v4902_v32  ;;  %v4575_v51 = vadd.f32 %v9352_v59, %v4559_v63  ;;  %vm4599_vm11 = vcmp.ne.f32.partialorder %v9135_v43, 0.0 }
 0x4d2   :  { %vm4615_vm12 = vcmp.ne.f32.partialorder %v9208_v37, 0.0  ;;  %v5106_v11 = vsel %vm4679_vm9, 1.0, %v9601_v57  ;;  %v5107_v5 = vsel %vm4695_vm10, 1.0, %v9601_v57  ;;  %vm4711_vm13 = vcmp.ne.f32.partialorder %v9238_v61, 0.0 }
 0x4d3   :  { %v4472_v1 = vadd.f32 %v5088_v17, %v4470_v12  ;;  %4923 = vadd.xlane.f32.xlu0 %v4918_v40  ;;  %v4577_v55 = vadd.f32 %v5097_v19, %v4575_v51  ;;  %vm4727_vm14 = vcmp.ne.f32.partialorder %v9240_v15, 0.0  ;;  %v4698_v13 = vadd.f32 %v5107_v5, %v5106_v11 }
 0x4d4   :  { %v5108_v14 = vsel %vm4711_vm13, 1.0, %v9601_v57  ;;  %v5094_v33 = vsel %vm4496_vm8, 1.0, %v9601_v57  ;;  %v5101_v43 = vsel %vm4599_vm11, 1.0, %v9601_v57  ;;  %v5109_v45 = vsel %vm4727_vm14, 1.0, %v9601_v57 }
 0x4d5   :  { %v4474_v10 = vadd.f32 %v5091_v35, %v4472_v1  ;;  %v4586_v46 = vadd.f32 %v5100_v38, %v4577_v55  ;;  %v4714_v7 = vadd.f32 %v5108_v14, %v4698_v13  ;;  %vm4743_vm15 = vcmp.ne.f32.partialorder %v9050_v44, 0.0 }
 0x4d6   :  { %v5102_v61 = vsel %vm4615_vm12, 1.0, %v9601_v57  ;;  %vm4759_vm0 = vcmp.ne.f32.partialorder %v9216_v60, 0.0  ;;  %vm4511_vm1 = vcmp.ne.f32.partialorder %v9298_v28, 0.0  ;;  %vm4628_vm2 = vcmp.ne.f32.partialorder %v9148_v42, 0.0 }
 0x4d7   :  { %v4483_v17 = vadd.f32 %v5093_v2, %v4474_v10  ;;  %v4602_v36 = vadd.f32 %v5101_v43, %v4586_v46  ;;  %v4730_v24 = vadd.f32 %v5109_v45, %v4714_v7  ;;  %v5110_v3 = vsel %vm4743_vm15, 1.0, %v9601_v57 }
 0x4d8   :  { %vm4775_vm3 = vcmp.ne.f32.partialorder %v9248_v52, 0.0  ;;  %vm4644_vm4 = vcmp.ne.f32.partialorder %v9213_v22, 0.0  ;;  %v5111_v44 = vsel %vm4759_vm0, 1.0, %v9601_v57  ;;  %vm4791_vm5 = vcmp.ne.f32.partialorder %v9264_v54, 0.0 }
 0x4d9   :  { %v4499_v48 = vadd.f32 %v5094_v33, %v4483_v17  ;;  %v4618_v16 = vadd.f32 %v5102_v61, %v4602_v36  ;;  %v4746_v0 = vadd.f32 %v5110_v3, %v4730_v24  ;;  %v5095_v60 = vsel %vm4511_vm1, 1.0, %v9601_v57 }
 0x4da   :  { %v5103_v42 = vsel %vm4628_vm2, 1.0, %v9601_v57  ;;  %v5112_v28 = vsel %vm4775_vm3, 1.0, %v9601_v57  ;;  %vm4807_vm6 = vcmp.ne.f32.partialorder %v9279_v4, 0.0  ;;  %v5104_v22 = vsel %vm4644_vm4, 1.0, %v9601_v57 }
 0x4db   :  { %v4501_v15 = vadd.f32 %v9324_v23, %v4499_v48  ;;  %v4620_v25 = vadd.f32 %v5098_v62, %v4618_v16  ;;  %v4762_v41 = vadd.f32 %v5111_v44, %v4746_v0  ;;  %v5113_v52 = vsel %vm4791_vm5, 1.0, %v9601_v57 }
 0x4dc   :  { %vm4823_vm7 = vcmp.ne.f32.partialorder %v9294_v6, 0.0  ;;  %v5114_v54 = vsel %vm4807_vm6, 1.0, %v9601_v57  ;;  %vm4839_vm8 = vcmp.ne.f32.partialorder %v9302_v50, 0.0  ;;  %vm4659_vm9 = vcmp.ne.f32.partialorder %v9223_v27, 0.0 }
 0x4dd   :  { %v4503_v18 = vadd.f32 %v5092_v49, %v4501_v15  ;;  %v4622_v23 = vadd.f32 %v5101_v43, %v4620_v25  ;;  %v4778_v35 = vadd.f32 %v5112_v28, %v4762_v41  ;;  %v5115_v62 = vsel %vm4823_vm7, 1.0, %v9601_v57 }
 0x4de   :  { %vm4855_vm10 = vcmp.ne.f32.partialorder %v9314_v47, 0.0  ;;  %v5116_v56 = vsel %vm4839_vm8, 1.0, %v9601_v57  ;;  %vm4871_vm11 = vcmp.ne.f32.partialorder %v9326_v30, 0.0  ;;  %v5105_v6 = vsel %vm4659_vm9, 1.0, %v9601_v57 }
 0x4df   :  { %v4505_v37 = vadd.f32 %v5094_v33, %v4503_v18  ;;  %v4631_v53 = vadd.f32 %v5103_v42, %v4622_v23  ;;  %v4794_v29 = vadd.f32 %v5113_v52, %v4778_v35  ;;  %v5117_v49 = vsel %vm4855_vm10, 1.0, %v9601_v57 }
 0x4e0   :  { %vm4887_vm12 = vcmp.ne.f32.partialorder %v9333_v31, 0.0  ;;  %v5118_v12 = vsel %vm4871_vm11, 1.0, %v9601_v57  ;;  %vm4903_vm13 = vcmp.ne.f32.partialorder %v9342_v26, 0.0  ;;  %vm4919_vm14 = vcmp.ne.f32.partialorder %v9348_v58, 0.0  ;;  %v1411_v31 = vld [vmem:[%s9434_s7 + $0x70] sm:$0xff]  ;;  %v1412_v26 = vld [vmem:[%s9434_s7 + $0x78] sm:$0xff] }
 0x4e1   :  { %v4514_v8 = vadd.f32 %v5095_v60, %v4505_v37  ;;  %v4647_v21 = vadd.f32 %v5104_v22, %v4631_v53  ;;  %v4810_v19 = vadd.f32 %v5114_v54, %v4794_v29  ;;  %v5119_v47 = vsel %vm4887_vm12, 1.0, %v9601_v57  ;;  %v9603_v29 = vld [vmem:[#allocation21_spill] sm:$0xff] }
 0x4e2   :  { %v5120_v30 = vsel %vm4903_vm13, 1.0, %v9601_v57  ;;  %v5121_v1 = vsel %vm4919_vm14, 1.0, %v9601_v57  ;;  %vm4927_vm15 = vcmask 7168   ;;  %vm4929_vm0 = vcmask 15360  }
 0x4e3   :  { %4517 = vadd.xlane.f32.xlu1 %v4514_v8  ;;  %v4649_v9 = vadd.f32 %v9352_v59, %v4647_v21  ;;  %v4826_v4 = vadd.f32 %v5115_v62, %v4810_v19  ;;  %vm4931_vm1 = vcmask 23552   ;;  %vm4933_vm2 = vcmask 31744   ;;  %v9604_v19 = vld [vmem:[#allocation33_spill] sm:$0xff] }
 0x4e4   :  { %vm4935_vm3 = vcmask 39936   ;;  %vm4937_vm4 = vcmask 1040384   ;;  %vm4939_vm5 = vcmask 48128  }
 0x4e5   :  { %v4651_v20 = vadd.f32 %v5102_v61, %v4649_v9  ;;  %v4842_v32 = vadd.f32 %v5116_v56, %v4826_v4  ;;  %v9605_v4 = vld [vmem:[#allocation24_spill] sm:$0xff] }
 0x4e7   :  { %v4653_v39 = vadd.f32 %v5104_v22, %v4651_v20  ;;  %v4858_v50 = vadd.f32 %v5117_v49, %v4842_v32 }
 0x4e9   :  { %v4662_v59 = vadd.f32 %v5105_v6, %v4653_v39  ;;  %v4874_v27 = vadd.f32 %v5118_v12, %v4858_v50  ;;  %v9606_v39 = vld [vmem:[#allocation35_spill] sm:$0xff] }
 0x4eb   :  { %4665 = vadd.xlane.f32.xlu0 %v4662_v59  ;;  %v4890_v63 = vadd.f32 %v5119_v47, %v4874_v27 }
 0x4ed   :  { %v4906_v40 = vadd.f32 %v5120_v30, %v4890_v63 }
 0x4ef   :  { %v4922_v51 = vadd.f32 %v5121_v1, %v4906_v40 }
 0x4f1   :  { %4925 = vadd.xlane.f32.xlu1 %v4922_v51 }
 0x501   :  { %1533 = vperm.xlu0 %5751, %v1411_v31  }
 0x502   :  { %1538 = vperm.xlu1 %5752, %v1412_v26  }
 0x51d   :  { %v2454_v2 = vpop.f32.mrb[136].mxu1 }
 0x51e   :  { %v2455_v38 = vpop.f32.mrb[137].mxu1 }
 0x522   :  { %v2458_v58 = vpop.f32.mrb[138].mxu1 }
 0x523   :  { %v2459_v34 = vpop.f32.mrb[139].mxu1 }
 0x527   :  { %v2462_v10 = vpop.f32.mrb[140].mxu1 }
 0x528   :  { %v2463_v55 = vpop.f32.mrb[141].mxu1 }
 0x52b   :  { %v2466_v11 = vpop.f32.mrb[142].mxu1 }
 0x52c   :  { %v2467_v57 = vpop.f32.mrb[143].mxu1 }
 0x52f   :  { %v2470_v5 = vpop.f32.mrb[144].mxu1 }
 0x530   :  { %v2471_v17 = vpop.f32.mrb[145].mxu1 }
 0x533   :  { %v2474_v46 = vpop.f32.mrb[146].mxu1 }
 0x534   :  { %v2475_v13 = vpop.f32.mrb[147].mxu1 }
 0x537   :  { %v2478_v14 = vpop.f32.mrb[148].mxu1 }
 0x538   :  { %v2479_v33 = vpop.f32.mrb[149].mxu1 }
 0x53b   :  { %v2482_v43 = vpop.f32.mrb[150].mxu1 }
 0x53c   :  { %v2483_v45 = vpop.f32.mrb[151].mxu1 }
 0x53f   :  { %v2486_v48 = vpop.f32.mrb[152].mxu1 }
 0x540   :  { %v2487_v36 = vpop.f32.mrb[153].mxu1 }
 0x543   :  { %v2490_v7 = vpop.f32.mrb[154].mxu1 }
 0x544   :  { %v2491_v61 = vpop.f32.mrb[155].mxu1 }
 0x547   :  { %v2494_v15 = vpop.f32.mrb[156].mxu1 }
 0x548   :  { %v2495_v16 = vpop.f32.mrb[157].mxu1 }
 0x54a   :  { %v4664_v37 = vpop.xlane.xlu0 %4663 }
 0x54b   :  { %v2498_v24 = vpop.f32.mrb[158].mxu1 }
 0x54c   :  { %v2499_v3 = vpop.f32.mrb[159].mxu1 }
 0x54e   :  { %v4516_v23 = vpop.xlane.xlu1 %4515 }
 0x54f   :  { %v2502_v18 = vpop.f32.mrb[160].mxu1  ;;  %v4928_v60 = vsel %vm4927_vm15, %v4516_v23, %v4664_v37 }
 0x550   :  { %v2503_v25 = vpop.f32.mrb[161].mxu1 }
 0x553   :  { %v2506_v0 = vpop.f32.mrb[162].mxu1 }
 0x554   :  { %v2507_v44 = vpop.f32.mrb[163].mxu1 }
 0x560   :  { %v4924_v41 = vpop.xlane.xlu0 %4923 }
 0x561   :  { %v4930_v42 = vsel %vm4929_vm0, %v4928_v60, %v4924_v41 }
 0x570   :  { %v4518_v28 = vpop.xlane.xlu1 %4517 }
 0x571   :  { %v4932_v53 = vsel %vm4931_vm1, %v4930_v42, %v4518_v28 }
 0x578   :  { %v4666_v8 = vpop.xlane.xlu0 %4665 }
 0x579   :  { %v4934_v35 = vsel %vm4933_vm2, %v4932_v53, %v4666_v8 }
 0x57e   :  { %v4926_v22 = vpop.xlane.xlu1 %4925 }
 0x57f   :  { %v4936_v21 = vsel %vm4935_vm3, %v4934_v35, %v4926_v22 }
 0x580   :  { %v1534_v52 = vpop.permute.xlu0 %1533  ;;  %v4938_v9 = vsel %vm4937_vm4, %v4936_v21, 0.0 }
 0x581   :  { %v1904_v54 = vadd.f32 %v9603_v29, %v1534_v52  ;;  %4940 = vst.msk [vmem:[%s9446_s15] sm:$0xff] %vm4939_vm5, %v4938_v9 }
 0x582   :  { %v1539_v20 = vpop.permute.xlu1 %1538 }
 0x583   :  { %v2275_v62 = vadd.f32 %v9604_v19, %v1904_v54  ;;  %v1909_v56 = vadd.f32 %v9605_v4, %v1539_v20 }
 0x585   :  { %2523 = vst [vmem:[%s9438_s14 + $0x70] sm:$0xff] %v2275_v62  ;;  %v2280_v32 = vadd.f32 %v9606_v39, %v1909_v56 }
 0x587   :  { %2524 = vst [vmem:[%s9438_s14 + $0x78] sm:$0xff] %v2280_v32 }

</bundles_post_ra>
